<compile_context>
chip_gen: v7x
topology: tpu7x:2x2x1
jax: 0.10.0
libtpu: 0.0.40
codegen_flags: <defaults>
</compile_context>

<pallas_src>
import functools

import jax
import jax.numpy as jnp
from jax import lax
from jax.experimental import pallas as pl
from jax.experimental.pallas import tpu as pltpu


# TODO(synk): PyTorch nn.GELU defaults to exact erf GELU; tanh approximation is
# used here for guaranteed TPU lowering.
_gelu = functools.partial(jax.nn.gelu, approximate=True)


def _row_tile(M, cap=512):
    """Largest bounded row tile that divides M (keeps VMEM use bounded)."""
    for t in (cap, 256, 128):
        if t <= M and M % t == 0:
            return t
    return M


# ----------------------------------------------------------------------------
# Kernel 1: batched two-layer MLP   out[g] = act(x @ w1[g] + b1[g]) @ w2[g] + b2[g]
# Used for (a) the R per-relation node MLPs (G = R) and (b) the output head (G = 1).
# ----------------------------------------------------------------------------

def _mlp_kernel(x_ref, w1_ref, b1_ref, w2_ref, b2_ref, o_ref, *, act):
    h = jnp.dot(x_ref[...], w1_ref[0], preferred_element_type=jnp.float32)
    h = act(h + b1_ref[0])
    o = jnp.dot(h, w2_ref[0], preferred_element_type=jnp.float32) + b2_ref[0]
    o_ref[0] = o.astype(o_ref.dtype)


def batched_mlp(x2d, w1, b1, w2, b2, act):
    """x2d: (M, Fin); w1: (G, Fin, Hd); b1: (G, 1, Hd); w2: (G, Hd, Fout);
    b2: (G, 1, Fout) -> (G, M, Fout)."""
    M, Fin = x2d.shape
    G, _, Hd = w1.shape
    Fout = w2.shape[-1]
    tm = _row_tile(M)
    grid = (G, M // tm)
    return pl.pallas_call(
        functools.partial(_mlp_kernel, act=act),
        out_shape=jax.ShapeDtypeStruct((G, M, Fout), jnp.float32),
        grid=grid,
        in_specs=[
            pl.BlockSpec((tm, Fin), lambda g, m: (m, 0)),
            pl.BlockSpec((1, Fin, Hd), lambda g, m: (g, 0, 0)),
            pl.BlockSpec((1, 1, Hd), lambda g, m: (g, 0, 0)),
            pl.BlockSpec((1, Hd, Fout), lambda g, m: (g, 0, 0)),
            pl.BlockSpec((1, 1, Fout), lambda g, m: (g, 0, 0)),
        ],
        out_specs=pl.BlockSpec((1, tm, Fout), lambda g, m: (g, m, 0)),
        compiler_params=pltpu.CompilerParams(
            dimension_semantics=("parallel", "parallel")),
    )(x2d, w1, b1, w2, b2)


# ----------------------------------------------------------------------------
# Kernel 2: fused encoder+decoder adaptive-graph GRU (grid over relations)
# ----------------------------------------------------------------------------

def _fused_atg_gru_kernel(x_ref, a_enc_ref, a_dec_ref, *args, T, L, H):
    """Per-relation: run T encoder steps then T decoder steps over L layers.

    Block shapes (leading relation dim of 1):
      x:      (1, T, BN, F2)        encoder input sequence
      a_enc:  (1, L, BN, BN)        block-diag adaptive adjacency (encoder)
      a_dec:  (1, L, BN, BN)        block-diag adaptive adjacency (decoder)
      per layer l weights (x4, for enc then dec):
        wx:   (1, Fin_l, 3H)   [wxzr | wxc]
        whzr: (1, H, 2H)
        whc:  (1, H, H)
        b:    (1, 1, 3H)       [bzr | bc]
      out:    (1, T, BN, H)         decoder outputs (last layer hidden per step)
      scratch h: (L, BN, H)         hidden state, resident across the time loop
    """
    n_w = 4 * L
    enc_w = args[:n_w]
    dec_w = args[n_w:2 * n_w]
    o_ref = args[2 * n_w]
    h_ref = args[2 * n_w + 1]

    def cell(inp, h_prev, a_blk, wx, whzr, whc, b):
        # inp is None  <=>  all-zeros input: the x-path contributes only the bias.
        if inp is None:
            proj_x = b                                          # (1, 3H), broadcasts
        else:
            xg = jnp.dot(a_blk, inp, preferred_element_type=jnp.float32)
            proj_x = jnp.dot(xg, wx, preferred_element_type=jnp.float32) + b
        zr = jax.nn.sigmoid(
            proj_x[:, :2 * H]
            + jnp.dot(h_prev, whzr, preferred_element_type=jnp.float32))
        z = zr[:, :H]
        r = zr[:, H:]
        cand = jnp.tanh(
            proj_x[:, 2 * H:]
            + jnp.dot(r * h_prev, whc, preferred_element_type=jnp.float32))
        return z * h_prev + (1.0 - z) * cand

    # encoder initial hidden = zeros (Encoder.initState)
    h_ref[...] = jnp.zeros_like(h_ref)

    def enc_step(t, carry):
        inp = x_ref[0, t]                                       # (BN, F2)
        for l in range(L):
            wx, whzr, whc, b = enc_w[4 * l:4 * l + 4]
            h_new = cell(inp, h_ref[l], a_enc_ref[0, l],
                         wx[0], whzr[0], whc[0], b[0])
            h_ref[l] = h_new
            inp = h_new
        return carry

    lax.fori_loop(0, T, enc_step, 0, unroll=True)

    # decoder: decode_input is all-zeros -> layer 0 x-path matmuls are skipped.
    def dec_step(t, carry):
        inp = None
        for l in range(L):
            wx, whzr, whc, b = dec_w[4 * l:4 * l + 4]
            if l == 0:
                h_new = cell(None, h_ref[l], None, None,
                             whzr[0], whc[0], b[0])
            else:
                h_new = cell(inp, h_ref[l], a_dec_ref[0, l],
                             wx[0], whzr[0], whc[0], b[0])
            h_ref[l] = h_new
            inp = h_new
        o_ref[0, t] = inp.astype(o_ref.dtype)
        return carry

    lax.fori_loop(0, T, dec_step, 0, unroll=True)


def fused_atg_gru(x_seq, a_enc, a_dec, enc_layers, dec_layers, *, T, L, H):
    """x_seq: (R, T, BN, F2); a_enc/a_dec: (R, L, BN, BN);
    enc/dec layers: list of L dicts of stacked (R, ...) weights.
    Returns decoder outputs (R, T, BN, H)."""
    R, T_, BN, F2 = x_seq.shape
    assert T_ == T

    def w_specs(layers):
        specs, arrays = [], []
        for p in layers:
            for name in ("wx", "whzr", "whc", "b"):
                arr = p[name]
                specs.append(pl.BlockSpec((1,) + tuple(arr.shape[1:]),
                                          lambda r: (r, 0, 0)))
                arrays.append(arr)
        return specs, arrays

    enc_specs, enc_arrays = w_specs(enc_layers)
    dec_specs, dec_arrays = w_specs(dec_layers)

    in_specs = [
        pl.BlockSpec((1, T, BN, F2), lambda r: (r, 0, 0, 0)),
        pl.BlockSpec((1, L, BN, BN), lambda r: (r, 0, 0, 0)),
        pl.BlockSpec((1, L, BN, BN), lambda r: (r, 0, 0, 0)),
    ] + enc_specs + dec_specs

    kernel = functools.partial(_fused_atg_gru_kernel, T=T, L=L, H=H)
    return pl.pallas_call(
        kernel,
        out_shape=jax.ShapeDtypeStruct((R, T, BN, H), jnp.float32),
        grid=(R,),
        in_specs=in_specs,
        out_specs=pl.BlockSpec((1, T, BN, H), lambda r: (r, 0, 0, 0)),
        scratch_shapes=[pltpu.VMEM((L, BN, H), jnp.float32)],
        compiler_params=pltpu.CompilerParams(
            dimension_semantics=("parallel",)),
    )(x_seq, a_enc, a_dec, *enc_arrays, *dec_arrays)


# ----------------------------------------------------------------------------
# Model glue (plain JAX): parameters, adjacency, layout plumbing
# ----------------------------------------------------------------------------

def _init(key, shape, scale=0.1):
    return scale * jax.random.normal(key, shape, dtype=jnp.float32)


def init_params(key, *, in_features, mlp_output_dim, hidden, out_features,
                R, N, Demb, L):
    keys = iter(jax.random.split(key, 256))
    p = {}
    # stacked per-relation node MLPs (fc1 -> GELU -> fc2, dropout p=0 is identity)
    p["mlp_w1"] = _init(next(keys), (R, in_features, mlp_output_dim))
    p["mlp_b1"] = _init(next(keys), (R, 1, mlp_output_dim))
    p["mlp_w2"] = _init(next(keys), (R, mlp_output_dim, mlp_output_dim))
    p["mlp_b2"] = _init(next(keys), (R, 1, mlp_output_dim))

    def gru_layers(fin0):
        layers = []
        for l in range(L):
            fin = fin0 if l == 0 else hidden
            layers.append(dict(
                wx=_init(next(keys), (R, fin, 3 * hidden)),      # [wxzr | wxc]
                whzr=_init(next(keys), (R, hidden, 2 * hidden)),
                whc=_init(next(keys), (R, hidden, hidden)),
                b=_init(next(keys), (R, 1, 3 * hidden)),         # [bzr | bc]
            ))
        return layers

    p["enc_gru"] = gru_layers(mlp_output_dim)
    p["dec_gru"] = gru_layers(hidden)
    p["enc_emb"] = _init(next(keys), (L, R, N, Demb), scale=1.0)
    p["dec_emb"] = _init(next(keys), (L, R, N, Demb), scale=1.0)
    # head: Linear(H*R -> H) -> tanh -> Linear(H -> out_features)
    p["head_w1"] = _init(next(keys), (1, hidden * R, hidden))
    p["head_b1"] = _init(next(keys), (1, 1, hidden))
    p["head_w2"] = _init(next(keys), (1, hidden, out_features))
    p["head_b2"] = _init(next(keys), (1, 1, out_features))
    return p


def adaptive_adj_blockdiag(emb, B):
    """emb: (L, R, N, D) -> batch-block-diagonal adjacency (R, L, B*N, B*N)
    so the kernel aggregates all B batches in a single (BN,BN)@(BN,F) matmul."""
    logits = jnp.einsum("lrnd,lrmd->lrnm", emb, emb)
    a = jax.nn.softmax(jax.nn.relu(logits), axis=-1)           # (L, R, N, N)
    Ld, Rd, Nd, _ = a.shape
    eye = jnp.eye(B, dtype=a.dtype)
    a_blk = jnp.einsum("bc,lrnm->lrbncm", eye, a).reshape(Ld, Rd, B * Nd, B * Nd)
    return jnp.transpose(a_blk, (1, 0, 2, 3))


def atgc_net_forward(x, params, *, R, H, L):
    """x: (B, T, N, in_features) -> (out (B,T,N,out), x_rel (B,T,N,mlp_out,R))."""
    B, T, N, Fin = x.shape
    BN = B * N
    M = T * B * N

    # ---- per-relation node MLPs: ONE pallas_call over (R, row tiles) --------
    # rows ordered (t, b, n) so each time step is a contiguous (B*N) slab for the GRU
    x2d = jnp.transpose(x, (1, 0, 2, 3)).reshape(M, Fin)
    rel = batched_mlp(x2d, params["mlp_w1"], params["mlp_b1"],
                      params["mlp_w2"], params["mlp_b2"], act=_gelu)  # (R, M, F2)
    F2 = rel.shape[-1]
    x_seq = rel.reshape(R, T, BN, F2)                           # GRU-kernel layout (free reshape)
    # reference returns torch.stack(x_relations, dim=-1): (B, T, N, F2, R)
    x_rel = jnp.transpose(rel.reshape(R, T, B, N, F2), (2, 1, 3, 4, 0))

    # ---- fused encoder + decoder recurrence: ONE pallas_call ----------------
    a_enc = adaptive_adj_blockdiag(params["enc_emb"], B)        # (R, L, BN, BN)
    a_dec = adaptive_adj_blockdiag(params["dec_emb"], B)
    dec_out = fused_atg_gru(x_seq, a_enc, a_dec,
                            params["enc_gru"], params["dec_gru"],
                            T=T, L=L, H=H)                      # (R, T, BN, H)

    # ---- output head: Linear(H*R -> H) -> tanh -> Linear(H -> out) ----------
    # (R,T,B,N,H) -> (B,T,N,H,R) -> (B*T*N, H*R)  (feature = h*R + r, as torch .view)
    flat = jnp.transpose(dec_out.reshape(R, T, B, N, H),
                         (2, 1, 3, 4, 0)).reshape(B * T * N, H * R)
    out = batched_mlp(flat, params["head_w1"], params["head_b1"],
                      params["head_w2"], params["head_b2"], act=jnp.tanh)  # (1, M, out)
    out = out.reshape(B, T, N, -1)
    return out, x_rel


if __name__ == "__main__":
    # small shapes consistent with the module's forward
    B, T, N = 2, 4, 16
    in_features = 7
    mlp_output_dim = 8
    hidden = 32
    out_features = 1
    R = 3
    Demb = 8
    L = 2

    x = jax.random.normal(jax.random.PRNGKey(0), (B, T, N, in_features), jnp.float32)
    params = init_params(
        jax.random.PRNGKey(42),
        in_features=in_features, mlp_output_dim=mlp_output_dim, hidden=hidden,
        out_features=out_features, R=R, N=N, Demb=Demb, L=L)

    fwd = jax.jit(functools.partial(atgc_net_forward, R=R, H=hidden, L=L))
    out, x_rel = fwd(x, params)
    out = jax.block_until_ready(out)
    x_rel = jax.block_until_ready(x_rel)

    assert out.shape == (B, T, N, out_features), out.shape
    assert x_rel.shape == (B, T, N, mlp_output_dim, R), x_rel.shape
    print("KERNEL_OK")
</pallas_src>

<mosaic_0001>
module attributes {stable_mosaic.version = 11 : i64} {
  func.func @_mlp_kernel(%arg0: i32, %arg1: i32, %arg2: memref<128x7xf32, #tpu.memory_space<vmem>>, %arg3: memref<1x7x8xf32, #tpu.memory_space<vmem>>, %arg4: memref<1x1x8xf32, #tpu.memory_space<vmem>>, %arg5: memref<1x8x8xf32, #tpu.memory_space<vmem>>, %arg6: memref<1x1x8xf32, #tpu.memory_space<vmem>>, %arg7: memref<1x128x8xf32, #tpu.memory_space<vmem>>) attributes {dimension_semantics = [#tpu.dimension_semantics<parallel>, #tpu.dimension_semantics<parallel>], iteration_bounds = array<i64: 3, 1>, scalar_prefetch = 0 : i64, scratch_operands = 0 : i64, tpu.core_type = #tpu.core_type<tc>, window_params = [{transform_indices = @transform_0, window_bounds = array<i64: 128, 7>}, {transform_indices = @transform_1, window_bounds = array<i64: 1, 7, 8>}, {transform_indices = @transform_2, window_bounds = array<i64: 1, 1, 8>}, {transform_indices = @transform_3, window_bounds = array<i64: 1, 8, 8>}, {transform_indices = @transform_4, window_bounds = array<i64: 1, 1, 8>}, {transform_indices = @transform_5, window_bounds = array<i64: 1, 128, 8>}]} {
    %c0 = arith.constant 0 : index
    %c0_0 = arith.constant 0 : index
    %0 = vector.load %arg2[%c0, %c0_0] : memref<128x7xf32, #tpu.memory_space<vmem>>, vector<128x7xf32>
    %c0_1 = arith.constant 0 : index
    %c0_2 = arith.constant 0 : index
    %c0_3 = arith.constant 0 : index
    %1 = vector.load %arg3[%c0_1, %c0_2, %c0_3] : memref<1x7x8xf32, #tpu.memory_space<vmem>>, vector<1x7x8xf32>
    %2 = vector.shape_cast %1 : vector<1x7x8xf32> to vector<7x8xf32>
    %cst = arith.constant dense<0.000000e+00> : vector<128x8xf32>
    %3 = tpu.matmul %0, %2, %cst {dimension_numbers = #tpu.dot_dimension_numbers<[1], [0], [0], [1], [0, 0, 1, 1], [], []>} : vector<128x7xf32>, vector<7x8xf32>, vector<128x8xf32> -> vector<128x8xf32>
    %c0_4 = arith.constant 0 : index
    %c0_5 = arith.constant 0 : index
    %c0_6 = arith.constant 0 : index
    %4 = vector.load %arg4[%c0_4, %c0_5, %c0_6] : memref<1x1x8xf32, #tpu.memory_space<vmem>>, vector<1x1x8xf32>
    %5 = vector.shape_cast %4 : vector<1x1x8xf32> to vector<1x8xf32>
    %6 = vector.broadcast %5 : vector<1x8xf32> to vector<128x8xf32>
    %7 = arith.addf %3, %6 : vector<128x8xf32>
    %8 = arith.mulf %7, %7 : vector<128x8xf32>
    %9 = arith.mulf %7, %8 : vector<128x8xf32>
    %cst_7 = arith.constant 4.471500e-02 : f32
    %10 = vector.broadcast %cst_7 : f32 to vector<128x8xf32>
    %11 = arith.mulf %10, %9 : vector<128x8xf32>
    %12 = arith.addf %7, %11 : vector<128x8xf32>
    %cst_8 = arith.constant 0.797884583 : f32
    %13 = vector.broadcast %cst_8 : f32 to vector<128x8xf32>
    %14 = arith.mulf %13, %12 : vector<128x8xf32>
    %15 = math.tanh %14 : vector<128x8xf32>
    %cst_9 = arith.constant 1.000000e+00 : f32
    %16 = vector.broadcast %cst_9 : f32 to vector<128x8xf32>
    %17 = arith.addf %16, %15 : vector<128x8xf32>
    %cst_10 = arith.constant 5.000000e-01 : f32
    %18 = vector.broadcast %cst_10 : f32 to vector<128x8xf32>
    %19 = arith.mulf %18, %17 : vector<128x8xf32>
    %20 = arith.mulf %7, %19 : vector<128x8xf32>
    %c0_11 = arith.constant 0 : index
    %c0_12 = arith.constant 0 : index
    %c0_13 = arith.constant 0 : index
    %21 = vector.load %arg5[%c0_11, %c0_12, %c0_13] : memref<1x8x8xf32, #tpu.memory_space<vmem>>, vector<1x8x8xf32>
    %22 = vector.shape_cast %21 : vector<1x8x8xf32> to vector<8x8xf32>
    %cst_14 = arith.constant dense<0.000000e+00> : vector<128x8xf32>
    %23 = tpu.matmul %20, %22, %cst_14 {dimension_numbers = #tpu.dot_dimension_numbers<[1], [0], [0], [1], [0, 0, 1, 1], [], []>} : vector<128x8xf32>, vector<8x8xf32>, vector<128x8xf32> -> vector<128x8xf32>
    %c0_15 = arith.constant 0 : index
    %c0_16 = arith.constant 0 : index
    %c0_17 = arith.constant 0 : index
    %24 = vector.load %arg6[%c0_15, %c0_16, %c0_17] : memref<1x1x8xf32, #tpu.memory_space<vmem>>, vector<1x1x8xf32>
    %25 = vector.shape_cast %24 : vector<1x1x8xf32> to vector<1x8xf32>
    %26 = vector.broadcast %25 : vector<1x8xf32> to vector<128x8xf32>
    %27 = arith.addf %23, %26 : vector<128x8xf32>
    %c0_18 = arith.constant 0 : index
    %c0_19 = arith.constant 0 : index
    %c0_20 = arith.constant 0 : index
    %28 = vector.load %arg7[%c0_18, %c0_19, %c0_20] : memref<1x128x8xf32, #tpu.memory_space<vmem>>, vector<1x128x8xf32>
    %29 = vector.shape_cast %28 : vector<1x128x8xf32> to vector<128x8xf32>
    %30 = vector.shape_cast %27 : vector<128x8xf32> to vector<1x128x8xf32>
    tpu.vector_store %arg7[%c0_18, %c0_19, %c0_20], %30 {strides = array<i32>} : memref<1x128x8xf32, #tpu.memory_space<vmem>>, vector<1x128x8xf32>,
    return
  }
  func.func @transform_0(%arg0: i32, %arg1: i32) -> (i32, i32) {
    %c0_i32 = arith.constant 0 : i32
    %c0_i32_0 = arith.constant 0 : i32
    return %arg1, %c0_i32 : i32, i32
  }
  func.func @transform_1(%arg0: i32, %arg1: i32) -> (i32, i32, i32) {
    %c0_i32 = arith.constant 0 : i32
    %c0_i32_0 = arith.constant 0 : i32
    %c0_i32_1 = arith.constant 0 : i32
    return %arg0, %c0_i32, %c0_i32_0 : i32, i32, i32
  }
  func.func @transform_2(%arg0: i32, %arg1: i32) -> (i32, i32, i32) {
    %c0_i32 = arith.constant 0 : i32
    %c0_i32_0 = arith.constant 0 : i32
    %c0_i32_1 = arith.constant 0 : i32
    return %arg0, %c0_i32, %c0_i32_0 : i32, i32, i32
  }
  func.func @transform_3(%arg0: i32, %arg1: i32) -> (i32, i32, i32) {
    %c0_i32 = arith.constant 0 : i32
    %c0_i32_0 = arith.constant 0 : i32
    %c0_i32_1 = arith.constant 0 : i32
    return %arg0, %c0_i32, %c0_i32_0 : i32, i32, i32
  }
  func.func @transform_4(%arg0: i32, %arg1: i32) -> (i32, i32, i32) {
    %c0_i32 = arith.constant 0 : i32
    %c0_i32_0 = arith.constant 0 : i32
    %c0_i32_1 = arith.constant 0 : i32
    return %arg0, %c0_i32, %c0_i32_0 : i32, i32, i32
  }
  func.func @transform_5(%arg0: i32, %arg1: i32) -> (i32, i32, i32) {
    %c0_i32 = arith.constant 0 : i32
    %c0_i32_0 = arith.constant 0 : i32
    return %arg0, %arg1, %c0_i32 : i32, i32, i32
  }
}

module attributes {stable_mosaic.version = 11 : i64} {
  func.func @_fused_atg_gru_kernel(%arg0: i32, %arg1: memref<1x4x32x8xf32, #tpu.memory_space<vmem>>, %arg2: memref<1x2x32x32xf32, #tpu.memory_space<vmem>>, %arg3: memref<1x2x32x32xf32, #tpu.memory_space<vmem>>, %arg4: memref<1x8x96xf32, #tpu.memory_space<vmem>>, %arg5: memref<1x32x64xf32, #tpu.memory_space<vmem>>, %arg6: memref<1x32x32xf32, #tpu.memory_space<vmem>>, %arg7: memref<1x1x96xf32, #tpu.memory_space<vmem>>, %arg8: memref<1x32x96xf32, #tpu.memory_space<vmem>>, %arg9: memref<1x32x64xf32, #tpu.memory_space<vmem>>, %arg10: memref<1x32x32xf32, #tpu.memory_space<vmem>>, %arg11: memref<1x1x96xf32, #tpu.memory_space<vmem>>, %arg12: memref<1x32x96xf32, #tpu.memory_space<vmem>>, %arg13: memref<1x32x64xf32, #tpu.memory_space<vmem>>, %arg14: memref<1x32x32xf32, #tpu.memory_space<vmem>>, %arg15: memref<1x1x96xf32, #tpu.memory_space<vmem>>, %arg16: memref<1x32x96xf32, #tpu.memory_space<vmem>>, %arg17: memref<1x32x64xf32, #tpu.memory_space<vmem>>, %arg18: memref<1x32x32xf32, #tpu.memory_space<vmem>>, %arg19: memref<1x1x96xf32, #tpu.memory_space<vmem>>, %arg20: memref<1x4x32x32xf32, #tpu.memory_space<vmem>>, %arg21: memref<2x32x32xf32, #tpu.memory_space<vmem>>) attributes {dimension_semantics = [#tpu.dimension_semantics<parallel>], iteration_bounds = array<i64: 3>, scalar_prefetch = 0 : i64, scratch_operands = 1 : i64, tpu.core_type = #tpu.core_type<tc>, window_params = [{transform_indices = @transform_0, window_bounds = array<i64: 1, 4, 32, 8>}, {transform_indices = @transform_1, window_bounds = array<i64: 1, 2, 32, 32>}, {transform_indices = @transform_2, window_bounds = array<i64: 1, 2, 32, 32>}, {transform_indices = @transform_3, window_bounds = array<i64: 1, 8, 96>}, {transform_indices = @transform_4, window_bounds = array<i64: 1, 32, 64>}, {transform_indices = @transform_5, window_bounds = array<i64: 1, 32, 32>}, {transform_indices = @transform_6, window_bounds = array<i64: 1, 1, 96>}, {transform_indices = @transform_7, window_bounds = array<i64: 1, 32, 96>}, {transform_indices = @transform_8, window_bounds = array<i64: 1, 32, 64>}, {transform_indices = @transform_9, window_bounds = array<i64: 1, 32, 32>}, {transform_indices = @transform_10, window_bounds = array<i64: 1, 1, 96>}, {transform_indices = @transform_11, window_bounds = array<i64: 1, 32, 96>}, {transform_indices = @transform_12, window_bounds = array<i64: 1, 32, 64>}, {transform_indices = @transform_13, window_bounds = array<i64: 1, 32, 32>}, {transform_indices = @transform_14, window_bounds = array<i64: 1, 1, 96>}, {transform_indices = @transform_15, window_bounds = array<i64: 1, 32, 96>}, {transform_indices = @transform_16, window_bounds = array<i64: 1, 32, 64>}, {transform_indices = @transform_17, window_bounds = array<i64: 1, 32, 32>}, {transform_indices = @transform_18, window_bounds = array<i64: 1, 1, 96>}, {transform_indices = @transform_19, window_bounds = array<i64: 1, 4, 32, 32>}]} {
    %cst = arith.constant 0.000000e+00 : f32
    %0 = vector.broadcast %cst : f32 to vector<2x32x32xf32>
    %c0 = arith.constant 0 : index
    %c0_0 = arith.constant 0 : index
    %c0_1 = arith.constant 0 : index
    %1 = vector.load %arg21[%c0, %c0_0, %c0_1] : memref<2x32x32xf32, #tpu.memory_space<vmem>>, vector<2x32x32xf32>
    tpu.vector_store %arg21[%c0, %c0_0, %c0_1], %0 {strides = array<i32>} : memref<2x32x32xf32, #tpu.memory_space<vmem>>, vector<2x32x32xf32>,
    %c0_i32 = arith.constant 0 : i32
    %c0_2 = arith.constant 0 : index
    %2 = arith.index_cast %c0_i32 : i32 to index
    %c0_3 = arith.constant 0 : index
    %c0_4 = arith.constant 0 : index
    %3 = vector.load %arg1[%c0_2, %2, %c0_3, %c0_4] : memref<1x4x32x8xf32, #tpu.memory_space<vmem>>, vector<1x1x32x8xf32>
    %4 = vector.shape_cast %3 : vector<1x1x32x8xf32> to vector<32x8xf32>
    %c0_5 = arith.constant 0 : index
    %c0_6 = arith.constant 0 : index
    %c0_7 = arith.constant 0 : index
    %5 = vector.load %arg21[%c0_5, %c0_6, %c0_7] : memref<2x32x32xf32, #tpu.memory_space<vmem>>, vector<1x32x32xf32>
    %6 = vector.shape_cast %5 : vector<1x32x32xf32> to vector<32x32xf32>
    %c0_8 = arith.constant 0 : index
    %c0_9 = arith.constant 0 : index
    %c0_10 = arith.constant 0 : index
    %c0_11 = arith.constant 0 : index
    %7 = vector.load %arg2[%c0_8, %c0_9, %c0_10, %c0_11] : memref<1x2x32x32xf32, #tpu.memory_space<vmem>>, vector<1x1x32x32xf32>
    %8 = vector.shape_cast %7 : vector<1x1x32x32xf32> to vector<32x32xf32>
    %c0_12 = arith.constant 0 : index
    %c0_13 = arith.constant 0 : index
    %c0_14 = arith.constant 0 : index
    %9 = vector.load %arg4[%c0_12, %c0_13, %c0_14] : memref<1x8x96xf32, #tpu.memory_space<vmem>>, vector<1x8x96xf32>
    %10 = vector.shape_cast %9 : vector<1x8x96xf32> to vector<8x96xf32>
    %c0_15 = arith.constant 0 : index
    %c0_16 = arith.constant 0 : index
    %c0_17 = arith.constant 0 : index
    %11 = vector.load %arg5[%c0_15, %c0_16, %c0_17] : memref<1x32x64xf32, #tpu.memory_space<vmem>>, vector<1x32x64xf32>
    %12 = vector.shape_cast %11 : vector<1x32x64xf32> to vector<32x64xf32>
    %c0_18 = arith.constant 0 : index
    %c0_19 = arith.constant 0 : index
    %c0_20 = arith.constant 0 : index
    %13 = vector.load %arg6[%c0_18, %c0_19, %c0_20] : memref<1x32x32xf32, #tpu.memory_space<vmem>>, vector<1x32x32xf32>
    %14 = vector.shape_cast %13 : vector<1x32x32xf32> to vector<32x32xf32>
    %c0_21 = arith.constant 0 : index
    %c0_22 = arith.constant 0 : index
    %c0_23 = arith.constant 0 : index
    %15 = vector.load %arg7[%c0_21, %c0_22, %c0_23] : memref<1x1x96xf32, #tpu.memory_space<vmem>>, vector<1x1x96xf32>
    %16 = vector.shape_cast %15 : vector<1x1x96xf32> to vector<1x96xf32>
    %cst_24 = arith.constant dense<0.000000e+00> : vector<32x8xf32>
    %17 = tpu.matmul %8, %4, %cst_24 {dimension_numbers = #tpu.dot_dimension_numbers<[1], [0], [0], [1], [0, 0, 1, 1], [], []>} : vector<32x32xf32>, vector<32x8xf32>, vector<32x8xf32> -> vector<32x8xf32>
    %cst_25 = arith.constant dense<0.000000e+00> : vector<32x96xf32>
    %18 = tpu.matmul %17, %10, %cst_25 {dimension_numbers = #tpu.dot_dimension_numbers<[1], [0], [0], [1], [0, 0, 1, 1], [], []>} : vector<32x8xf32>, vector<8x96xf32>, vector<32x96xf32> -> vector<32x96xf32>
    %19 = vector.broadcast %16 : vector<1x96xf32> to vector<32x96xf32>
    %20 = arith.addf %18, %19 : vector<32x96xf32>
    %21 = vector.extract_strided_slice %20 {offsets = [0, 0], sizes = [32, 64], strides = [1, 1]} : vector<32x96xf32> to vector<32x64xf32>
    %cst_26 = arith.constant dense<0.000000e+00> : vector<32x64xf32>
    %22 = tpu.matmul %6, %12, %cst_26 {dimension_numbers = #tpu.dot_dimension_numbers<[1], [0], [0], [1], [0, 0, 1, 1], [], []>} : vector<32x32xf32>, vector<32x64xf32>, vector<32x64xf32> -> vector<32x64xf32>
    %23 = arith.addf %21, %22 : vector<32x64xf32>
    %24 = arith.negf %23 : vector<32x64xf32>
    %25 = math.exp %24 : vector<32x64xf32>
    %cst_27 = arith.constant 1.000000e+00 : f32
    %26 = vector.broadcast %cst_27 : f32 to vector<32x64xf32>
    %27 = arith.addf %26, %25 : vector<32x64xf32>
    %28 = arith.divf %26, %27 : vector<32x64xf32>
    %29 = vector.extract_strided_slice %28 {offsets = [0, 0], sizes = [32, 32], strides = [1, 1]} : vector<32x64xf32> to vector<32x32xf32>
    %30 = vector.extract_strided_slice %28 {offsets = [0, 32], sizes = [32, 32], strides = [1, 1]} : vector<32x64xf32> to vector<32x32xf32>
    %31 = vector.extract_strided_slice %20 {offsets = [0, 64], sizes = [32, 32], strides = [1, 1]} : vector<32x96xf32> to vector<32x32xf32>
    %32 = arith.mulf %30, %6 : vector<32x32xf32>
    %cst_28 = arith.constant dense<0.000000e+00> : vector<32x32xf32>
    %33 = tpu.matmul %32, %14, %cst_28 {dimension_numbers = #tpu.dot_dimension_numbers<[1], [0], [0], [1], [0, 0, 1, 1], [], []>} : vector<32x32xf32>, vector<32x32xf32>, vector<32x32xf32> -> vector<32x32xf32>
    %34 = arith.addf %31, %33 : vector<32x32xf32>
    %35 = math.tanh %34 : vector<32x32xf32>
    %36 = arith.mulf %29, %6 : vector<32x32xf32>
    %cst_29 = arith.constant 1.000000e+00 : f32
    %37 = vector.broadcast %cst_29 : f32 to vector<32x32xf32>
    %38 = arith.subf %37, %29 : vector<32x32xf32>
    %39 = arith.mulf %38, %35 : vector<32x32xf32>
    %40 = arith.addf %36, %39 : vector<32x32xf32>
    %c0_30 = arith.constant 0 : index
    %c0_31 = arith.constant 0 : index
    %c0_32 = arith.constant 0 : index
    %41 = vector.load %arg21[%c0_30, %c0_31, %c0_32] : memref<2x32x32xf32, #tpu.memory_space<vmem>>, vector<1x32x32xf32>
    %42 = vector.shape_cast %41 : vector<1x32x32xf32> to vector<32x32xf32>
    %43 = vector.shape_cast %40 : vector<32x32xf32> to vector<1x32x32xf32>
    tpu.vector_store %arg21[%c0_30, %c0_31, %c0_32], %43 {strides = array<i32>} : memref<2x32x32xf32, #tpu.memory_space<vmem>>, vector<1x32x32xf32>,
    %c1 = arith.constant 1 : index
    %c0_33 = arith.constant 0 : index
    %c0_34 = arith.constant 0 : index
    %44 = vector.load %arg21[%c1, %c0_33, %c0_34] : memref<2x32x32xf32, #tpu.memory_space<vmem>>, vector<1x32x32xf32>
    %45 = vector.shape_cast %44 : vector<1x32x32xf32> to vector<32x32xf32>
    %c0_35 = arith.constant 0 : index
    %c1_36 = arith.constant 1 : index
    %c0_37 = arith.constant 0 : index
    %c0_38 = arith.constant 0 : index
    %46 = vector.load %arg2[%c0_35, %c1_36, %c0_37, %c0_38] : memref<1x2x32x32xf32, #tpu.memory_space<vmem>>, vector<1x1x32x32xf32>
    %47 = vector.shape_cast %46 : vector<1x1x32x32xf32> to vector<32x32xf32>
    %c0_39 = arith.constant 0 : index
    %c0_40 = arith.constant 0 : index
    %c0_41 = arith.constant 0 : index
    %48 = vector.load %arg8[%c0_39, %c0_40, %c0_41] : memref<1x32x96xf32, #tpu.memory_space<vmem>>, vector<1x32x96xf32>
    %49 = vector.shape_cast %48 : vector<1x32x96xf32> to vector<32x96xf32>
    %c0_42 = arith.constant 0 : index
    %c0_43 = arith.constant 0 : index
    %c0_44 = arith.constant 0 : index
    %50 = vector.load %arg9[%c0_42, %c0_43, %c0_44] : memref<1x32x64xf32, #tpu.memory_space<vmem>>, vector<1x32x64xf32>
    %51 = vector.shape_cast %50 : vector<1x32x64xf32> to vector<32x64xf32>
    %c0_45 = arith.constant 0 : index
    %c0_46 = arith.constant 0 : index
    %c0_47 = arith.constant 0 : index
    %52 = vector.load %arg10[%c0_45, %c0_46, %c0_47] : memref<1x32x32xf32, #tpu.memory_space<vmem>>, vector<1x32x32xf32>
    %53 = vector.shape_cast %52 : vector<1x32x32xf32> to vector<32x32xf32>
    %c0_48 = arith.constant 0 : index
    %c0_49 = arith.constant 0 : index
    %c0_50 = arith.constant 0 : index
    %54 = vector.load %arg11[%c0_48, %c0_49, %c0_50] : memref<1x1x96xf32, #tpu.memory_space<vmem>>, vector<1x1x96xf32>
    %55 = vector.shape_cast %54 : vector<1x1x96xf32> to vector<1x96xf32>
    %cst_51 = arith.constant dense<0.000000e+00> : vector<32x32xf32>
    %56 = tpu.matmul %47, %40, %cst_51 {dimension_numbers = #tpu.dot_dimension_numbers<[1], [0], [0], [1], [0, 0, 1, 1], [], []>} : vector<32x32xf32>, vector<32x32xf32>, vector<32x32xf32> -> vector<32x32xf32>
    %cst_52 = arith.constant dense<0.000000e+00> : vector<32x96xf32>
    %57 = tpu.matmul %56, %49, %cst_52 {dimension_numbers = #tpu.dot_dimension_numbers<[1], [0], [0], [1], [0, 0, 1, 1], [], []>} : vector<32x32xf32>, vector<32x96xf32>, vector<32x96xf32> -> vector<32x96xf32>
    %58 = vector.broadcast %55 : vector<1x96xf32> to vector<32x96xf32>
    %59 = arith.addf %57, %58 : vector<32x96xf32>
    %60 = vector.extract_strided_slice %59 {offsets = [0, 0], sizes = [32, 64], strides = [1, 1]} : vector<32x96xf32> to vector<32x64xf32>
    %cst_53 = arith.constant dense<0.000000e+00> : vector<32x64xf32>
    %61 = tpu.matmul %45, %51, %cst_53 {dimension_numbers = #tpu.dot_dimension_numbers<[1], [0], [0], [1], [0, 0, 1, 1], [], []>} : vector<32x32xf32>, vector<32x64xf32>, vector<32x64xf32> -> vector<32x64xf32>
    %62 = arith.addf %60, %61 : vector<32x64xf32>
    %63 = arith.negf %62 : vector<32x64xf32>
    %64 = math.exp %63 : vector<32x64xf32>
    %cst_54 = arith.constant 1.000000e+00 : f32
    %65 = vector.broadcast %cst_54 : f32 to vector<32x64xf32>
    %66 = arith.addf %65, %64 : vector<32x64xf32>
    %67 = arith.divf %65, %66 : vector<32x64xf32>
    %68 = vector.extract_strided_slice %67 {offsets = [0, 0], sizes = [32, 32], strides = [1, 1]} : vector<32x64xf32> to vector<32x32xf32>
    %69 = vector.extract_strided_slice %67 {offsets = [0, 32], sizes = [32, 32], strides = [1, 1]} : vector<32x64xf32> to vector<32x32xf32>
    %70 = vector.extract_strided_slice %59 {offsets = [0, 64], sizes = [32, 32], strides = [1, 1]} : vector<32x96xf32> to vector<32x32xf32>
    %71 = arith.mulf %69, %45 : vector<32x32xf32>
    %cst_55 = arith.constant dense<0.000000e+00> : vector<32x32xf32>
    %72 = tpu.matmul %71, %53, %cst_55 {dimension_numbers = #tpu.dot_dimension_numbers<[1], [0], [0], [1], [0, 0, 1, 1], [], []>} : vector<32x32xf32>, vector<32x32xf32>, vector<32x32xf32> -> vector<32x32xf32>
    %73 = arith.addf %70, %72 : vector<32x32xf32>
    %74 = math.tanh %73 : vector<32x32xf32>
    %75 = arith.mulf %68, %45 : vector<32x32xf32>
    %cst_56 = arith.constant 1.000000e+00 : f32
    %76 = vector.broadcast %cst_56 : f32 to vector<32x32xf32>
    %77 = arith.subf %76, %68 : vector<32x32xf32>
    %78 = arith.mulf %77, %74 : vector<32x32xf32>
    %79 = arith.addf %75, %78 : vector<32x32xf32>
    %c1_57 = arith.constant 1 : index
    %c0_58 = arith.constant 0 : index
    %c0_59 = arith.constant 0 : index
    %80 = vector.load %arg21[%c1_57, %c0_58, %c0_59] : memref<2x32x32xf32, #tpu.memory_space<vmem>>, vector<1x32x32xf32>
    %81 = vector.shape_cast %80 : vector<1x32x32xf32> to vector<32x32xf32>
    %82 = vector.shape_cast %79 : vector<32x32xf32> to vector<1x32x32xf32>
    tpu.vector_store %arg21[%c1_57, %c0_58, %c0_59], %82 {strides = array<i32>} : memref<2x32x32xf32, #tpu.memory_space<vmem>>, vector<1x32x32xf32>,
    %c1_i32 = arith.constant 1 : i32
    %c0_60 = arith.constant 0 : index
    %83 = arith.index_cast %c1_i32 : i32 to index
    %c0_61 = arith.constant 0 : index
    %c0_62 = arith.constant 0 : index
    %84 = vector.load %arg1[%c0_60, %83, %c0_61, %c0_62] : memref<1x4x32x8xf32, #tpu.memory_space<vmem>>, vector<1x1x32x8xf32>
    %85 = vector.shape_cast %84 : vector<1x1x32x8xf32> to vector<32x8xf32>
    %c0_63 = arith.constant 0 : index
    %c0_64 = arith.constant 0 : index
    %c0_65 = arith.constant 0 : index
    %86 = vector.load %arg21[%c0_63, %c0_64, %c0_65] : memref<2x32x32xf32, #tpu.memory_space<vmem>>, vector<1x32x32xf32>
    %87 = vector.shape_cast %86 : vector<1x32x32xf32> to vector<32x32xf32>
    %c0_66 = arith.constant 0 : index
    %c0_67 = arith.constant 0 : index
    %c0_68 = arith.constant 0 : index
    %c0_69 = arith.constant 0 : index
    %88 = vector.load %arg2[%c0_66, %c0_67, %c0_68, %c0_69] : memref<1x2x32x32xf32, #tpu.memory_space<vmem>>, vector<1x1x32x32xf32>
    %89 = vector.shape_cast %88 : vector<1x1x32x32xf32> to vector<32x32xf32>
    %c0_70 = arith.constant 0 : index
    %c0_71 = arith.constant 0 : index
    %c0_72 = arith.constant 0 : index
    %90 = vector.load %arg4[%c0_70, %c0_71, %c0_72] : memref<1x8x96xf32, #tpu.memory_space<vmem>>, vector<1x8x96xf32>
    %91 = vector.shape_cast %90 : vector<1x8x96xf32> to vector<8x96xf32>
    %c0_73 = arith.constant 0 : index
    %c0_74 = arith.constant 0 : index
    %c0_75 = arith.constant 0 : index
    %92 = vector.load %arg5[%c0_73, %c0_74, %c0_75] : memref<1x32x64xf32, #tpu.memory_space<vmem>>, vector<1x32x64xf32>
    %93 = vector.shape_cast %92 : vector<1x32x64xf32> to vector<32x64xf32>
    %c0_76 = arith.constant 0 : index
    %c0_77 = arith.constant 0 : index
    %c0_78 = arith.constant 0 : index
    %94 = vector.load %arg6[%c0_76, %c0_77, %c0_78] : memref<1x32x32xf32, #tpu.memory_space<vmem>>, vector<1x32x32xf32>
    %95 = vector.shape_cast %94 : vector<1x32x32xf32> to vector<32x32xf32>
    %c0_79 = arith.constant 0 : index
    %c0_80 = arith.constant 0 : index
    %c0_81 = arith.constant 0 : index
    %96 = vector.load %arg7[%c0_79, %c0_80, %c0_81] : memref<1x1x96xf32, #tpu.memory_space<vmem>>, vector<1x1x96xf32>
    %97 = vector.shape_cast %96 : vector<1x1x96xf32> to vector<1x96xf32>
    %cst_82 = arith.constant dense<0.000000e+00> : vector<32x8xf32>
    %98 = tpu.matmul %89, %85, %cst_82 {dimension_numbers = #tpu.dot_dimension_numbers<[1], [0], [0], [1], [0, 0, 1, 1], [], []>} : vector<32x32xf32>, vector<32x8xf32>, vector<32x8xf32> -> vector<32x8xf32>
    %cst_83 = arith.constant dense<0.000000e+00> : vector<32x96xf32>
    %99 = tpu.matmul %98, %91, %cst_83 {dimension_numbers = #tpu.dot_dimension_numbers<[1], [0], [0], [1], [0, 0, 1, 1], [], []>} : vector<32x8xf32>, vector<8x96xf32>, vector<32x96xf32> -> vector<32x96xf32>
    %100 = vector.broadcast %97 : vector<1x96xf32> to vector<32x96xf32>
    %101 = arith.addf %99, %100 : vector<32x96xf32>
    %102 = vector.extract_strided_slice %101 {offsets = [0, 0], sizes = [32, 64], strides = [1, 1]} : vector<32x96xf32> to vector<32x64xf32>
    %cst_84 = arith.constant dense<0.000000e+00> : vector<32x64xf32>
    %103 = tpu.matmul %87, %93, %cst_84 {dimension_numbers = #tpu.dot_dimension_numbers<[1], [0], [0], [1], [0, 0, 1, 1], [], []>} : vector<32x32xf32>, vector<32x64xf32>, vector<32x64xf32> -> vector<32x64xf32>
    %104 = arith.addf %102, %103 : vector<32x64xf32>
    %105 = arith.negf %104 : vector<32x64xf32>
    %106 = math.exp %105 : vector<32x64xf32>
    %cst_85 = arith.constant 1.000000e+00 : f32
    %107 = vector.broadcast %cst_85 : f32 to vector<32x64xf32>
    %108 = arith.addf %107, %106 : vector<32x64xf32>
    %109 = arith.divf %107, %108 : vector<32x64xf32>
    %110 = vector.extract_strided_slice %109 {offsets = [0, 0], sizes = [32, 32], strides = [1, 1]} : vector<32x64xf32> to vector<32x32xf32>
    %111 = vector.extract_strided_slice %109 {offsets = [0, 32], sizes = [32, 32], strides = [1, 1]} : vector<32x64xf32> to vector<32x32xf32>
    %112 = vector.extract_strided_slice %101 {offsets = [0, 64], sizes = [32, 32], strides = [1, 1]} : vector<32x96xf32> to vector<32x32xf32>
    %113 = arith.mulf %111, %87 : vector<32x32xf32>
    %cst_86 = arith.constant dense<0.000000e+00> : vector<32x32xf32>
    %114 = tpu.matmul %113, %95, %cst_86 {dimension_numbers = #tpu.dot_dimension_numbers<[1], [0], [0], [1], [0, 0, 1, 1], [], []>} : vector<32x32xf32>, vector<32x32xf32>, vector<32x32xf32> -> vector<32x32xf32>
    %115 = arith.addf %112, %114 : vector<32x32xf32>
    %116 = math.tanh %115 : vector<32x32xf32>
    %117 = arith.mulf %110, %87 : vector<32x32xf32>
    %cst_87 = arith.constant 1.000000e+00 : f32
    %118 = vector.broadcast %cst_87 : f32 to vector<32x32xf32>
    %119 = arith.subf %118, %110 : vector<32x32xf32>
    %120 = arith.mulf %119, %116 : vector<32x32xf32>
    %121 = arith.addf %117, %120 : vector<32x32xf32>
    %c0_88 = arith.constant 0 : index
    %c0_89 = arith.constant 0 : index
    %c0_90 = arith.constant 0 : index
    %122 = vector.load %arg21[%c0_88, %c0_89, %c0_90] : memref<2x32x32xf32, #tpu.memory_space<vmem>>, vector<1x32x32xf32>
    %123 = vector.shape_cast %122 : vector<1x32x32xf32> to vector<32x32xf32>
    %124 = vector.shape_cast %121 : vector<32x32xf32> to vector<1x32x32xf32>
    tpu.vector_store %arg21[%c0_88, %c0_89, %c0_90], %124 {strides = array<i32>} : memref<2x32x32xf32, #tpu.memory_space<vmem>>, vector<1x32x32xf32>,
    %c1_91 = arith.constant 1 : index
    %c0_92 = arith.constant 0 : index
    %c0_93 = arith.constant 0 : index
    %125 = vector.load %arg21[%c1_91, %c0_92, %c0_93] : memref<2x32x32xf32, #tpu.memory_space<vmem>>, vector<1x32x32xf32>
    %126 = vector.shape_cast %125 : vector<1x32x32xf32> to vector<32x32xf32>
    %c0_94 = arith.constant 0 : index
    %c1_95 = arith.constant 1 : index
    %c0_96 = arith.constant 0 : index
    %c0_97 = arith.constant 0 : index
    %127 = vector.load %arg2[%c0_94, %c1_95, %c0_96, %c0_97] : memref<1x2x32x32xf32, #tpu.memory_space<vmem>>, vector<1x1x32x32xf32>
    %128 = vector.shape_cast %127 : vector<1x1x32x32xf32> to vector<32x32xf32>
    %c0_98 = arith.constant 0 : index
    %c0_99 = arith.constant 0 : index
    %c0_100 = arith.constant 0 : index
    %129 = vector.load %arg8[%c0_98, %c0_99, %c0_100] : memref<1x32x96xf32, #tpu.memory_space<vmem>>, vector<1x32x96xf32>
    %130 = vector.shape_cast %129 : vector<1x32x96xf32> to vector<32x96xf32>
    %c0_101 = arith.constant 0 : index
    %c0_102 = arith.constant 0 : index
    %c0_103 = arith.constant 0 : index
    %131 = vector.load %arg9[%c0_101, %c0_102, %c0_103] : memref<1x32x64xf32, #tpu.memory_space<vmem>>, vector<1x32x64xf32>
    %132 = vector.shape_cast %131 : vector<1x32x64xf32> to vector<32x64xf32>
    %c0_104 = arith.constant 0 : index
    %c0_105 = arith.constant 0 : index
    %c0_106 = arith.constant 0 : index
    %133 = vector.load %arg10[%c0_104, %c0_105, %c0_106] : memref<1x32x32xf32, #tpu.memory_space<vmem>>, vector<1x32x32xf32>
    %134 = vector.shape_cast %133 : vector<1x32x32xf32> to vector<32x32xf32>
    %c0_107 = arith.constant 0 : index
    %c0_108 = arith.constant 0 : index
    %c0_109 = arith.constant 0 : index
    %135 = vector.load %arg11[%c0_107, %c0_108, %c0_109] : memref<1x1x96xf32, #tpu.memory_space<vmem>>, vector<1x1x96xf32>
    %136 = vector.shape_cast %135 : vector<1x1x96xf32> to vector<1x96xf32>
    %cst_110 = arith.constant dense<0.000000e+00> : vector<32x32xf32>
    %137 = tpu.matmul %128, %121, %cst_110 {dimension_numbers = #tpu.dot_dimension_numbers<[1], [0], [0], [1], [0, 0, 1, 1], [], []>} : vector<32x32xf32>, vector<32x32xf32>, vector<32x32xf32> -> vector<32x32xf32>
    %cst_111 = arith.constant dense<0.000000e+00> : vector<32x96xf32>
    %138 = tpu.matmul %137, %130, %cst_111 {dimension_numbers = #tpu.dot_dimension_numbers<[1], [0], [0], [1], [0, 0, 1, 1], [], []>} : vector<32x32xf32>, vector<32x96xf32>, vector<32x96xf32> -> vector<32x96xf32>
    %139 = vector.broadcast %136 : vector<1x96xf32> to vector<32x96xf32>
    %140 = arith.addf %138, %139 : vector<32x96xf32>
    %141 = vector.extract_strided_slice %140 {offsets = [0, 0], sizes = [32, 64], strides = [1, 1]} : vector<32x96xf32> to vector<32x64xf32>
    %cst_112 = arith.constant dense<0.000000e+00> : vector<32x64xf32>
    %142 = tpu.matmul %126, %132, %cst_112 {dimension_numbers = #tpu.dot_dimension_numbers<[1], [0], [0], [1], [0, 0, 1, 1], [], []>} : vector<32x32xf32>, vector<32x64xf32>, vector<32x64xf32> -> vector<32x64xf32>
    %143 = arith.addf %141, %142 : vector<32x64xf32>
    %144 = arith.negf %143 : vector<32x64xf32>
    %145 = math.exp %144 : vector<32x64xf32>
    %cst_113 = arith.constant 1.000000e+00 : f32
    %146 = vector.broadcast %cst_113 : f32 to vector<32x64xf32>
    %147 = arith.addf %146, %145 : vector<32x64xf32>
    %148 = arith.divf %146, %147 : vector<32x64xf32>
    %149 = vector.extract_strided_slice %148 {offsets = [0, 0], sizes = [32, 32], strides = [1, 1]} : vector<32x64xf32> to vector<32x32xf32>
    %150 = vector.extract_strided_slice %148 {offsets = [0, 32], sizes = [32, 32], strides = [1, 1]} : vector<32x64xf32> to vector<32x32xf32>
    %151 = vector.extract_strided_slice %140 {offsets = [0, 64], sizes = [32, 32], strides = [1, 1]} : vector<32x96xf32> to vector<32x32xf32>
    %152 = arith.mulf %150, %126 : vector<32x32xf32>
    %cst_114 = arith.constant dense<0.000000e+00> : vector<32x32xf32>
    %153 = tpu.matmul %152, %134, %cst_114 {dimension_numbers = #tpu.dot_dimension_numbers<[1], [0], [0], [1], [0, 0, 1, 1], [], []>} : vector<32x32xf32>, vector<32x32xf32>, vector<32x32xf32> -> vector<32x32xf32>
    %154 = arith.addf %151, %153 : vector<32x32xf32>
    %155 = math.tanh %154 : vector<32x32xf32>
    %156 = arith.mulf %149, %126 : vector<32x32xf32>
    %cst_115 = arith.constant 1.000000e+00 : f32
    %157 = vector.broadcast %cst_115 : f32 to vector<32x32xf32>
    %158 = arith.subf %157, %149 : vector<32x32xf32>
    %159 = arith.mulf %158, %155 : vector<32x32xf32>
    %160 = arith.addf %156, %159 : vector<32x32xf32>
    %c1_116 = arith.constant 1 : index
    %c0_117 = arith.constant 0 : index
    %c0_118 = arith.constant 0 : index
    %161 = vector.load %arg21[%c1_116, %c0_117, %c0_118] : memref<2x32x32xf32, #tpu.memory_space<vmem>>, vector<1x32x32xf32>
    %162 = vector.shape_cast %161 : vector<1x32x32xf32> to vector<32x32xf32>
    %163 = vector.shape_cast %160 : vector<32x32xf32> to vector<1x32x32xf32>
    tpu.vector_store %arg21[%c1_116, %c0_117, %c0_118], %163 {strides = array<i32>} : memref<2x32x32xf32, #tpu.memory_space<vmem>>, vector<1x32x32xf32>,
    %c2_i32 = arith.constant 2 : i32
    %c0_119 = arith.constant 0 : index
    %164 = arith.index_cast %c2_i32 : i32 to index
    %c0_120 = arith.constant 0 : index
    %c0_121 = arith.constant 0 : index
    %165 = vector.load %arg1[%c0_119, %164, %c0_120, %c0_121] : memref<1x4x32x8xf32, #tpu.memory_space<vmem>>, vector<1x1x32x8xf32>
    %166 = vector.shape_cast %165 : vector<1x1x32x8xf32> to vector<32x8xf32>
    %c0_122 = arith.constant 0 : index
    %c0_123 = arith.constant 0 : index
    %c0_124 = arith.constant 0 : index
    %167 = vector.load %arg21[%c0_122, %c0_123, %c0_124] : memref<2x32x32xf32, #tpu.memory_space<vmem>>, vector<1x32x32xf32>
    %168 = vector.shape_cast %167 : vector<1x32x32xf32> to vector<32x32xf32>
    %c0_125 = arith.constant 0 : index
    %c0_126 = arith.constant 0 : index
    %c0_127 = arith.constant 0 : index
    %c0_128 = arith.constant 0 : index
    %169 = vector.load %arg2[%c0_125, %c0_126, %c0_127, %c0_128] : memref<1x2x32x32xf32, #tpu.memory_space<vmem>>, vector<1x1x32x32xf32>
    %170 = vector.shape_cast %169 : vector<1x1x32x32xf32> to vector<32x32xf32>
    %c0_129 = arith.constant 0 : index
    %c0_130 = arith.constant 0 : index
    %c0_131 = arith.constant 0 : index
    %171 = vector.load %arg4[%c0_129, %c0_130, %c0_131] : memref<1x8x96xf32, #tpu.memory_space<vmem>>, vector<1x8x96xf32>
    %172 = vector.shape_cast %171 : vector<1x8x96xf32> to vector<8x96xf32>
    %c0_132 = arith.constant 0 : index
    %c0_133 = arith.constant 0 : index
    %c0_134 = arith.constant 0 : index
    %173 = vector.load %arg5[%c0_132, %c0_133, %c0_134] : memref<1x32x64xf32, #tpu.memory_space<vmem>>, vector<1x32x64xf32>
    %174 = vector.shape_cast %173 : vector<1x32x64xf32> to vector<32x64xf32>
    %c0_135 = arith.constant 0 : index
    %c0_136 = arith.constant 0 : index
    %c0_137 = arith.constant 0 : index
    %175 = vector.load %arg6[%c0_135, %c0_136, %c0_137] : memref<1x32x32xf32, #tpu.memory_space<vmem>>, vector<1x32x32xf32>
    %176 = vector.shape_cast %175 : vector<1x32x32xf32> to vector<32x32xf32>
    %c0_138 = arith.constant 0 : index
    %c0_139 = arith.constant 0 : index
    %c0_140 = arith.constant 0 : index
    %177 = vector.load %arg7[%c0_138, %c0_139, %c0_140] : memref<1x1x96xf32, #tpu.memory_space<vmem>>, vector<1x1x96xf32>
    %178 = vector.shape_cast %177 : vector<1x1x96xf32> to vector<1x96xf32>
    %cst_141 = arith.constant dense<0.000000e+00> : vector<32x8xf32>
    %179 = tpu.matmul %170, %166, %cst_141 {dimension_numbers = #tpu.dot_dimension_numbers<[1], [0], [0], [1], [0, 0, 1, 1], [], []>} : vector<32x32xf32>, vector<32x8xf32>, vector<32x8xf32> -> vector<32x8xf32>
    %cst_142 = arith.constant dense<0.000000e+00> : vector<32x96xf32>
    %180 = tpu.matmul %179, %172, %cst_142 {dimension_numbers = #tpu.dot_dimension_numbers<[1], [0], [0], [1], [0, 0, 1, 1], [], []>} : vector<32x8xf32>, vector<8x96xf32>, vector<32x96xf32> -> vector<32x96xf32>
    %181 = vector.broadcast %178 : vector<1x96xf32> to vector<32x96xf32>
    %182 = arith.addf %180, %181 : vector<32x96xf32>
    %183 = vector.extract_strided_slice %182 {offsets = [0, 0], sizes = [32, 64], strides = [1, 1]} : vector<32x96xf32> to vector<32x64xf32>
    %cst_143 = arith.constant dense<0.000000e+00> : vector<32x64xf32>
    %184 = tpu.matmul %168, %174, %cst_143 {dimension_numbers = #tpu.dot_dimension_numbers<[1], [0], [0], [1], [0, 0, 1, 1], [], []>} : vector<32x32xf32>, vector<32x64xf32>, vector<32x64xf32> -> vector<32x64xf32>
    %185 = arith.addf %183, %184 : vector<32x64xf32>
    %186 = arith.negf %185 : vector<32x64xf32>
    %187 = math.exp %186 : vector<32x64xf32>
    %cst_144 = arith.constant 1.000000e+00 : f32
    %188 = vector.broadcast %cst_144 : f32 to vector<32x64xf32>
    %189 = arith.addf %188, %187 : vector<32x64xf32>
    %190 = arith.divf %188, %189 : vector<32x64xf32>
    %191 = vector.extract_strided_slice %190 {offsets = [0, 0], sizes = [32, 32], strides = [1, 1]} : vector<32x64xf32> to vector<32x32xf32>
    %192 = vector.extract_strided_slice %190 {offsets = [0, 32], sizes = [32, 32], strides = [1, 1]} : vector<32x64xf32> to vector<32x32xf32>
    %193 = vector.extract_strided_slice %182 {offsets = [0, 64], sizes = [32, 32], strides = [1, 1]} : vector<32x96xf32> to vector<32x32xf32>
    %194 = arith.mulf %192, %168 : vector<32x32xf32>
    %cst_145 = arith.constant dense<0.000000e+00> : vector<32x32xf32>
    %195 = tpu.matmul %194, %176, %cst_145 {dimension_numbers = #tpu.dot_dimension_numbers<[1], [0], [0], [1], [0, 0, 1, 1], [], []>} : vector<32x32xf32>, vector<32x32xf32>, vector<32x32xf32> -> vector<32x32xf32>
    %196 = arith.addf %193, %195 : vector<32x32xf32>
    %197 = math.tanh %196 : vector<32x32xf32>
    %198 = arith.mulf %191, %168 : vector<32x32xf32>
    %cst_146 = arith.constant 1.000000e+00 : f32
    %199 = vector.broadcast %cst_146 : f32 to vector<32x32xf32>
    %200 = arith.subf %199, %191 : vector<32x32xf32>
    %201 = arith.mulf %200, %197 : vector<32x32xf32>
    %202 = arith.addf %198, %201 : vector<32x32xf32>
    %c0_147 = arith.constant 0 : index
    %c0_148 = arith.constant 0 : index
    %c0_149 = arith.constant 0 : index
    %203 = vector.load %arg21[%c0_147, %c0_148, %c0_149] : memref<2x32x32xf32, #tpu.memory_space<vmem>>, vector<1x32x32xf32>
    %204 = vector.shape_cast %203 : vector<1x32x32xf32> to vector<32x32xf32>
    %205 = vector.shape_cast %202 : vector<32x32xf32> to vector<1x32x32xf32>
    tpu.vector_store %arg21[%c0_147, %c0_148, %c0_149], %205 {strides = array<i32>} : memref<2x32x32xf32, #tpu.memory_space<vmem>>, vector<1x32x32xf32>,
    %c1_150 = arith.constant 1 : index
    %c0_151 = arith.constant 0 : index
    %c0_152 = arith.constant 0 : index
    %206 = vector.load %arg21[%c1_150, %c0_151, %c0_152] : memref<2x32x32xf32, #tpu.memory_space<vmem>>, vector<1x32x32xf32>
    %207 = vector.shape_cast %206 : vector<1x32x32xf32> to vector<32x32xf32>
    %c0_153 = arith.constant 0 : index
    %c1_154 = arith.constant 1 : index
    %c0_155 = arith.constant 0 : index
    %c0_156 = arith.constant 0 : index
    %208 = vector.load %arg2[%c0_153, %c1_154, %c0_155, %c0_156] : memref<1x2x32x32xf32, #tpu.memory_space<vmem>>, vector<1x1x32x32xf32>
    %209 = vector.shape_cast %208 : vector<1x1x32x32xf32> to vector<32x32xf32>
    %c0_157 = arith.constant 0 : index
    %c0_158 = arith.constant 0 : index
    %c0_159 = arith.constant 0 : index
    %210 = vector.load %arg8[%c0_157, %c0_158, %c0_159] : memref<1x32x96xf32, #tpu.memory_space<vmem>>, vector<1x32x96xf32>
    %211 = vector.shape_cast %210 : vector<1x32x96xf32> to vector<32x96xf32>
    %c0_160 = arith.constant 0 : index
    %c0_161 = arith.constant 0 : index
    %c0_162 = arith.constant 0 : index
    %212 = vector.load %arg9[%c0_160, %c0_161, %c0_162] : memref<1x32x64xf32, #tpu.memory_space<vmem>>, vector<1x32x64xf32>
    %213 = vector.shape_cast %212 : vector<1x32x64xf32> to vector<32x64xf32>
    %c0_163 = arith.constant 0 : index
    %c0_164 = arith.constant 0 : index
    %c0_165 = arith.constant 0 : index
    %214 = vector.load %arg10[%c0_163, %c0_164, %c0_165] : memref<1x32x32xf32, #tpu.memory_space<vmem>>, vector<1x32x32xf32>
    %215 = vector.shape_cast %214 : vector<1x32x32xf32> to vector<32x32xf32>
    %c0_166 = arith.constant 0 : index
    %c0_167 = arith.constant 0 : index
    %c0_168 = arith.constant 0 : index
    %216 = vector.load %arg11[%c0_166, %c0_167, %c0_168] : memref<1x1x96xf32, #tpu.memory_space<vmem>>, vector<1x1x96xf32>
    %217 = vector.shape_cast %216 : vector<1x1x96xf32> to vector<1x96xf32>
    %cst_169 = arith.constant dense<0.000000e+00> : vector<32x32xf32>
    %218 = tpu.matmul %209, %202, %cst_169 {dimension_numbers = #tpu.dot_dimension_numbers<[1], [0], [0], [1], [0, 0, 1, 1], [], []>} : vector<32x32xf32>, vector<32x32xf32>, vector<32x32xf32> -> vector<32x32xf32>
    %cst_170 = arith.constant dense<0.000000e+00> : vector<32x96xf32>
    %219 = tpu.matmul %218, %211, %cst_170 {dimension_numbers = #tpu.dot_dimension_numbers<[1], [0], [0], [1], [0, 0, 1, 1], [], []>} : vector<32x32xf32>, vector<32x96xf32>, vector<32x96xf32> -> vector<32x96xf32>
    %220 = vector.broadcast %217 : vector<1x96xf32> to vector<32x96xf32>
    %221 = arith.addf %219, %220 : vector<32x96xf32>
    %222 = vector.extract_strided_slice %221 {offsets = [0, 0], sizes = [32, 64], strides = [1, 1]} : vector<32x96xf32> to vector<32x64xf32>
    %cst_171 = arith.constant dense<0.000000e+00> : vector<32x64xf32>
    %223 = tpu.matmul %207, %213, %cst_171 {dimension_numbers = #tpu.dot_dimension_numbers<[1], [0], [0], [1], [0, 0, 1, 1], [], []>} : vector<32x32xf32>, vector<32x64xf32>, vector<32x64xf32> -> vector<32x64xf32>
    %224 = arith.addf %222, %223 : vector<32x64xf32>
    %225 = arith.negf %224 : vector<32x64xf32>
    %226 = math.exp %225 : vector<32x64xf32>
    %cst_172 = arith.constant 1.000000e+00 : f32
    %227 = vector.broadcast %cst_172 : f32 to vector<32x64xf32>
    %228 = arith.addf %227, %226 : vector<32x64xf32>
    %229 = arith.divf %227, %228 : vector<32x64xf32>
    %230 = vector.extract_strided_slice %229 {offsets = [0, 0], sizes = [32, 32], strides = [1, 1]} : vector<32x64xf32> to vector<32x32xf32>
    %231 = vector.extract_strided_slice %229 {offsets = [0, 32], sizes = [32, 32], strides = [1, 1]} : vector<32x64xf32> to vector<32x32xf32>
    %232 = vector.extract_strided_slice %221 {offsets = [0, 64], sizes = [32, 32], strides = [1, 1]} : vector<32x96xf32> to vector<32x32xf32>
    %233 = arith.mulf %231, %207 : vector<32x32xf32>
    %cst_173 = arith.constant dense<0.000000e+00> : vector<32x32xf32>
    %234 = tpu.matmul %233, %215, %cst_173 {dimension_numbers = #tpu.dot_dimension_numbers<[1], [0], [0], [1], [0, 0, 1, 1], [], []>} : vector<32x32xf32>, vector<32x32xf32>, vector<32x32xf32> -> vector<32x32xf32>
    %235 = arith.addf %232, %234 : vector<32x32xf32>
    %236 = math.tanh %235 : vector<32x32xf32>
    %237 = arith.mulf %230, %207 : vector<32x32xf32>
    %cst_174 = arith.constant 1.000000e+00 : f32
    %238 = vector.broadcast %cst_174 : f32 to vector<32x32xf32>
    %239 = arith.subf %238, %230 : vector<32x32xf32>
    %240 = arith.mulf %239, %236 : vector<32x32xf32>
    %241 = arith.addf %237, %240 : vector<32x32xf32>
    %c1_175 = arith.constant 1 : index
    %c0_176 = arith.constant 0 : index
    %c0_177 = arith.constant 0 : index
    %242 = vector.load %arg21[%c1_175, %c0_176, %c0_177] : memref<2x32x32xf32, #tpu.memory_space<vmem>>, vector<1x32x32xf32>
    %243 = vector.shape_cast %242 : vector<1x32x32xf32> to vector<32x32xf32>
    %244 = vector.shape_cast %241 : vector<32x32xf32> to vector<1x32x32xf32>
    tpu.vector_store %arg21[%c1_175, %c0_176, %c0_177], %244 {strides = array<i32>} : memref<2x32x32xf32, #tpu.memory_space<vmem>>, vector<1x32x32xf32>,
    %c3_i32 = arith.constant 3 : i32
    %c0_178 = arith.constant 0 : index
    %245 = arith.index_cast %c3_i32 : i32 to index
    %c0_179 = arith.constant 0 : index
    %c0_180 = arith.constant 0 : index
    %246 = vector.load %arg1[%c0_178, %245, %c0_179, %c0_180] : memref<1x4x32x8xf32, #tpu.memory_space<vmem>>, vector<1x1x32x8xf32>
    %247 = vector.shape_cast %246 : vector<1x1x32x8xf32> to vector<32x8xf32>
    %c0_181 = arith.constant 0 : index
    %c0_182 = arith.constant 0 : index
    %c0_183 = arith.constant 0 : index
    %248 = vector.load %arg21[%c0_181, %c0_182, %c0_183] : memref<2x32x32xf32, #tpu.memory_space<vmem>>, vector<1x32x32xf32>
    %249 = vector.shape_cast %248 : vector<1x32x32xf32> to vector<32x32xf32>
    %c0_184 = arith.constant 0 : index
    %c0_185 = arith.constant 0 : index
    %c0_186 = arith.constant 0 : index
    %c0_187 = arith.constant 0 : index
    %250 = vector.load %arg2[%c0_184, %c0_185, %c0_186, %c0_187] : memref<1x2x32x32xf32, #tpu.memory_space<vmem>>, vector<1x1x32x32xf32>
    %251 = vector.shape_cast %250 : vector<1x1x32x32xf32> to vector<32x32xf32>
    %c0_188 = arith.constant 0 : index
    %c0_189 = arith.constant 0 : index
    %c0_190 = arith.constant 0 : index
    %252 = vector.load %arg4[%c0_188, %c0_189, %c0_190] : memref<1x8x96xf32, #tpu.memory_space<vmem>>, vector<1x8x96xf32>
    %253 = vector.shape_cast %252 : vector<1x8x96xf32> to vector<8x96xf32>
    %c0_191 = arith.constant 0 : index
    %c0_192 = arith.constant 0 : index
    %c0_193 = arith.constant 0 : index
    %254 = vector.load %arg5[%c0_191, %c0_192, %c0_193] : memref<1x32x64xf32, #tpu.memory_space<vmem>>, vector<1x32x64xf32>
    %255 = vector.shape_cast %254 : vector<1x32x64xf32> to vector<32x64xf32>
    %c0_194 = arith.constant 0 : index
    %c0_195 = arith.constant 0 : index
    %c0_196 = arith.constant 0 : index
    %256 = vector.load %arg6[%c0_194, %c0_195, %c0_196] : memref<1x32x32xf32, #tpu.memory_space<vmem>>, vector<1x32x32xf32>
    %257 = vector.shape_cast %256 : vector<1x32x32xf32> to vector<32x32xf32>
    %c0_197 = arith.constant 0 : index
    %c0_198 = arith.constant 0 : index
    %c0_199 = arith.constant 0 : index
    %258 = vector.load %arg7[%c0_197, %c0_198, %c0_199] : memref<1x1x96xf32, #tpu.memory_space<vmem>>, vector<1x1x96xf32>
    %259 = vector.shape_cast %258 : vector<1x1x96xf32> to vector<1x96xf32>
    %cst_200 = arith.constant dense<0.000000e+00> : vector<32x8xf32>
    %260 = tpu.matmul %251, %247, %cst_200 {dimension_numbers = #tpu.dot_dimension_numbers<[1], [0], [0], [1], [0, 0, 1, 1], [], []>} : vector<32x32xf32>, vector<32x8xf32>, vector<32x8xf32> -> vector<32x8xf32>
    %cst_201 = arith.constant dense<0.000000e+00> : vector<32x96xf32>
    %261 = tpu.matmul %260, %253, %cst_201 {dimension_numbers = #tpu.dot_dimension_numbers<[1], [0], [0], [1], [0, 0, 1, 1], [], []>} : vector<32x8xf32>, vector<8x96xf32>, vector<32x96xf32> -> vector<32x96xf32>
    %262 = vector.broadcast %259 : vector<1x96xf32> to vector<32x96xf32>
    %263 = arith.addf %261, %262 : vector<32x96xf32>
    %264 = vector.extract_strided_slice %263 {offsets = [0, 0], sizes = [32, 64], strides = [1, 1]} : vector<32x96xf32> to vector<32x64xf32>
    %cst_202 = arith.constant dense<0.000000e+00> : vector<32x64xf32>
    %265 = tpu.matmul %249, %255, %cst_202 {dimension_numbers = #tpu.dot_dimension_numbers<[1], [0], [0], [1], [0, 0, 1, 1], [], []>} : vector<32x32xf32>, vector<32x64xf32>, vector<32x64xf32> -> vector<32x64xf32>
    %266 = arith.addf %264, %265 : vector<32x64xf32>
    %267 = arith.negf %266 : vector<32x64xf32>
    %268 = math.exp %267 : vector<32x64xf32>
    %cst_203 = arith.constant 1.000000e+00 : f32
    %269 = vector.broadcast %cst_203 : f32 to vector<32x64xf32>
    %270 = arith.addf %269, %268 : vector<32x64xf32>
    %271 = arith.divf %269, %270 : vector<32x64xf32>
    %272 = vector.extract_strided_slice %271 {offsets = [0, 0], sizes = [32, 32], strides = [1, 1]} : vector<32x64xf32> to vector<32x32xf32>
    %273 = vector.extract_strided_slice %271 {offsets = [0, 32], sizes = [32, 32], strides = [1, 1]} : vector<32x64xf32> to vector<32x32xf32>
    %274 = vector.extract_strided_slice %263 {offsets = [0, 64], sizes = [32, 32], strides = [1, 1]} : vector<32x96xf32> to vector<32x32xf32>
    %275 = arith.mulf %273, %249 : vector<32x32xf32>
    %cst_204 = arith.constant dense<0.000000e+00> : vector<32x32xf32>
    %276 = tpu.matmul %275, %257, %cst_204 {dimension_numbers = #tpu.dot_dimension_numbers<[1], [0], [0], [1], [0, 0, 1, 1], [], []>} : vector<32x32xf32>, vector<32x32xf32>, vector<32x32xf32> -> vector<32x32xf32>
    %277 = arith.addf %274, %276 : vector<32x32xf32>
    %278 = math.tanh %277 : vector<32x32xf32>
    %279 = arith.mulf %272, %249 : vector<32x32xf32>
    %cst_205 = arith.constant 1.000000e+00 : f32
    %280 = vector.broadcast %cst_205 : f32 to vector<32x32xf32>
    %281 = arith.subf %280, %272 : vector<32x32xf32>
    %282 = arith.mulf %281, %278 : vector<32x32xf32>
    %283 = arith.addf %279, %282 : vector<32x32xf32>
    %c0_206 = arith.constant 0 : index
    %c0_207 = arith.constant 0 : index
    %c0_208 = arith.constant 0 : index
    %284 = vector.load %arg21[%c0_206, %c0_207, %c0_208] : memref<2x32x32xf32, #tpu.memory_space<vmem>>, vector<1x32x32xf32>
    %285 = vector.shape_cast %284 : vector<1x32x32xf32> to vector<32x32xf32>
    %286 = vector.shape_cast %283 : vector<32x32xf32> to vector<1x32x32xf32>
    tpu.vector_store %arg21[%c0_206, %c0_207, %c0_208], %286 {strides = array<i32>} : memref<2x32x32xf32, #tpu.memory_space<vmem>>, vector<1x32x32xf32>,
    %c1_209 = arith.constant 1 : index
    %c0_210 = arith.constant 0 : index
    %c0_211 = arith.constant 0 : index
    %287 = vector.load %arg21[%c1_209, %c0_210, %c0_211] : memref<2x32x32xf32, #tpu.memory_space<vmem>>, vector<1x32x32xf32>
    %288 = vector.shape_cast %287 : vector<1x32x32xf32> to vector<32x32xf32>
    %c0_212 = arith.constant 0 : index
    %c1_213 = arith.constant 1 : index
    %c0_214 = arith.constant 0 : index
    %c0_215 = arith.constant 0 : index
    %289 = vector.load %arg2[%c0_212, %c1_213, %c0_214, %c0_215] : memref<1x2x32x32xf32, #tpu.memory_space<vmem>>, vector<1x1x32x32xf32>
    %290 = vector.shape_cast %289 : vector<1x1x32x32xf32> to vector<32x32xf32>
    %c0_216 = arith.constant 0 : index
    %c0_217 = arith.constant 0 : index
    %c0_218 = arith.constant 0 : index
    %291 = vector.load %arg8[%c0_216, %c0_217, %c0_218] : memref<1x32x96xf32, #tpu.memory_space<vmem>>, vector<1x32x96xf32>
    %292 = vector.shape_cast %291 : vector<1x32x96xf32> to vector<32x96xf32>
    %c0_219 = arith.constant 0 : index
    %c0_220 = arith.constant 0 : index
    %c0_221 = arith.constant 0 : index
    %293 = vector.load %arg9[%c0_219, %c0_220, %c0_221] : memref<1x32x64xf32, #tpu.memory_space<vmem>>, vector<1x32x64xf32>
    %294 = vector.shape_cast %293 : vector<1x32x64xf32> to vector<32x64xf32>
    %c0_222 = arith.constant 0 : index
    %c0_223 = arith.constant 0 : index
    %c0_224 = arith.constant 0 : index
    %295 = vector.load %arg10[%c0_222, %c0_223, %c0_224] : memref<1x32x32xf32, #tpu.memory_space<vmem>>, vector<1x32x32xf32>
    %296 = vector.shape_cast %295 : vector<1x32x32xf32> to vector<32x32xf32>
    %c0_225 = arith.constant 0 : index
    %c0_226 = arith.constant 0 : index
    %c0_227 = arith.constant 0 : index
    %297 = vector.load %arg11[%c0_225, %c0_226, %c0_227] : memref<1x1x96xf32, #tpu.memory_space<vmem>>, vector<1x1x96xf32>
    %298 = vector.shape_cast %297 : vector<1x1x96xf32> to vector<1x96xf32>
    %cst_228 = arith.constant dense<0.000000e+00> : vector<32x32xf32>
    %299 = tpu.matmul %290, %283, %cst_228 {dimension_numbers = #tpu.dot_dimension_numbers<[1], [0], [0], [1], [0, 0, 1, 1], [], []>} : vector<32x32xf32>, vector<32x32xf32>, vector<32x32xf32> -> vector<32x32xf32>
    %cst_229 = arith.constant dense<0.000000e+00> : vector<32x96xf32>
    %300 = tpu.matmul %299, %292, %cst_229 {dimension_numbers = #tpu.dot_dimension_numbers<[1], [0], [0], [1], [0, 0, 1, 1], [], []>} : vector<32x32xf32>, vector<32x96xf32>, vector<32x96xf32> -> vector<32x96xf32>
    %301 = vector.broadcast %298 : vector<1x96xf32> to vector<32x96xf32>
    %302 = arith.addf %300, %301 : vector<32x96xf32>
    %303 = vector.extract_strided_slice %302 {offsets = [0, 0], sizes = [32, 64], strides = [1, 1]} : vector<32x96xf32> to vector<32x64xf32>
    %cst_230 = arith.constant dense<0.000000e+00> : vector<32x64xf32>
    %304 = tpu.matmul %288, %294, %cst_230 {dimension_numbers = #tpu.dot_dimension_numbers<[1], [0], [0], [1], [0, 0, 1, 1], [], []>} : vector<32x32xf32>, vector<32x64xf32>, vector<32x64xf32> -> vector<32x64xf32>
    %305 = arith.addf %303, %304 : vector<32x64xf32>
    %306 = arith.negf %305 : vector<32x64xf32>
    %307 = math.exp %306 : vector<32x64xf32>
    %cst_231 = arith.constant 1.000000e+00 : f32
    %308 = vector.broadcast %cst_231 : f32 to vector<32x64xf32>
    %309 = arith.addf %308, %307 : vector<32x64xf32>
    %310 = arith.divf %308, %309 : vector<32x64xf32>
    %311 = vector.extract_strided_slice %310 {offsets = [0, 0], sizes = [32, 32], strides = [1, 1]} : vector<32x64xf32> to vector<32x32xf32>
    %312 = vector.extract_strided_slice %310 {offsets = [0, 32], sizes = [32, 32], strides = [1, 1]} : vector<32x64xf32> to vector<32x32xf32>
    %313 = vector.extract_strided_slice %302 {offsets = [0, 64], sizes = [32, 32], strides = [1, 1]} : vector<32x96xf32> to vector<32x32xf32>
    %314 = arith.mulf %312, %288 : vector<32x32xf32>
    %cst_232 = arith.constant dense<0.000000e+00> : vector<32x32xf32>
    %315 = tpu.matmul %314, %296, %cst_232 {dimension_numbers = #tpu.dot_dimension_numbers<[1], [0], [0], [1], [0, 0, 1, 1], [], []>} : vector<32x32xf32>, vector<32x32xf32>, vector<32x32xf32> -> vector<32x32xf32>
    %316 = arith.addf %313, %315 : vector<32x32xf32>
    %317 = math.tanh %316 : vector<32x32xf32>
    %318 = arith.mulf %311, %288 : vector<32x32xf32>
    %cst_233 = arith.constant 1.000000e+00 : f32
    %319 = vector.broadcast %cst_233 : f32 to vector<32x32xf32>
    %320 = arith.subf %319, %311 : vector<32x32xf32>
    %321 = arith.mulf %320, %317 : vector<32x32xf32>
    %322 = arith.addf %318, %321 : vector<32x32xf32>
    %c1_234 = arith.constant 1 : index
    %c0_235 = arith.constant 0 : index
    %c0_236 = arith.constant 0 : index
    %323 = vector.load %arg21[%c1_234, %c0_235, %c0_236] : memref<2x32x32xf32, #tpu.memory_space<vmem>>, vector<1x32x32xf32>
    %324 = vector.shape_cast %323 : vector<1x32x32xf32> to vector<32x32xf32>
    %325 = vector.shape_cast %322 : vector<32x32xf32> to vector<1x32x32xf32>
    tpu.vector_store %arg21[%c1_234, %c0_235, %c0_236], %325 {strides = array<i32>} : memref<2x32x32xf32, #tpu.memory_space<vmem>>, vector<1x32x32xf32>,
    %c4_i32 = arith.constant 4 : i32
    %c0_i32_237 = arith.constant 0 : i32
    %c0_238 = arith.constant 0 : index
    %c0_239 = arith.constant 0 : index
    %c0_240 = arith.constant 0 : index
    %326 = vector.load %arg21[%c0_238, %c0_239, %c0_240] : memref<2x32x32xf32, #tpu.memory_space<vmem>>, vector<1x32x32xf32>
    %327 = vector.shape_cast %326 : vector<1x32x32xf32> to vector<32x32xf32>
    %c0_241 = arith.constant 0 : index
    %c0_242 = arith.constant 0 : index
    %c0_243 = arith.constant 0 : index
    %328 = vector.load %arg13[%c0_241, %c0_242, %c0_243] : memref<1x32x64xf32, #tpu.memory_space<vmem>>, vector<1x32x64xf32>
    %329 = vector.shape_cast %328 : vector<1x32x64xf32> to vector<32x64xf32>
    %c0_244 = arith.constant 0 : index
    %c0_245 = arith.constant 0 : index
    %c0_246 = arith.constant 0 : index
    %330 = vector.load %arg14[%c0_244, %c0_245, %c0_246] : memref<1x32x32xf32, #tpu.memory_space<vmem>>, vector<1x32x32xf32>
    %331 = vector.shape_cast %330 : vector<1x32x32xf32> to vector<32x32xf32>
    %c0_247 = arith.constant 0 : index
    %c0_248 = arith.constant 0 : index
    %c0_249 = arith.constant 0 : index
    %332 = vector.load %arg15[%c0_247, %c0_248, %c0_249] : memref<1x1x96xf32, #tpu.memory_space<vmem>>, vector<1x1x96xf32>
    %333 = vector.shape_cast %332 : vector<1x1x96xf32> to vector<1x96xf32>
    %334 = vector.extract_strided_slice %333 {offsets = [0, 0], sizes = [1, 64], strides = [1, 1]} : vector<1x96xf32> to vector<1x64xf32>
    %cst_250 = arith.constant dense<0.000000e+00> : vector<32x64xf32>
    %335 = tpu.matmul %327, %329, %cst_250 {dimension_numbers = #tpu.dot_dimension_numbers<[1], [0], [0], [1], [0, 0, 1, 1], [], []>} : vector<32x32xf32>, vector<32x64xf32>, vector<32x64xf32> -> vector<32x64xf32>
    %336 = vector.broadcast %334 : vector<1x64xf32> to vector<32x64xf32>
    %337 = arith.addf %336, %335 : vector<32x64xf32>
    %338 = arith.negf %337 : vector<32x64xf32>
    %339 = math.exp %338 : vector<32x64xf32>
    %cst_251 = arith.constant 1.000000e+00 : f32
    %340 = vector.broadcast %cst_251 : f32 to vector<32x64xf32>
    %341 = arith.addf %340, %339 : vector<32x64xf32>
    %342 = arith.divf %340, %341 : vector<32x64xf32>
    %343 = vector.extract_strided_slice %342 {offsets = [0, 0], sizes = [32, 32], strides = [1, 1]} : vector<32x64xf32> to vector<32x32xf32>
    %344 = vector.extract_strided_slice %342 {offsets = [0, 32], sizes = [32, 32], strides = [1, 1]} : vector<32x64xf32> to vector<32x32xf32>
    %345 = vector.extract_strided_slice %333 {offsets = [0, 64], sizes = [1, 32], strides = [1, 1]} : vector<1x96xf32> to vector<1x32xf32>
    %346 = arith.mulf %344, %327 : vector<32x32xf32>
    %cst_252 = arith.constant dense<0.000000e+00> : vector<32x32xf32>
    %347 = tpu.matmul %346, %331, %cst_252 {dimension_numbers = #tpu.dot_dimension_numbers<[1], [0], [0], [1], [0, 0, 1, 1], [], []>} : vector<32x32xf32>, vector<32x32xf32>, vector<32x32xf32> -> vector<32x32xf32>
    %348 = vector.broadcast %345 : vector<1x32xf32> to vector<32x32xf32>
    %349 = arith.addf %348, %347 : vector<32x32xf32>
    %350 = math.tanh %349 : vector<32x32xf32>
    %351 = arith.mulf %343, %327 : vector<32x32xf32>
    %cst_253 = arith.constant 1.000000e+00 : f32
    %352 = vector.broadcast %cst_253 : f32 to vector<32x32xf32>
    %353 = arith.subf %352, %343 : vector<32x32xf32>
    %354 = arith.mulf %353, %350 : vector<32x32xf32>
    %355 = arith.addf %351, %354 : vector<32x32xf32>
    %c0_254 = arith.constant 0 : index
    %c0_255 = arith.constant 0 : index
    %c0_256 = arith.constant 0 : index
    %356 = vector.load %arg21[%c0_254, %c0_255, %c0_256] : memref<2x32x32xf32, #tpu.memory_space<vmem>>, vector<1x32x32xf32>
    %357 = vector.shape_cast %356 : vector<1x32x32xf32> to vector<32x32xf32>
    %358 = vector.shape_cast %355 : vector<32x32xf32> to vector<1x32x32xf32>
    tpu.vector_store %arg21[%c0_254, %c0_255, %c0_256], %358 {strides = array<i32>} : memref<2x32x32xf32, #tpu.memory_space<vmem>>, vector<1x32x32xf32>,
    %c1_257 = arith.constant 1 : index
    %c0_258 = arith.constant 0 : index
    %c0_259 = arith.constant 0 : index
    %359 = vector.load %arg21[%c1_257, %c0_258, %c0_259] : memref<2x32x32xf32, #tpu.memory_space<vmem>>, vector<1x32x32xf32>
    %360 = vector.shape_cast %359 : vector<1x32x32xf32> to vector<32x32xf32>
    %c0_260 = arith.constant 0 : index
    %c1_261 = arith.constant 1 : index
    %c0_262 = arith.constant 0 : index
    %c0_263 = arith.constant 0 : index
    %361 = vector.load %arg3[%c0_260, %c1_261, %c0_262, %c0_263] : memref<1x2x32x32xf32, #tpu.memory_space<vmem>>, vector<1x1x32x32xf32>
    %362 = vector.shape_cast %361 : vector<1x1x32x32xf32> to vector<32x32xf32>
    %c0_264 = arith.constant 0 : index
    %c0_265 = arith.constant 0 : index
    %c0_266 = arith.constant 0 : index
    %363 = vector.load %arg16[%c0_264, %c0_265, %c0_266] : memref<1x32x96xf32, #tpu.memory_space<vmem>>, vector<1x32x96xf32>
    %364 = vector.shape_cast %363 : vector<1x32x96xf32> to vector<32x96xf32>
    %c0_267 = arith.constant 0 : index
    %c0_268 = arith.constant 0 : index
    %c0_269 = arith.constant 0 : index
    %365 = vector.load %arg17[%c0_267, %c0_268, %c0_269] : memref<1x32x64xf32, #tpu.memory_space<vmem>>, vector<1x32x64xf32>
    %366 = vector.shape_cast %365 : vector<1x32x64xf32> to vector<32x64xf32>
    %c0_270 = arith.constant 0 : index
    %c0_271 = arith.constant 0 : index
    %c0_272 = arith.constant 0 : index
    %367 = vector.load %arg18[%c0_270, %c0_271, %c0_272] : memref<1x32x32xf32, #tpu.memory_space<vmem>>, vector<1x32x32xf32>
    %368 = vector.shape_cast %367 : vector<1x32x32xf32> to vector<32x32xf32>
    %c0_273 = arith.constant 0 : index
    %c0_274 = arith.constant 0 : index
    %c0_275 = arith.constant 0 : index
    %369 = vector.load %arg19[%c0_273, %c0_274, %c0_275] : memref<1x1x96xf32, #tpu.memory_space<vmem>>, vector<1x1x96xf32>
    %370 = vector.shape_cast %369 : vector<1x1x96xf32> to vector<1x96xf32>
    %cst_276 = arith.constant dense<0.000000e+00> : vector<32x32xf32>
    %371 = tpu.matmul %362, %355, %cst_276 {dimension_numbers = #tpu.dot_dimension_numbers<[1], [0], [0], [1], [0, 0, 1, 1], [], []>} : vector<32x32xf32>, vector<32x32xf32>, vector<32x32xf32> -> vector<32x32xf32>
    %cst_277 = arith.constant dense<0.000000e+00> : vector<32x96xf32>
    %372 = tpu.matmul %371, %364, %cst_277 {dimension_numbers = #tpu.dot_dimension_numbers<[1], [0], [0], [1], [0, 0, 1, 1], [], []>} : vector<32x32xf32>, vector<32x96xf32>, vector<32x96xf32> -> vector<32x96xf32>
    %373 = vector.broadcast %370 : vector<1x96xf32> to vector<32x96xf32>
    %374 = arith.addf %372, %373 : vector<32x96xf32>
    %375 = vector.extract_strided_slice %374 {offsets = [0, 0], sizes = [32, 64], strides = [1, 1]} : vector<32x96xf32> to vector<32x64xf32>
    %cst_278 = arith.constant dense<0.000000e+00> : vector<32x64xf32>
    %376 = tpu.matmul %360, %366, %cst_278 {dimension_numbers = #tpu.dot_dimension_numbers<[1], [0], [0], [1], [0, 0, 1, 1], [], []>} : vector<32x32xf32>, vector<32x64xf32>, vector<32x64xf32> -> vector<32x64xf32>
    %377 = arith.addf %375, %376 : vector<32x64xf32>
    %378 = arith.negf %377 : vector<32x64xf32>
    %379 = math.exp %378 : vector<32x64xf32>
    %cst_279 = arith.constant 1.000000e+00 : f32
    %380 = vector.broadcast %cst_279 : f32 to vector<32x64xf32>
    %381 = arith.addf %380, %379 : vector<32x64xf32>
    %382 = arith.divf %380, %381 : vector<32x64xf32>
    %383 = vector.extract_strided_slice %382 {offsets = [0, 0], sizes = [32, 32], strides = [1, 1]} : vector<32x64xf32> to vector<32x32xf32>
    %384 = vector.extract_strided_slice %382 {offsets = [0, 32], sizes = [32, 32], strides = [1, 1]} : vector<32x64xf32> to vector<32x32xf32>
    %385 = vector.extract_strided_slice %374 {offsets = [0, 64], sizes = [32, 32], strides = [1, 1]} : vector<32x96xf32> to vector<32x32xf32>
    %386 = arith.mulf %384, %360 : vector<32x32xf32>
    %cst_280 = arith.constant dense<0.000000e+00> : vector<32x32xf32>
    %387 = tpu.matmul %386, %368, %cst_280 {dimension_numbers = #tpu.dot_dimension_numbers<[1], [0], [0], [1], [0, 0, 1, 1], [], []>} : vector<32x32xf32>, vector<32x32xf32>, vector<32x32xf32> -> vector<32x32xf32>
    %388 = arith.addf %385, %387 : vector<32x32xf32>
    %389 = math.tanh %388 : vector<32x32xf32>
    %390 = arith.mulf %383, %360 : vector<32x32xf32>
    %cst_281 = arith.constant 1.000000e+00 : f32
    %391 = vector.broadcast %cst_281 : f32 to vector<32x32xf32>
    %392 = arith.subf %391, %383 : vector<32x32xf32>
    %393 = arith.mulf %392, %389 : vector<32x32xf32>
    %394 = arith.addf %390, %393 : vector<32x32xf32>
    %c1_282 = arith.constant 1 : index
    %c0_283 = arith.constant 0 : index
    %c0_284 = arith.constant 0 : index
    %395 = vector.load %arg21[%c1_282, %c0_283, %c0_284] : memref<2x32x32xf32, #tpu.memory_space<vmem>>, vector<1x32x32xf32>
    %396 = vector.shape_cast %395 : vector<1x32x32xf32> to vector<32x32xf32>
    %397 = vector.shape_cast %394 : vector<32x32xf32> to vector<1x32x32xf32>
    tpu.vector_store %arg21[%c1_282, %c0_283, %c0_284], %397 {strides = array<i32>} : memref<2x32x32xf32, #tpu.memory_space<vmem>>, vector<1x32x32xf32>,
    %c0_285 = arith.constant 0 : index
    %398 = arith.index_cast %c0_i32_237 : i32 to index
    %c0_286 = arith.constant 0 : index
    %c0_287 = arith.constant 0 : index
    %399 = vector.load %arg20[%c0_285, %398, %c0_286, %c0_287] : memref<1x4x32x32xf32, #tpu.memory_space<vmem>>, vector<1x1x32x32xf32>
    %400 = vector.shape_cast %399 : vector<1x1x32x32xf32> to vector<32x32xf32>
    %401 = vector.shape_cast %394 : vector<32x32xf32> to vector<1x1x32x32xf32>
    tpu.vector_store %arg20[%c0_285, %398, %c0_286, %c0_287], %401 {strides = array<i32>} : memref<1x4x32x32xf32, #tpu.memory_space<vmem>>, vector<1x1x32x32xf32>,
    %c1_i32_288 = arith.constant 1 : i32
    %c0_289 = arith.constant 0 : index
    %c0_290 = arith.constant 0 : index
    %c0_291 = arith.constant 0 : index
    %402 = vector.load %arg21[%c0_289, %c0_290, %c0_291] : memref<2x32x32xf32, #tpu.memory_space<vmem>>, vector<1x32x32xf32>
    %403 = vector.shape_cast %402 : vector<1x32x32xf32> to vector<32x32xf32>
    %c0_292 = arith.constant 0 : index
    %c0_293 = arith.constant 0 : index
    %c0_294 = arith.constant 0 : index
    %404 = vector.load %arg13[%c0_292, %c0_293, %c0_294] : memref<1x32x64xf32, #tpu.memory_space<vmem>>, vector<1x32x64xf32>
    %405 = vector.shape_cast %404 : vector<1x32x64xf32> to vector<32x64xf32>
    %c0_295 = arith.constant 0 : index
    %c0_296 = arith.constant 0 : index
    %c0_297 = arith.constant 0 : index
    %406 = vector.load %arg14[%c0_295, %c0_296, %c0_297] : memref<1x32x32xf32, #tpu.memory_space<vmem>>, vector<1x32x32xf32>
    %407 = vector.shape_cast %406 : vector<1x32x32xf32> to vector<32x32xf32>
    %c0_298 = arith.constant 0 : index
    %c0_299 = arith.constant 0 : index
    %c0_300 = arith.constant 0 : index
    %408 = vector.load %arg15[%c0_298, %c0_299, %c0_300] : memref<1x1x96xf32, #tpu.memory_space<vmem>>, vector<1x1x96xf32>
    %409 = vector.shape_cast %408 : vector<1x1x96xf32> to vector<1x96xf32>
    %410 = vector.extract_strided_slice %409 {offsets = [0, 0], sizes = [1, 64], strides = [1, 1]} : vector<1x96xf32> to vector<1x64xf32>
    %cst_301 = arith.constant dense<0.000000e+00> : vector<32x64xf32>
    %411 = tpu.matmul %403, %405, %cst_301 {dimension_numbers = #tpu.dot_dimension_numbers<[1], [0], [0], [1], [0, 0, 1, 1], [], []>} : vector<32x32xf32>, vector<32x64xf32>, vector<32x64xf32> -> vector<32x64xf32>
    %412 = vector.broadcast %410 : vector<1x64xf32> to vector<32x64xf32>
    %413 = arith.addf %412, %411 : vector<32x64xf32>
    %414 = arith.negf %413 : vector<32x64xf32>
    %415 = math.exp %414 : vector<32x64xf32>
    %cst_302 = arith.constant 1.000000e+00 : f32
    %416 = vector.broadcast %cst_302 : f32 to vector<32x64xf32>
    %417 = arith.addf %416, %415 : vector<32x64xf32>
    %418 = arith.divf %416, %417 : vector<32x64xf32>
    %419 = vector.extract_strided_slice %418 {offsets = [0, 0], sizes = [32, 32], strides = [1, 1]} : vector<32x64xf32> to vector<32x32xf32>
    %420 = vector.extract_strided_slice %418 {offsets = [0, 32], sizes = [32, 32], strides = [1, 1]} : vector<32x64xf32> to vector<32x32xf32>
    %421 = vector.extract_strided_slice %409 {offsets = [0, 64], sizes = [1, 32], strides = [1, 1]} : vector<1x96xf32> to vector<1x32xf32>
    %422 = arith.mulf %420, %403 : vector<32x32xf32>
    %cst_303 = arith.constant dense<0.000000e+00> : vector<32x32xf32>
    %423 = tpu.matmul %422, %407, %cst_303 {dimension_numbers = #tpu.dot_dimension_numbers<[1], [0], [0], [1], [0, 0, 1, 1], [], []>} : vector<32x32xf32>, vector<32x32xf32>, vector<32x32xf32> -> vector<32x32xf32>
    %424 = vector.broadcast %421 : vector<1x32xf32> to vector<32x32xf32>
    %425 = arith.addf %424, %423 : vector<32x32xf32>
    %426 = math.tanh %425 : vector<32x32xf32>
    %427 = arith.mulf %419, %403 : vector<32x32xf32>
    %cst_304 = arith.constant 1.000000e+00 : f32
    %428 = vector.broadcast %cst_304 : f32 to vector<32x32xf32>
    %429 = arith.subf %428, %419 : vector<32x32xf32>
    %430 = arith.mulf %429, %426 : vector<32x32xf32>
    %431 = arith.addf %427, %430 : vector<32x32xf32>
    %c0_305 = arith.constant 0 : index
    %c0_306 = arith.constant 0 : index
    %c0_307 = arith.constant 0 : index
    %432 = vector.load %arg21[%c0_305, %c0_306, %c0_307] : memref<2x32x32xf32, #tpu.memory_space<vmem>>, vector<1x32x32xf32>
    %433 = vector.shape_cast %432 : vector<1x32x32xf32> to vector<32x32xf32>
    %434 = vector.shape_cast %431 : vector<32x32xf32> to vector<1x32x32xf32>
    tpu.vector_store %arg21[%c0_305, %c0_306, %c0_307], %434 {strides = array<i32>} : memref<2x32x32xf32, #tpu.memory_space<vmem>>, vector<1x32x32xf32>,
    %c1_308 = arith.constant 1 : index
    %c0_309 = arith.constant 0 : index
    %c0_310 = arith.constant 0 : index
    %435 = vector.load %arg21[%c1_308, %c0_309, %c0_310] : memref<2x32x32xf32, #tpu.memory_space<vmem>>, vector<1x32x32xf32>
    %436 = vector.shape_cast %435 : vector<1x32x32xf32> to vector<32x32xf32>
    %c0_311 = arith.constant 0 : index
    %c1_312 = arith.constant 1 : index
    %c0_313 = arith.constant 0 : index
    %c0_314 = arith.constant 0 : index
    %437 = vector.load %arg3[%c0_311, %c1_312, %c0_313, %c0_314] : memref<1x2x32x32xf32, #tpu.memory_space<vmem>>, vector<1x1x32x32xf32>
    %438 = vector.shape_cast %437 : vector<1x1x32x32xf32> to vector<32x32xf32>
    %c0_315 = arith.constant 0 : index
    %c0_316 = arith.constant 0 : index
    %c0_317 = arith.constant 0 : index
    %439 = vector.load %arg16[%c0_315, %c0_316, %c0_317] : memref<1x32x96xf32, #tpu.memory_space<vmem>>, vector<1x32x96xf32>
    %440 = vector.shape_cast %439 : vector<1x32x96xf32> to vector<32x96xf32>
    %c0_318 = arith.constant 0 : index
    %c0_319 = arith.constant 0 : index
    %c0_320 = arith.constant 0 : index
    %441 = vector.load %arg17[%c0_318, %c0_319, %c0_320] : memref<1x32x64xf32, #tpu.memory_space<vmem>>, vector<1x32x64xf32>
    %442 = vector.shape_cast %441 : vector<1x32x64xf32> to vector<32x64xf32>
    %c0_321 = arith.constant 0 : index
    %c0_322 = arith.constant 0 : index
    %c0_323 = arith.constant 0 : index
    %443 = vector.load %arg18[%c0_321, %c0_322, %c0_323] : memref<1x32x32xf32, #tpu.memory_space<vmem>>, vector<1x32x32xf32>
    %444 = vector.shape_cast %443 : vector<1x32x32xf32> to vector<32x32xf32>
    %c0_324 = arith.constant 0 : index
    %c0_325 = arith.constant 0 : index
    %c0_326 = arith.constant 0 : index
    %445 = vector.load %arg19[%c0_324, %c0_325, %c0_326] : memref<1x1x96xf32, #tpu.memory_space<vmem>>, vector<1x1x96xf32>
    %446 = vector.shape_cast %445 : vector<1x1x96xf32> to vector<1x96xf32>
    %cst_327 = arith.constant dense<0.000000e+00> : vector<32x32xf32>
    %447 = tpu.matmul %438, %431, %cst_327 {dimension_numbers = #tpu.dot_dimension_numbers<[1], [0], [0], [1], [0, 0, 1, 1], [], []>} : vector<32x32xf32>, vector<32x32xf32>, vector<32x32xf32> -> vector<32x32xf32>
    %cst_328 = arith.constant dense<0.000000e+00> : vector<32x96xf32>
    %448 = tpu.matmul %447, %440, %cst_328 {dimension_numbers = #tpu.dot_dimension_numbers<[1], [0], [0], [1], [0, 0, 1, 1], [], []>} : vector<32x32xf32>, vector<32x96xf32>, vector<32x96xf32> -> vector<32x96xf32>
    %449 = vector.broadcast %446 : vector<1x96xf32> to vector<32x96xf32>
    %450 = arith.addf %448, %449 : vector<32x96xf32>
    %451 = vector.extract_strided_slice %450 {offsets = [0, 0], sizes = [32, 64], strides = [1, 1]} : vector<32x96xf32> to vector<32x64xf32>
    %cst_329 = arith.constant dense<0.000000e+00> : vector<32x64xf32>
    %452 = tpu.matmul %436, %442, %cst_329 {dimension_numbers = #tpu.dot_dimension_numbers<[1], [0], [0], [1], [0, 0, 1, 1], [], []>} : vector<32x32xf32>, vector<32x64xf32>, vector<32x64xf32> -> vector<32x64xf32>
    %453 = arith.addf %451, %452 : vector<32x64xf32>
    %454 = arith.negf %453 : vector<32x64xf32>
    %455 = math.exp %454 : vector<32x64xf32>
    %cst_330 = arith.constant 1.000000e+00 : f32
    %456 = vector.broadcast %cst_330 : f32 to vector<32x64xf32>
    %457 = arith.addf %456, %455 : vector<32x64xf32>
    %458 = arith.divf %456, %457 : vector<32x64xf32>
    %459 = vector.extract_strided_slice %458 {offsets = [0, 0], sizes = [32, 32], strides = [1, 1]} : vector<32x64xf32> to vector<32x32xf32>
    %460 = vector.extract_strided_slice %458 {offsets = [0, 32], sizes = [32, 32], strides = [1, 1]} : vector<32x64xf32> to vector<32x32xf32>
    %461 = vector.extract_strided_slice %450 {offsets = [0, 64], sizes = [32, 32], strides = [1, 1]} : vector<32x96xf32> to vector<32x32xf32>
    %462 = arith.mulf %460, %436 : vector<32x32xf32>
    %cst_331 = arith.constant dense<0.000000e+00> : vector<32x32xf32>
    %463 = tpu.matmul %462, %444, %cst_331 {dimension_numbers = #tpu.dot_dimension_numbers<[1], [0], [0], [1], [0, 0, 1, 1], [], []>} : vector<32x32xf32>, vector<32x32xf32>, vector<32x32xf32> -> vector<32x32xf32>
    %464 = arith.addf %461, %463 : vector<32x32xf32>
    %465 = math.tanh %464 : vector<32x32xf32>
    %466 = arith.mulf %459, %436 : vector<32x32xf32>
    %cst_332 = arith.constant 1.000000e+00 : f32
    %467 = vector.broadcast %cst_332 : f32 to vector<32x32xf32>
    %468 = arith.subf %467, %459 : vector<32x32xf32>
    %469 = arith.mulf %468, %465 : vector<32x32xf32>
    %470 = arith.addf %466, %469 : vector<32x32xf32>
    %c1_333 = arith.constant 1 : index
    %c0_334 = arith.constant 0 : index
    %c0_335 = arith.constant 0 : index
    %471 = vector.load %arg21[%c1_333, %c0_334, %c0_335] : memref<2x32x32xf32, #tpu.memory_space<vmem>>, vector<1x32x32xf32>
    %472 = vector.shape_cast %471 : vector<1x32x32xf32> to vector<32x32xf32>
    %473 = vector.shape_cast %470 : vector<32x32xf32> to vector<1x32x32xf32>
    tpu.vector_store %arg21[%c1_333, %c0_334, %c0_335], %473 {strides = array<i32>} : memref<2x32x32xf32, #tpu.memory_space<vmem>>, vector<1x32x32xf32>,
    %c0_336 = arith.constant 0 : index
    %474 = arith.index_cast %c1_i32_288 : i32 to index
    %c0_337 = arith.constant 0 : index
    %c0_338 = arith.constant 0 : index
    %475 = vector.load %arg20[%c0_336, %474, %c0_337, %c0_338] : memref<1x4x32x32xf32, #tpu.memory_space<vmem>>, vector<1x1x32x32xf32>
    %476 = vector.shape_cast %475 : vector<1x1x32x32xf32> to vector<32x32xf32>
    %477 = vector.shape_cast %470 : vector<32x32xf32> to vector<1x1x32x32xf32>
    tpu.vector_store %arg20[%c0_336, %474, %c0_337, %c0_338], %477 {strides = array<i32>} : memref<1x4x32x32xf32, #tpu.memory_space<vmem>>, vector<1x1x32x32xf32>,
    %c2_i32_339 = arith.constant 2 : i32
    %c0_340 = arith.constant 0 : index
    %c0_341 = arith.constant 0 : index
    %c0_342 = arith.constant 0 : index
    %478 = vector.load %arg21[%c0_340, %c0_341, %c0_342] : memref<2x32x32xf32, #tpu.memory_space<vmem>>, vector<1x32x32xf32>
    %479 = vector.shape_cast %478 : vector<1x32x32xf32> to vector<32x32xf32>
    %c0_343 = arith.constant 0 : index
    %c0_344 = arith.constant 0 : index
    %c0_345 = arith.constant 0 : index
    %480 = vector.load %arg13[%c0_343, %c0_344, %c0_345] : memref<1x32x64xf32, #tpu.memory_space<vmem>>, vector<1x32x64xf32>
    %481 = vector.shape_cast %480 : vector<1x32x64xf32> to vector<32x64xf32>
    %c0_346 = arith.constant 0 : index
    %c0_347 = arith.constant 0 : index
    %c0_348 = arith.constant 0 : index
    %482 = vector.load %arg14[%c0_346, %c0_347, %c0_348] : memref<1x32x32xf32, #tpu.memory_space<vmem>>, vector<1x32x32xf32>
    %483 = vector.shape_cast %482 : vector<1x32x32xf32> to vector<32x32xf32>
    %c0_349 = arith.constant 0 : index
    %c0_350 = arith.constant 0 : index
    %c0_351 = arith.constant 0 : index
    %484 = vector.load %arg15[%c0_349, %c0_350, %c0_351] : memref<1x1x96xf32, #tpu.memory_space<vmem>>, vector<1x1x96xf32>
    %485 = vector.shape_cast %484 : vector<1x1x96xf32> to vector<1x96xf32>
    %486 = vector.extract_strided_slice %485 {offsets = [0, 0], sizes = [1, 64], strides = [1, 1]} : vector<1x96xf32> to vector<1x64xf32>
    %cst_352 = arith.constant dense<0.000000e+00> : vector<32x64xf32>
    %487 = tpu.matmul %479, %481, %cst_352 {dimension_numbers = #tpu.dot_dimension_numbers<[1], [0], [0], [1], [0, 0, 1, 1], [], []>} : vector<32x32xf32>, vector<32x64xf32>, vector<32x64xf32> -> vector<32x64xf32>
    %488 = vector.broadcast %486 : vector<1x64xf32> to vector<32x64xf32>
    %489 = arith.addf %488, %487 : vector<32x64xf32>
    %490 = arith.negf %489 : vector<32x64xf32>
    %491 = math.exp %490 : vector<32x64xf32>
    %cst_353 = arith.constant 1.000000e+00 : f32
    %492 = vector.broadcast %cst_353 : f32 to vector<32x64xf32>
    %493 = arith.addf %492, %491 : vector<32x64xf32>
    %494 = arith.divf %492, %493 : vector<32x64xf32>
    %495 = vector.extract_strided_slice %494 {offsets = [0, 0], sizes = [32, 32], strides = [1, 1]} : vector<32x64xf32> to vector<32x32xf32>
    %496 = vector.extract_strided_slice %494 {offsets = [0, 32], sizes = [32, 32], strides = [1, 1]} : vector<32x64xf32> to vector<32x32xf32>
    %497 = vector.extract_strided_slice %485 {offsets = [0, 64], sizes = [1, 32], strides = [1, 1]} : vector<1x96xf32> to vector<1x32xf32>
    %498 = arith.mulf %496, %479 : vector<32x32xf32>
    %cst_354 = arith.constant dense<0.000000e+00> : vector<32x32xf32>
    %499 = tpu.matmul %498, %483, %cst_354 {dimension_numbers = #tpu.dot_dimension_numbers<[1], [0], [0], [1], [0, 0, 1, 1], [], []>} : vector<32x32xf32>, vector<32x32xf32>, vector<32x32xf32> -> vector<32x32xf32>
    %500 = vector.broadcast %497 : vector<1x32xf32> to vector<32x32xf32>
    %501 = arith.addf %500, %499 : vector<32x32xf32>
    %502 = math.tanh %501 : vector<32x32xf32>
    %503 = arith.mulf %495, %479 : vector<32x32xf32>
    %cst_355 = arith.constant 1.000000e+00 : f32
    %504 = vector.broadcast %cst_355 : f32 to vector<32x32xf32>
    %505 = arith.subf %504, %495 : vector<32x32xf32>
    %506 = arith.mulf %505, %502 : vector<32x32xf32>
    %507 = arith.addf %503, %506 : vector<32x32xf32>
    %c0_356 = arith.constant 0 : index
    %c0_357 = arith.constant 0 : index
    %c0_358 = arith.constant 0 : index
    %508 = vector.load %arg21[%c0_356, %c0_357, %c0_358] : memref<2x32x32xf32, #tpu.memory_space<vmem>>, vector<1x32x32xf32>
    %509 = vector.shape_cast %508 : vector<1x32x32xf32> to vector<32x32xf32>
    %510 = vector.shape_cast %507 : vector<32x32xf32> to vector<1x32x32xf32>
    tpu.vector_store %arg21[%c0_356, %c0_357, %c0_358], %510 {strides = array<i32>} : memref<2x32x32xf32, #tpu.memory_space<vmem>>, vector<1x32x32xf32>,
    %c1_359 = arith.constant 1 : index
    %c0_360 = arith.constant 0 : index
    %c0_361 = arith.constant 0 : index
    %511 = vector.load %arg21[%c1_359, %c0_360, %c0_361] : memref<2x32x32xf32, #tpu.memory_space<vmem>>, vector<1x32x32xf32>
    %512 = vector.shape_cast %511 : vector<1x32x32xf32> to vector<32x32xf32>
    %c0_362 = arith.constant 0 : index
    %c1_363 = arith.constant 1 : index
    %c0_364 = arith.constant 0 : index
    %c0_365 = arith.constant 0 : index
    %513 = vector.load %arg3[%c0_362, %c1_363, %c0_364, %c0_365] : memref<1x2x32x32xf32, #tpu.memory_space<vmem>>, vector<1x1x32x32xf32>
    %514 = vector.shape_cast %513 : vector<1x1x32x32xf32> to vector<32x32xf32>
    %c0_366 = arith.constant 0 : index
    %c0_367 = arith.constant 0 : index
    %c0_368 = arith.constant 0 : index
    %515 = vector.load %arg16[%c0_366, %c0_367, %c0_368] : memref<1x32x96xf32, #tpu.memory_space<vmem>>, vector<1x32x96xf32>
    %516 = vector.shape_cast %515 : vector<1x32x96xf32> to vector<32x96xf32>
    %c0_369 = arith.constant 0 : index
    %c0_370 = arith.constant 0 : index
    %c0_371 = arith.constant 0 : index
    %517 = vector.load %arg17[%c0_369, %c0_370, %c0_371] : memref<1x32x64xf32, #tpu.memory_space<vmem>>, vector<1x32x64xf32>
    %518 = vector.shape_cast %517 : vector<1x32x64xf32> to vector<32x64xf32>
    %c0_372 = arith.constant 0 : index
    %c0_373 = arith.constant 0 : index
    %c0_374 = arith.constant 0 : index
    %519 = vector.load %arg18[%c0_372, %c0_373, %c0_374] : memref<1x32x32xf32, #tpu.memory_space<vmem>>, vector<1x32x32xf32>
    %520 = vector.shape_cast %519 : vector<1x32x32xf32> to vector<32x32xf32>
    %c0_375 = arith.constant 0 : index
    %c0_376 = arith.constant 0 : index
    %c0_377 = arith.constant 0 : index
    %521 = vector.load %arg19[%c0_375, %c0_376, %c0_377] : memref<1x1x96xf32, #tpu.memory_space<vmem>>, vector<1x1x96xf32>
    %522 = vector.shape_cast %521 : vector<1x1x96xf32> to vector<1x96xf32>
    %cst_378 = arith.constant dense<0.000000e+00> : vector<32x32xf32>
    %523 = tpu.matmul %514, %507, %cst_378 {dimension_numbers = #tpu.dot_dimension_numbers<[1], [0], [0], [1], [0, 0, 1, 1], [], []>} : vector<32x32xf32>, vector<32x32xf32>, vector<32x32xf32> -> vector<32x32xf32>
    %cst_379 = arith.constant dense<0.000000e+00> : vector<32x96xf32>
    %524 = tpu.matmul %523, %516, %cst_379 {dimension_numbers = #tpu.dot_dimension_numbers<[1], [0], [0], [1], [0, 0, 1, 1], [], []>} : vector<32x32xf32>, vector<32x96xf32>, vector<32x96xf32> -> vector<32x96xf32>
    %525 = vector.broadcast %522 : vector<1x96xf32> to vector<32x96xf32>
    %526 = arith.addf %524, %525 : vector<32x96xf32>
    %527 = vector.extract_strided_slice %526 {offsets = [0, 0], sizes = [32, 64], strides = [1, 1]} : vector<32x96xf32> to vector<32x64xf32>
    %cst_380 = arith.constant dense<0.000000e+00> : vector<32x64xf32>
    %528 = tpu.matmul %512, %518, %cst_380 {dimension_numbers = #tpu.dot_dimension_numbers<[1], [0], [0], [1], [0, 0, 1, 1], [], []>} : vector<32x32xf32>, vector<32x64xf32>, vector<32x64xf32> -> vector<32x64xf32>
    %529 = arith.addf %527, %528 : vector<32x64xf32>
    %530 = arith.negf %529 : vector<32x64xf32>
    %531 = math.exp %530 : vector<32x64xf32>
    %cst_381 = arith.constant 1.000000e+00 : f32
    %532 = vector.broadcast %cst_381 : f32 to vector<32x64xf32>
    %533 = arith.addf %532, %531 : vector<32x64xf32>
    %534 = arith.divf %532, %533 : vector<32x64xf32>
    %535 = vector.extract_strided_slice %534 {offsets = [0, 0], sizes = [32, 32], strides = [1, 1]} : vector<32x64xf32> to vector<32x32xf32>
    %536 = vector.extract_strided_slice %534 {offsets = [0, 32], sizes = [32, 32], strides = [1, 1]} : vector<32x64xf32> to vector<32x32xf32>
    %537 = vector.extract_strided_slice %526 {offsets = [0, 64], sizes = [32, 32], strides = [1, 1]} : vector<32x96xf32> to vector<32x32xf32>
    %538 = arith.mulf %536, %512 : vector<32x32xf32>
    %cst_382 = arith.constant dense<0.000000e+00> : vector<32x32xf32>
    %539 = tpu.matmul %538, %520, %cst_382 {dimension_numbers = #tpu.dot_dimension_numbers<[1], [0], [0], [1], [0, 0, 1, 1], [], []>} : vector<32x32xf32>, vector<32x32xf32>, vector<32x32xf32> -> vector<32x32xf32>
    %540 = arith.addf %537, %539 : vector<32x32xf32>
    %541 = math.tanh %540 : vector<32x32xf32>
    %542 = arith.mulf %535, %512 : vector<32x32xf32>
    %cst_383 = arith.constant 1.000000e+00 : f32
    %543 = vector.broadcast %cst_383 : f32 to vector<32x32xf32>
    %544 = arith.subf %543, %535 : vector<32x32xf32>
    %545 = arith.mulf %544, %541 : vector<32x32xf32>
    %546 = arith.addf %542, %545 : vector<32x32xf32>
    %c1_384 = arith.constant 1 : index
    %c0_385 = arith.constant 0 : index
    %c0_386 = arith.constant 0 : index
    %547 = vector.load %arg21[%c1_384, %c0_385, %c0_386] : memref<2x32x32xf32, #tpu.memory_space<vmem>>, vector<1x32x32xf32>
    %548 = vector.shape_cast %547 : vector<1x32x32xf32> to vector<32x32xf32>
    %549 = vector.shape_cast %546 : vector<32x32xf32> to vector<1x32x32xf32>
    tpu.vector_store %arg21[%c1_384, %c0_385, %c0_386], %549 {strides = array<i32>} : memref<2x32x32xf32, #tpu.memory_space<vmem>>, vector<1x32x32xf32>,
    %c0_387 = arith.constant 0 : index
    %550 = arith.index_cast %c2_i32_339 : i32 to index
    %c0_388 = arith.constant 0 : index
    %c0_389 = arith.constant 0 : index
    %551 = vector.load %arg20[%c0_387, %550, %c0_388, %c0_389] : memref<1x4x32x32xf32, #tpu.memory_space<vmem>>, vector<1x1x32x32xf32>
    %552 = vector.shape_cast %551 : vector<1x1x32x32xf32> to vector<32x32xf32>
    %553 = vector.shape_cast %546 : vector<32x32xf32> to vector<1x1x32x32xf32>
    tpu.vector_store %arg20[%c0_387, %550, %c0_388, %c0_389], %553 {strides = array<i32>} : memref<1x4x32x32xf32, #tpu.memory_space<vmem>>, vector<1x1x32x32xf32>,
    %c3_i32_390 = arith.constant 3 : i32
    %c0_391 = arith.constant 0 : index
    %c0_392 = arith.constant 0 : index
    %c0_393 = arith.constant 0 : index
    %554 = vector.load %arg21[%c0_391, %c0_392, %c0_393] : memref<2x32x32xf32, #tpu.memory_space<vmem>>, vector<1x32x32xf32>
    %555 = vector.shape_cast %554 : vector<1x32x32xf32> to vector<32x32xf32>
    %c0_394 = arith.constant 0 : index
    %c0_395 = arith.constant 0 : index
    %c0_396 = arith.constant 0 : index
    %556 = vector.load %arg13[%c0_394, %c0_395, %c0_396] : memref<1x32x64xf32, #tpu.memory_space<vmem>>, vector<1x32x64xf32>
    %557 = vector.shape_cast %556 : vector<1x32x64xf32> to vector<32x64xf32>
    %c0_397 = arith.constant 0 : index
    %c0_398 = arith.constant 0 : index
    %c0_399 = arith.constant 0 : index
    %558 = vector.load %arg14[%c0_397, %c0_398, %c0_399] : memref<1x32x32xf32, #tpu.memory_space<vmem>>, vector<1x32x32xf32>
    %559 = vector.shape_cast %558 : vector<1x32x32xf32> to vector<32x32xf32>
    %c0_400 = arith.constant 0 : index
    %c0_401 = arith.constant 0 : index
    %c0_402 = arith.constant 0 : index
    %560 = vector.load %arg15[%c0_400, %c0_401, %c0_402] : memref<1x1x96xf32, #tpu.memory_space<vmem>>, vector<1x1x96xf32>
    %561 = vector.shape_cast %560 : vector<1x1x96xf32> to vector<1x96xf32>
    %562 = vector.extract_strided_slice %561 {offsets = [0, 0], sizes = [1, 64], strides = [1, 1]} : vector<1x96xf32> to vector<1x64xf32>
    %cst_403 = arith.constant dense<0.000000e+00> : vector<32x64xf32>
    %563 = tpu.matmul %555, %557, %cst_403 {dimension_numbers = #tpu.dot_dimension_numbers<[1], [0], [0], [1], [0, 0, 1, 1], [], []>} : vector<32x32xf32>, vector<32x64xf32>, vector<32x64xf32> -> vector<32x64xf32>
    %564 = vector.broadcast %562 : vector<1x64xf32> to vector<32x64xf32>
    %565 = arith.addf %564, %563 : vector<32x64xf32>
    %566 = arith.negf %565 : vector<32x64xf32>
    %567 = math.exp %566 : vector<32x64xf32>
    %cst_404 = arith.constant 1.000000e+00 : f32
    %568 = vector.broadcast %cst_404 : f32 to vector<32x64xf32>
    %569 = arith.addf %568, %567 : vector<32x64xf32>
    %570 = arith.divf %568, %569 : vector<32x64xf32>
    %571 = vector.extract_strided_slice %570 {offsets = [0, 0], sizes = [32, 32], strides = [1, 1]} : vector<32x64xf32> to vector<32x32xf32>
    %572 = vector.extract_strided_slice %570 {offsets = [0, 32], sizes = [32, 32], strides = [1, 1]} : vector<32x64xf32> to vector<32x32xf32>
    %573 = vector.extract_strided_slice %561 {offsets = [0, 64], sizes = [1, 32], strides = [1, 1]} : vector<1x96xf32> to vector<1x32xf32>
    %574 = arith.mulf %572, %555 : vector<32x32xf32>
    %cst_405 = arith.constant dense<0.000000e+00> : vector<32x32xf32>
    %575 = tpu.matmul %574, %559, %cst_405 {dimension_numbers = #tpu.dot_dimension_numbers<[1], [0], [0], [1], [0, 0, 1, 1], [], []>} : vector<32x32xf32>, vector<32x32xf32>, vector<32x32xf32> -> vector<32x32xf32>
    %576 = vector.broadcast %573 : vector<1x32xf32> to vector<32x32xf32>
    %577 = arith.addf %576, %575 : vector<32x32xf32>
    %578 = math.tanh %577 : vector<32x32xf32>
    %579 = arith.mulf %571, %555 : vector<32x32xf32>
    %cst_406 = arith.constant 1.000000e+00 : f32
    %580 = vector.broadcast %cst_406 : f32 to vector<32x32xf32>
    %581 = arith.subf %580, %571 : vector<32x32xf32>
    %582 = arith.mulf %581, %578 : vector<32x32xf32>
    %583 = arith.addf %579, %582 : vector<32x32xf32>
    %c0_407 = arith.constant 0 : index
    %c0_408 = arith.constant 0 : index
    %c0_409 = arith.constant 0 : index
    %584 = vector.load %arg21[%c0_407, %c0_408, %c0_409] : memref<2x32x32xf32, #tpu.memory_space<vmem>>, vector<1x32x32xf32>
    %585 = vector.shape_cast %584 : vector<1x32x32xf32> to vector<32x32xf32>
    %586 = vector.shape_cast %583 : vector<32x32xf32> to vector<1x32x32xf32>
    tpu.vector_store %arg21[%c0_407, %c0_408, %c0_409], %586 {strides = array<i32>} : memref<2x32x32xf32, #tpu.memory_space<vmem>>, vector<1x32x32xf32>,
    %c1_410 = arith.constant 1 : index
    %c0_411 = arith.constant 0 : index
    %c0_412 = arith.constant 0 : index
    %587 = vector.load %arg21[%c1_410, %c0_411, %c0_412] : memref<2x32x32xf32, #tpu.memory_space<vmem>>, vector<1x32x32xf32>
    %588 = vector.shape_cast %587 : vector<1x32x32xf32> to vector<32x32xf32>
    %c0_413 = arith.constant 0 : index
    %c1_414 = arith.constant 1 : index
    %c0_415 = arith.constant 0 : index
    %c0_416 = arith.constant 0 : index
    %589 = vector.load %arg3[%c0_413, %c1_414, %c0_415, %c0_416] : memref<1x2x32x32xf32, #tpu.memory_space<vmem>>, vector<1x1x32x32xf32>
    %590 = vector.shape_cast %589 : vector<1x1x32x32xf32> to vector<32x32xf32>
    %c0_417 = arith.constant 0 : index
    %c0_418 = arith.constant 0 : index
    %c0_419 = arith.constant 0 : index
    %591 = vector.load %arg16[%c0_417, %c0_418, %c0_419] : memref<1x32x96xf32, #tpu.memory_space<vmem>>, vector<1x32x96xf32>
    %592 = vector.shape_cast %591 : vector<1x32x96xf32> to vector<32x96xf32>
    %c0_420 = arith.constant 0 : index
    %c0_421 = arith.constant 0 : index
    %c0_422 = arith.constant 0 : index
    %593 = vector.load %arg17[%c0_420, %c0_421, %c0_422] : memref<1x32x64xf32, #tpu.memory_space<vmem>>, vector<1x32x64xf32>
    %594 = vector.shape_cast %593 : vector<1x32x64xf32> to vector<32x64xf32>
    %c0_423 = arith.constant 0 : index
    %c0_424 = arith.constant 0 : index
    %c0_425 = arith.constant 0 : index
    %595 = vector.load %arg18[%c0_423, %c0_424, %c0_425] : memref<1x32x32xf32, #tpu.memory_space<vmem>>, vector<1x32x32xf32>
    %596 = vector.shape_cast %595 : vector<1x32x32xf32> to vector<32x32xf32>
    %c0_426 = arith.constant 0 : index
    %c0_427 = arith.constant 0 : index
    %c0_428 = arith.constant 0 : index
    %597 = vector.load %arg19[%c0_426, %c0_427, %c0_428] : memref<1x1x96xf32, #tpu.memory_space<vmem>>, vector<1x1x96xf32>
    %598 = vector.shape_cast %597 : vector<1x1x96xf32> to vector<1x96xf32>
    %cst_429 = arith.constant dense<0.000000e+00> : vector<32x32xf32>
    %599 = tpu.matmul %590, %583, %cst_429 {dimension_numbers = #tpu.dot_dimension_numbers<[1], [0], [0], [1], [0, 0, 1, 1], [], []>} : vector<32x32xf32>, vector<32x32xf32>, vector<32x32xf32> -> vector<32x32xf32>
    %cst_430 = arith.constant dense<0.000000e+00> : vector<32x96xf32>
    %600 = tpu.matmul %599, %592, %cst_430 {dimension_numbers = #tpu.dot_dimension_numbers<[1], [0], [0], [1], [0, 0, 1, 1], [], []>} : vector<32x32xf32>, vector<32x96xf32>, vector<32x96xf32> -> vector<32x96xf32>
    %601 = vector.broadcast %598 : vector<1x96xf32> to vector<32x96xf32>
    %602 = arith.addf %600, %601 : vector<32x96xf32>
    %603 = vector.extract_strided_slice %602 {offsets = [0, 0], sizes = [32, 64], strides = [1, 1]} : vector<32x96xf32> to vector<32x64xf32>
    %cst_431 = arith.constant dense<0.000000e+00> : vector<32x64xf32>
    %604 = tpu.matmul %588, %594, %cst_431 {dimension_numbers = #tpu.dot_dimension_numbers<[1], [0], [0], [1], [0, 0, 1, 1], [], []>} : vector<32x32xf32>, vector<32x64xf32>, vector<32x64xf32> -> vector<32x64xf32>
    %605 = arith.addf %603, %604 : vector<32x64xf32>
    %606 = arith.negf %605 : vector<32x64xf32>
    %607 = math.exp %606 : vector<32x64xf32>
    %cst_432 = arith.constant 1.000000e+00 : f32
    %608 = vector.broadcast %cst_432 : f32 to vector<32x64xf32>
    %609 = arith.addf %608, %607 : vector<32x64xf32>
    %610 = arith.divf %608, %609 : vector<32x64xf32>
    %611 = vector.extract_strided_slice %610 {offsets = [0, 0], sizes = [32, 32], strides = [1, 1]} : vector<32x64xf32> to vector<32x32xf32>
    %612 = vector.extract_strided_slice %610 {offsets = [0, 32], sizes = [32, 32], strides = [1, 1]} : vector<32x64xf32> to vector<32x32xf32>
    %613 = vector.extract_strided_slice %602 {offsets = [0, 64], sizes = [32, 32], strides = [1, 1]} : vector<32x96xf32> to vector<32x32xf32>
    %614 = arith.mulf %612, %588 : vector<32x32xf32>
    %cst_433 = arith.constant dense<0.000000e+00> : vector<32x32xf32>
    %615 = tpu.matmul %614, %596, %cst_433 {dimension_numbers = #tpu.dot_dimension_numbers<[1], [0], [0], [1], [0, 0, 1, 1], [], []>} : vector<32x32xf32>, vector<32x32xf32>, vector<32x32xf32> -> vector<32x32xf32>
    %616 = arith.addf %613, %615 : vector<32x32xf32>
    %617 = math.tanh %616 : vector<32x32xf32>
    %618 = arith.mulf %611, %588 : vector<32x32xf32>
    %cst_434 = arith.constant 1.000000e+00 : f32
    %619 = vector.broadcast %cst_434 : f32 to vector<32x32xf32>
    %620 = arith.subf %619, %611 : vector<32x32xf32>
    %621 = arith.mulf %620, %617 : vector<32x32xf32>
    %622 = arith.addf %618, %621 : vector<32x32xf32>
    %c1_435 = arith.constant 1 : index
    %c0_436 = arith.constant 0 : index
    %c0_437 = arith.constant 0 : index
    %623 = vector.load %arg21[%c1_435, %c0_436, %c0_437] : memref<2x32x32xf32, #tpu.memory_space<vmem>>, vector<1x32x32xf32>
    %624 = vector.shape_cast %623 : vector<1x32x32xf32> to vector<32x32xf32>
    %625 = vector.shape_cast %622 : vector<32x32xf32> to vector<1x32x32xf32>
    tpu.vector_store %arg21[%c1_435, %c0_436, %c0_437], %625 {strides = array<i32>} : memref<2x32x32xf32, #tpu.memory_space<vmem>>, vector<1x32x32xf32>,
    %c0_438 = arith.constant 0 : index
    %626 = arith.index_cast %c3_i32_390 : i32 to index
    %c0_439 = arith.constant 0 : index
    %c0_440 = arith.constant 0 : index
    %627 = vector.load %arg20[%c0_438, %626, %c0_439, %c0_440] : memref<1x4x32x32xf32, #tpu.memory_space<vmem>>, vector<1x1x32x32xf32>
    %628 = vector.shape_cast %627 : vector<1x1x32x32xf32> to vector<32x32xf32>
    %629 = vector.shape_cast %622 : vector<32x32xf32> to vector<1x1x32x32xf32>
    tpu.vector_store %arg20[%c0_438, %626, %c0_439, %c0_440], %629 {strides = array<i32>} : memref<1x4x32x32xf32, #tpu.memory_space<vmem>>, vector<1x1x32x32xf32>,
    %c4_i32_441 = arith.constant 4 : i32
    return
  }
  func.func @transform_0(%arg0: i32) -> (i32, i32, i32, i32) {
    %c0_i32 = arith.constant 0 : i32
    %c0_i32_0 = arith.constant 0 : i32
    %c0_i32_1 = arith.constant 0 : i32
    %c0_i32_2 = arith.constant 0 : i32
    return %arg0, %c0_i32, %c0_i32_0, %c0_i32_1 : i32, i32, i32, i32
  }
  func.func @transform_1(%arg0: i32) -> (i32, i32, i32, i32) {
    %c0_i32 = arith.constant 0 : i32
    %c0_i32_0 = arith.constant 0 : i32
    %c0_i32_1 = arith.constant 0 : i32
    %c0_i32_2 = arith.constant 0 : i32
    return %arg0, %c0_i32, %c0_i32_0, %c0_i32_1 : i32, i32, i32, i32
  }
  func.func @transform_2(%arg0: i32) -> (i32, i32, i32, i32) {
    %c0_i32 = arith.constant 0 : i32
    %c0_i32_0 = arith.constant 0 : i32
    %c0_i32_1 = arith.constant 0 : i32
    %c0_i32_2 = arith.constant 0 : i32
    return %arg0, %c0_i32, %c0_i32_0, %c0_i32_1 : i32, i32, i32, i32
  }
  func.func @transform_3(%arg0: i32) -> (i32, i32, i32) {
    %c0_i32 = arith.constant 0 : i32
    %c0_i32_0 = arith.constant 0 : i32
    %c0_i32_1 = arith.constant 0 : i32
    return %arg0, %c0_i32, %c0_i32_0 : i32, i32, i32
  }
  func.func @transform_4(%arg0: i32) -> (i32, i32, i32) {
    %c0_i32 = arith.constant 0 : i32
    %c0_i32_0 = arith.constant 0 : i32
    %c0_i32_1 = arith.constant 0 : i32
    return %arg0, %c0_i32, %c0_i32_0 : i32, i32, i32
  }
  func.func @transform_5(%arg0: i32) -> (i32, i32, i32) {
    %c0_i32 = arith.constant 0 : i32
    %c0_i32_0 = arith.constant 0 : i32
    %c0_i32_1 = arith.constant 0 : i32
    return %arg0, %c0_i32, %c0_i32_0 : i32, i32, i32
  }
  func.func @transform_6(%arg0: i32) -> (i32, i32, i32) {
    %c0_i32 = arith.constant 0 : i32
    %c0_i32_0 = arith.constant 0 : i32
    %c0_i32_1 = arith.constant 0 : i32
    return %arg0, %c0_i32, %c0_i32_0 : i32, i32, i32
  }
  func.func @transform_7(%arg0: i32) -> (i32, i32, i32) {
    %c0_i32 = arith.constant 0 : i32
    %c0_i32_0 = arith.constant 0 : i32
    %c0_i32_1 = arith.constant 0 : i32
    return %arg0, %c0_i32, %c0_i32_0 : i32, i32, i32
  }
  func.func @transform_8(%arg0: i32) -> (i32, i32, i32) {
    %c0_i32 = arith.constant 0 : i32
    %c0_i32_0 = arith.constant 0 : i32
    %c0_i32_1 = arith.constant 0 : i32
    return %arg0, %c0_i32, %c0_i32_0 : i32, i32, i32
  }
  func.func @transform_9(%arg0: i32) -> (i32, i32, i32) {
    %c0_i32 = arith.constant 0 : i32
    %c0_i32_0 = arith.constant 0 : i32
    %c0_i32_1 = arith.constant 0 : i32
    return %arg0, %c0_i32, %c0_i32_0 : i32, i32, i32
  }
  func.func @transform_10(%arg0: i32) -> (i32, i32, i32) {
    %c0_i32 = arith.constant 0 : i32
    %c0_i32_0 = arith.constant 0 : i32
    %c0_i32_1 = arith.constant 0 : i32
    return %arg0, %c0_i32, %c0_i32_0 : i32, i32, i32
  }
  func.func @transform_11(%arg0: i32) -> (i32, i32, i32) {
    %c0_i32 = arith.constant 0 : i32
    %c0_i32_0 = arith.constant 0 : i32
    %c0_i32_1 = arith.constant 0 : i32
    return %arg0, %c0_i32, %c0_i32_0 : i32, i32, i32
  }
  func.func @transform_12(%arg0: i32) -> (i32, i32, i32) {
    %c0_i32 = arith.constant 0 : i32
    %c0_i32_0 = arith.constant 0 : i32
    %c0_i32_1 = arith.constant 0 : i32
    return %arg0, %c0_i32, %c0_i32_0 : i32, i32, i32
  }
  func.func @transform_13(%arg0: i32) -> (i32, i32, i32) {
    %c0_i32 = arith.constant 0 : i32
    %c0_i32_0 = arith.constant 0 : i32
    %c0_i32_1 = arith.constant 0 : i32
    return %arg0, %c0_i32, %c0_i32_0 : i32, i32, i32
  }
  func.func @transform_14(%arg0: i32) -> (i32, i32, i32) {
    %c0_i32 = arith.constant 0 : i32
    %c0_i32_0 = arith.constant 0 : i32
    %c0_i32_1 = arith.constant 0 : i32
    return %arg0, %c0_i32, %c0_i32_0 : i32, i32, i32
  }
  func.func @transform_15(%arg0: i32) -> (i32, i32, i32) {
    %c0_i32 = arith.constant 0 : i32
    %c0_i32_0 = arith.constant 0 : i32
    %c0_i32_1 = arith.constant 0 : i32
    return %arg0, %c0_i32, %c0_i32_0 : i32, i32, i32
  }
  func.func @transform_16(%arg0: i32) -> (i32, i32, i32) {
    %c0_i32 = arith.constant 0 : i32
    %c0_i32_0 = arith.constant 0 : i32
    %c0_i32_1 = arith.constant 0 : i32
    return %arg0, %c0_i32, %c0_i32_0 : i32, i32, i32
  }
  func.func @transform_17(%arg0: i32) -> (i32, i32, i32) {
    %c0_i32 = arith.constant 0 : i32
    %c0_i32_0 = arith.constant 0 : i32
    %c0_i32_1 = arith.constant 0 : i32
    return %arg0, %c0_i32, %c0_i32_0 : i32, i32, i32
  }
  func.func @transform_18(%arg0: i32) -> (i32, i32, i32) {
    %c0_i32 = arith.constant 0 : i32
    %c0_i32_0 = arith.constant 0 : i32
    %c0_i32_1 = arith.constant 0 : i32
    return %arg0, %c0_i32, %c0_i32_0 : i32, i32, i32
  }
  func.func @transform_19(%arg0: i32) -> (i32, i32, i32, i32) {
    %c0_i32 = arith.constant 0 : i32
    %c0_i32_0 = arith.constant 0 : i32
    %c0_i32_1 = arith.constant 0 : i32
    %c0_i32_2 = arith.constant 0 : i32
    return %arg0, %c0_i32, %c0_i32_0, %c0_i32_1 : i32, i32, i32, i32
  }
}

module attributes {stable_mosaic.version = 11 : i64} {
  func.func @_mlp_kernel(%arg0: i32, %arg1: i32, %arg2: memref<128x96xf32, #tpu.memory_space<vmem>>, %arg3: memref<1x96x32xf32, #tpu.memory_space<vmem>>, %arg4: memref<1x1x32xf32, #tpu.memory_space<vmem>>, %arg5: memref<1x32x1xf32, #tpu.memory_space<vmem>>, %arg6: memref<1x1x1xf32, #tpu.memory_space<vmem>>, %arg7: memref<1x128x1xf32, #tpu.memory_space<vmem>>) attributes {dimension_semantics = [#tpu.dimension_semantics<parallel>, #tpu.dimension_semantics<parallel>], iteration_bounds = array<i64: 1, 1>, scalar_prefetch = 0 : i64, scratch_operands = 0 : i64, tpu.core_type = #tpu.core_type<tc>, window_params = [{transform_indices = @transform_0, window_bounds = array<i64: 128, 96>}, {transform_indices = @transform_1, window_bounds = array<i64: 1, 96, 32>}, {transform_indices = @transform_2, window_bounds = array<i64: 1, 1, 32>}, {transform_indices = @transform_3, window_bounds = array<i64: 1, 32, 1>}, {transform_indices = @transform_4, window_bounds = array<i64: 1, 1, 1>}, {transform_indices = @transform_5, window_bounds = array<i64: 1, 128, 1>}]} {
    %c0 = arith.constant 0 : index
    %c0_0 = arith.constant 0 : index
    %0 = vector.load %arg2[%c0, %c0_0] : memref<128x96xf32, #tpu.memory_space<vmem>>, vector<128x96xf32>
    %c0_1 = arith.constant 0 : index
    %c0_2 = arith.constant 0 : index
    %c0_3 = arith.constant 0 : index
    %1 = vector.load %arg3[%c0_1, %c0_2, %c0_3] : memref<1x96x32xf32, #tpu.memory_space<vmem>>, vector<1x96x32xf32>
    %2 = vector.shape_cast %1 : vector<1x96x32xf32> to vector<96x32xf32>
    %cst = arith.constant dense<0.000000e+00> : vector<128x32xf32>
    %3 = tpu.matmul %0, %2, %cst {dimension_numbers = #tpu.dot_dimension_numbers<[1], [0], [0], [1], [0, 0, 1, 1], [], []>} : vector<128x96xf32>, vector<96x32xf32>, vector<128x32xf32> -> vector<128x32xf32>
    %c0_4 = arith.constant 0 : index
    %c0_5 = arith.constant 0 : index
    %c0_6 = arith.constant 0 : index
    %4 = vector.load %arg4[%c0_4, %c0_5, %c0_6] : memref<1x1x32xf32, #tpu.memory_space<vmem>>, vector<1x1x32xf32>
    %5 = vector.shape_cast %4 : vector<1x1x32xf32> to vector<1x32xf32>
    %6 = vector.broadcast %5 : vector<1x32xf32> to vector<128x32xf32>
    %7 = arith.addf %3, %6 : vector<128x32xf32>
    %8 = math.tanh %7 : vector<128x32xf32>
    %c0_7 = arith.constant 0 : index
    %c0_8 = arith.constant 0 : index
    %c0_9 = arith.constant 0 : index
    %9 = vector.load %arg5[%c0_7, %c0_8, %c0_9] : memref<1x32x1xf32, #tpu.memory_space<vmem>>, vector<1x32x1xf32>
    %10 = vector.shape_cast %9 : vector<1x32x1xf32> to vector<32x1xf32>
    %cst_10 = arith.constant dense<0.000000e+00> : vector<128x1xf32>
    %11 = tpu.matmul %8, %10, %cst_10 {dimension_numbers = #tpu.dot_dimension_numbers<[1], [0], [0], [1], [0, 0, 1, 1], [], []>} : vector<128x32xf32>, vector<32x1xf32>, vector<128x1xf32> -> vector<128x1xf32>
    %c0_11 = arith.constant 0 : index
    %c0_12 = arith.constant 0 : index
    %c0_13 = arith.constant 0 : index
    %12 = vector.load %arg6[%c0_11, %c0_12, %c0_13] : memref<1x1x1xf32, #tpu.memory_space<vmem>>, vector<1x1x1xf32>
    %13 = vector.shape_cast %12 : vector<1x1x1xf32> to vector<1x1xf32>
    %14 = vector.broadcast %13 : vector<1x1xf32> to vector<128x1xf32>
    %15 = arith.addf %11, %14 : vector<128x1xf32>
    %c0_14 = arith.constant 0 : index
    %c0_15 = arith.constant 0 : index
    %c0_16 = arith.constant 0 : index
    %16 = vector.load %arg7[%c0_14, %c0_15, %c0_16] : memref<1x128x1xf32, #tpu.memory_space<vmem>>, vector<1x128x1xf32>
    %17 = vector.shape_cast %16 : vector<1x128x1xf32> to vector<128x1xf32>
    %18 = vector.shape_cast %15 : vector<128x1xf32> to vector<1x128x1xf32>
    tpu.vector_store %arg7[%c0_14, %c0_15, %c0_16], %18 {strides = array<i32>} : memref<1x128x1xf32, #tpu.memory_space<vmem>>, vector<1x128x1xf32>,
    return
  }
  func.func @transform_0(%arg0: i32, %arg1: i32) -> (i32, i32) {
    %c0_i32 = arith.constant 0 : i32
    %c0_i32_0 = arith.constant 0 : i32
    return %arg1, %c0_i32 : i32, i32
  }
  func.func @transform_1(%arg0: i32, %arg1: i32) -> (i32, i32, i32) {
    %c0_i32 = arith.constant 0 : i32
    %c0_i32_0 = arith.constant 0 : i32
    %c0_i32_1 = arith.constant 0 : i32
    return %arg0, %c0_i32, %c0_i32_0 : i32, i32, i32
  }
  func.func @transform_2(%arg0: i32, %arg1: i32) -> (i32, i32, i32) {
    %c0_i32 = arith.constant 0 : i32
    %c0_i32_0 = arith.constant 0 : i32
    %c0_i32_1 = arith.constant 0 : i32
    return %arg0, %c0_i32, %c0_i32_0 : i32, i32, i32
  }
  func.func @transform_3(%arg0: i32, %arg1: i32) -> (i32, i32, i32) {
    %c0_i32 = arith.constant 0 : i32
    %c0_i32_0 = arith.constant 0 : i32
    %c0_i32_1 = arith.constant 0 : i32
    return %arg0, %c0_i32, %c0_i32_0 : i32, i32, i32
  }
  func.func @transform_4(%arg0: i32, %arg1: i32) -> (i32, i32, i32) {
    %c0_i32 = arith.constant 0 : i32
    %c0_i32_0 = arith.constant 0 : i32
    %c0_i32_1 = arith.constant 0 : i32
    return %arg0, %c0_i32, %c0_i32_0 : i32, i32, i32
  }
  func.func @transform_5(%arg0: i32, %arg1: i32) -> (i32, i32, i32) {
    %c0_i32 = arith.constant 0 : i32
    %c0_i32_0 = arith.constant 0 : i32
    return %arg0, %arg1, %c0_i32 : i32, i32, i32
  }
}

</mosaic_0001>

<bundles_post_ra>
// kernel: atgc_net_forward.3
= control target key start
LH: loop header
LB: loop body
LE: loop exit
PB: predicated region body
PF: predicated region fallthrough
CT: control target
= control target key end

     0   :  { %s1266_s18 = smov 0   ;;  %s1268_s19 = smov 0   ;;  %s1562_s0 = inlined_call_operand.vmem [shape: f32[128,7], index: 0, kind: input, shape index: {}]   ;;  %s1563_s1 = inlined_call_operand.vmem [shape: f32[3,7,8], index: 1, kind: input, shape index: {}]   ;;  %s1564_s2 = inlined_call_operand.vmem [shape: f32[3,1,8], index: 2, kind: input, shape index: {}]   ;;  %s1565_s3 = inlined_call_operand.vmem [shape: f32[3,8,8], index: 3, kind: input, shape index: {}]   ;;  %s1566_s4 = inlined_call_operand.vmem [shape: f32[3,1,8], index: 4, kind: input, shape index: {}]   ;;  %s1567_s5 = inlined_call_operand.vmem [shape: f32[3,128,8], index: 5, kind: output, shape index: {}]  }
   0x1   :  { %s1270_s20 = smov 0  }
   0x2 LB: > { %s27_s21 = sadd.s32 1, %s1230_s19  ;;  %p1027_p0 = scmp.ge.s32.totalorder %s1234_s20, 1  ;;  %s1234_s20 = sphi %s1270_s20, %s15_s20   ;;  %s1230_s19 = sphi %s1268_s19, %s1569_s19   ;;  %s1226_s18 = sphi %s1266_s18, %s1568_s18  }
   0x3   : > { %p29_p1 = scmp.ge.s32.totalorder %s27_s21, 3  ;;  %p236_p2 = scmp.lt.s32.totalorder %s1234_s20, 4 }
   0x5   : > { %s1571_s21 = smov (%p29_p1, %s27_s21), 0  ;;  %p237_p3 = pnand %p1027_p0, %p236_p2 }
   0x6   : > { %p288_p4 = scmp.lt.s32.totalorder (!%p237_p3), %s1226_s18, 2  ;;  %v312_v0 = vld [vmem:[%s1562_s0] sm:$0xff] (!%p237_p3)  ;;  %vm336_vm0 = vcmask (!%p237_p3), 56320   ;;  %vm385_vm1 = vcmask (!%p237_p3), 1046528   ;;  %v313_v2 = vld [vmem:[%s1562_s0 + $0x8] sm:$0xff] (!%p237_p3)  ;;  %v314_v3 = vld [vmem:[%s1562_s0 + $0x10] sm:$0xff] (!%p237_p3) }
   0x7   : > { %240 = sbr.rel (%p237_p3) target bundleno = 512 (0x200), region = 40  ;;  %1106 = vmatprep.mubr.msk.f32.mxu0 (!%p237_p3), %vm336_vm0, %v312_v0  ;;  %v315_v4 = vld [vmem:[%s1562_s0 + $0x18] sm:$0xff] (!%p237_p3)  ;;  %v316_v5 = vld [vmem:[%s1562_s0 + $0x20] sm:$0xff] (!%p237_p3)  ;;  %v317_v6 = vld [vmem:[%s1562_s0 + $0x28] sm:$0xff] (!%p237_p3)  ;;  %vm686_vm2 = vcmask (!%p237_p3), 64512  }
   0x8   : > { %v318_v7 = vld [vmem:[%s1562_s0 + $0x30] sm:$0xff] (!%p237_p3)  ;;  %v319_v8 = vld [vmem:[%s1562_s0 + $0x38] sm:$0xff] (!%p237_p3)  ;;  %v320_v9 = vld [vmem:[%s1562_s0 + $0x40] sm:$0xff] (!%p237_p3) }
   0x9   : > { %v321_v10 = vld [vmem:[%s1562_s0 + $0x48] sm:$0xff] (!%p237_p3)  ;;  %v322_v11 = vld [vmem:[%s1562_s0 + $0x50] sm:$0xff] (!%p237_p3)  ;;  %v323_v12 = vld [vmem:[%s1562_s0 + $0x58] sm:$0xff] (!%p237_p3) }
   0xa   : > { %v324_v13 = vld [vmem:[%s1562_s0 + $0x60] sm:$0xff] (!%p237_p3)  ;;  %v325_v14 = vld [vmem:[%s1562_s0 + $0x68] sm:$0xff] (!%p237_p3)  ;;  %v326_v15 = vld [vmem:[%s1562_s0 + $0x70] sm:$0xff] (!%p237_p3) }
   0xb   : > { %v327_v16 = vld [vmem:[%s1562_s0 + $0x78] sm:$0xff] (!%p237_p3) }
   0xe   : > { %s1573_s18 = smov (!%p288_p4, %s1226_s18), 2 }
   0xf   : > { %s1028_s24 = sshll.u32 %s1573_s18, 3  ;;  %s294_s22 = scalar_lea.vmem %s1564_s2, %s1573_s18 }
  0x10   : > { %s291_s27 = scalar_lea.vmem %s1563_s1, %s1028_s24  ;;  %s298_s15 = scalar_lea.vmem %s1565_s3, %s1028_s24  ;;  %v1365_v18 = vld [vmem:[%s294_s22] ss:$0 sm:$0xff] }
  0x11   : > { %v328_v1 = vld [vmem:[%s291_s27] sm:$0x7f]  ;;  %s301_s25 = scalar_lea.vmem %s1566_s4, %s1573_s18  ;;  %s1069_s26 = sshll.u32 %s1573_s18, 7 }
  0x12   : > { %1104 = vmatprep.subr.msk.mxu0 %vm385_vm1, %v328_v1  ;;  %v678_v17 = vld [vmem:[%s298_s15] sm:$0xff]  ;;  %s1519_s29 = scalar_lea.vmem %s1567_s5, %s1069_s26 }
  0x13   : > { %1105 = vmatpush3.msk.msra.mxu0 %vm385_vm1, %v328_v1  ;;  %1130 = vmatprep.subr.mxu1 %v678_v17 }
  0x14   : > { %1107 = vmatmul.mubr.msk.f32.vlgmr.msra.gmra.mrb[0].mxu0 %vm336_vm0, %v313_v2  ;;  %1131 = vmatpush3.msra.mxu1 %v678_v17 }
  0x15   : > { %1109 = vmatprep.mubr.msk.f32.mxu0 %vm336_vm0, %v314_v3 }
  0x18   : > { %1110 = vmatmul.mubr.msk.f32.gmra.mrb[2].mxu0 %vm336_vm0, %v315_v4 }
  0x19   : > { %1112 = vmatprep.mubr.msk.f32.mxu0 %vm336_vm0, %v316_v5 }
  0x1c   : > { %1113 = vmatmul.mubr.msk.f32.gmra.mrb[4].mxu0 %vm336_vm0, %v317_v6 }
  0x1d   : > { %1115 = vmatprep.mubr.msk.f32.mxu0 %vm336_vm0, %v318_v7 }
  0x20   : > { %1116 = vmatmul.mubr.msk.f32.gmra.mrb[6].mxu0 %vm336_vm0, %v319_v8 }
  0x21   : > { %1118 = vmatprep.mubr.msk.f32.mxu0 %vm336_vm0, %v320_v9 }
  0x24   : > { %1119 = vmatmul.mubr.msk.f32.gmra.mrb[8].mxu0 %vm336_vm0, %v321_v10 }
  0x25   : > { %1121 = vmatprep.mubr.msk.f32.mxu0 %vm336_vm0, %v322_v11 }
  0x28   : > { %1122 = vmatmul.mubr.msk.f32.gmra.mrb[10].mxu0 %vm336_vm0, %v323_v12 }
  0x29   : > { %1124 = vmatprep.mubr.msk.f32.mxu0 %vm336_vm0, %v324_v13 }
  0x2c   : > { %1125 = vmatmul.mubr.msk.f32.gmra.mrb[12].mxu0 %vm336_vm0, %v325_v14 }
  0x2d   : > { %1127 = vmatprep.mubr.msk.f32.mxu0 %vm336_vm0, %v326_v15 }
  0x30   : > { %1128 = vmatmul.mubr.msk.f32.gmra.mrb[14].mxu0 %vm336_vm0, %v327_v16 }
  0xe7   : > { %v1108_v19 = vpop.f32.mrb[0].mxu0 }
  0xe8   : > { %v1368_v20 = vadd.f32 %v1108_v19, %v1365_v18  ;;  %v455_v21 = vpop.f32.mrb[1].mxu0 }
  0xe9   : > { %v1371_v22 = vadd.f32 %v1365_v18, %v455_v21 }
  0xea   : > { %v535_v23 = vmul.f32 %v1368_v20, %v1368_v20 }
  0xeb   : > { %v534_v24 = vmul.f32 %v1371_v22, %v1371_v22  ;;  %v1111_v25 = vpop.f32.mrb[2].mxu0 }
  0xec   : > { %v551_v26 = vmul.f32 %v535_v23, %v1368_v20  ;;  %v1379_v27 = vadd.f32 %v1111_v25, %v1365_v18  ;;  %v465_v28 = vpop.f32.mrb[3].mxu0 }
  0xed   : > { %v550_v29 = vmul.f32 %v534_v24, %v1371_v22  ;;  %v1383_v30 = vadd.f32 %v1365_v18, %v465_v28 }
  0xee   : > { %v567_v31 = vmul.f32 0.044715, %v551_v26  ;;  %v537_v32 = vmul.f32 %v1379_v27, %v1379_v27 }
  0xef   : > { %v566_v33 = vmul.f32 0.044715, %v550_v29  ;;  %v536_v34 = vmul.f32 %v1383_v30, %v1383_v30  ;;  %v1114_v35 = vpop.f32.mrb[4].mxu0 }
  0xf0   : > { %v583_v36 = vadd.f32 %v567_v31, %v1368_v20  ;;  %v553_v37 = vmul.f32 %v537_v32, %v1379_v27  ;;  %v1392_v38 = vadd.f32 %v1114_v35, %v1365_v18  ;;  %v475_v39 = vpop.f32.mrb[5].mxu0 }
  0xf1   : > { %v552_v40 = vmul.f32 %v536_v34, %v1383_v30  ;;  %v1396_v41 = vadd.f32 %v1365_v18, %v475_v39  ;;  %v582_v42 = vadd.f32 %v566_v33, %v1371_v22 }
  0xf2   : > { %v599_v43 = vmul.f32 0.7978846, %v583_v36  ;;  %v569_v44 = vmul.f32 0.044715, %v553_v37  ;;  %v539_v45 = vmul.f32 %v1392_v38, %v1392_v38 }
  0xf3   : > { %v568_v46 = vmul.f32 0.044715, %v552_v40  ;;  %v538_v47 = vmul.f32 %v1396_v41, %v1396_v41  ;;  %v1117_v48 = vpop.f32.mrb[6].mxu0  ;;  %v598_v49 = vmul.f32 0.7978846, %v582_v42 }
  0xf4   : > { %1180 = vtanh.f32 %v599_v43  ;;  %v585_v50 = vadd.f32 %v569_v44, %v1379_v27  ;;  %v555_v51 = vmul.f32 %v539_v45, %v1392_v38  ;;  %v1406_v52 = vadd.f32 %v1117_v48, %v1365_v18  ;;  %v485_v53 = vpop.f32.mrb[7].mxu0 }
  0xf5   : > { %v584_v54 = vadd.f32 %v568_v46, %v1383_v30  ;;  %v554_v55 = vmul.f32 %v538_v47, %v1396_v41  ;;  %v1411_v56 = vadd.f32 %v1365_v18, %v485_v53  ;;  %1182 = vtanh.f32 %v598_v49 }
  0xf6   : > { %v571_v57 = vmul.f32 0.044715, %v555_v51  ;;  %v541_v58 = vmul.f32 %v1406_v52, %v1406_v52  ;;  %v601_v59 = vmul.f32 0.7978846, %v585_v50 }
  0xf7   : > { %v570_v60 = vmul.f32 0.044715, %v554_v55  ;;  %v540_v61 = vmul.f32 %v1411_v56, %v1411_v56  ;;  %v1120_v62 = vpop.f32.mrb[8].mxu0  ;;  %v600_v63 = vmul.f32 0.7978846, %v584_v54 }
  0xf8   : > { %v587_v0 = vadd.f32 %v571_v57, %v1392_v38  ;;  %v557_v1 = vmul.f32 %v541_v58, %v1406_v52  ;;  %v1420_v2 = vadd.f32 %v1120_v62, %v1365_v18  ;;  %v495_v3 = vpop.f32.mrb[9].mxu0  ;;  %1184 = vtanh.f32 %v601_v59 }
  0xf9   : > { %v586_v4 = vadd.f32 %v570_v60, %v1396_v41  ;;  %v556_v5 = vmul.f32 %v540_v61, %v1411_v56  ;;  %v1425_v6 = vadd.f32 %v1365_v18, %v495_v3  ;;  %1186 = vtanh.f32 %v600_v63 }
  0xfa   : > { %v603_v7 = vmul.f32 0.7978846, %v587_v0  ;;  %v573_v8 = vmul.f32 0.044715, %v557_v1  ;;  %v543_v9 = vmul.f32 %v1420_v2, %v1420_v2 }
  0xfb   : > { %v602_v10 = vmul.f32 0.7978846, %v586_v4  ;;  %v572_v11 = vmul.f32 0.044715, %v556_v5  ;;  %v542_v12 = vmul.f32 %v1425_v6, %v1425_v6  ;;  %v1123_v13 = vpop.f32.mrb[10].mxu0 }
  0xfc   : > { %v589_v14 = vadd.f32 %v573_v8, %v1406_v52  ;;  %v559_v15 = vmul.f32 %v543_v9, %v1420_v2  ;;  %v1434_v16 = vadd.f32 %v1123_v13, %v1365_v18  ;;  %v505_v17 = vpop.f32.mrb[11].mxu0 }
  0xfd   : > { %1188 = vtanh.f32 %v602_v10  ;;  %v588_v19 = vadd.f32 %v572_v11, %v1411_v56  ;;  %v558_v21 = vmul.f32 %v542_v12, %v1425_v6  ;;  %v1439_v23 = vadd.f32 %v1365_v18, %v505_v17 }
  0xfe   : > { %v1181_v24 = vpop.eup %1180  ;;  %1190 = vtanh.f32 %v603_v7  ;;  %v605_v25 = vmul.f32 0.7978846, %v589_v14  ;;  %v575_v26 = vmul.f32 0.044715, %v559_v15  ;;  %v545_v28 = vmul.f32 %v1434_v16, %v1434_v16 }
  0xff   : > { %v1183_v29 = vpop.eup %1182  ;;  %v604_v31 = vmul.f32 0.7978846, %v588_v19  ;;  %v574_v32 = vmul.f32 0.044715, %v558_v21  ;;  %v544_v33 = vmul.f32 %v1439_v23, %v1439_v23  ;;  %v1126_v34 = vpop.f32.mrb[12].mxu0  ;;  %v631_v35 = vadd.f32 1.0, %v1181_v24 }
 0x100   : > { %1192 = vtanh.f32 %v605_v25  ;;  %v591_v36 = vadd.f32 %v575_v26, %v1420_v2  ;;  %v561_v37 = vmul.f32 %v545_v28, %v1434_v16  ;;  %v1448_v39 = vadd.f32 %v1126_v34, %v1365_v18  ;;  %v515_v40 = vpop.f32.mrb[13].mxu0 }
 0x101   : > { %1194 = vtanh.f32 %v604_v31  ;;  %v590_v42 = vadd.f32 %v574_v32, %v1425_v6  ;;  %v560_v43 = vmul.f32 %v544_v33, %v1439_v23  ;;  %v1453_v44 = vadd.f32 %v1365_v18, %v515_v40 }
 0x102   : > { %v607_v45 = vmul.f32 0.7978846, %v591_v36  ;;  %v577_v46 = vmul.f32 0.044715, %v561_v37  ;;  %v547_v47 = vmul.f32 %v1448_v39, %v1448_v39  ;;  %v630_v48 = vadd.f32 1.0, %v1183_v29  ;;  %v1185_v60 = vpop.eup %1184 }
 0x103   : > { %v606_v49 = vmul.f32 0.7978846, %v590_v42  ;;  %v576_v50 = vmul.f32 0.044715, %v560_v43  ;;  %v546_v51 = vmul.f32 %v1453_v44, %v1453_v44  ;;  %v1129_v53 = vpop.f32.mrb[14].mxu0  ;;  %v647_v54 = vmul.f32 0.5, %v631_v35  ;;  %v1187_v0 = vpop.eup %1186 }
 0x104   : > { %1196 = vtanh.f32 %v607_v45  ;;  %v593_v55 = vadd.f32 %v577_v46, %v1434_v16  ;;  %v563_v57 = vmul.f32 %v547_v47, %v1448_v39  ;;  %v1462_v58 = vadd.f32 %v1129_v53, %v1365_v18  ;;  %v525_v59 = vpop.f32.mrb[15].mxu0 }
 0x105   : > { %1198 = vtanh.f32 %v606_v49  ;;  %v592_v61 = vadd.f32 %v576_v50, %v1439_v23  ;;  %v562_v62 = vmul.f32 %v546_v51, %v1453_v44  ;;  %v1467_v63 = vadd.f32 %v1365_v18, %v525_v59 }
 0x106   : > { %v609_v1 = vmul.f32 0.7978846, %v593_v55  ;;  %v579_v3 = vmul.f32 0.044715, %v563_v57  ;;  %v549_v4 = vmul.f32 %v1462_v58, %v1462_v58  ;;  %v646_v5 = vmul.f32 0.5, %v630_v48 }
 0x107   : > { %v1189_v7 = vpop.eup %1188  ;;  %v608_v8 = vmul.f32 0.7978846, %v592_v61  ;;  %v578_v9 = vmul.f32 0.044715, %v562_v62  ;;  %v548_v10 = vmul.f32 %v1467_v63, %v1467_v63  ;;  %v663_v11 = vmul.f32 %v647_v54, %v1368_v20 }
 0x108   : > { %v1191_v12 = vpop.eup %1190  ;;  %1200 = vtanh.f32 %v609_v1  ;;  %v595_v18 = vadd.f32 %v579_v3, %v1448_v39  ;;  %v565_v13 = vmul.f32 %v549_v4, %v1462_v58  ;;  %v662_v14 = vmul.f32 %v646_v5, %v1371_v22 }
 0x109   : > { %1202 = vtanh.f32 %v608_v8  ;;  %v594_v15 = vadd.f32 %v578_v9, %v1453_v44  ;;  %v564_v17 = vmul.f32 %v548_v10, %v1467_v63  ;;  %v632_v19 = vadd.f32 1.0, %v1187_v0 }
 0x10a   : > { %v1193_v21 = vpop.eup %1192  ;;  %v611_v24 = vmul.f32 0.7978846, %v595_v18  ;;  %v581_v25 = vmul.f32 0.044715, %v565_v13  ;;  %1132 = vmatprep.mubr.msk.f32.mxu1 %vm686_vm2, %v662_v14  ;;  %v633_v20 = vadd.f32 1.0, %v1185_v60  ;;  %v634_v26 = vadd.f32 1.0, %v1189_v7 }
 0x10b   : > { %v1195_v28 = vpop.eup %1194  ;;  %v610_v29 = vmul.f32 0.7978846, %v594_v15  ;;  %v580_v31 = vmul.f32 0.044715, %v564_v17  ;;  %1133 = vmatmul.mubr.msk.f32.vlgmr.msra.gmra.mrb[0].mxu1 %vm686_vm2, %v663_v11  ;;  %v648_v32 = vmul.f32 0.5, %v632_v19  ;;  %v635_v22 = vadd.f32 1.0, %v1191_v12 }
 0x10c   : > { %1204 = vtanh.f32 %v611_v24  ;;  %v597_v33 = vadd.f32 %v581_v25, %v1462_v58  ;;  %v649_v34 = vmul.f32 0.5, %v633_v20  ;;  %v650_v35 = vmul.f32 0.5, %v634_v26 }
 0x10d   : > { %1206 = vtanh.f32 %v610_v29  ;;  %v596_v36 = vadd.f32 %v580_v31, %v1467_v63  ;;  %v664_v37 = vmul.f32 %v648_v32, %v1383_v30  ;;  %v651_v40 = vmul.f32 0.5, %v635_v22 }
 0x10e   : > { %v1197_v42 = vpop.eup %1196  ;;  %v613_v43 = vmul.f32 0.7978846, %v597_v33  ;;  %v665_v45 = vmul.f32 %v649_v34, %v1379_v27  ;;  %v666_v46 = vmul.f32 %v650_v35, %v1396_v41  ;;  %v636_v47 = vadd.f32 1.0, %v1195_v28 }
 0x10f   : > { %v1199_v48 = vpop.eup %1198  ;;  %v612_v49 = vmul.f32 0.7978846, %v596_v36  ;;  %1135 = vmatprep.mubr.msk.f32.mxu1 %vm686_vm2, %v664_v37  ;;  %v637_v50 = vadd.f32 1.0, %v1193_v21  ;;  %v667_v30 = vmul.f32 %v651_v40, %v1392_v38  ;;  %v639_v57 = vadd.f32 1.0, %v1197_v42 }
 0x110   : > { %1208 = vtanh.f32 %v613_v43  ;;  %1136 = vmatmul.mubr.msk.f32.gmra.mrb[2].mxu1 %vm686_vm2, %v665_v45  ;;  %v652_v51 = vmul.f32 0.5, %v636_v47  ;;  %v638_v53 = vadd.f32 1.0, %v1199_v48 }
 0x111   : > { %1210 = vtanh.f32 %v612_v49  ;;  %1138 = vmatprep.mubr.msk.f32.mxu1 %vm686_vm2, %v666_v46  ;;  %v653_v41 = vmul.f32 0.5, %v637_v50  ;;  %v655_v1 = vmul.f32 0.5, %v639_v57 }
 0x112   : > { %v1201_v54 = vpop.eup %1200  ;;  %v668_v27 = vmul.f32 %v652_v51, %v1411_v56  ;;  %v654_v55 = vmul.f32 0.5, %v638_v53 }
 0x113   : > { %v1203_v59 = vpop.eup %1202  ;;  %v669_v0 = vmul.f32 %v653_v41, %v1406_v52  ;;  %v641_v38 = vadd.f32 1.0, %v1201_v54  ;;  %v671_v8 = vmul.f32 %v655_v1, %v1420_v2 }
 0x114   : > { %1139 = vmatmul.mubr.msk.f32.gmra.mrb[4].mxu1 %vm686_vm2, %v667_v30  ;;  %v640_v60 = vadd.f32 1.0, %v1203_v59  ;;  %v670_v61 = vmul.f32 %v654_v55, %v1425_v6 }
 0x115   : > { %1141 = vmatprep.mubr.msk.f32.mxu1 %vm686_vm2, %v668_v27  ;;  %v657_v9 = vmul.f32 0.5, %v641_v38 }
 0x116   : > { %v1205_v62 = vpop.eup %1204  ;;  %v656_v3 = vmul.f32 0.5, %v640_v60 }
 0x117   : > { %v1207_v4 = vpop.eup %1206  ;;  %v643_v6 = vadd.f32 1.0, %v1205_v62  ;;  %v673_v18 = vmul.f32 %v657_v9, %v1434_v16  ;;  %v1050_v16 = vld [vmem:[%s301_s25] ss:$0 sm:$0xff] }
 0x118   : > { %1142 = vmatmul.mubr.msk.f32.gmra.mrb[6].mxu1 %vm686_vm2, %v669_v0  ;;  %v642_v56 = vadd.f32 1.0, %v1207_v4  ;;  %v672_v5 = vmul.f32 %v656_v3, %v1439_v23 }
 0x119   : > { %1144 = vmatprep.mubr.msk.f32.mxu1 %vm686_vm2, %v670_v61  ;;  %v659_v13 = vmul.f32 0.5, %v643_v6 }
 0x11a   : > { %v1209_v7 = vpop.eup %1208  ;;  %v658_v10 = vmul.f32 0.5, %v642_v56 }
 0x11b   : > { %v1211_v11 = vpop.eup %1210  ;;  %v645_v14 = vadd.f32 1.0, %v1209_v7  ;;  %v675_v15 = vmul.f32 %v659_v13, %v1448_v39 }
 0x11c   : > { %1145 = vmatmul.mubr.msk.f32.gmra.mrb[8].mxu1 %vm686_vm2, %v671_v8  ;;  %v644_v52 = vadd.f32 1.0, %v1211_v11  ;;  %v674_v12 = vmul.f32 %v658_v10, %v1453_v44 }
 0x11d   : > { %1147 = vmatprep.mubr.msk.f32.mxu1 %vm686_vm2, %v672_v5  ;;  %v661_v17 = vmul.f32 0.5, %v645_v14 }
 0x11e   : > { %v660_v23 = vmul.f32 0.5, %v644_v52 }
 0x11f   : > { %v677_v44 = vmul.f32 %v661_v17, %v1462_v58 }
 0x120   : > { %1148 = vmatmul.mubr.msk.f32.gmra.mrb[10].mxu1 %vm686_vm2, %v673_v18  ;;  %v676_v2 = vmul.f32 %v660_v23, %v1467_v63 }
 0x121   : > { %1150 = vmatprep.mubr.msk.f32.mxu1 %vm686_vm2, %v674_v12 }
 0x124   : > { %1151 = vmatmul.mubr.msk.f32.gmra.mrb[12].mxu1 %vm686_vm2, %v675_v15 }
 0x125   : > { %1153 = vmatprep.mubr.msk.f32.mxu1 %vm686_vm2, %v676_v2 }
 0x128   : > { %1154 = vmatmul.mubr.msk.f32.gmra.mrb[14].mxu1 %vm686_vm2, %v677_v44 }
 0x1de   : > { %v1134_v39 = vpop.f32.mrb[0].mxu1 }
 0x1df   : > { %v807_v58 = vadd.f32 %v1134_v39, %v1050_v16  ;;  %v801_v63 = vpop.f32.mrb[1].mxu1 }
 0x1e0   : > { %v802_v19 = vadd.f32 %v1050_v16, %v801_v63 }
 0x1e1   : > { %881 = vst.msk [vmem:[%s1519_s29 + $0x8] sm:$0xff] %vm686_vm2, %v807_v58 }
 0x1e2   : > { %880 = vst.msk [vmem:[%s1519_s29] sm:$0xff] %vm686_vm2, %v802_v19 }
 0x1e3   : > { %v1137_v21 = vpop.f32.mrb[2].mxu1 }
 0x1e4   : > { %v817_v24 = vadd.f32 %v1137_v21, %v1050_v16  ;;  %v811_v25 = vpop.f32.mrb[3].mxu1 }
 0x1e5   : > { %v812_v20 = vadd.f32 %v1050_v16, %v811_v25 }
 0x1e6   : > { %883 = vst.msk [vmem:[%s1519_s29 + $0x18] sm:$0xff] %vm686_vm2, %v817_v24 }
 0x1e7   : > { %882 = vst.msk [vmem:[%s1519_s29 + $0x10] sm:$0xff] %vm686_vm2, %v812_v20  ;;  %v1140_v26 = vpop.f32.mrb[4].mxu1 }
 0x1e8   : > { %v827_v28 = vadd.f32 %v1140_v26, %v1050_v16  ;;  %v821_v29 = vpop.f32.mrb[5].mxu1 }
 0x1e9   : > { %v822_v31 = vadd.f32 %v1050_v16, %v821_v29 }
 0x1ea   : > { %885 = vst.msk [vmem:[%s1519_s29 + $0x28] sm:$0xff] %vm686_vm2, %v827_v28 }
 0x1eb   : > { %884 = vst.msk [vmem:[%s1519_s29 + $0x20] sm:$0xff] %vm686_vm2, %v822_v31  ;;  %v1143_v32 = vpop.f32.mrb[6].mxu1 }
 0x1ec   : > { %v837_v22 = vadd.f32 %v1143_v32, %v1050_v16  ;;  %v831_v33 = vpop.f32.mrb[7].mxu1 }
 0x1ed   : > { %v832_v34 = vadd.f32 %v1050_v16, %v831_v33 }
 0x1ee   : > { %887 = vst.msk [vmem:[%s1519_s29 + $0x38] sm:$0xff] %vm686_vm2, %v837_v22 }
 0x1ef   : > { %886 = vst.msk [vmem:[%s1519_s29 + $0x30] sm:$0xff] %vm686_vm2, %v832_v34  ;;  %v1146_v35 = vpop.f32.mrb[8].mxu1 }
 0x1f0   : > { %v847_v36 = vadd.f32 %v1146_v35, %v1050_v16  ;;  %v841_v37 = vpop.f32.mrb[9].mxu1 }
 0x1f1   : > { %v842_v40 = vadd.f32 %v1050_v16, %v841_v37 }
 0x1f2   : > { %889 = vst.msk [vmem:[%s1519_s29 + $0x48] sm:$0xff] %vm686_vm2, %v847_v36 }
 0x1f3   : > { %888 = vst.msk [vmem:[%s1519_s29 + $0x40] sm:$0xff] %vm686_vm2, %v842_v40  ;;  %v1149_v42 = vpop.f32.mrb[10].mxu1 }
 0x1f4   : > { %v857_v43 = vadd.f32 %v1149_v42, %v1050_v16  ;;  %v851_v45 = vpop.f32.mrb[11].mxu1 }
 0x1f5   : > { %v852_v46 = vadd.f32 %v1050_v16, %v851_v45 }
 0x1f6   : > { %891 = vst.msk [vmem:[%s1519_s29 + $0x58] sm:$0xff] %vm686_vm2, %v857_v43 }
 0x1f7   : > { %890 = vst.msk [vmem:[%s1519_s29 + $0x50] sm:$0xff] %vm686_vm2, %v852_v46  ;;  %v1152_v47 = vpop.f32.mrb[12].mxu1 }
 0x1f8   : > { %v867_v48 = vadd.f32 %v1152_v47, %v1050_v16  ;;  %v861_v49 = vpop.f32.mrb[13].mxu1 }
 0x1f9   : > { %v862_v50 = vadd.f32 %v1050_v16, %v861_v49 }
 0x1fa   : > { %893 = vst.msk [vmem:[%s1519_s29 + $0x68] sm:$0xff] %vm686_vm2, %v867_v48 }
 0x1fb   : > { %892 = vst.msk [vmem:[%s1519_s29 + $0x60] sm:$0xff] %vm686_vm2, %v862_v50  ;;  %v1155_v51 = vpop.f32.mrb[14].mxu1 }
 0x1fc   : > { %v877_v53 = vadd.f32 %v1155_v51, %v1050_v16  ;;  %v871_v30 = vpop.f32.mrb[15].mxu1 }
 0x1fd   : > { %v872_v54 = vadd.f32 %v1050_v16, %v871_v30 }
 0x1fe   : > { %895 = vst.msk [vmem:[%s1519_s29 + $0x78] sm:$0xff] %vm686_vm2, %v877_v53 }
 0x1ff   : > { %894 = vst.msk [vmem:[%s1519_s29 + $0x70] sm:$0xff] %vm686_vm2, %v872_v54 }
 0x200 PF: > { %s15_s20 = sadd.s32 1, %s1234_s20   ;;  %s1568_s18 = smov %s1230_s19 }
 0x201   : > { %p12_p5 = scmp.ge.s32.totalorder %s15_s20, 5   ;;  %s1569_s19 = smov %s1571_s21 }
 0x203   :  { %14 = sbr.rel (!%p12_p5) target bundleno = 2 (0x2), region = 82 }

// kernel: atgc_net_forward.5
= control target key start
LH: loop header
LB: loop body
LE: loop exit
PB: predicated region body
PF: predicated region fallthrough
CT: control target
= control target key end

     0   :  { %vm57_vm0 = vcmask 785408   ;;  %vm278_vm1 = vcmask 261120   ;;  %vm472_vm2 = vcmask 7168   ;;  %s965_s1 = inlined_call_operand.vmem [shape: f32[1,96,32], index: 1, kind: input, shape index: {}]   ;;  %s966_s0 = inlined_call_operand.vmem [shape: f32[128,96], index: 0, kind: input, shape index: {}]   ;;  %s967_s3 = inlined_call_operand.vmem [shape: f32[1,32,1], index: 3, kind: input, shape index: {}]   ;;  %s968_s4 = inlined_call_operand.<no memory space> [shape: f32[1,1,1], index: 4, kind: input, shape index: {}]   ;;  %s969_s2 = inlined_call_operand.vmem [shape: f32[1,1,32], index: 2, kind: input, shape index: {}]   ;;  %s970_s5 = inlined_call_operand.vmem [shape: f32[1,128,1], index: 5, kind: output, shape index: {}]  }
   0x1   :  { %v38_v0 = vld [vmem:[%s965_s1] sm:$0xff]  ;;  %v39_v1 = vld [vmem:[%s965_s1 + $0x8] sm:$0xff]  ;;  %v40_v2 = vld [vmem:[%s965_s1 + $0x10] sm:$0xff]  ;;  %v10_v40 = vstv %s968_s4 }
   0x2   :  { %v655_v3 = vpack.c.bf16 %v39_v1, %v38_v0  ;;  %v41_v4 = vld [vmem:[%s965_s1 + $0x18] sm:$0xff]  ;;  %v42_v6 = vld [vmem:[%s965_s1 + $0x20] sm:$0xff]  ;;  %v43_v7 = vld [vmem:[%s965_s1 + $0x28] sm:$0xff]  ;;  %11 = vst [vmem:[#allocation2] sm:$0x1] %v10_v40 }
   0x3   :  { %v659_v5 = vpack.c.bf16 %v41_v4, %v40_v2  ;;  %v22_v8 = vld [vmem:[%s966_s0] sm:$0xff]  ;;  %v663_v9 = vpack.c.bf16 %v43_v7, %v42_v6  ;;  %v44_v10 = vld [vmem:[%s965_s1 + $0x30] sm:$0xff]  ;;  %v45_v11 = vld [vmem:[%s965_s1 + $0x38] sm:$0xff] }
   0x4   :  { %656 = vmatprep.subr.bf16.mxu0 %v655_v3  ;;  %599 = vmatprep.mubr.msk.f32.mxu0 %vm57_vm0, %v22_v8  ;;  %v667_v12 = vpack.c.bf16 %v45_v11, %v44_v10  ;;  %v46_v13 = vld [vmem:[%s965_s1 + $0x40] sm:$0xff]  ;;  %v47_v14 = vld [vmem:[%s965_s1 + $0x48] sm:$0xff]  ;;  %v48_v16 = vld [vmem:[%s965_s1 + $0x50] sm:$0xff] }
   0x5   :  { %658 = vmatpush3.bf16.msra.mxu0 %v655_v3  ;;  %v671_v15 = vpack.c.bf16 %v47_v14, %v46_v13  ;;  %v49_v17 = vld [vmem:[%s965_s1 + $0x58] sm:$0xff]  ;;  %v23_v19 = vld [vmem:[%s966_s0 + $0x8] sm:$0xff]  ;;  %v24_v20 = vld [vmem:[%s966_s0 + $0x10] sm:$0xff] }
   0x6   :  { %660 = vmatprep.subr.bf16.mxu0 %v659_v5  ;;  %v675_v18 = vpack.c.bf16 %v49_v17, %v48_v16  ;;  %v25_v21 = vld [vmem:[%s966_s0 + $0x18] sm:$0xff]  ;;  %v26_v22 = vld [vmem:[%s966_s0 + $0x20] sm:$0xff]  ;;  %v27_v23 = vld [vmem:[%s966_s0 + $0x28] sm:$0xff] }
   0x7   :  { %v28_v24 = vld [vmem:[%s966_s0 + $0x30] sm:$0xff]  ;;  %v29_v25 = vld [vmem:[%s966_s0 + $0x38] sm:$0xff]  ;;  %v30_v26 = vld [vmem:[%s966_s0 + $0x40] sm:$0xff] }
   0x8   :  { %v31_v27 = vld [vmem:[%s966_s0 + $0x48] sm:$0xff]  ;;  %v32_v28 = vld [vmem:[%s966_s0 + $0x50] sm:$0xff]  ;;  %v33_v29 = vld [vmem:[%s966_s0 + $0x58] sm:$0xff] }
   0x9   :  { %662 = vmatpush3.bf16.msra.mxu0 %v659_v5  ;;  %v34_v30 = vld [vmem:[%s966_s0 + $0x60] sm:$0xff]  ;;  %v35_v31 = vld [vmem:[%s966_s0 + $0x68] sm:$0xff]  ;;  %v36_v32 = vld [vmem:[%s966_s0 + $0x70] sm:$0xff] }
   0xa   :  { %664 = vmatprep.subr.bf16.mxu0 %v663_v9  ;;  %v37_v33 = vld [vmem:[%s966_s0 + $0x78] sm:$0xff]  ;;  %v267_v34 = vld [vmem:[%s967_s3] sm:$0xff]  ;;  %v268_v35 = vld [vmem:[%s967_s3 + $0x8] sm:$0xff] }
   0xb   :  { %v679_v36 = vpack.c.bf16 %v268_v35, %v267_v34  ;;  %v269_v37 = vld [vmem:[%s967_s3 + $0x10] sm:$0xff]  ;;  %v270_v38 = vld [vmem:[%s967_s3 + $0x18] sm:$0xff]  ;;  %v867_v41 = vld [vmem:[%s969_s2] ss:$0 sm:$0xff] }
   0xc   :  { %v683_v39 = vpack.c.bf16 %v270_v38, %v269_v37 }
   0xd   :  { %666 = vmatpush3.bf16.msra.mxu0 %v663_v9  ;;  %680 = vmatprep.subr.bf16.mxu1 %v679_v36 }
   0xe   :  { %668 = vmatprep.subr.bf16.mxu0 %v667_v12  ;;  %682 = vmatpush3.bf16.msra.mxu1 %v679_v36 }
   0xf   :  { %684 = vmatprep.subr.bf16.mxu1 %v683_v39 }
  0x11   :  { %670 = vmatpush3.bf16.msra.mxu0 %v667_v12 }
  0x12   :  { %672 = vmatprep.subr.bf16.mxu0 %v671_v15  ;;  %686 = vmatpush3.bf16.msra.mxu1 %v683_v39 }
  0x15   :  { %674 = vmatpush3.bf16.msra.mxu0 %v671_v15 }
  0x16   :  { %676 = vmatprep.subr.bf16.mxu0 %v675_v18 }
  0x19   :  { %678 = vmatpush3.bf16.msra.mxu0 %v675_v18 }
  0x1c   :  { %600 = vmatmul.mubr.msk.f32.vlgmr.msra.gmra.mrb[0].mxu0 %vm57_vm0, %v23_v19 }
  0x1d   :  { %602 = vmatprep.mubr.msk.f32.mxu0 %vm57_vm0, %v24_v20 }
  0x20   :  { %603 = vmatmul.mubr.msk.f32.gmra.mrb[2].mxu0 %vm57_vm0, %v25_v21 }
  0x21   :  { %605 = vmatprep.mubr.msk.f32.mxu0 %vm57_vm0, %v26_v22 }
  0x24   :  { %606 = vmatmul.mubr.msk.f32.gmra.mrb[4].mxu0 %vm57_vm0, %v27_v23 }
  0x25   :  { %608 = vmatprep.mubr.msk.f32.mxu0 %vm57_vm0, %v28_v24 }
  0x28   :  { %609 = vmatmul.mubr.msk.f32.gmra.mrb[6].mxu0 %vm57_vm0, %v29_v25 }
  0x29   :  { %611 = vmatprep.mubr.msk.f32.mxu0 %vm57_vm0, %v30_v26  ;;  %v510_v26 = vld [vmem:[#allocation2] ss:$0 sm:$0xff] }
  0x2c   :  { %612 = vmatmul.mubr.msk.f32.gmra.mrb[8].mxu0 %vm57_vm0, %v31_v27 }
  0x2d   :  { %614 = vmatprep.mubr.msk.f32.mxu0 %vm57_vm0, %v32_v28 }
  0x30   :  { %615 = vmatmul.mubr.msk.f32.gmra.mrb[10].mxu0 %vm57_vm0, %v33_v29 }
  0x31   :  { %617 = vmatprep.mubr.msk.f32.mxu0 %vm57_vm0, %v34_v30 }
  0x34   :  { %618 = vmatmul.mubr.msk.f32.gmra.mrb[12].mxu0 %vm57_vm0, %v35_v31 }
  0x35   :  { %620 = vmatprep.mubr.msk.f32.mxu0 %vm57_vm0, %v36_v32 }
  0x38   :  { %621 = vmatmul.mubr.msk.f32.gmra.mrb[14].mxu0 %vm57_vm0, %v37_v33 }
  0xef   :  { %v601_v42 = vpop.f32.mrb[0].mxu0 }
  0xf0   :  { %v178_v43 = vadd.f32 %v601_v42, %v867_v41  ;;  %v172_v44 = vpop.f32.mrb[1].mxu0 }
  0xf1   :  { %v173_v45 = vadd.f32 %v867_v41, %v172_v44 }
  0xf3   :  { %687 = vtanh.f32 %v173_v45  ;;  %v604_v46 = vpop.f32.mrb[2].mxu0 }
  0xf4   :  { %689 = vtanh.f32 %v178_v43  ;;  %v188_v47 = vadd.f32 %v604_v46, %v867_v41  ;;  %v182_v48 = vpop.f32.mrb[3].mxu0 }
  0xf5   :  { %v183_v49 = vadd.f32 %v867_v41, %v182_v48 }
  0xf7   :  { %691 = vtanh.f32 %v183_v49  ;;  %v607_v50 = vpop.f32.mrb[4].mxu0 }
  0xf8   :  { %693 = vtanh.f32 %v188_v47  ;;  %v198_v51 = vadd.f32 %v607_v50, %v867_v41  ;;  %v192_v52 = vpop.f32.mrb[5].mxu0 }
  0xf9   :  { %v193_v53 = vadd.f32 %v867_v41, %v192_v52 }
  0xfb   :  { %695 = vtanh.f32 %v193_v53  ;;  %v610_v54 = vpop.f32.mrb[6].mxu0 }
  0xfc   :  { %697 = vtanh.f32 %v198_v51  ;;  %v208_v55 = vadd.f32 %v610_v54, %v867_v41  ;;  %v202_v56 = vpop.f32.mrb[7].mxu0 }
  0xfd   :  { %v688_v57 = vpop.eup %687  ;;  %v203_v58 = vadd.f32 %v867_v41, %v202_v56 }
  0xfe   :  { %v690_v59 = vpop.eup %689  ;;  %631 = vmatprep.mubr.msk.f32.mxu1 %vm278_vm1, %v688_v57 }
  0xff   :  { %699 = vtanh.f32 %v203_v58  ;;  %v613_v60 = vpop.f32.mrb[8].mxu0  ;;  %632 = vmatmul.mubr.msk.f32.vlgmr.msra.gmra.mrb[0].mxu1 %vm278_vm1, %v690_v59 }
 0x100   :  { %701 = vtanh.f32 %v208_v55  ;;  %v218_v61 = vadd.f32 %v613_v60, %v867_v41  ;;  %v212_v62 = vpop.f32.mrb[9].mxu0 }
 0x101   :  { %v692_v63 = vpop.eup %691  ;;  %v213_v0 = vadd.f32 %v867_v41, %v212_v62 }
 0x102   :  { %v694_v1 = vpop.eup %693  ;;  %634 = vmatprep.mubr.msk.f32.mxu1 %vm278_vm1, %v692_v63 }
 0x103   :  { %703 = vtanh.f32 %v213_v0  ;;  %v616_v2 = vpop.f32.mrb[10].mxu0  ;;  %635 = vmatmul.mubr.msk.f32.gmra.mrb[2].mxu1 %vm278_vm1, %v694_v1 }
 0x104   :  { %705 = vtanh.f32 %v218_v61  ;;  %v228_v3 = vadd.f32 %v616_v2, %v867_v41  ;;  %v222_v4 = vpop.f32.mrb[11].mxu0 }
 0x105   :  { %v696_v5 = vpop.eup %695  ;;  %v223_v6 = vadd.f32 %v867_v41, %v222_v4 }
 0x106   :  { %v698_v7 = vpop.eup %697  ;;  %637 = vmatprep.mubr.msk.f32.mxu1 %vm278_vm1, %v696_v5 }
 0x107   :  { %707 = vtanh.f32 %v223_v6  ;;  %v619_v8 = vpop.f32.mrb[12].mxu0  ;;  %638 = vmatmul.mubr.msk.f32.gmra.mrb[4].mxu1 %vm278_vm1, %v698_v7 }
 0x108   :  { %709 = vtanh.f32 %v228_v3  ;;  %v238_v9 = vadd.f32 %v619_v8, %v867_v41  ;;  %v232_v10 = vpop.f32.mrb[13].mxu0 }
 0x109   :  { %v700_v11 = vpop.eup %699  ;;  %v233_v12 = vadd.f32 %v867_v41, %v232_v10 }
 0x10a   :  { %v702_v13 = vpop.eup %701  ;;  %640 = vmatprep.mubr.msk.f32.mxu1 %vm278_vm1, %v700_v11 }
 0x10b   :  { %711 = vtanh.f32 %v233_v12  ;;  %v622_v14 = vpop.f32.mrb[14].mxu0  ;;  %641 = vmatmul.mubr.msk.f32.gmra.mrb[6].mxu1 %vm278_vm1, %v702_v13 }
 0x10c   :  { %713 = vtanh.f32 %v238_v9  ;;  %v248_v15 = vadd.f32 %v622_v14, %v867_v41  ;;  %v242_v16 = vpop.f32.mrb[15].mxu0 }
 0x10d   :  { %v704_v17 = vpop.eup %703  ;;  %v243_v18 = vadd.f32 %v867_v41, %v242_v16 }
 0x10e   :  { %v706_v19 = vpop.eup %705  ;;  %643 = vmatprep.mubr.msk.f32.mxu1 %vm278_vm1, %v704_v17 }
 0x10f   :  { %715 = vtanh.f32 %v243_v18  ;;  %644 = vmatmul.mubr.msk.f32.gmra.mrb[8].mxu1 %vm278_vm1, %v706_v19 }
 0x110   :  { %717 = vtanh.f32 %v248_v15 }
 0x111   :  { %v708_v20 = vpop.eup %707 }
 0x112   :  { %v710_v21 = vpop.eup %709  ;;  %646 = vmatprep.mubr.msk.f32.mxu1 %vm278_vm1, %v708_v20 }
 0x113   :  { %647 = vmatmul.mubr.msk.f32.gmra.mrb[10].mxu1 %vm278_vm1, %v710_v21 }
 0x115   :  { %v712_v22 = vpop.eup %711 }
 0x116   :  { %v714_v23 = vpop.eup %713  ;;  %649 = vmatprep.mubr.msk.f32.mxu1 %vm278_vm1, %v712_v22 }
 0x117   :  { %650 = vmatmul.mubr.msk.f32.gmra.mrb[12].mxu1 %vm278_vm1, %v714_v23 }
 0x119   :  { %v716_v24 = vpop.eup %715 }
 0x11a   :  { %v718_v25 = vpop.eup %717  ;;  %652 = vmatprep.mubr.msk.f32.mxu1 %vm278_vm1, %v716_v24 }
 0x11b   :  { %653 = vmatmul.mubr.msk.f32.gmra.mrb[14].mxu1 %vm278_vm1, %v718_v25 }
 0x1d2   :  { %v633_v27 = vpop.f32.mrb[0].mxu1 }
 0x1d3   :  { %v399_v28 = vadd.f32 %v633_v27, %v510_v26  ;;  %v393_v29 = vpop.f32.mrb[1].mxu1 }
 0x1d4   :  { %v394_v30 = vadd.f32 %v510_v26, %v393_v29 }
 0x1d5   :  { %474 = vst.msk [vmem:[%s970_s5 + $0x8] sm:$0xff] %vm472_vm2, %v399_v28 }
 0x1d6   :  { %473 = vst.msk [vmem:[%s970_s5] sm:$0xff] %vm472_vm2, %v394_v30  ;;  %v636_v31 = vpop.f32.mrb[2].mxu1 }
 0x1d7   :  { %v409_v32 = vadd.f32 %v636_v31, %v510_v26  ;;  %v403_v33 = vpop.f32.mrb[3].mxu1 }
 0x1d8   :  { %v404_v34 = vadd.f32 %v510_v26, %v403_v33 }
 0x1d9   :  { %476 = vst.msk [vmem:[%s970_s5 + $0x18] sm:$0xff] %vm472_vm2, %v409_v32 }
 0x1da   :  { %475 = vst.msk [vmem:[%s970_s5 + $0x10] sm:$0xff] %vm472_vm2, %v404_v34  ;;  %v639_v35 = vpop.f32.mrb[4].mxu1 }
 0x1db   :  { %v419_v36 = vadd.f32 %v639_v35, %v510_v26  ;;  %v413_v37 = vpop.f32.mrb[5].mxu1 }
 0x1dc   :  { %v414_v38 = vadd.f32 %v510_v26, %v413_v37 }
 0x1dd   :  { %478 = vst.msk [vmem:[%s970_s5 + $0x28] sm:$0xff] %vm472_vm2, %v419_v36 }
 0x1de   :  { %477 = vst.msk [vmem:[%s970_s5 + $0x20] sm:$0xff] %vm472_vm2, %v414_v38  ;;  %v642_v39 = vpop.f32.mrb[6].mxu1 }
 0x1df   :  { %v429_v40 = vadd.f32 %v642_v39, %v510_v26  ;;  %v423_v41 = vpop.f32.mrb[7].mxu1 }
 0x1e0   :  { %v424_v42 = vadd.f32 %v510_v26, %v423_v41 }
 0x1e1   :  { %480 = vst.msk [vmem:[%s970_s5 + $0x38] sm:$0xff] %vm472_vm2, %v429_v40 }
 0x1e2   :  { %479 = vst.msk [vmem:[%s970_s5 + $0x30] sm:$0xff] %vm472_vm2, %v424_v42  ;;  %v645_v43 = vpop.f32.mrb[8].mxu1 }
 0x1e3   :  { %v439_v44 = vadd.f32 %v645_v43, %v510_v26  ;;  %v433_v45 = vpop.f32.mrb[9].mxu1 }
 0x1e4   :  { %v434_v46 = vadd.f32 %v510_v26, %v433_v45 }
 0x1e5   :  { %482 = vst.msk [vmem:[%s970_s5 + $0x48] sm:$0xff] %vm472_vm2, %v439_v44 }
 0x1e6   :  { %481 = vst.msk [vmem:[%s970_s5 + $0x40] sm:$0xff] %vm472_vm2, %v434_v46  ;;  %v648_v47 = vpop.f32.mrb[10].mxu1 }
 0x1e7   :  { %v449_v48 = vadd.f32 %v648_v47, %v510_v26  ;;  %v443_v49 = vpop.f32.mrb[11].mxu1 }
 0x1e8   :  { %v444_v50 = vadd.f32 %v510_v26, %v443_v49 }
 0x1e9   :  { %484 = vst.msk [vmem:[%s970_s5 + $0x58] sm:$0xff] %vm472_vm2, %v449_v48 }
 0x1ea   :  { %483 = vst.msk [vmem:[%s970_s5 + $0x50] sm:$0xff] %vm472_vm2, %v444_v50  ;;  %v651_v51 = vpop.f32.mrb[12].mxu1 }
 0x1eb   :  { %v459_v52 = vadd.f32 %v651_v51, %v510_v26  ;;  %v453_v53 = vpop.f32.mrb[13].mxu1 }
 0x1ec   :  { %v454_v54 = vadd.f32 %v510_v26, %v453_v53 }
 0x1ed   :  { %486 = vst.msk [vmem:[%s970_s5 + $0x68] sm:$0xff] %vm472_vm2, %v459_v52 }
 0x1ee   :  { %485 = vst.msk [vmem:[%s970_s5 + $0x60] sm:$0xff] %vm472_vm2, %v454_v54  ;;  %v654_v55 = vpop.f32.mrb[14].mxu1 }
 0x1ef   :  { %v469_v56 = vadd.f32 %v654_v55, %v510_v26  ;;  %v463_v57 = vpop.f32.mrb[15].mxu1 }
 0x1f0   :  { %v464_v58 = vadd.f32 %v510_v26, %v463_v57 }
 0x1f1   :  { %488 = vst.msk [vmem:[%s970_s5 + $0x78] sm:$0xff] %vm472_vm2, %v469_v56 }
 0x1f2   :  { %487 = vst.msk [vmem:[%s970_s5 + $0x70] sm:$0xff] %vm472_vm2, %v464_v58 }

// kernel: atgc_net_forward.4
= control target key start
LH: loop header
LB: loop body
LE: loop exit
PB: predicated region body
PF: predicated region fallthrough
CT: control target
= control target key end

     0   :  { %s11392_s29 = smov 0   ;;  %s13602_s0 = inlined_call_operand.vmem [shape: f32[3,4,32,8], index: 0, kind: input, shape index: {}]   ;;  %s13603_s1 = inlined_call_operand.vmem [shape: f32[3,2,32,32], index: 1, kind: input, shape index: {}]   ;;  %s13604_s2 = inlined_call_operand.vmem [shape: f32[3,2,32,32], index: 2, kind: input, shape index: {}]   ;;  %s13605_s3 = inlined_call_operand.vmem [shape: f32[3,8,96], index: 3, kind: input, shape index: {}]   ;;  %s13606_s4 = inlined_call_operand.vmem [shape: f32[3,32,64], index: 4, kind: input, shape index: {}]   ;;  %s13607_s5 = inlined_call_operand.vmem [shape: f32[3,32,32], index: 5, kind: input, shape index: {}]   ;;  %s13608_s6 = inlined_call_operand.vmem [shape: f32[3,1,96], index: 6, kind: input, shape index: {}]   ;;  %s13609_s7 = inlined_call_operand.vmem [shape: f32[3,32,96], index: 7, kind: input, shape index: {}]   ;;  %s13610_s8 = inlined_call_operand.vmem [shape: f32[3,32,64], index: 8, kind: input, shape index: {}]   ;;  %s13611_s9 = inlined_call_operand.vmem [shape: f32[3,32,32], index: 9, kind: input, shape index: {}]   ;;  %s13612_s10 = inlined_call_operand.vmem [shape: f32[3,1,96], index: 10, kind: input, shape index: {}]   ;;  %s13613_s11 = inlined_call_operand.vmem [shape: f32[3,32,96], index: 11, kind: input, shape index: {}]   ;;  %s13614_s12 = inlined_call_operand.vmem [shape: f32[3,32,64], index: 12, kind: input, shape index: {}]   ;;  %s13615_s13 = inlined_call_operand.vmem [shape: f32[3,32,32], index: 13, kind: input, shape index: {}]   ;;  %s13616_s14 = inlined_call_operand.vmem [shape: f32[3,1,96], index: 14, kind: input, shape index: {}]   ;;  %s13617_s15 = inlined_call_operand.vmem [shape: f32[3,32,96], index: 15, kind: input, shape index: {}]   ;;  %s13618_s16 = inlined_call_operand.vmem [shape: f32[3,32,64], index: 16, kind: input, shape index: {}]   ;;  %s13619_s17 = inlined_call_operand.vmem [shape: f32[3,32,32], index: 17, kind: input, shape index: {}]   ;;  %s13620_s18 = inlined_call_operand.vmem [shape: f32[3,1,96], index: 18, kind: input, shape index: {}]   ;;  %s13621_s19 = inlined_call_operand.vmem [shape: f32[3,4,32,32], index: 19, kind: output, shape index: {}]  }
   0x1   :  { %13630 = sst [smem:[#allocation3_spill]] %s13602_s0 }
   0x2   :  { %13631 = sst [smem:[#allocation4_spill]] %s13603_s1 }
   0x3   :  { %13632 = sst [smem:[#allocation5_spill]] %s13604_s2 }
   0x4   :  { %13633 = sst [smem:[#allocation6_spill]] %s13605_s3 }
   0x5 LB: > { %s8858_s0 = sadd.s32 4294967295, %s11286_s29   ;;  %p8862_p0 = scmp.ge.s32.totalorder %s11286_s29, 1  ;;  %s11286_s29 = sphi %s11392_s29, %s29_s29  }
   0x6   : > { %p708_p1 = scmp.lt.s32.totalorder %s11286_s29, 4 }
   0x8   : > { %p709_p2 = pnand %p8862_p0, %p708_p1 }
   0x9   : > { %p845_p3 = scmp.lt.s32.totalorder (!%p709_p2), %s8858_s0, 2  ;;  %s13634_s22 = sld [smem:[#allocation3_spill]] (!%p709_p2)  ;;  %vm936_vm0 = vcmask (!%p709_p2), 261120   ;;  %v11288_v14 = vmov (!%p709_p2), 0.0   ;;  %vm1070_vm1 = vcmask (!%p709_p2), 64512  }
   0xa   : > { %712 = sbr.rel (%p709_p2) target bundleno = 10579 (0x2953), region = 96  ;;  %s13635_s25 = sld [smem:[#allocation4_spill]] (!%p709_p2)  ;;  %937 = vst.msk [vmem:[#allocation2] sm:$0xff] (!%p709_p2), %vm936_vm0, %v11288_v14  ;;  %938 = vst.msk [vmem:[#allocation2 + $0x8] sm:$0xff] (!%p709_p2), %vm936_vm0, %v11288_v14 }
   0xb   : > { %s13636_s21 = sld [smem:[#allocation6_spill]] (!%p709_p2)  ;;  %939 = vst.msk [vmem:[#allocation2 + $0x10] sm:$0xff] (!%p709_p2), %vm936_vm0, %v11288_v14  ;;  %940 = vst.msk [vmem:[#allocation2 + $0x18] sm:$0xff] (!%p709_p2), %vm936_vm0, %v11288_v14  ;;  %s13624_s27 = smov (!%p709_p2), 64  }
   0xc   : > { %941 = vst.msk [vmem:[#allocation2 + $0x20] sm:$0xff] (!%p709_p2), %vm936_vm0, %v11288_v14  ;;  %942 = vst.msk [vmem:[#allocation2 + $0x28] sm:$0xff] (!%p709_p2), %vm936_vm0, %v11288_v14 }
   0xd   : > { %943 = vst.msk [vmem:[#allocation2 + $0x30] sm:$0xff] (!%p709_p2), %vm936_vm0, %v11288_v14  ;;  %944 = vst.msk [vmem:[#allocation2 + $0x38] sm:$0xff] (!%p709_p2), %vm936_vm0, %v11288_v14 }
  0x11   : > { %s13644_s0 = smov (!%p845_p3, %s8858_s0), 2  ;;  %v11475_v15 = vld [vmem:[#allocation2] sm:$0xff]  ;;  %v11483_v17 = vld [vmem:[#allocation2 + $0x8] sm:$0xff] }
  0x12   : > { %s13622_s30 = sshll.u32 %s13644_s0, 7  ;;  %s13623_s20 = sshll.u32 %s13644_s0, 6  ;;  %v11477_v16 = vld [vmem:[#allocation2 + $0x10] sm:$0xff]  ;;  %v11485_v18 = vld [vmem:[#allocation2 + $0x18] sm:$0xff] }
  0x13   : > { %s11409_s2 = scalar_lea.vmem %s13634_s22, %s13622_s30  ;;  %s11416_s3 = scalar_lea.vmem %s13635_s25, %s13623_s20 }
  0x14   : > { %v945_v0 = vld [vmem:[%s11409_s2] sm:$0xff]  ;;  %v946_v1 = vld [vmem:[%s11409_s2 + $0x8] sm:$0xff]  ;;  %v947_v2 = vld [vmem:[%s11409_s2 + $0x10] sm:$0xff]  ;;  %s8869_s26 = sshll.u32 %s13644_s0, 3  ;;  %s11444_s11 = sshll.u32 %s13644_s0, 5 }
  0x15   : > { %v10464_v3 = vpack.c.bf16 %v946_v1, %v945_v0  ;;  %v948_v4 = vld [vmem:[%s11409_s2 + $0x18] sm:$0xff]  ;;  %v11423_v5 = vld [vmem:[%s11416_s3] sm:$0xff]  ;;  %v11428_v7 = vld [vmem:[%s11416_s3 + $0x8] sm:$0xff]  ;;  %s11449_s1 = scalar_lea.vmem %s13636_s21, %s8869_s26  ;;  %s11455_s24 = scalar_lea.vmem %s13606_s4, %s11444_s11 }
  0x16   : > { %v10468_v6 = vpack.c.bf16 %v948_v4, %v947_v2  ;;  %9712 = vmatprep.mubr.msk.f32.mxu0 %vm936_vm0, %v11423_v5  ;;  %v11431_v8 = vld [vmem:[%s11416_s3 + $0x10] sm:$0xff]  ;;  %v11438_v9 = vld [vmem:[%s11416_s3 + $0x18] sm:$0xff]  ;;  %v11458_v10 = vld [vmem:[%s11449_s1] sm:$0xff]  ;;  %s13626_s25 = smov 32   ;;  %s11514_s28 = scalar_lea.vmem %s13607_s5, %s11444_s11 }
  0x17   : > { %10465 = vmatprep.subr.bf16.mxu0 %v10464_v3  ;;  %v958_v11 = vld [vmem:[%s11455_s24] sm:$0xff]  ;;  %v959_v12 = vld [vmem:[%s11455_s24 + $0x8] sm:$0xff]  ;;  %9718 = vmatprep.subr.mxu1 %v11458_v10  ;;  %v960_v19 = vld [vmem:[%s11455_s24 + $0x10] sm:$0xff]  ;;  %s11532_s23 = scalar_lea.vmem %s13608_s6, %s13644_s0  ;;  %s13628_s26 = smov 96  }
  0x18   : > { %10467 = vmatpush3.bf16.msra.mxu0 %v10464_v3  ;;  %v11463_v13 = vpack.c.bf16 %v959_v12, %v958_v11  ;;  %9719 = vmatpush3.msra.mxu1 %v11458_v10  ;;  %v961_v20 = vld [vmem:[%s11455_s24 + $0x18] sm:$0xff]  ;;  %v962_v26 = vld [vmem:[%s11514_s28] sm:$0xff]  ;;  %v963_v27 = vld [vmem:[%s11514_s28 + $0x8] sm:$0xff]  ;;  %s11610_s30 = scalar_lea.vmem %s13609_s7, %s11444_s11  ;;  %s11636_s20 = scalar_lea.vmem %s13610_s8, %s11444_s11 }
  0x19   : > { %10469 = vmatprep.subr.bf16.mxu0 %v10468_v6  ;;  %1293 = vrot.lane.b32.xlu0 %v11475_v15, %s13626_s25  ;;  %v11493_v23 = vpack.c.bf16 %v961_v20, %v960_v19  ;;  %v964_v28 = vld [vmem:[%s11514_s28 + $0x10] sm:$0xff]  ;;  %v11519_v29 = vpack.c.bf16 %v963_v27, %v962_v26  ;;  %v965_v30 = vld [vmem:[%s11514_s28 + $0x18] sm:$0xff]  ;;  %v11535_v34 = vld [vmem:[%s11532_s23] ss:$0 sm:$0xff]  ;;  %s13637_s21 = smov 32   ;;  %s13638_s22 = smov 64  }
  0x1a   : > { %10473 = vmatprep.subr.bf16.mxu1 %v11463_v13  ;;  %1297 = vrot.lane.b32.xlu1 %v11477_v16, %s13626_s25  ;;  %v11522_v31 = vpack.c.bf16 %v965_v30, %v964_v28 }
  0x1c   : > { %10471 = vmatpush3.bf16.msra.mxu0 %v10468_v6 }
  0x1d   : > { %1295 = vrot.lane.b32.xlu0 %v11483_v17, %s13626_s25  ;;  %10481 = vmatprep.subr.bf16.mxu0 %v11519_v29 }
  0x1e   : > { %1299 = vrot.lane.b32.xlu1 %v11485_v18, %s13626_s25 }
  0x1f   : > { %9713 = vmatmul.mubr.msk.f32.vlgmr.msra.gmra.mrb[0].mxu0 %vm936_vm0, %v11428_v7 }
  0x20   : > { %9715 = vmatprep.mubr.msk.f32.mxu0 %vm936_vm0, %v11431_v8  ;;  %10483 = vmatpush3.bf16.msra.mxu0 %v11519_v29 }
  0x21   : > { %10485 = vmatprep.subr.bf16.mxu0 %v11522_v31 }
  0x23   : > { %9716 = vmatmul.mubr.msk.f32.gmra.mrb[2].mxu0 %vm936_vm0, %v11438_v9 }
  0x24   : > { %10487 = vmatpush3.bf16.msra.mxu0 %v11522_v31 }
  0x8b   : > { %v1294_v60 = vpop.permute.xlu0 %1293 }
  0x8c   : > { %v1298_v62 = vpop.permute.xlu1 %1297 }
  0x8f   : > { %v1296_v63 = vpop.permute.xlu0 %1295 }
  0x90   : > { %v1300_v4 = vpop.permute.xlu1 %1299 }
  0xf2   : > { %v9714_v21 = vpop.f32.mrb[0].mxu0 }
  0xf3   : > { %v1045_v22 = vpop.f32.mrb[1].mxu0 }
  0xf4   : > { %9720 = vmatprep.mubr.msk.f32.mxu1 %vm1070_vm1, %v1045_v22 }
  0xf5   : > { %9721 = vmatmul.mubr.msk.f32.vlgmr.msra.gmra.mrb[0].mxu1 %vm1070_vm1, %v9714_v21 }
  0xf6   : > { %v9717_v24 = vpop.f32.mrb[2].mxu0  ;;  %10475 = vmatpush3.bf16.msra.mxu1 %v11463_v13 }
  0xf7   : > { %v1055_v25 = vpop.f32.mrb[3].mxu0  ;;  %10477 = vmatprep.subr.bf16.mxu1 %v11493_v23 }
  0xf8   : > { %9723 = vmatprep.mubr.msk.f32.mxu1 %vm1070_vm1, %v1055_v25 }
  0xf9   : > { %9724 = vmatmul.mubr.msk.f32.gmra.mrb[2].mxu1 %vm1070_vm1, %v9717_v24 }
  0xfa   : > { %10479 = vmatpush3.bf16.msra.mxu1 %v11493_v23  ;;  %9734 = vmatprep.mubr.msk.f32.mxu1 %vm936_vm0, %v11475_v15 }
  0xfd   : > { %9735 = vmatmul.mubr.msk.f32.vlgmr.msra.gmra.mrb[4].mxu1 %vm936_vm0, %v11483_v17 }
  0xfe   : > { %9737 = vmatprep.mubr.msk.f32.mxu1 %vm936_vm0, %v11477_v16 }
 0x101   : > { %9738 = vmatmul.mubr.msk.f32.gmra.mrb[6].mxu1 %vm936_vm0, %v11485_v18 }
 0x1c8   : > { %v9722_v32 = vpop.f32.mrb[0].mxu1 }
 0x1c9   : > { %v1149_v33 = vpop.f32.mrb[1].mxu1  ;;  %v11538_v37 = vadd.f32 %v9722_v32, %v11535_v34 }
 0x1ca   : > { %v11541_v38 = vadd.f32 %v11535_v34, %v1149_v33 }
 0x1cc   : > { %v9725_v35 = vpop.f32.mrb[2].mxu1 }
 0x1cd   : > { %v1159_v36 = vpop.f32.mrb[3].mxu1  ;;  %v11546_v43 = vadd.f32 %v9725_v35, %v11535_v34 }
 0x1ce   : > { %v11549_v45 = vadd.f32 %v11535_v34, %v1159_v36 }
 0x1d0   : > { %v9736_v39 = vpop.f32.mrb[4].mxu1 }
 0x1d1   : > { %v1266_v40 = vadd.f32 %v9736_v39, %v11538_v37  ;;  %v1246_v41 = vpop.f32.mrb[5].mxu1 }
 0x1d2   : > { %v1265_v42 = vadd.f32 %v1246_v41, %v11541_v38 }
 0x1d3   : > { %v8906_v44 = vmul.f32 -1.442695, %v1266_v40 }
 0x1d4   : > { %v8905_v46 = vmul.f32 -1.442695, %v1265_v42  ;;  %v9739_v47 = vpop.f32.mrb[6].mxu1  ;;  %v11582_v42 = vld [vmem:[%s11416_s3 + $0x20] sm:$0xff] }
 0x1d5   : > { %10896 = vpow2.f32 %v8906_v44  ;;  %v1268_v48 = vadd.f32 %v9739_v47, %v11546_v43  ;;  %v1256_v49 = vpop.f32.mrb[7].mxu1  ;;  %9762 = vmatprep.mubr.msk.f32.mxu1 %vm936_vm0, %v11582_v42  ;;  %v11600_v47 = vld [vmem:[#allocation2 + $0x30] sm:$0xff] }
 0x1d6   : > { %10898 = vpow2.f32 %v8905_v46  ;;  %v1267_v50 = vadd.f32 %v1256_v49, %v11549_v45  ;;  %v11598_v46 = vld [vmem:[#allocation2 + $0x38] sm:$0xff]  ;;  %v1485_v49 = vld [vmem:[%s11610_s30 + $0x8] sm:$0xff] }
 0x1d7   : > { %v8908_v51 = vmul.f32 -1.442695, %v1268_v48  ;;  %v1484_v48 = vld [vmem:[%s11610_s30] sm:$0xff] }
 0x1d8   : > { %v8907_v52 = vmul.f32 -1.442695, %v1267_v50  ;;  %v1486_v50 = vld [vmem:[%s11610_s30 + $0x10] sm:$0xff] }
 0x1d9   : > { %10900 = vpow2.f32 %v8908_v51  ;;  %v11615_v51 = vpack.c.bf16 %v1485_v49, %v1484_v48 }
 0x1da   : > { %10902 = vpow2.f32 %v8907_v52  ;;  %v1487_v52 = vld [vmem:[%s11610_s30 + $0x18] sm:$0xff] }
 0x1db   : > { %10497 = vmatprep.subr.bf16.mxu0 %v11615_v51 }
 0x1df   : > { %v10897_v53 = vpop.eup %10896 }
 0x1e0   : > { %v10899_v54 = vpop.eup %10898  ;;  %v1282_v55 = vadd.f32 1.0, %v10897_v53  ;;  %v11618_v53 = vpack.c.bf16 %v1487_v52, %v1486_v50 }
 0x1e1   : > { %v1281_v56 = vadd.f32 1.0, %v10899_v54 }
 0x1e2   : > { %10904 = vrcp.f32 %v1282_v55 }
 0x1e3   : > { %v10901_v57 = vpop.eup %10900  ;;  %10906 = vrcp.f32 %v1281_v56 }
 0x1e4   : > { %v10903_v58 = vpop.eup %10902  ;;  %v1284_v59 = vadd.f32 1.0, %v10901_v57 }
 0x1e5   : > { %v1283_v61 = vadd.f32 1.0, %v10903_v58 }
 0x1e6   : > { %10908 = vrcp.f32 %v1284_v59 }
 0x1e7   : > { %10910 = vrcp.f32 %v1283_v61 }
 0x1ec   : > { %v11553_v0 = vpop.eup %10904 }
 0x1ed   : > { %v11555_v1 = vpop.eup %10906  ;;  %v1306_v2 = vmul.f32 %v11553_v0, %v1296_v63  ;;  %v1443_v54 = vsub.f32 1.0, %v11553_v0  ;;  %v1439_v57 = vmul.f32 %v11553_v0, %v11483_v17 }
 0x1ee   : > { %v1305_v3 = vmul.f32 %v11555_v1, %v1294_v60  ;;  %v1442_v56 = vsub.f32 1.0, %v11555_v1  ;;  %v1438_v60 = vmul.f32 %v11555_v1, %v11475_v15 }
 0x1ef   : > { %1315 = vrot.lane.b32.xlu1 %v1306_v2, %s13628_s26 }
 0x1f0   : > { %v11560_v6 = vpop.eup %10908  ;;  %1313 = vrot.lane.b32.xlu0 %v1305_v3, %s13628_s26 }
 0x1f1   : > { %v11563_v11 = vpop.eup %10910  ;;  %v1308_v12 = vmul.f32 %v11560_v6, %v1300_v4  ;;  %v1445_v63 = vsub.f32 1.0, %v11560_v6  ;;  %v1441_v15 = vmul.f32 %v11560_v6, %v11485_v18 }
 0x1f2   : > { %v1307_v14 = vmul.f32 %v11563_v11, %v1298_v62  ;;  %v1444_v4 = vsub.f32 1.0, %v11563_v11  ;;  %v1440_v1 = vmul.f32 %v11563_v11, %v11477_v16  ;;  %v1490_v16 = vld [vmem:[%s11636_s20 + $0x10] sm:$0xff]  ;;  %v1491_v11 = vld [vmem:[%s11636_s20 + $0x18] sm:$0xff] }
 0x1f3   : > { %1319 = vrot.lane.b32.xlu1 %v1308_v12, %s13628_s26 }
 0x1f4   : > { %1317 = vrot.lane.b32.xlu0 %v1307_v14, %s13628_s26 }
 0x261   : > { %v1316_v19 = vpop.permute.xlu1 %1315 }
 0x262   : > { %v1314_v20 = vpop.permute.xlu0 %1313 }
 0x263   : > { %9748 = vmatprep.mubr.msk.f32.mxu0 %vm936_vm0, %v1314_v20  ;;  %v1488_v20 = vld [vmem:[%s11636_s20] sm:$0xff] }
 0x264   : > { %9749 = vmatmul.mubr.msk.f32.vlgmr.msra.gmra.mrb[4].mxu0 %vm936_vm0, %v1316_v19 }
 0x265   : > { %v1320_v22 = vpop.permute.xlu1 %1319  ;;  %10499 = vmatpush3.bf16.msra.mxu0 %v11615_v51 }
 0x266   : > { %v1318_v21 = vpop.permute.xlu0 %1317  ;;  %10501 = vmatprep.subr.bf16.mxu0 %v11618_v53 }
 0x267   : > { %9751 = vmatprep.mubr.msk.f32.mxu0 %vm936_vm0, %v1318_v21  ;;  %v1489_v21 = vld [vmem:[%s11636_s20 + $0x8] sm:$0xff] }
 0x268   : > { %9752 = vmatmul.mubr.msk.f32.gmra.mrb[6].mxu0 %vm936_vm0, %v1320_v22  ;;  %v11648_v6 = vpack.c.bf16 %v1489_v21, %v1488_v20 }
 0x269   : > { %10503 = vmatpush3.bf16.msra.mxu0 %v11618_v53 }
 0x337   : > { %v9750_v24 = vpop.f32.mrb[4].mxu0 }
 0x338   : > { %v1395_v25 = vpop.f32.mrb[5].mxu0  ;;  %1420 = vrot.lane.b32.xlu1 %v9750_v24, %s13624_s27  ;;  %v11653_v24 = vld [vmem:[%s11416_s3 + $0x28] sm:$0xff] }
 0x339   : > { %1418 = vrot.lane.b32.xlu0 %v1395_v25, %s13624_s27  ;;  %v11657_v25 = vld [vmem:[%s11416_s3 + $0x30] sm:$0xff] }
 0x33b   : > { %v9753_v26 = vpop.f32.mrb[6].mxu0 }
 0x33c   : > { %1424 = vrot.lane.b32.xlu1 %v9753_v26, %s13624_s27  ;;  %v1405_v27 = vpop.f32.mrb[7].mxu0  ;;  %v11659_v26 = vpack.c.bf16 %v1491_v11, %v1490_v16 }
 0x33d   : > { %1422 = vrot.lane.b32.xlu0 %v1405_v27, %s13624_s27  ;;  %v8938_v27 = vld [vmem:[%s11409_s2 + $0x20] sm:$0xff] }
 0x3aa   : > { %v1421_v28 = vpop.permute.xlu1 %1420 }
 0x3ab   : > { %v1431_v30 = vadd.f32 %v1421_v28, %v11538_v37  ;;  %v1419_v32 = vpop.permute.xlu0 %1418  ;;  %v8939_v28 = vld [vmem:[%s11409_s2 + $0x28] sm:$0xff] }
 0x3ac   : > { %v1430_v33 = vadd.f32 %v1419_v32, %v11541_v38  ;;  %v10520_v32 = vpack.c.bf16 %v8939_v28, %v8938_v27 }
 0x3ad   : > { %10912 = vtanh.f32 %v1431_v30  ;;  %v11669_v30 = vld [vmem:[%s11416_s3 + $0x38] sm:$0xff] }
 0x3ae   : > { %10914 = vtanh.f32 %v1430_v33  ;;  %v1425_v35 = vpop.permute.xlu1 %1424  ;;  %v8940_v33 = vld [vmem:[%s11409_s2 + $0x30] sm:$0xff] }
 0x3af   : > { %v1433_v36 = vadd.f32 %v1425_v35, %v11546_v43  ;;  %v1423_v39 = vpop.permute.xlu0 %1422  ;;  %v11590_v43 = vld [vmem:[#allocation2 + $0x28] sm:$0xff]  ;;  %v8941_v35 = vld [vmem:[%s11409_s2 + $0x38] sm:$0xff] }
 0x3b0   : > { %v1432_v40 = vadd.f32 %v1423_v39, %v11549_v45  ;;  %v11592_v45 = vld [vmem:[#allocation2 + $0x20] sm:$0xff] }
 0x3b1   : > { %10916 = vtanh.f32 %v1433_v36  ;;  %v10524_v36 = vpack.c.bf16 %v8941_v35, %v8940_v33 }
 0x3b2   : > { %10918 = vtanh.f32 %v1432_v40 }
 0x3b7   : > { %v10913_v41 = vpop.eup %10912 }
 0x3b8   : > { %v10915_v44 = vpop.eup %10914  ;;  %1452 = vrot.lane.b32.xlu1 %v10913_v41, %s13624_s27 }
 0x3b9   : > { %1450 = vrot.lane.b32.xlu0 %v10915_v44, %s13624_s27 }
 0x3bb   : > { %v10917_v37 = vpop.eup %10916 }
 0x3bc   : > { %v10919_v38 = vpop.eup %10918  ;;  %1456 = vrot.lane.b32.xlu1 %v10917_v37, %s13624_s27 }
 0x3bd   : > { %1454 = vrot.lane.b32.xlu0 %v10919_v38, %s13624_s27  ;;  %s11739_s27 = scalar_lea.vmem %s13611_s9, %s11444_s11 }
 0x3c0   : > { %1824 = vrot.lane.b32.xlu1 %v11590_v43, %s13626_s25 }
 0x3c1   : > { %1822 = vrot.lane.b32.xlu0 %v11592_v45, %s13626_s25 }
 0x3c4   : > { %1828 = vrot.lane.b32.xlu1 %v11598_v46, %s13626_s25 }
 0x3c5   : > { %1826 = vrot.lane.b32.xlu0 %v11600_v47, %s13626_s25  ;;  %s11758_s25 = scalar_lea.vmem %s13612_s10, %s13644_s0 }
 0x42a   : > { %v1453_v55 = vpop.permute.xlu1 %1452 }
 0x42b   : > { %v1463_v58 = vmul.f32 %v1453_v55, %v1443_v54  ;;  %v1451_v59 = vpop.permute.xlu0 %1450 }
 0x42c   : > { %v1462_v61 = vmul.f32 %v1451_v59, %v1442_v56  ;;  %v1494_v59 = vld [vmem:[%s11739_s27 + $0x10] sm:$0xff] }
 0x42d   : > { %v1467_v62 = vadd.f32 %v1463_v58, %v1439_v57  ;;  %v1492_v57 = vld [vmem:[%s11739_s27] sm:$0xff]  ;;  %v1493_v58 = vld [vmem:[%s11739_s27 + $0x8] sm:$0xff] }
 0x42e   : > { %v1466_v2 = vadd.f32 %v1462_v61, %v1438_v60  ;;  %v1457_v3 = vpop.permute.xlu1 %1456  ;;  %v11744_v60 = vpack.c.bf16 %v1493_v58, %v1492_v57  ;;  %v1495_v61 = vld [vmem:[%s11739_s27 + $0x18] sm:$0xff] }
 0x42f   : > { %1471 = vst.msk [vmem:[#allocation2 + $0x8] sm:$0xff] %vm936_vm0, %v1467_v62  ;;  %v1465_v17 = vmul.f32 %v1457_v3, %v1445_v63  ;;  %v1455_v0 = vpop.permute.xlu0 %1454  ;;  %v11761_v63 = vld [vmem:[%s11758_s25] ss:$0 sm:$0xff] }
 0x430   : > { %1470 = vst.msk [vmem:[#allocation2] sm:$0xff] %vm936_vm0, %v1466_v2  ;;  %v1464_v12 = vmul.f32 %v1455_v0, %v1444_v4  ;;  %v10488_v14 = vpack.c.bf16 %v1467_v62, %v1466_v2  ;;  %v11747_v62 = vpack.c.bf16 %v1495_v61, %v1494_v59  ;;  %10513 = vmatprep.subr.bf16.mxu0 %v11744_v60 }
 0x431   : > { %v1469_v19 = vadd.f32 %v1465_v17, %v1441_v15 }
 0x432   : > { %v1468_v22 = vadd.f32 %v1464_v12, %v1440_v1  ;;  %10489 = vmatprep.subr.bf16.mxu1 %v10488_v14 }
 0x433   : > { %1473 = vst.msk [vmem:[#allocation2 + $0x18] sm:$0xff] %vm936_vm0, %v1469_v19  ;;  %10491 = vmatpush3.bf16.msra.mxu1 %v10488_v14 }
 0x434   : > { %1472 = vst.msk [vmem:[#allocation2 + $0x10] sm:$0xff] %vm936_vm0, %v1468_v22  ;;  %v10492_v18 = vpack.c.bf16 %v1469_v19, %v1468_v22 }
 0x436   : > { %10493 = vmatprep.subr.bf16.mxu1 %v10492_v18 }
 0x437   : > { %10495 = vmatpush3.bf16.msra.mxu1 %v10492_v18  ;;  %v11696_v39 = vld [vmem:[#allocation2] sm:$0xff] }
 0x438   : > { %10505 = vmatprep.subr.bf16.mxu1 %v11648_v6 }
 0x43a   : > { %9763 = vmatmul.mubr.msk.f32.vlgmr.msra.gmra.mrb[8].mxu1 %vm936_vm0, %v11653_v24 }
 0x43b   : > { %10507 = vmatpush3.bf16.msra.mxu1 %v11648_v6  ;;  %9765 = vmatprep.mubr.msk.f32.mxu1 %vm936_vm0, %v11657_v25 }
 0x43c   : > { %10509 = vmatprep.subr.bf16.mxu1 %v11659_v26 }
 0x43e   : > { %9766 = vmatmul.mubr.msk.f32.gmra.mrb[10].mxu1 %vm936_vm0, %v11669_v30 }
 0x43f   : > { %10511 = vmatpush3.bf16.msra.mxu1 %v11659_v26  ;;  %9790 = vmatprep.mubr.msk.f32.mxu1 %vm936_vm0, %v11592_v45 }
 0x440   : > { %10521 = vmatprep.subr.bf16.mxu1 %v10520_v32 }
 0x442   : > { %9791 = vmatmul.mubr.msk.f32.vlgmr.msra.gmra.mrb[12].mxu1 %vm936_vm0, %v11590_v43 }
 0x443   : > { %10523 = vmatpush3.bf16.msra.mxu1 %v10520_v32  ;;  %9793 = vmatprep.mubr.msk.f32.mxu1 %vm936_vm0, %v11600_v47 }
 0x444   : > { %10525 = vmatprep.subr.bf16.mxu1 %v10524_v36 }
 0x446   : > { %9794 = vmatmul.mubr.msk.f32.gmra.mrb[14].mxu1 %vm936_vm0, %v11598_v46 }
 0x447   : > { %10527 = vmatpush3.bf16.msra.mxu1 %v10524_v36  ;;  %9818 = vmatprep.mubr.msk.f32.mxu1 %vm936_vm0, %v11423_v5  ;;  %v11701_v5 = vld [vmem:[#allocation2 + $0x8] sm:$0xff] }
 0x448   : > { %10529 = vmatprep.subr.bf16.mxu1 %v11463_v13 }
 0x44a   : > { %9819 = vmatmul.mubr.msk.f32.vlgmr.msra.gmra.mrb[16].mxu1 %vm936_vm0, %v11428_v7  ;;  %v11705_v7 = vld [vmem:[#allocation2 + $0x10] sm:$0xff] }
 0x44b   : > { %10531 = vmatpush3.bf16.msra.mxu1 %v11463_v13  ;;  %9821 = vmatprep.mubr.msk.f32.mxu1 %vm936_vm0, %v11431_v8  ;;  %v11709_v8 = vld [vmem:[#allocation2 + $0x18] sm:$0xff] }
 0x44c   : > { %10533 = vmatprep.subr.bf16.mxu1 %v11493_v23 }
 0x44e   : > { %9822 = vmatmul.mubr.msk.f32.gmra.mrb[18].mxu1 %vm936_vm0, %v11438_v9 }
 0x44f   : > { %10535 = vmatpush3.bf16.msra.mxu1 %v11493_v23  ;;  %9840 = vmatprep.mubr.msk.f32.mxu1 %vm936_vm0, %v11696_v39 }
 0x452   : > { %9841 = vmatmul.mubr.msk.f32.vlgmr.msra.gmra.mrb[20].mxu1 %vm936_vm0, %v11701_v5 }
 0x453   : > { %9843 = vmatprep.mubr.msk.f32.mxu1 %vm936_vm0, %v11705_v7 }
 0x456   : > { %9844 = vmatmul.mubr.msk.f32.gmra.mrb[22].mxu1 %vm936_vm0, %v11709_v8 }
 0x457   : > { %9868 = vmatprep.mubr.msk.f32.mxu1 %vm936_vm0, %v11582_v42 }
 0x50d   : > { %v9764_v9 = vpop.f32.mrb[8].mxu1 }
 0x50e   : > { %v1575_v13 = vpop.f32.mrb[9].mxu1 }
 0x50f   : > { %9776 = vmatprep.mubr.msk.f32.mxu0 %vm936_vm0, %v1575_v13 }
 0x510   : > { %9777 = vmatmul.mubr.msk.f32.vlgmr.msra.gmra.mrb[8].mxu0 %vm936_vm0, %v9764_v9 }
 0x511   : > { %v9767_v23 = vpop.f32.mrb[10].mxu1  ;;  %10515 = vmatpush3.bf16.msra.mxu0 %v11744_v60 }
 0x512   : > { %v1585_v40 = vpop.f32.mrb[11].mxu1  ;;  %10517 = vmatprep.subr.bf16.mxu0 %v11747_v62 }
 0x513   : > { %9779 = vmatprep.mubr.msk.f32.mxu0 %vm936_vm0, %v1585_v40  ;;  %v1823_v40 = vpop.permute.xlu0 %1822 }
 0x514   : > { %9780 = vmatmul.mubr.msk.f32.gmra.mrb[10].mxu0 %vm936_vm0, %v9767_v23  ;;  %v1825_v23 = vpop.permute.xlu1 %1824 }
 0x515   : > { %v9792_v41 = vpop.f32.mrb[12].mxu1  ;;  %10519 = vmatpush3.bf16.msra.mxu0 %v11747_v62 }
 0x516   : > { %v1775_v44 = vpop.f32.mrb[13].mxu1  ;;  %9824 = vmatprep.subr.mxu0 %v11458_v10 }
 0x517   : > { %v1827_v58 = vpop.permute.xlu0 %1826 }
 0x518   : > { %v1829_v57 = vpop.permute.xlu1 %1828 }
 0x519   : > { %v9795_v37 = vpop.f32.mrb[14].mxu1 }
 0x51a   : > { %v1785_v38 = vpop.f32.mrb[15].mxu1 }
 0x51d   : > { %v11719_v48 = vpop.f32.mrb[16].mxu1 }
 0x51e   : > { %v11721_v42 = vpop.f32.mrb[17].mxu1 }
 0x521   : > { %v11723_v49 = vpop.f32.mrb[18].mxu1 }
 0x522   : > { %v11725_v50 = vpop.f32.mrb[19].mxu1 }
 0x525   : > { %v11727_v52 = vpop.f32.mrb[20].mxu1 }
 0x526   : > { %v11729_v54 = vpop.f32.mrb[21].mxu1 }
 0x529   : > { %v11731_v55 = vpop.f32.mrb[22].mxu1 }
 0x52a   : > { %v11733_v56 = vpop.f32.mrb[23].mxu1 }
 0x5e3   : > { %v9778_v2 = vpop.f32.mrb[8].mxu0 }
 0x5e4   : > { %v11764_v3 = vadd.f32 %v9778_v2, %v11761_v63  ;;  %v1678_v4 = vpop.f32.mrb[9].mxu0 }
 0x5e5   : > { %v11767_v15 = vadd.f32 %v11761_v63, %v1678_v4 }
 0x5e6   : > { %v1795_v17 = vadd.f32 %v9792_v41, %v11764_v3 }
 0x5e7   : > { %v1794_v0 = vadd.f32 %v1775_v44, %v11767_v15  ;;  %v9781_v1 = vpop.f32.mrb[10].mxu0 }
 0x5e8   : > { %v8931_v12 = vmul.f32 -1.442695, %v1795_v17  ;;  %v11772_v14 = vadd.f32 %v9781_v1, %v11761_v63  ;;  %v1688_v19 = vpop.f32.mrb[11].mxu0 }
 0x5e9   : > { %v8930_v20 = vmul.f32 -1.442695, %v1794_v0  ;;  %v11775_v21 = vadd.f32 %v11761_v63, %v1688_v19 }
 0x5ea   : > { %10920 = vpow2.f32 %v8931_v12  ;;  %v1797_v22 = vadd.f32 %v9795_v37, %v11772_v14 }
 0x5eb   : > { %10922 = vpow2.f32 %v8930_v20  ;;  %v1796_v18 = vadd.f32 %v1785_v38, %v11775_v21 }
 0x5ec   : > { %v8933_v16 = vmul.f32 -1.442695, %v1797_v22 }
 0x5ed   : > { %v8932_v11 = vmul.f32 -1.442695, %v1796_v18 }
 0x5ee   : > { %10924 = vpow2.f32 %v8933_v16 }
 0x5ef   : > { %10926 = vpow2.f32 %v8932_v11 }
 0x5f4   : > { %v10921_v27 = vpop.eup %10920 }
 0x5f5   : > { %v10923_v28 = vpop.eup %10922  ;;  %v1811_v32 = vadd.f32 1.0, %v10921_v27 }
 0x5f6   : > { %v1810_v33 = vadd.f32 1.0, %v10923_v28 }
 0x5f7   : > { %10928 = vrcp.f32 %v1811_v32 }
 0x5f8   : > { %v10925_v35 = vpop.eup %10924  ;;  %10930 = vrcp.f32 %v1810_v33 }
 0x5f9   : > { %v10927_v36 = vpop.eup %10926  ;;  %v1813_v9 = vadd.f32 1.0, %v10925_v35 }
 0x5fa   : > { %v1812_v13 = vadd.f32 1.0, %v10927_v36 }
 0x5fb   : > { %10932 = vrcp.f32 %v1813_v9 }
 0x5fc   : > { %10934 = vrcp.f32 %v1812_v13 }
 0x601   : > { %v11779_v41 = vpop.eup %10928 }
 0x602   : > { %v11781_v44 = vpop.eup %10930  ;;  %v1835_v37 = vmul.f32 %v11779_v41, %v1825_v23 }
 0x603   : > { %v1834_v38 = vmul.f32 %v11781_v44, %v1823_v40 }
 0x604   : > { %1844 = vrot.lane.b32.xlu1 %v1835_v37, %s13628_s26 }
 0x605   : > { %v11786_v59 = vpop.eup %10932  ;;  %1842 = vrot.lane.b32.xlu0 %v1834_v38, %s13628_s26 }
 0x606   : > { %v11789_v61 = vpop.eup %10934  ;;  %v1837_v2 = vmul.f32 %v11786_v59, %v1829_v57 }
 0x607   : > { %v1836_v4 = vmul.f32 %v11789_v61, %v1827_v58 }
 0x608   : > { %1848 = vrot.lane.b32.xlu1 %v1837_v2, %s13628_s26 }
 0x609   : > { %1846 = vrot.lane.b32.xlu0 %v1836_v4, %s13628_s26 }
 0x60c   : > { %2353 = vrot.lane.b32.xlu1 %v11701_v5, %s13637_s21 }
 0x60d   : > { %2351 = vrot.lane.b32.xlu0 %v11696_v39, %s13637_s21 }
 0x610   : > { %2357 = vrot.lane.b32.xlu1 %v11709_v8, %s13637_s21 }
 0x611   : > { %2355 = vrot.lane.b32.xlu0 %v11705_v7, %s13637_s21 }
 0x676   : > { %v1845_v17 = vpop.permute.xlu1 %1844 }
 0x677   : > { %v1843_v0 = vpop.permute.xlu0 %1842 }
 0x678   : > { %9804 = vmatprep.mubr.msk.f32.mxu0 %vm936_vm0, %v1843_v0 }
 0x679   : > { %9805 = vmatmul.mubr.msk.f32.vlgmr.msra.gmra.mrb[12].mxu0 %vm936_vm0, %v1845_v17 }
 0x67a   : > { %9825 = vmatpush3.msra.mxu0 %v11458_v10  ;;  %v1849_v12 = vpop.permute.xlu1 %1848 }
 0x67b   : > { %v1847_v1 = vpop.permute.xlu0 %1846  ;;  %10537 = vmatprep.subr.bf16.mxu0 %v11519_v29 }
 0x67c   : > { %9807 = vmatprep.mubr.msk.f32.mxu0 %vm936_vm0, %v1847_v1 }
 0x67d   : > { %9808 = vmatmul.mubr.msk.f32.gmra.mrb[14].mxu0 %vm936_vm0, %v1849_v12 }
 0x67e   : > { %9826 = vmatprep.mubr.msk.f32.mxu0 %vm1070_vm1, %v11721_v42 }
 0x67f   : > { %v2352_v57 = vpop.permute.xlu0 %2351 }
 0x681   : > { %9827 = vmatmul.mubr.msk.f32.vlgmr.msra.gmra.mrb[16].mxu0 %vm1070_vm1, %v11719_v48 }
 0x682   : > { %9829 = vmatprep.mubr.msk.f32.mxu0 %vm1070_vm1, %v11725_v50  ;;  %10539 = vmatpush3.bf16.msra.mxu0 %v11519_v29 }
 0x683   : > { %10541 = vmatprep.subr.bf16.mxu0 %v11522_v31  ;;  %v2356_v12 = vpop.permute.xlu0 %2355 }
 0x685   : > { %9830 = vmatmul.mubr.msk.f32.gmra.mrb[18].mxu0 %vm1070_vm1, %v11723_v49 }
 0x686   : > { %10543 = vmatpush3.bf16.msra.mxu0 %v11522_v31 }
 0x687   : > { %10553 = vmatprep.subr.bf16.mxu0 %v11615_v51 }
 0x74c   : > { %v11821_v10 = vpop.f32.mrb[12].mxu0 }
 0x74d   : > { %v11823_v42 = vpop.f32.mrb[13].mxu0 }
 0x750   : > { %v11825_v19 = vpop.f32.mrb[14].mxu0 }
 0x751   : > { %v11827_v48 = vpop.f32.mrb[15].mxu0 }
 0x754   : > { %v9828_v50 = vpop.f32.mrb[16].mxu0 }
 0x755   : > { %v11830_v29 = vadd.f32 %v9828_v50, %v11535_v34  ;;  %v2207_v20 = vpop.f32.mrb[17].mxu0 }
 0x756   : > { %v11833_v22 = vadd.f32 %v11535_v34, %v2207_v20 }
 0x757   : > { %v2324_v31 = vadd.f32 %v11727_v52, %v11830_v29 }
 0x758   : > { %v2323_v49 = vadd.f32 %v11729_v54, %v11833_v22  ;;  %v9831_v18 = vpop.f32.mrb[18].mxu0 }
 0x759   : > { %v8956_v16 = vmul.f32 -1.442695, %v2324_v31  ;;  %v11840_v11 = vadd.f32 %v9831_v18, %v11535_v34  ;;  %v2217_v27 = vpop.f32.mrb[19].mxu0 }
 0x75a   : > { %v8955_v28 = vmul.f32 -1.442695, %v2323_v49  ;;  %v11843_v32 = vadd.f32 %v11535_v34, %v2217_v27 }
 0x75b   : > { %10936 = vpow2.f32 %v8956_v16  ;;  %v2326_v33 = vadd.f32 %v11731_v55, %v11840_v11  ;;  %v2354_v55 = vpop.permute.xlu1 %2353 }
 0x75c   : > { %10938 = vpow2.f32 %v8955_v28  ;;  %v2325_v52 = vadd.f32 %v11733_v56, %v11843_v32 }
 0x75d   : > { %v8958_v35 = vmul.f32 -1.442695, %v2326_v33 }
 0x75e   : > { %v8957_v54 = vmul.f32 -1.442695, %v2325_v52 }
 0x75f   : > { %10940 = vpow2.f32 %v8958_v35  ;;  %v2358_v0 = vpop.permute.xlu1 %2357 }
 0x760   : > { %10942 = vpow2.f32 %v8957_v54 }
 0x765   : > { %v10937_v36 = vpop.eup %10936 }
 0x766   : > { %v10939_v9 = vpop.eup %10938  ;;  %v2340_v13 = vadd.f32 1.0, %v10937_v36 }
 0x767   : > { %v2339_v23 = vadd.f32 1.0, %v10939_v9 }
 0x768   : > { %10944 = vrcp.f32 %v2340_v13 }
 0x769   : > { %v10941_v40 = vpop.eup %10940  ;;  %10946 = vrcp.f32 %v2339_v23 }
 0x76a   : > { %v10943_v34 = vpop.eup %10942  ;;  %v2342_v37 = vadd.f32 1.0, %v10941_v40 }
 0x76b   : > { %v2341_v38 = vadd.f32 1.0, %v10943_v34 }
 0x76c   : > { %10948 = vrcp.f32 %v2342_v37 }
 0x76d   : > { %10950 = vrcp.f32 %v2341_v38 }
 0x772   : > { %v11849_v58 = vpop.eup %10944 }
 0x773   : > { %v11851_v56 = vpop.eup %10946  ;;  %v2364_v2 = vmul.f32 %v11849_v58, %v2354_v55  ;;  %v2497_v38 = vmul.f32 %v11849_v58, %v11701_v5 }
 0x774   : > { %v2363_v4 = vmul.f32 %v11851_v56, %v2352_v57 }
 0x775   : > { %2373 = vrot.lane.b32.xlu1 %v2364_v2, %s13628_s26 }
 0x776   : > { %v11856_v17 = vpop.eup %10948  ;;  %2371 = vrot.lane.b32.xlu0 %v2363_v4, %s13628_s26 }
 0x777   : > { %v11859_v1 = vpop.eup %10950  ;;  %v2366_v50 = vmul.f32 %v11856_v17, %v2358_v0 }
 0x778   : > { %v2365_v20 = vmul.f32 %v11859_v1, %v2356_v12  ;;  %v2499_v12 = vmul.f32 %v11856_v17, %v11709_v8 }
 0x779   : > { %2377 = vrot.lane.b32.xlu1 %v2366_v50, %s13628_s26 }
 0x77a   : > { %2375 = vrot.lane.b32.xlu0 %v2365_v20, %s13628_s26 }
 0x7e7   : > { %v2374_v31 = vpop.permute.xlu1 %2373 }
 0x7e8   : > { %v2372_v49 = vpop.permute.xlu0 %2371 }
 0x7e9   : > { %9854 = vmatprep.mubr.msk.f32.mxu0 %vm936_vm0, %v2372_v49 }
 0x7ea   : > { %9855 = vmatmul.mubr.msk.f32.vlgmr.msra.gmra.mrb[20].mxu0 %vm936_vm0, %v2374_v31 }
 0x7eb   : > { %10555 = vmatpush3.bf16.msra.mxu0 %v11615_v51  ;;  %v2378_v16 = vpop.permute.xlu1 %2377 }
 0x7ec   : > { %v2376_v18 = vpop.permute.xlu0 %2375  ;;  %10557 = vmatprep.subr.bf16.mxu0 %v11618_v53 }
 0x7ed   : > { %9857 = vmatprep.mubr.msk.f32.mxu0 %vm936_vm0, %v2376_v18 }
 0x7ee   : > { %9858 = vmatmul.mubr.msk.f32.gmra.mrb[22].mxu0 %vm936_vm0, %v2378_v16 }
 0x7ef   : > { %10559 = vmatpush3.bf16.msra.mxu0 %v11618_v53 }
 0x7f0   : > { %10569 = vmatprep.subr.bf16.mxu0 %v11744_v60 }
 0x8bd   : > { %v9856_v27 = vpop.f32.mrb[20].mxu0 }
 0x8be   : > { %2478 = vrot.lane.b32.xlu1 %v9856_v27, %s13638_s22  ;;  %v2453_v28 = vpop.f32.mrb[21].mxu0 }
 0x8bf   : > { %2476 = vrot.lane.b32.xlu0 %v2453_v28, %s13638_s22 }
 0x8c1   : > { %v9859_v33 = vpop.f32.mrb[22].mxu0 }
 0x8c2   : > { %2482 = vrot.lane.b32.xlu1 %v9859_v33, %s13638_s22  ;;  %v2463_v51 = vpop.f32.mrb[23].mxu0 }
 0x8c3   : > { %2480 = vrot.lane.b32.xlu0 %v2463_v51, %s13638_s22  ;;  %v1971_v51 = vsub.f32 1.0, %v11781_v44 }
 0x930   : > { %v2479_v52 = vpop.permute.xlu1 %2478 }
 0x931   : > { %v2489_v35 = vadd.f32 %v2479_v52, %v11830_v29  ;;  %v2477_v54 = vpop.permute.xlu0 %2476 }
 0x932   : > { %v2488_v53 = vadd.f32 %v2477_v54, %v11833_v22  ;;  %v2501_v22 = vsub.f32 1.0, %v11849_v58  ;;  %v1967_v54 = vmul.f32 %v11781_v44, %v11592_v45  ;;  %v1969_v45 = vmul.f32 %v11789_v61, %v11600_v47  ;;  %v3073_v47 = vld [vmem:[%s11455_s24] sm:$0xff] }
 0x933   : > { %10952 = vtanh.f32 %v2489_v35 }
 0x934   : > { %10954 = vtanh.f32 %v2488_v53  ;;  %v2483_v36 = vpop.permute.xlu1 %2482 }
 0x935   : > { %v2491_v9 = vadd.f32 %v2483_v36, %v11840_v11  ;;  %v2481_v13 = vpop.permute.xlu0 %2480 }
 0x936   : > { %v2490_v23 = vadd.f32 %v2481_v13, %v11843_v32  ;;  %v2500_v32 = vsub.f32 1.0, %v11851_v56 }
 0x937   : > { %10956 = vtanh.f32 %v2491_v9  ;;  %v1974_v9 = vsub.f32 1.0, %v11786_v59 }
 0x938   : > { %10958 = vtanh.f32 %v2490_v23 }
 0x93d   : > { %v10953_v40 = vpop.eup %10952 }
 0x93e   : > { %v10955_v34 = vpop.eup %10954  ;;  %2510 = vrot.lane.b32.xlu1 %v10953_v40, %s13638_s22  ;;  %v1973_v40 = vsub.f32 1.0, %v11789_v61  ;;  %v3074_v61 = vld [vmem:[%s11455_s24 + $0x8] sm:$0xff] }
 0x93f   : > { %2508 = vrot.lane.b32.xlu0 %v10955_v34, %s13638_s22 }
 0x941   : > { %v10957_v29 = vpop.eup %10956 }
 0x942   : > { %v10959_v37 = vpop.eup %10958  ;;  %2514 = vrot.lane.b32.xlu1 %v10957_v29, %s13638_s22 }
 0x943   : > { %2512 = vrot.lane.b32.xlu0 %v10959_v37, %s13638_s22 }
 0x946   : > { %1949 = vrot.lane.b32.xlu1 %v11821_v10, %s13638_s22  ;;  %v2496_v10 = vmul.f32 %v11851_v56, %v11696_v39  ;;  %v2498_v39 = vmul.f32 %v11859_v1, %v11705_v7 }
 0x947   : > { %1947 = vrot.lane.b32.xlu0 %v11823_v42, %s13638_s22 }
 0x94a   : > { %1953 = vrot.lane.b32.xlu1 %v11825_v19, %s13638_s22  ;;  %v2503_v19 = vsub.f32 1.0, %v11856_v17 }
 0x94b   : > { %1951 = vrot.lane.b32.xlu0 %v11827_v48, %s13638_s22  ;;  %v2502_v48 = vsub.f32 1.0, %v11859_v1 }
 0x9b0   : > { %v2511_v11 = vpop.permute.xlu1 %2510 }
 0x9b1   : > { %v2521_v55 = vmul.f32 %v2511_v11, %v2501_v22  ;;  %v2509_v57 = vpop.permute.xlu0 %2508  ;;  %v8990_v22 = vld [vmem:[%s11409_s2 + $0x50] sm:$0xff]  ;;  %v8991_v11 = vld [vmem:[%s11409_s2 + $0x58] sm:$0xff] }
 0x9b2   : > { %v2520_v42 = vmul.f32 %v2509_v57, %v2500_v32  ;;  %v10580_v32 = vpack.c.bf16 %v8991_v11, %v8990_v22  ;;  %v11968_v57 = vld [vmem:[%s11416_s3] sm:$0xff] }
 0x9b3   : > { %v2525_v2 = vadd.f32 %v2521_v55, %v2497_v38 }
 0x9b4   : > { %v2524_v4 = vadd.f32 %v2520_v42, %v2496_v10  ;;  %v2515_v0 = vpop.permute.xlu1 %2514  ;;  %v11970_v10 = vpack.c.bf16 %v3074_v61, %v3073_v47  ;;  %v3075_v42 = vld [vmem:[%s11455_s24 + $0x10] sm:$0xff] }
 0x9b5   : > { %2529 = vst.msk [vmem:[#allocation2 + $0x8] sm:$0xff] %vm936_vm0, %v2525_v2  ;;  %v2523_v50 = vmul.f32 %v2515_v0, %v2503_v19  ;;  %v2513_v5 = vpop.permute.xlu0 %2512  ;;  %v11983_v19 = vld [vmem:[%s11416_s3 + $0x8] sm:$0xff] }
 0x9b6   : > { %2528 = vst.msk [vmem:[#allocation2] sm:$0xff] %vm936_vm0, %v2524_v4  ;;  %v2522_v58 = vmul.f32 %v2513_v5, %v2502_v48  ;;  %v10544_v56 = vpack.c.bf16 %v2525_v2, %v2524_v4  ;;  %v3076_v2 = vld [vmem:[%s11455_s24 + $0x18] sm:$0xff]  ;;  %v11987_v4 = vld [vmem:[%s11416_s3 + $0x10] sm:$0xff]  ;;  %s12608_s24 = scalar_lea.vmem %s13616_s14, %s13644_s0 }
 0x9b7   : > { %v2527_v20 = vadd.f32 %v2523_v50, %v2499_v12  ;;  %v11989_v0 = vpack.c.bf16 %v3076_v2, %v3075_v42  ;;  %v11997_v48 = vld [vmem:[%s11416_s3 + $0x18] sm:$0xff] }
 0x9b8   : > { %v2526_v31 = vadd.f32 %v2522_v58, %v2498_v39  ;;  %v1950_v49 = vpop.permute.xlu1 %1949  ;;  %10545 = vmatprep.subr.bf16.mxu1 %v10544_v56 }
 0x9b9   : > { %2531 = vst.msk [vmem:[#allocation2 + $0x18] sm:$0xff] %vm936_vm0, %v2527_v20  ;;  %v1960_v18 = vadd.f32 %v1950_v49, %v11764_v3  ;;  %10547 = vmatpush3.bf16.msra.mxu1 %v10544_v56  ;;  %v1948_v16 = vpop.permute.xlu0 %1947  ;;  %v8988_v3 = vld [vmem:[%s11409_s2 + $0x40] sm:$0xff] }
 0x9ba   : > { %2530 = vst.msk [vmem:[#allocation2 + $0x10] sm:$0xff] %vm936_vm0, %v2526_v31  ;;  %v1959_v8 = vadd.f32 %v1948_v16, %v11767_v15  ;;  %v10548_v17 = vpack.c.bf16 %v2527_v20, %v2526_v31  ;;  %v8989_v15 = vld [vmem:[%s11409_s2 + $0x48] sm:$0xff] }
 0x9bb   : > { %10960 = vtanh.f32 %v1960_v18 }
 0x9bc   : > { %10962 = vtanh.f32 %v1959_v8  ;;  %v1954_v7 = vpop.permute.xlu1 %1953  ;;  %10549 = vmatprep.subr.bf16.mxu1 %v10548_v17  ;;  %v12007_v50 = vld [vmem:[#allocation2 + $0x8] sm:$0xff] }
 0x9bd   : > { %v1962_v1 = vadd.f32 %v1954_v7, %v11772_v14  ;;  %10551 = vmatpush3.bf16.msra.mxu1 %v10548_v17  ;;  %v1952_v27 = vpop.permute.xlu0 %1951  ;;  %v12002_v12 = vld [vmem:[#allocation2] sm:$0xff] }
 0x9be   : > { %v1961_v28 = vadd.f32 %v1952_v27, %v11775_v21  ;;  %10561 = vmatprep.subr.bf16.mxu1 %v11648_v6  ;;  %v10576_v21 = vpack.c.bf16 %v8989_v15, %v8988_v3 }
 0x9bf   : > { %10964 = vtanh.f32 %v1962_v1 }
 0x9c0   : > { %10966 = vtanh.f32 %v1961_v28  ;;  %9869 = vmatmul.mubr.msk.f32.vlgmr.msra.gmra.mrb[24].mxu1 %vm936_vm0, %v11653_v24  ;;  %v12015_v39 = vld [vmem:[#allocation2 + $0x18] sm:$0xff] }
 0x9c1   : > { %9871 = vmatprep.mubr.msk.f32.mxu1 %vm936_vm0, %v11657_v25  ;;  %10563 = vmatpush3.bf16.msra.mxu1 %v11648_v6  ;;  %v1972_v6 = vsub.f32 1.0, %v11779_v41  ;;  %v12011_v5 = vld [vmem:[#allocation2 + $0x10] sm:$0xff] }
 0x9c2   : > { %10565 = vmatprep.subr.bf16.mxu1 %v11659_v26 }
 0x9c4   : > { %9872 = vmatmul.mubr.msk.f32.gmra.mrb[26].mxu1 %vm936_vm0, %v11669_v30 }
 0x9c5   : > { %v10961_v14 = vpop.eup %10960  ;;  %10567 = vmatpush3.bf16.msra.mxu1 %v11659_v26  ;;  %v1968_v26 = vmul.f32 %v11779_v41, %v11590_v43  ;;  %v1970_v43 = vmul.f32 %v11786_v59, %v11598_v46 }
 0x9c6   : > { %v10963_v33 = vpop.eup %10962  ;;  %1981 = vrot.lane.b32.xlu1 %v10961_v14, %s13638_s22  ;;  %10577 = vmatprep.subr.bf16.mxu1 %v10576_v21 }
 0x9c7   : > { %1979 = vrot.lane.b32.xlu0 %v10963_v33, %s13638_s22 }
 0x9c9   : > { %v10965_v24 = vpop.eup %10964 }
 0x9ca   : > { %v10967_v25 = vpop.eup %10966  ;;  %1985 = vrot.lane.b32.xlu1 %v10965_v24, %s13638_s22 }
 0x9cb   : > { %1983 = vrot.lane.b32.xlu0 %v10967_v25, %s13638_s22 }
 0xa38   : > { %v1982_v30 = vpop.permute.xlu1 %1981 }
 0xa39   : > { %v1992_v52 = vmul.f32 %v1982_v30, %v1972_v6  ;;  %v1980_v35 = vpop.permute.xlu0 %1979 }
 0xa3a   : > { %v1991_v53 = vmul.f32 %v1980_v35, %v1971_v51 }
 0xa3b   : > { %v1996_v36 = vadd.f32 %v1992_v52, %v1968_v26 }
 0xa3c   : > { %v1995_v13 = vadd.f32 %v1991_v53, %v1967_v54  ;;  %v1986_v23 = vpop.permute.xlu1 %1985 }
 0xa3d   : > { %2000 = vst.msk [vmem:[#allocation2 + $0x28] sm:$0xff] %vm936_vm0, %v1996_v36  ;;  %v1994_v41 = vmul.f32 %v1986_v23, %v1974_v9  ;;  %v1984_v34 = vpop.permute.xlu0 %1983 }
 0xa3e   : > { %1999 = vst.msk [vmem:[#allocation2 + $0x20] sm:$0xff] %vm936_vm0, %v1995_v13  ;;  %v1993_v44 = vmul.f32 %v1984_v34, %v1973_v40 }
 0xa3f   : > { %v1998_v29 = vadd.f32 %v1994_v41, %v1970_v43 }
 0xa40   : > { %v1997_v37 = vadd.f32 %v1993_v44, %v1969_v45  ;;  %v12059_v45 = vld [vmem:[%s11449_s1] sm:$0xff] }
 0xa41   : > { %2002 = vst.msk [vmem:[#allocation2 + $0x38] sm:$0xff] %vm936_vm0, %v1998_v29 }
 0xa42   : > { %2001 = vst.msk [vmem:[#allocation2 + $0x30] sm:$0xff] %vm936_vm0, %v1997_v37 }
 0xa44   : > { %v11947_v46 = vld [vmem:[#allocation2 + $0x28] sm:$0xff] }
 0xa45   : > { %2880 = vrot.lane.b32.xlu1 %v11947_v46, %s13637_s21  ;;  %v11951_v59 = vld [vmem:[#allocation2 + $0x20] sm:$0xff] }
 0xa46   : > { %2878 = vrot.lane.b32.xlu0 %v11951_v59, %s13637_s21  ;;  %9896 = vmatprep.mubr.msk.f32.mxu1 %vm936_vm0, %v11951_v59 }
 0xa47   : > { %9897 = vmatmul.mubr.msk.f32.vlgmr.msra.gmra.mrb[28].mxu1 %vm936_vm0, %v11947_v46 }
 0xa48   : > { %10579 = vmatpush3.bf16.msra.mxu1 %v10576_v21  ;;  %v11961_v38 = vld [vmem:[#allocation2 + $0x38] sm:$0xff] }
 0xa49   : > { %2884 = vrot.lane.b32.xlu1 %v11961_v38, %s13637_s21  ;;  %v11965_v55 = vld [vmem:[#allocation2 + $0x30] sm:$0xff]  ;;  %10581 = vmatprep.subr.bf16.mxu1 %v10580_v32 }
 0xa4a   : > { %2882 = vrot.lane.b32.xlu0 %v11965_v55, %s13637_s21  ;;  %9899 = vmatprep.mubr.msk.f32.mxu1 %vm936_vm0, %v11965_v55 }
 0xa4b   : > { %9900 = vmatmul.mubr.msk.f32.gmra.mrb[30].mxu1 %vm936_vm0, %v11961_v38 }
 0xa4c   : > { %10583 = vmatpush3.bf16.msra.mxu1 %v10580_v32  ;;  %9924 = vmatprep.mubr.msk.f32.mxu1 %vm936_vm0, %v11968_v57 }
 0xa4d   : > { %10585 = vmatprep.subr.bf16.mxu1 %v11970_v10 }
 0xa4f   : > { %9925 = vmatmul.mubr.msk.f32.vlgmr.msra.gmra.mrb[32].mxu1 %vm936_vm0, %v11983_v19 }
 0xa50   : > { %10587 = vmatpush3.bf16.msra.mxu1 %v11970_v10  ;;  %9927 = vmatprep.mubr.msk.f32.mxu1 %vm936_vm0, %v11987_v4 }
 0xa51   : > { %10589 = vmatprep.subr.bf16.mxu1 %v11989_v0 }
 0xa53   : > { %9928 = vmatmul.mubr.msk.f32.gmra.mrb[34].mxu1 %vm936_vm0, %v11997_v48 }
 0xa54   : > { %10591 = vmatpush3.bf16.msra.mxu1 %v11989_v0  ;;  %9946 = vmatprep.mubr.msk.f32.mxu1 %vm936_vm0, %v12002_v12 }
 0xa57   : > { %9947 = vmatmul.mubr.msk.f32.vlgmr.msra.gmra.mrb[36].mxu1 %vm936_vm0, %v12007_v50 }
 0xa58   : > { %9949 = vmatprep.mubr.msk.f32.mxu1 %vm936_vm0, %v12011_v5 }
 0xa5b   : > { %9950 = vmatmul.mubr.msk.f32.gmra.mrb[38].mxu1 %vm936_vm0, %v12015_v39 }
 0xa93   : > { %v9870_v58 = vpop.f32.mrb[24].mxu1 }
 0xa94   : > { %v2631_v56 = vpop.f32.mrb[25].mxu1 }
 0xa95   : > { %9882 = vmatprep.mubr.msk.f32.mxu0 %vm936_vm0, %v2631_v56 }
 0xa96   : > { %9883 = vmatmul.mubr.msk.f32.vlgmr.msra.gmra.mrb[24].mxu0 %vm936_vm0, %v9870_v58 }
 0xa97   : > { %v9873_v20 = vpop.f32.mrb[26].mxu1  ;;  %10571 = vmatpush3.bf16.msra.mxu0 %v11744_v60 }
 0xa98   : > { %v2641_v31 = vpop.f32.mrb[27].mxu1  ;;  %10573 = vmatprep.subr.bf16.mxu0 %v11747_v62 }
 0xa99   : > { %9885 = vmatprep.mubr.msk.f32.mxu0 %vm936_vm0, %v2641_v31 }
 0xa9a   : > { %9886 = vmatmul.mubr.msk.f32.gmra.mrb[26].mxu0 %vm936_vm0, %v9873_v20 }
 0xa9b   : > { %10575 = vmatpush3.bf16.msra.mxu0 %v11747_v62 }
 0xa9c   : > { %9930 = vmatprep.subr.mxu0 %v12059_v45 }
 0xab7   : > { %v2881_v29 = vpop.permute.xlu1 %2880 }
 0xab8   : > { %v2879_v37 = vpop.permute.xlu0 %2878 }
 0xabb   : > { %v2885_v42 = vpop.permute.xlu1 %2884 }
 0xabc   : > { %v2883_v58 = vpop.permute.xlu0 %2882 }
 0xb1a   : > { %v9898_v49 = vpop.f32.mrb[28].mxu1 }
 0xb1b   : > { %v2831_v18 = vpop.f32.mrb[29].mxu1 }
 0xb1e   : > { %v9901_v16 = vpop.f32.mrb[30].mxu1 }
 0xb1f   : > { %v2841_v8 = vpop.f32.mrb[31].mxu1 }
 0xb22   : > { %v12026_v17 = vpop.f32.mrb[32].mxu1 }
 0xb23   : > { %v12028_v7 = vpop.f32.mrb[33].mxu1 }
 0xb26   : > { %v12030_v1 = vpop.f32.mrb[34].mxu1 }
 0xb27   : > { %v12032_v60 = vpop.f32.mrb[35].mxu1 }
 0xb2a   : > { %v12034_v27 = vpop.f32.mrb[36].mxu1 }
 0xb2b   : > { %v12036_v28 = vpop.f32.mrb[37].mxu1 }
 0xb2e   : > { %v12038_v3 = vpop.f32.mrb[38].mxu1 }
 0xb2f   : > { %v12040_v15 = vpop.f32.mrb[39].mxu1 }
 0xb69   : > { %v9884_v62 = vpop.f32.mrb[24].mxu0 }
 0xb6a   : > { %v12043_v14 = vadd.f32 %v9884_v62, %v11761_v63  ;;  %v2734_v21 = vpop.f32.mrb[25].mxu0  ;;  %v3078_v62 = vld [vmem:[%s11514_s28 + $0x8] sm:$0xff] }
 0xb6b   : > { %v12046_v33 = vadd.f32 %v11761_v63, %v2734_v21  ;;  %v3079_v21 = vld [vmem:[%s11514_s28 + $0x10] sm:$0xff] }
 0xb6c   : > { %v2851_v24 = vadd.f32 %v9898_v49, %v12043_v14 }
 0xb6d   : > { %v2850_v25 = vadd.f32 %v2831_v18, %v12046_v33  ;;  %v9887_v6 = vpop.f32.mrb[26].mxu0 }
 0xb6e   : > { %v8981_v30 = vmul.f32 -1.442695, %v2851_v24  ;;  %v12051_v51 = vadd.f32 %v9887_v6, %v11761_v63  ;;  %v2744_v26 = vpop.f32.mrb[27].mxu0 }
 0xb6f   : > { %v8980_v52 = vmul.f32 -1.442695, %v2850_v25  ;;  %v12054_v35 = vadd.f32 %v11761_v63, %v2744_v26  ;;  %v3080_v25 = vld [vmem:[%s11514_s28 + $0x18] sm:$0xff] }
 0xb70   : > { %10968 = vpow2.f32 %v8981_v30  ;;  %v2853_v54 = vadd.f32 %v9901_v16, %v12051_v51  ;;  %v12105_v6 = vpack.c.bf16 %v3080_v25, %v3079_v21  ;;  %v12120_v30 = vld [vmem:[%s11532_s23] ss:$0 sm:$0xff]  ;;  %s12637_s23 = scalar_lea.vmem %s13615_s13, %s11444_s11 }
 0xb71   : > { %10970 = vpow2.f32 %v8980_v52  ;;  %v2852_v53 = vadd.f32 %v2841_v8, %v12054_v35  ;;  %v3077_v8 = vld [vmem:[%s11514_s28] sm:$0xff]  ;;  %s13641_s28 = sshll.u32 %s13644_s0, 7 }
 0xb72   : > { %v8983_v36 = vmul.f32 -1.442695, %v2853_v54  ;;  %v12102_v24 = vpack.c.bf16 %v3078_v62, %v3077_v8 }
 0xb73   : > { %v8982_v9 = vmul.f32 -1.442695, %v2852_v53 }
 0xb74   : > { %10972 = vpow2.f32 %v8983_v36 }
 0xb75   : > { %10974 = vpow2.f32 %v8982_v9 }
 0xb7a   : > { %v10969_v13 = vpop.eup %10968 }
 0xb7b   : > { %v10971_v23 = vpop.eup %10970  ;;  %v2867_v40 = vadd.f32 1.0, %v10969_v13 }
 0xb7c   : > { %v2866_v43 = vadd.f32 1.0, %v10971_v23 }
 0xb7d   : > { %10976 = vrcp.f32 %v2867_v40 }
 0xb7e   : > { %v10973_v41 = vpop.eup %10972  ;;  %10978 = vrcp.f32 %v2866_v43 }
 0xb7f   : > { %v10975_v63 = vpop.eup %10974  ;;  %v2869_v34 = vadd.f32 1.0, %v10973_v41 }
 0xb80   : > { %v2868_v44 = vadd.f32 1.0, %v10975_v63 }
 0xb81   : > { %10980 = vrcp.f32 %v2869_v34 }
 0xb82   : > { %10982 = vrcp.f32 %v2868_v44 }
 0xb87   : > { %v12062_v22 = vpop.eup %10976 }
 0xb88   : > { %v12064_v11 = vpop.eup %10978  ;;  %v2891_v32 = vmul.f32 %v12062_v22, %v2881_v29 }
 0xb89   : > { %v2890_v47 = vmul.f32 %v12064_v11, %v2879_v37 }
 0xb8a   : > { %2900 = vrot.lane.b32.xlu1 %v2891_v32, %s13628_s26 }
 0xb8b   : > { %v12069_v61 = vpop.eup %10980  ;;  %2898 = vrot.lane.b32.xlu0 %v2890_v47, %s13628_s26 }
 0xb8c   : > { %v12072_v2 = vpop.eup %10982  ;;  %v2893_v56 = vmul.f32 %v12069_v61, %v2885_v42 }
 0xb8d   : > { %v2892_v20 = vmul.f32 %v12072_v2, %v2883_v58 }
 0xb8e   : > { %2904 = vrot.lane.b32.xlu1 %v2893_v56, %s13628_s26 }
 0xb8f   : > { %2902 = vrot.lane.b32.xlu0 %v2892_v20, %s13628_s26 }
 0xb92   : > { %3409 = vrot.lane.b32.xlu1 %v12007_v50, %s13637_s21 }
 0xb93   : > { %3407 = vrot.lane.b32.xlu0 %v12002_v12, %s13637_s21 }
 0xb96   : > { %3413 = vrot.lane.b32.xlu1 %v12015_v39, %s13637_s21 }
 0xb97   : > { %3411 = vrot.lane.b32.xlu0 %v12011_v5, %s13637_s21 }
 0xbfc   : > { %v2901_v31 = vpop.permute.xlu1 %2900 }
 0xbfd   : > { %v2899_v49 = vpop.permute.xlu0 %2898 }
 0xbfe   : > { %9910 = vmatprep.mubr.msk.f32.mxu0 %vm936_vm0, %v2899_v49 }
 0xbff   : > { %9911 = vmatmul.mubr.msk.f32.vlgmr.msra.gmra.mrb[28].mxu0 %vm936_vm0, %v2901_v31 }
 0xc00   : > { %9931 = vmatpush3.msra.mxu0 %v12059_v45  ;;  %v2905_v16 = vpop.permute.xlu1 %2904 }
 0xc01   : > { %v2903_v18 = vpop.permute.xlu0 %2902  ;;  %10593 = vmatprep.subr.bf16.mxu0 %v12102_v24 }
 0xc02   : > { %9913 = vmatprep.mubr.msk.f32.mxu0 %vm936_vm0, %v2903_v18 }
 0xc03   : > { %9914 = vmatmul.mubr.msk.f32.gmra.mrb[30].mxu0 %vm936_vm0, %v2905_v16 }
 0xc04   : > { %9932 = vmatprep.mubr.msk.f32.mxu0 %vm1070_vm1, %v12028_v7 }
 0xc05   : > { %v3408_v31 = vpop.permute.xlu0 %3407 }
 0xc07   : > { %9933 = vmatmul.mubr.msk.f32.vlgmr.msra.gmra.mrb[32].mxu0 %vm1070_vm1, %v12026_v17 }
 0xc08   : > { %9935 = vmatprep.mubr.msk.f32.mxu0 %vm1070_vm1, %v12032_v60  ;;  %10595 = vmatpush3.bf16.msra.mxu0 %v12102_v24 }
 0xc09   : > { %10597 = vmatprep.subr.bf16.mxu0 %v12105_v6  ;;  %v3412_v25 = vpop.permute.xlu0 %3411 }
 0xc0b   : > { %9936 = vmatmul.mubr.msk.f32.gmra.mrb[34].mxu0 %vm1070_vm1, %v12030_v1 }
 0xc0c   : > { %10599 = vmatpush3.bf16.msra.mxu0 %v12105_v6 }
 0xcd2   : > { %v12111_v17 = vpop.f32.mrb[28].mxu0 }
 0xcd3   : > { %v12113_v7 = vpop.f32.mrb[29].mxu0 }
 0xcd6   : > { %v12115_v1 = vpop.f32.mrb[30].mxu0 }
 0xcd7   : > { %v12117_v60 = vpop.f32.mrb[31].mxu0 }
 0xcda   : > { %v9934_v26 = vpop.f32.mrb[32].mxu0 }
 0xcdb   : > { %v12123_v52 = vadd.f32 %v9934_v26, %v12120_v30  ;;  %v3263_v54 = vpop.f32.mrb[33].mxu0 }
 0xcdc   : > { %v12126_v53 = vadd.f32 %v12120_v30, %v3263_v54 }
 0xcdd   : > { %v3380_v36 = vadd.f32 %v12034_v27, %v12123_v52 }
 0xcde   : > { %v3379_v9 = vadd.f32 %v12036_v28, %v12126_v53  ;;  %v9937_v13 = vpop.f32.mrb[34].mxu0 }
 0xcdf   : > { %v9006_v23 = vmul.f32 -1.442695, %v3380_v36  ;;  %v12133_v40 = vadd.f32 %v9937_v13, %v12120_v30  ;;  %v3273_v43 = vpop.f32.mrb[35].mxu0 }
 0xce0   : > { %v9005_v41 = vmul.f32 -1.442695, %v3379_v9  ;;  %v3274_v63 = vadd.f32 %v12120_v30, %v3273_v43 }
 0xce1   : > { %10984 = vpow2.f32 %v9006_v23  ;;  %v3382_v34 = vadd.f32 %v12038_v3, %v12133_v40  ;;  %v3410_v3 = vpop.permute.xlu1 %3409 }
 0xce2   : > { %10986 = vpow2.f32 %v9005_v41  ;;  %v3381_v44 = vadd.f32 %v12040_v15, %v3274_v63 }
 0xce3   : > { %v9008_v27 = vmul.f32 -1.442695, %v3382_v34 }
 0xce4   : > { %v9007_v29 = vmul.f32 -1.442695, %v3381_v44 }
 0xce5   : > { %10988 = vpow2.f32 %v9008_v27  ;;  %v3414_v62 = vpop.permute.xlu1 %3413 }
 0xce6   : > { %10990 = vpow2.f32 %v9007_v29 }
 0xceb   : > { %v10985_v28 = vpop.eup %10984 }
 0xcec   : > { %v10987_v37 = vpop.eup %10986  ;;  %v3396_v32 = vadd.f32 1.0, %v10985_v28 }
 0xced   : > { %v3395_v47 = vadd.f32 1.0, %v10987_v37 }
 0xcee   : > { %10992 = vrcp.f32 %v3396_v32 }
 0xcef   : > { %v10989_v42 = vpop.eup %10988  ;;  %10994 = vrcp.f32 %v3395_v47 }
 0xcf0   : > { %v10991_v58 = vpop.eup %10990  ;;  %v3398_v56 = vadd.f32 1.0, %v10989_v42 }
 0xcf1   : > { %v3397_v20 = vadd.f32 1.0, %v10991_v58 }
 0xcf2   : > { %10996 = vrcp.f32 %v3398_v56 }
 0xcf3   : > { %10998 = vrcp.f32 %v3397_v20 }
 0xcf8   : > { %v10993_v49 = vpop.eup %10992 }
 0xcf9   : > { %v12139_v15 = vpop.eup %10994  ;;  %v3420_v18 = vmul.f32 %v10993_v49, %v3410_v3  ;;  %v12165_v3 = vld [vmem:[%s11416_s3 + $0x20] sm:$0xff] }
 0xcfa   : > { %v3419_v16 = vmul.f32 %v12139_v15, %v3408_v31  ;;  %9974 = vmatprep.mubr.msk.f32.mxu1 %vm936_vm0, %v12165_v3  ;;  %v3556_v31 = vsub.f32 1.0, %v12139_v15 }
 0xcfb   : > { %3429 = vrot.lane.b32.xlu1 %v3420_v18, %s13628_s26  ;;  %v3553_v18 = vmul.f32 %v10993_v49, %v12007_v50 }
 0xcfc   : > { %v12143_v8 = vpop.eup %10996  ;;  %3427 = vrot.lane.b32.xlu0 %v3419_v16, %s13628_s26 }
 0xcfd   : > { %v12146_v21 = vpop.eup %10998  ;;  %v3422_v26 = vmul.f32 %v12143_v8, %v3414_v62 }
 0xcfe   : > { %v3421_v54 = vmul.f32 %v12146_v21, %v3412_v25 }
 0xcff   : > { %3433 = vrot.lane.b32.xlu1 %v3422_v26, %s13628_s26 }
 0xd00   : > { %3431 = vrot.lane.b32.xlu0 %v3421_v54, %s13628_s26 }
 0xd6d   : > { %v3430_v36 = vpop.permute.xlu1 %3429 }
 0xd6e   : > { %v3428_v9 = vpop.permute.xlu0 %3427 }
 0xd6f   : > { %9960 = vmatprep.mubr.msk.f32.mxu0 %vm936_vm0, %v3428_v9 }
 0xd70   : > { %9961 = vmatmul.mubr.msk.f32.vlgmr.msra.gmra.mrb[36].mxu0 %vm936_vm0, %v3430_v36  ;;  %v3558_v36 = vsub.f32 1.0, %v12146_v21 }
 0xd71   : > { %v3434_v23 = vpop.permute.xlu1 %3433 }
 0xd72   : > { %v3432_v13 = vpop.permute.xlu0 %3431 }
 0xd73   : > { %9963 = vmatprep.mubr.msk.f32.mxu0 %vm936_vm0, %v3432_v13 }
 0xd74   : > { %9964 = vmatmul.mubr.msk.f32.gmra.mrb[38].mxu0 %vm936_vm0, %v3434_v23 }
 0xe43   : > { %v9962_v43 = vpop.f32.mrb[36].mxu0 }
 0xe44   : > { %3534 = vrot.lane.b32.xlu1 %v9962_v43, %s13638_s22  ;;  %v3509_v41 = vpop.f32.mrb[37].mxu0 }
 0xe45   : > { %3532 = vrot.lane.b32.xlu0 %v3509_v41, %s13638_s22 }
 0xe47   : > { %v9965_v34 = vpop.f32.mrb[38].mxu0 }
 0xe48   : > { %3538 = vrot.lane.b32.xlu1 %v9965_v34, %s13638_s22  ;;  %v3519_v44 = vpop.f32.mrb[39].mxu0  ;;  %v3600_v34 = vld [vmem:[%s11636_s20] sm:$0xff] }
 0xe49   : > { %3536 = vrot.lane.b32.xlu0 %v3519_v44, %s13638_s22  ;;  %v3601_v44 = vld [vmem:[%s11636_s20 + $0x8] sm:$0xff] }
 0xeb6   : > { %v3535_v27 = vpop.permute.xlu1 %3534 }
 0xeb7   : > { %v3545_v29 = vadd.f32 %v3535_v27, %v12123_v52  ;;  %v3533_v28 = vpop.permute.xlu0 %3532 }
 0xeb8   : > { %v3544_v37 = vadd.f32 %v3533_v28, %v12126_v53  ;;  %v12202_v28 = vpack.c.bf16 %v3601_v44, %v3600_v34  ;;  %v3604_v44 = vld [vmem:[%s11739_s27] sm:$0xff] }
 0xeb9   : > { %11000 = vtanh.f32 %v3545_v29  ;;  %v12200_v29 = vld [vmem:[%s11416_s3 + $0x28] sm:$0xff] }
 0xeba   : > { %11002 = vtanh.f32 %v3544_v37  ;;  %v3539_v32 = vpop.permute.xlu1 %3538  ;;  %v12206_v37 = vld [vmem:[%s11416_s3 + $0x30] sm:$0xff] }
 0xebb   : > { %v3547_v47 = vadd.f32 %v3539_v32, %v12133_v40  ;;  %v3537_v42 = vpop.permute.xlu0 %3536  ;;  %v3557_v40 = vsub.f32 1.0, %v10993_v49  ;;  %v3603_v32 = vld [vmem:[%s11636_s20 + $0x18] sm:$0xff] }
 0xebc   : > { %v3546_v58 = vadd.f32 %v3537_v42, %v3274_v63 }
 0xebd   : > { %11004 = vtanh.f32 %v3547_v47  ;;  %v12216_v47 = vld [vmem:[%s11416_s3 + $0x38] sm:$0xff]  ;;  %s13640_s3 = sld [smem:[#allocation5_spill]] }
 0xebe   : > { %11006 = vtanh.f32 %v3546_v58  ;;  %v9039_v58 = vld [vmem:[%s11409_s2 + $0x68] sm:$0xff] }
 0xec3   : > { %v11001_v56 = vpop.eup %11000 }
 0xec4   : > { %v11003_v20 = vpop.eup %11002  ;;  %3566 = vrot.lane.b32.xlu1 %v11001_v56, %s13638_s22 }
 0xec5   : > { %3564 = vrot.lane.b32.xlu0 %v11003_v20, %s13638_s22 }
 0xec7   : > { %v11005_v52 = vpop.eup %11004 }
 0xec8   : > { %v11007_v53 = vpop.eup %11006  ;;  %3570 = vrot.lane.b32.xlu1 %v11005_v52, %s13638_s22 }
 0xec9   : > { %3568 = vrot.lane.b32.xlu0 %v11007_v53, %s13638_s22 }
 0xecc   : > { %3005 = vrot.lane.b32.xlu1 %v12111_v17, %s13638_s22  ;;  %v3552_v17 = vmul.f32 %v12139_v15, %v12002_v12  ;;  %v3554_v12 = vmul.f32 %v12146_v21, %v12011_v5 }
 0xecd   : > { %3003 = vrot.lane.b32.xlu0 %v12113_v7, %s13638_s22  ;;  %v3559_v7 = vsub.f32 1.0, %v12143_v8 }
 0xed0   : > { %3009 = vrot.lane.b32.xlu1 %v12115_v1, %s13638_s22 }
 0xed1   : > { %3007 = vrot.lane.b32.xlu0 %v12117_v60, %s13638_s22  ;;  %v3555_v60 = vmul.f32 %v12143_v8, %v12015_v39 }
 0xf36   : > { %v3567_v63 = vpop.permute.xlu1 %3566 }
 0xf37   : > { %v3577_v16 = vmul.f32 %v3567_v63, %v3557_v40  ;;  %v3565_v62 = vpop.permute.xlu0 %3564  ;;  %v3596_v63 = vld [vmem:[%s11610_s30] sm:$0xff] }
 0xf38   : > { %v3576_v25 = vmul.f32 %v3565_v62, %v3556_v31  ;;  %v3597_v31 = vld [vmem:[%s11610_s30 + $0x8] sm:$0xff]  ;;  %v3599_v62 = vld [vmem:[%s11610_s30 + $0x18] sm:$0xff] }
 0xf39   : > { %v3581_v26 = vadd.f32 %v3577_v16, %v3553_v18  ;;  %v3598_v18 = vld [vmem:[%s11610_s30 + $0x10] sm:$0xff]  ;;  %v12234_v16 = vpack.c.bf16 %v3597_v31, %v3596_v63  ;;  %s12872_s30 = scalar_lea.vmem %s13619_s17, %s11444_s11 }
 0xf3a   : > { %v3580_v54 = vadd.f32 %v3576_v25, %v3552_v17  ;;  %v3571_v1 = vpop.permute.xlu1 %3570  ;;  %v12237_v17 = vpack.c.bf16 %v3599_v62, %v3598_v18  ;;  %v3028_v25 = vsub.f32 1.0, %v12062_v22 }
 0xf3b   : > { %3585 = vst.msk [vmem:[#allocation2 + $0x8] sm:$0xff] %vm936_vm0, %v3581_v26  ;;  %v3579_v9 = vmul.f32 %v3571_v1, %v3559_v7  ;;  %v3569_v50 = vpop.permute.xlu0 %3568  ;;  %10609 = vmatprep.subr.bf16.mxu0 %v12234_v16  ;;  %v3027_v7 = vsub.f32 1.0, %v12064_v11 }
 0xf3c   : > { %3584 = vst.msk [vmem:[#allocation2] sm:$0xff] %vm936_vm0, %v3580_v54  ;;  %v3578_v49 = vmul.f32 %v3569_v50, %v3558_v36  ;;  %v10600_v15 = vpack.c.bf16 %v3581_v26, %v3580_v54  ;;  %10611 = vmatpush3.bf16.msra.mxu0 %v12234_v16  ;;  %v3024_v54 = vmul.f32 %v12062_v22, %v11947_v46 }
 0xf3d   : > { %v3583_v13 = vadd.f32 %v3579_v9, %v3555_v60  ;;  %10613 = vmatprep.subr.bf16.mxu0 %v12237_v17  ;;  %v3023_v60 = vmul.f32 %v12064_v11, %v11951_v59  ;;  %v3026_v46 = vmul.f32 %v12069_v61, %v11961_v38  ;;  %v3025_v59 = vmul.f32 %v12072_v2, %v11965_v55 }
 0xf3e   : > { %v3582_v23 = vadd.f32 %v3578_v49, %v3554_v12  ;;  %v3006_v43 = vpop.permute.xlu1 %3005  ;;  %10601 = vmatprep.subr.bf16.mxu1 %v10600_v15  ;;  %v3030_v12 = vsub.f32 1.0, %v12069_v61 }
 0xf3f   : > { %3587 = vst.msk [vmem:[#allocation2 + $0x18] sm:$0xff] %vm936_vm0, %v3583_v13  ;;  %v3016_v39 = vadd.f32 %v3006_v43, %v12043_v14  ;;  %10603 = vmatpush3.bf16.msra.mxu1 %v10600_v15  ;;  %v3004_v8 = vpop.permute.xlu0 %3003 }
 0xf40   : > { %3586 = vst.msk [vmem:[#allocation2 + $0x10] sm:$0xff] %vm936_vm0, %v3582_v23  ;;  %v3015_v5 = vadd.f32 %v3004_v8, %v12046_v33  ;;  %v10604_v21 = vpack.c.bf16 %v3583_v13, %v3582_v23  ;;  %10615 = vmatpush3.bf16.msra.mxu0 %v12237_v17  ;;  %v3029_v13 = vsub.f32 1.0, %v12072_v2  ;;  %v9040_v8 = vld [vmem:[%s11409_s2 + $0x70] sm:$0xff] }
 0xf41   : > { %11008 = vtanh.f32 %v3016_v39 }
 0xf42   : > { %11010 = vtanh.f32 %v3015_v5  ;;  %v3010_v41 = vpop.permute.xlu1 %3009  ;;  %10605 = vmatprep.subr.bf16.mxu1 %v10604_v21  ;;  %v9041_v5 = vld [vmem:[%s11409_s2 + $0x78] sm:$0xff] }
 0xf43   : > { %v3018_v27 = vadd.f32 %v3010_v41, %v12051_v51  ;;  %10607 = vmatpush3.bf16.msra.mxu1 %v10604_v21  ;;  %v3008_v14 = vpop.permute.xlu0 %3007  ;;  %v3602_v51 = vld [vmem:[%s11636_s20 + $0x10] sm:$0xff]  ;;  %v10636_v61 = vpack.c.bf16 %v9041_v5, %v9040_v8  ;;  %v12296_v41 = vld [vmem:[#allocation2] sm:$0xff] }
 0xf44   : > { %v3017_v33 = vadd.f32 %v3008_v14, %v12054_v35  ;;  %10617 = vmatprep.subr.bf16.mxu1 %v12202_v28  ;;  %v12219_v42 = vpack.c.bf16 %v3603_v32, %v3602_v51  ;;  %v9038_v35 = vld [vmem:[%s11409_s2 + $0x60] sm:$0xff]  ;;  %v3606_v14 = vld [vmem:[%s11739_s27 + $0x10] sm:$0xff]  ;;  %v3607_v51 = vld [vmem:[%s11739_s27 + $0x18] sm:$0xff]  ;;  %s12512_s2 = scalar_lea.vmem %s13614_s12, %s11444_s11 }
 0xf45   : > { %11012 = vtanh.f32 %v3018_v27  ;;  %v10632_v20 = vpack.c.bf16 %v9039_v58, %v9038_v35  ;;  %v3605_v27 = vld [vmem:[%s11739_s27 + $0x8] sm:$0xff]  ;;  %v12325_v32 = vpack.c.bf16 %v3607_v51, %v3606_v14  ;;  %s13639_s27 = sshll.u32 %s13644_s0, 6 }
 0xf46   : > { %11014 = vtanh.f32 %v3017_v33  ;;  %9975 = vmatmul.mubr.msk.f32.vlgmr.msra.gmra.mrb[40].mxu1 %vm936_vm0, %v12200_v29  ;;  %v12322_v33 = vpack.c.bf16 %v3605_v27, %v3604_v44  ;;  %s12704_s1 = scalar_lea.vmem %s13640_s3, %s13639_s27  ;;  %s12741_s27 = scalar_lea.vmem %s13618_s16, %s11444_s11 }
 0xf47   : > { %9977 = vmatprep.mubr.msk.f32.mxu1 %vm936_vm0, %v12206_v37  ;;  %10619 = vmatpush3.bf16.msra.mxu1 %v12202_v28  ;;  %s12781_s3 = scalar_lea.vmem %s13617_s15, %s11444_s11 }
 0xf48   : > { %10621 = vmatprep.subr.bf16.mxu1 %v12219_v42  ;;  %10625 = vmatprep.subr.bf16.mxu0 %v12322_v33 }
 0xf4a   : > { %9978 = vmatmul.mubr.msk.f32.gmra.mrb[42].mxu1 %vm936_vm0, %v12216_v47 }
 0xf4b   : > { %v11009_v56 = vpop.eup %11008  ;;  %10623 = vmatpush3.bf16.msra.mxu1 %v12219_v42 }
 0xf4c   : > { %v11011_v52 = vpop.eup %11010  ;;  %3037 = vrot.lane.b32.xlu1 %v11009_v56, %s13638_s22  ;;  %10633 = vmatprep.subr.bf16.mxu1 %v10632_v20 }
 0xf4d   : > { %3035 = vrot.lane.b32.xlu0 %v11011_v52, %s13638_s22 }
 0xf4f   : > { %v11013_v53 = vpop.eup %11012 }
 0xf50   : > { %v11015_v40 = vpop.eup %11014  ;;  %3041 = vrot.lane.b32.xlu1 %v11013_v53, %s13638_s22 }
 0xf51   : > { %3039 = vrot.lane.b32.xlu0 %v11015_v40, %s13638_s22 }
 0xfbe   : > { %v3038_v26 = vpop.permute.xlu1 %3037 }
 0xfbf   : > { %v3048_v1 = vmul.f32 %v3038_v26, %v3028_v25  ;;  %v3036_v36 = vpop.permute.xlu0 %3035  ;;  %v12349_v25 = vld [vmem:[%s11758_s25] ss:$0 sm:$0xff]  ;;  %s12891_s25 = scalar_lea.vmem %s13620_s18, %s13644_s0  ;;  %s13642_s0 = smov 96  }
 0xfc0   : > { %v3047_v9 = vmul.f32 %v3036_v36, %v3027_v7 }
 0xfc1   : > { %v3052_v50 = vadd.f32 %v3048_v1, %v3024_v54 }
 0xfc2   : > { %v3051_v49 = vadd.f32 %v3047_v9, %v3023_v60  ;;  %v3042_v15 = vpop.permute.xlu1 %3041 }
 0xfc3   : > { %3056 = vst.msk [vmem:[#allocation2 + $0x28] sm:$0xff] %vm936_vm0, %v3052_v50  ;;  %v3050_v22 = vmul.f32 %v3042_v15, %v3030_v12  ;;  %v3040_v23 = vpop.permute.xlu0 %3039 }
 0xfc4   : > { %3055 = vst.msk [vmem:[#allocation2 + $0x20] sm:$0xff] %vm936_vm0, %v3051_v49  ;;  %v3049_v11 = vmul.f32 %v3040_v23, %v3029_v13 }
 0xfc5   : > { %v3054_v43 = vadd.f32 %v3050_v22, %v3026_v46 }
 0xfc6   : > { %v3053_v39 = vadd.f32 %v3049_v11, %v3025_v59 }
 0xfc7   : > { %3058 = vst.msk [vmem:[#allocation2 + $0x38] sm:$0xff] %vm936_vm0, %v3054_v43 }
 0xfc8   : > { %3057 = vst.msk [vmem:[#allocation2 + $0x30] sm:$0xff] %vm936_vm0, %v3053_v39 }
 0xfca   : > { %v12261_v21 = vld [vmem:[#allocation2 + $0x28] sm:$0xff] }
 0xfcb   : > { %3936 = vrot.lane.b32.xlu1 %v12261_v21, %s13637_s21  ;;  %v12265_v38 = vld [vmem:[#allocation2 + $0x20] sm:$0xff] }
 0xfcc   : > { %3934 = vrot.lane.b32.xlu0 %v12265_v38, %s13637_s21  ;;  %10002 = vmatprep.mubr.msk.f32.mxu1 %vm936_vm0, %v12265_v38 }
 0xfcd   : > { %10003 = vmatmul.mubr.msk.f32.vlgmr.msra.gmra.mrb[44].mxu1 %vm936_vm0, %v12261_v21 }
 0xfce   : > { %10635 = vmatpush3.bf16.msra.mxu1 %v10632_v20  ;;  %v12273_v55 = vld [vmem:[#allocation2 + $0x38] sm:$0xff] }
 0xfcf   : > { %3940 = vrot.lane.b32.xlu1 %v12273_v55, %s13637_s21  ;;  %v12277_v2 = vld [vmem:[#allocation2 + $0x30] sm:$0xff]  ;;  %10637 = vmatprep.subr.bf16.mxu1 %v10636_v61 }
 0xfd0   : > { %3938 = vrot.lane.b32.xlu0 %v12277_v2, %s13637_s21  ;;  %10005 = vmatprep.mubr.msk.f32.mxu1 %vm936_vm0, %v12277_v2 }
 0xfd1   : > { %10006 = vmatmul.mubr.msk.f32.gmra.mrb[46].mxu1 %vm936_vm0, %v12273_v55 }
 0xfd2   : > { %10639 = vmatpush3.bf16.msra.mxu1 %v10636_v61  ;;  %10030 = vmatprep.mubr.msk.f32.mxu1 %vm936_vm0, %v11968_v57  ;;  %v12301_v57 = vld [vmem:[#allocation2 + $0x8] sm:$0xff] }
 0xfd3   : > { %10641 = vmatprep.subr.bf16.mxu1 %v11970_v10 }
 0xfd5   : > { %10031 = vmatmul.mubr.msk.f32.vlgmr.msra.gmra.mrb[48].mxu1 %vm936_vm0, %v11983_v19  ;;  %v12309_v19 = vld [vmem:[#allocation2 + $0x18] sm:$0xff] }
 0xfd6   : > { %10643 = vmatpush3.bf16.msra.mxu1 %v11970_v10  ;;  %10033 = vmatprep.mubr.msk.f32.mxu1 %vm936_vm0, %v11987_v4  ;;  %v12305_v10 = vld [vmem:[#allocation2 + $0x10] sm:$0xff] }
 0xfd7   : > { %10645 = vmatprep.subr.bf16.mxu1 %v11989_v0 }
 0xfd9   : > { %10034 = vmatmul.mubr.msk.f32.gmra.mrb[50].mxu1 %vm936_vm0, %v11997_v48 }
 0xfda   : > { %10647 = vmatpush3.bf16.msra.mxu1 %v11989_v0  ;;  %10052 = vmatprep.mubr.msk.f32.mxu1 %vm936_vm0, %v12296_v41 }
 0xfdd   : > { %10053 = vmatmul.mubr.msk.f32.vlgmr.msra.gmra.mrb[52].mxu1 %vm936_vm0, %v12301_v57 }
 0xfde   : > { %10055 = vmatprep.mubr.msk.f32.mxu1 %vm936_vm0, %v12305_v10 }
 0xfe1   : > { %10056 = vmatmul.mubr.msk.f32.gmra.mrb[54].mxu1 %vm936_vm0, %v12309_v19 }
 0xfe2   : > { %10080 = vmatprep.mubr.msk.f32.mxu1 %vm936_vm0, %v12165_v3 }
0x1019   : > { %v9976_v4 = vpop.f32.mrb[40].mxu1 }
0x101a   : > { %v3687_v0 = vpop.f32.mrb[41].mxu1 }
0x101b   : > { %9988 = vmatprep.mubr.msk.f32.mxu0 %vm936_vm0, %v3687_v0 }
0x101c   : > { %9989 = vmatmul.mubr.msk.f32.vlgmr.msra.gmra.mrb[40].mxu0 %vm936_vm0, %v9976_v4 }
0x101d   : > { %v9979_v48 = vpop.f32.mrb[42].mxu1  ;;  %10627 = vmatpush3.bf16.msra.mxu0 %v12322_v33 }
0x101e   : > { %v3697_v34 = vpop.f32.mrb[43].mxu1  ;;  %10629 = vmatprep.subr.bf16.mxu0 %v12325_v32 }
0x101f   : > { %9991 = vmatprep.mubr.msk.f32.mxu0 %vm936_vm0, %v3697_v34 }
0x1020   : > { %9992 = vmatmul.mubr.msk.f32.gmra.mrb[42].mxu0 %vm936_vm0, %v9979_v48 }
0x1021   : > { %10631 = vmatpush3.bf16.msra.mxu0 %v12325_v32 }
0x1022   : > { %10036 = vmatprep.subr.mxu0 %v12059_v45 }
0x103d   : > { %v3937_v48 = vpop.permute.xlu1 %3936 }
0x103e   : > { %v3935_v34 = vpop.permute.xlu0 %3934 }
0x10a0   : > { %v10004_v3 = vpop.f32.mrb[44].mxu1 }
0x10a1   : > { %v3887_v35 = vpop.f32.mrb[45].mxu1 }
0x10a4   : > { %v10007_v58 = vpop.f32.mrb[46].mxu1 }
0x10a5   : > { %v3897_v56 = vpop.f32.mrb[47].mxu1 }
0x10a8   : > { %v12332_v20 = vpop.f32.mrb[48].mxu1 }
0x10a9   : > { %v12334_v52 = vpop.f32.mrb[49].mxu1 }
0x10ac   : > { %v12336_v53 = vpop.f32.mrb[50].mxu1 }
0x10ad   : > { %v12338_v40 = vpop.f32.mrb[51].mxu1 }
0x10b0   : > { %v12340_v63 = vpop.f32.mrb[52].mxu1 }
0x10b1   : > { %v12342_v31 = vpop.f32.mrb[53].mxu1 }
0x10b4   : > { %v12344_v18 = vpop.f32.mrb[54].mxu1 }
0x10b5   : > { %v12346_v62 = vpop.f32.mrb[55].mxu1 }
0x10ef   : > { %v9990_v26 = vpop.f32.mrb[40].mxu0 }
0x10f0   : > { %v12352_v7 = vadd.f32 %v9990_v26, %v12349_v25  ;;  %v3790_v54 = vpop.f32.mrb[41].mxu0 }
0x10f1   : > { %v12355_v1 = vadd.f32 %v12349_v25, %v3790_v54 }
0x10f2   : > { %v3907_v36 = vadd.f32 %v10004_v3, %v12352_v7 }
0x10f3   : > { %v3906_v60 = vadd.f32 %v3887_v35, %v12355_v1  ;;  %v9993_v9 = vpop.f32.mrb[42].mxu0  ;;  %v3941_v35 = vpop.permute.xlu1 %3940 }
0x10f4   : > { %v9031_v50 = vmul.f32 -1.442695, %v3907_v36  ;;  %v12360_v12 = vadd.f32 %v9993_v9, %v12349_v25  ;;  %v3800_v49 = vpop.f32.mrb[43].mxu0 }
0x10f5   : > { %v9030_v15 = vmul.f32 -1.442695, %v3906_v60  ;;  %v12363_v13 = vadd.f32 %v12349_v25, %v3800_v49 }
0x10f6   : > { %11016 = vpow2.f32 %v9031_v50  ;;  %v3909_v46 = vadd.f32 %v10007_v58, %v12360_v12 }
0x10f7   : > { %11018 = vpow2.f32 %v9030_v15  ;;  %v3908_v22 = vadd.f32 %v3897_v56, %v12363_v13  ;;  %v3939_v56 = vpop.permute.xlu0 %3938 }
0x10f8   : > { %v9033_v23 = vmul.f32 -1.442695, %v3909_v46 }
0x10f9   : > { %v9032_v59 = vmul.f32 -1.442695, %v3908_v22 }
0x10fa   : > { %11020 = vpow2.f32 %v9033_v23 }
0x10fb   : > { %11022 = vpow2.f32 %v9032_v59 }
0x1100   : > { %v11017_v11 = vpop.eup %11016 }
0x1101   : > { %v11019_v43 = vpop.eup %11018  ;;  %v3923_v39 = vadd.f32 1.0, %v11017_v11 }
0x1102   : > { %v3922_v8 = vadd.f32 1.0, %v11019_v43 }
0x1103   : > { %11024 = vrcp.f32 %v3923_v39 }
0x1104   : > { %v11021_v5 = vpop.eup %11020  ;;  %11026 = vrcp.f32 %v3922_v8 }
0x1105   : > { %v11023_v61 = vpop.eup %11022  ;;  %v3925_v4 = vadd.f32 1.0, %v11021_v5 }
0x1106   : > { %v3924_v0 = vadd.f32 1.0, %v11023_v61 }
0x1107   : > { %11028 = vrcp.f32 %v3925_v4 }
0x1108   : > { %11030 = vrcp.f32 %v3924_v0 }
0x110d   : > { %v12367_v44 = vpop.eup %11024 }
0x110e   : > { %v12369_v27 = vpop.eup %11026  ;;  %v3947_v14 = vmul.f32 %v12367_v44, %v3937_v48 }
0x110f   : > { %v3946_v51 = vmul.f32 %v12369_v27, %v3935_v34 }
0x1110   : > { %3956 = vrot.lane.b32.xlu1 %v3947_v14, %s13628_s26 }
0x1111   : > { %v12374_v3 = vpop.eup %11028  ;;  %3954 = vrot.lane.b32.xlu0 %v3946_v51, %s13628_s26 }
0x1112   : > { %v12377_v58 = vpop.eup %11030  ;;  %v3949_v26 = vmul.f32 %v12374_v3, %v3941_v35 }
0x1113   : > { %v3948_v54 = vmul.f32 %v12377_v58, %v3939_v56 }
0x1114   : > { %3960 = vrot.lane.b32.xlu1 %v3949_v26, %s13628_s26 }
0x1115   : > { %3958 = vrot.lane.b32.xlu0 %v3948_v54, %s13628_s26 }
0x1118   : > { %4465 = vrot.lane.b32.xlu1 %v12301_v57, %s13637_s21 }
0x1119   : > { %4463 = vrot.lane.b32.xlu0 %v12296_v41, %s13637_s21 }
0x111c   : > { %4469 = vrot.lane.b32.xlu1 %v12309_v19, %s13637_s21 }
0x111d   : > { %4467 = vrot.lane.b32.xlu0 %v12305_v10, %s13637_s21 }
0x1182   : > { %v3957_v36 = vpop.permute.xlu1 %3956 }
0x1183   : > { %v3955_v60 = vpop.permute.xlu0 %3954 }
0x1184   : > { %10016 = vmatprep.mubr.msk.f32.mxu0 %vm936_vm0, %v3955_v60 }
0x1185   : > { %10017 = vmatmul.mubr.msk.f32.vlgmr.msra.gmra.mrb[44].mxu0 %vm936_vm0, %v3957_v36 }
0x1186   : > { %10037 = vmatpush3.msra.mxu0 %v12059_v45  ;;  %v3961_v50 = vpop.permute.xlu1 %3960 }
0x1187   : > { %v3959_v9 = vpop.permute.xlu0 %3958  ;;  %10649 = vmatprep.subr.bf16.mxu0 %v12102_v24 }
0x1188   : > { %10019 = vmatprep.mubr.msk.f32.mxu0 %vm936_vm0, %v3959_v9 }
0x1189   : > { %10020 = vmatmul.mubr.msk.f32.gmra.mrb[46].mxu0 %vm936_vm0, %v3961_v50 }
0x118a   : > { %10038 = vmatprep.mubr.msk.f32.mxu0 %vm1070_vm1, %v12334_v52 }
0x118b   : > { %v4464_v35 = vpop.permute.xlu0 %4463 }
0x118d   : > { %10039 = vmatmul.mubr.msk.f32.vlgmr.msra.gmra.mrb[48].mxu0 %vm1070_vm1, %v12332_v20 }
0x118e   : > { %10041 = vmatprep.mubr.msk.f32.mxu0 %vm1070_vm1, %v12338_v40  ;;  %10651 = vmatpush3.bf16.msra.mxu0 %v12102_v24 }
0x118f   : > { %10653 = vmatprep.subr.bf16.mxu0 %v12105_v6  ;;  %v4468_v50 = vpop.permute.xlu0 %4467 }
0x1191   : > { %10042 = vmatmul.mubr.msk.f32.gmra.mrb[50].mxu0 %vm1070_vm1, %v12336_v53 }
0x1192   : > { %10655 = vmatpush3.bf16.msra.mxu0 %v12105_v6 }
0x1193   : > { %10665 = vmatprep.subr.bf16.mxu0 %v12234_v16 }
0x1258   : > { %v12409_v45 = vpop.f32.mrb[44].mxu0 }
0x1259   : > { %v12411_v52 = vpop.f32.mrb[45].mxu0 }
0x125c   : > { %v12413_v49 = vpop.f32.mrb[46].mxu0 }
0x125d   : > { %v12415_v20 = vpop.f32.mrb[47].mxu0 }
0x1260   : > { %v10040_v40 = vpop.f32.mrb[48].mxu0 }
0x1261   : > { %v12418_v24 = vadd.f32 %v10040_v40, %v12120_v30  ;;  %v4319_v15 = vpop.f32.mrb[49].mxu0 }
0x1262   : > { %v12421_v46 = vadd.f32 %v12120_v30, %v4319_v15 }
0x1263   : > { %v4436_v6 = vadd.f32 %v12340_v63, %v12418_v24 }
0x1264   : > { %v4435_v53 = vadd.f32 %v12342_v31, %v12421_v46  ;;  %v10043_v22 = vpop.f32.mrb[50].mxu0 }
0x1265   : > { %v9056_v23 = vmul.f32 -1.442695, %v4436_v6  ;;  %v12428_v59 = vadd.f32 %v10043_v22, %v12120_v30  ;;  %v4329_v11 = vpop.f32.mrb[51].mxu0 }
0x1266   : > { %v9055_v43 = vmul.f32 -1.442695, %v4435_v53  ;;  %v12431_v39 = vadd.f32 %v12120_v30, %v4329_v11 }
0x1267   : > { %11032 = vpow2.f32 %v9056_v23  ;;  %v4438_v8 = vadd.f32 %v12344_v18, %v12428_v59  ;;  %v4466_v18 = vpop.permute.xlu1 %4465 }
0x1268   : > { %11034 = vpow2.f32 %v9055_v43  ;;  %v4437_v63 = vadd.f32 %v12346_v62, %v12431_v39 }
0x1269   : > { %v9058_v5 = vmul.f32 -1.442695, %v4438_v8 }
0x126a   : > { %v9057_v31 = vmul.f32 -1.442695, %v4437_v63 }
0x126b   : > { %11036 = vpow2.f32 %v9058_v5  ;;  %v4470_v60 = vpop.permute.xlu1 %4469 }
0x126c   : > { %11038 = vpow2.f32 %v9057_v31 }
0x1271   : > { %v11033_v61 = vpop.eup %11032 }
0x1272   : > { %v11035_v4 = vpop.eup %11034  ;;  %v4452_v0 = vadd.f32 1.0, %v11033_v61 }
0x1273   : > { %v4451_v48 = vadd.f32 1.0, %v11035_v4 }
0x1274   : > { %11040 = vrcp.f32 %v4452_v0 }
0x1275   : > { %v11037_v34 = vpop.eup %11036  ;;  %11042 = vrcp.f32 %v4451_v48 }
0x1276   : > { %v11039_v30 = vpop.eup %11038  ;;  %v4454_v14 = vadd.f32 1.0, %v11037_v34 }
0x1277   : > { %v4453_v51 = vadd.f32 1.0, %v11039_v30 }
0x1278   : > { %11044 = vrcp.f32 %v4454_v14 }
0x1279   : > { %11046 = vrcp.f32 %v4453_v51 }
0x127e   : > { %v12437_v56 = vpop.eup %11040 }
0x127f   : > { %v12439_v62 = vpop.eup %11042  ;;  %v4476_v26 = vmul.f32 %v12437_v56, %v4466_v18  ;;  %v4609_v51 = vmul.f32 %v12437_v56, %v12301_v57 }
0x1280   : > { %v4475_v54 = vmul.f32 %v12439_v62, %v4464_v35 }
0x1281   : > { %4485 = vrot.lane.b32.xlu1 %v4476_v26, %s13628_s26 }
0x1282   : > { %v12444_v36 = vpop.eup %11044  ;;  %4483 = vrot.lane.b32.xlu0 %v4475_v54, %s13628_s26 }
0x1283   : > { %v12447_v9 = vpop.eup %11046  ;;  %v4478_v40 = vmul.f32 %v12444_v36, %v4470_v60 }
0x1284   : > { %v4477_v15 = vmul.f32 %v12447_v9, %v4468_v50  ;;  %v4611_v50 = vmul.f32 %v12444_v36, %v12309_v19 }
0x1285   : > { %4489 = vrot.lane.b32.xlu1 %v4478_v40, %s13628_s26 }
0x1286   : > { %4487 = vrot.lane.b32.xlu0 %v4477_v15, %s13628_s26 }
0x12f3   : > { %v4486_v6 = vpop.permute.xlu1 %4485 }
0x12f4   : > { %v4484_v53 = vpop.permute.xlu0 %4483 }
0x12f5   : > { %10066 = vmatprep.mubr.msk.f32.mxu0 %vm936_vm0, %v4484_v53 }
0x12f6   : > { %10067 = vmatmul.mubr.msk.f32.vlgmr.msra.gmra.mrb[52].mxu0 %vm936_vm0, %v4486_v6 }
0x12f7   : > { %10667 = vmatpush3.bf16.msra.mxu0 %v12234_v16  ;;  %v4490_v23 = vpop.permute.xlu1 %4489 }
0x12f8   : > { %v4488_v22 = vpop.permute.xlu0 %4487  ;;  %10669 = vmatprep.subr.bf16.mxu0 %v12237_v17 }
0x12f9   : > { %10069 = vmatprep.mubr.msk.f32.mxu0 %vm936_vm0, %v4488_v22 }
0x12fa   : > { %10070 = vmatmul.mubr.msk.f32.gmra.mrb[54].mxu0 %vm936_vm0, %v4490_v23 }
0x12fb   : > { %10671 = vmatpush3.bf16.msra.mxu0 %v12237_v17 }
0x12fc   : > { %10681 = vmatprep.subr.bf16.mxu0 %v12322_v33 }
0x13c9   : > { %v10068_v11 = vpop.f32.mrb[52].mxu0 }
0x13ca   : > { %4590 = vrot.lane.b32.xlu1 %v10068_v11, %s13638_s22  ;;  %v4565_v43 = vpop.f32.mrb[53].mxu0 }
0x13cb   : > { %4588 = vrot.lane.b32.xlu0 %v4565_v43, %s13638_s22 }
0x13cd   : > { %v10071_v8 = vpop.f32.mrb[54].mxu0 }
0x13ce   : > { %4594 = vrot.lane.b32.xlu1 %v10071_v8, %s13638_s22  ;;  %v4575_v16 = vpop.f32.mrb[55].mxu0 }
0x13cf   : > { %4592 = vrot.lane.b32.xlu0 %v4575_v16, %s13638_s22  ;;  %v4080_v16 = vmul.f32 %v12367_v44, %v12261_v21  ;;  %v4082_v21 = vmul.f32 %v12374_v3, %v12273_v55 }
0x143c   : > { %v4591_v63 = vpop.permute.xlu1 %4590 }
0x143d   : > { %v4601_v5 = vadd.f32 %v4591_v63, %v12418_v24  ;;  %v4589_v31 = vpop.permute.xlu0 %4588 }
0x143e   : > { %v4600_v17 = vadd.f32 %v4589_v31, %v12421_v46  ;;  %v4613_v46 = vsub.f32 1.0, %v12437_v56  ;;  %v4079_v31 = vmul.f32 %v12369_v27, %v12265_v38  ;;  %v4081_v38 = vmul.f32 %v12377_v58, %v12277_v2 }
0x143f   : > { %11048 = vtanh.f32 %v4601_v5 }
0x1440   : > { %11050 = vtanh.f32 %v4600_v17  ;;  %v4595_v61 = vpop.permute.xlu1 %4594 }
0x1441   : > { %v4603_v4 = vadd.f32 %v4595_v61, %v12428_v59  ;;  %v4593_v0 = vpop.permute.xlu0 %4592 }
0x1442   : > { %v4602_v48 = vadd.f32 %v4593_v0, %v12431_v39  ;;  %v4612_v39 = vsub.f32 1.0, %v12439_v62 }
0x1443   : > { %11052 = vtanh.f32 %v4603_v4  ;;  %v4086_v4 = vsub.f32 1.0, %v12374_v3 }
0x1444   : > { %11054 = vtanh.f32 %v4602_v48 }
0x1449   : > { %v11049_v34 = vpop.eup %11048 }
0x144a   : > { %v11051_v30 = vpop.eup %11050  ;;  %4622 = vrot.lane.b32.xlu1 %v11049_v34, %s13638_s22  ;;  %v4085_v34 = vsub.f32 1.0, %v12377_v58 }
0x144b   : > { %4620 = vrot.lane.b32.xlu0 %v11051_v30, %s13638_s22 }
0x144d   : > { %v11053_v24 = vpop.eup %11052 }
0x144e   : > { %v11055_v14 = vpop.eup %11054  ;;  %4626 = vrot.lane.b32.xlu1 %v11053_v24, %s13638_s22 }
0x144f   : > { %4624 = vrot.lane.b32.xlu0 %v11055_v14, %s13638_s22 }
0x1452   : > { %4061 = vrot.lane.b32.xlu1 %v12409_v45, %s13638_s22  ;;  %v4608_v45 = vmul.f32 %v12439_v62, %v12296_v41  ;;  %v4610_v41 = vmul.f32 %v12447_v9, %v12305_v10 }
0x1453   : > { %4059 = vrot.lane.b32.xlu0 %v12411_v52, %s13638_s22 }
0x1456   : > { %4065 = vrot.lane.b32.xlu1 %v12413_v49, %s13638_s22  ;;  %v4615_v49 = vsub.f32 1.0, %v12444_v36 }
0x1457   : > { %4063 = vrot.lane.b32.xlu0 %v12415_v20, %s13638_s22  ;;  %v4614_v20 = vsub.f32 1.0, %v12447_v9 }
0x14bc   : > { %v4623_v59 = vpop.permute.xlu1 %4622 }
0x14bd   : > { %v4633_v18 = vmul.f32 %v4623_v59, %v4613_v46  ;;  %v4621_v35 = vpop.permute.xlu0 %4620  ;;  %v5177_v46 = vld [vmem:[%s12512_s2 + $0x10] sm:$0xff]  ;;  %v5178_v59 = vld [vmem:[%s12512_s2 + $0x18] sm:$0xff] }
0x14be   : > { %v4632_v52 = vmul.f32 %v4621_v35, %v4612_v39  ;;  %v12550_v3 = vpack.c.bf16 %v5178_v59, %v5177_v46 }
0x14bf   : > { %v4637_v26 = vadd.f32 %v4633_v18, %v4609_v51 }
0x14c0   : > { %v4636_v54 = vadd.f32 %v4632_v52, %v4608_v45  ;;  %v4627_v60 = vpop.permute.xlu1 %4626 }
0x14c1   : > { %4641 = vst.msk [vmem:[#allocation2 + $0x8] sm:$0xff] %vm936_vm0, %v4637_v26  ;;  %v4635_v40 = vmul.f32 %v4627_v60, %v4615_v49  ;;  %v4625_v57 = vpop.permute.xlu0 %4624 }
0x14c2   : > { %4640 = vst.msk [vmem:[#allocation2] sm:$0xff] %vm936_vm0, %v4636_v54  ;;  %v4634_v56 = vmul.f32 %v4625_v57, %v4614_v20  ;;  %v10656_v62 = vpack.c.bf16 %v4637_v26, %v4636_v54 }
0x14c3   : > { %v4639_v15 = vadd.f32 %v4635_v40, %v4611_v50 }
0x14c4   : > { %v4638_v6 = vadd.f32 %v4634_v56, %v4610_v41  ;;  %v4062_v53 = vpop.permute.xlu1 %4061  ;;  %10657 = vmatprep.subr.bf16.mxu1 %v10656_v62 }
0x14c5   : > { %4643 = vst.msk [vmem:[#allocation2 + $0x18] sm:$0xff] %vm936_vm0, %v4639_v15  ;;  %v4072_v22 = vadd.f32 %v4062_v53, %v12352_v7  ;;  %10659 = vmatpush3.bf16.msra.mxu1 %v10656_v62  ;;  %v4060_v23 = vpop.permute.xlu0 %4059  ;;  %v5175_v7 = vld [vmem:[%s12512_s2] sm:$0xff] }
0x14c6   : > { %4642 = vst.msk [vmem:[#allocation2 + $0x10] sm:$0xff] %vm936_vm0, %v4638_v6  ;;  %v4071_v19 = vadd.f32 %v4060_v23, %v12355_v1  ;;  %v10660_v36 = vpack.c.bf16 %v4639_v15, %v4638_v6  ;;  %v5176_v1 = vld [vmem:[%s12512_s2 + $0x8] sm:$0xff] }
0x14c7   : > { %11056 = vtanh.f32 %v4072_v22 }
0x14c8   : > { %11058 = vtanh.f32 %v4071_v19  ;;  %v4066_v10 = vpop.permute.xlu1 %4065  ;;  %10661 = vmatprep.subr.bf16.mxu1 %v10660_v36  ;;  %v12577_v18 = vld [vmem:[#allocation2 + $0x8] sm:$0xff] }
0x14c9   : > { %v4074_v9 = vadd.f32 %v4066_v10, %v12360_v12  ;;  %10663 = vmatpush3.bf16.msra.mxu1 %v10660_v36  ;;  %v4064_v11 = vpop.permute.xlu0 %4063  ;;  %v12572_v51 = vld [vmem:[#allocation2] sm:$0xff] }
0x14ca   : > { %v4073_v43 = vadd.f32 %v4064_v11, %v12363_v13  ;;  %10673 = vmatprep.subr.bf16.mxu1 %v12202_v28 }
0x14cb   : > { %11060 = vtanh.f32 %v4074_v9 }
0x14cc   : > { %11062 = vtanh.f32 %v4073_v43  ;;  %10081 = vmatmul.mubr.msk.f32.vlgmr.msra.gmra.mrb[56].mxu1 %vm936_vm0, %v12200_v29  ;;  %v12589_v45 = vld [vmem:[#allocation2 + $0x18] sm:$0xff] }
0x14cd   : > { %10083 = vmatprep.mubr.msk.f32.mxu1 %vm936_vm0, %v12206_v37  ;;  %10675 = vmatpush3.bf16.msra.mxu1 %v12202_v28  ;;  %v12519_v37 = vpack.c.bf16 %v5176_v1, %v5175_v7  ;;  %v12585_v35 = vld [vmem:[#allocation2 + $0x10] sm:$0xff] }
0x14ce   : > { %10677 = vmatprep.subr.bf16.mxu1 %v12219_v42 }
0x14d0   : > { %10084 = vmatmul.mubr.msk.f32.gmra.mrb[58].mxu1 %vm936_vm0, %v12216_v47  ;;  %v4084_v47 = vsub.f32 1.0, %v12367_v44 }
0x14d1   : > { %v11057_v29 = vpop.eup %11056  ;;  %10679 = vmatpush3.bf16.msra.mxu1 %v12219_v42  ;;  %v4083_v42 = vsub.f32 1.0, %v12369_v27 }
0x14d2   : > { %v11059_v28 = vpop.eup %11058  ;;  %4093 = vrot.lane.b32.xlu1 %v11057_v29, %s13638_s22  ;;  %10689 = vmatprep.subr.bf16.mxu1 %v12519_v37 }
0x14d3   : > { %4091 = vrot.lane.b32.xlu0 %v11059_v28, %s13638_s22 }
0x14d5   : > { %v11061_v12 = vpop.eup %11060 }
0x14d6   : > { %v11063_v13 = vpop.eup %11062  ;;  %4097 = vrot.lane.b32.xlu1 %v11061_v12, %s13638_s22 }
0x14d7   : > { %4095 = vrot.lane.b32.xlu0 %v11063_v13, %s13638_s22 }
0x1544   : > { %v4094_v8 = vpop.permute.xlu1 %4093 }
0x1545   : > { %v4104_v63 = vmul.f32 %v4094_v8, %v4084_v47  ;;  %v4092_v5 = vpop.permute.xlu0 %4091 }
0x1546   : > { %v4103_v17 = vmul.f32 %v4092_v5, %v4083_v42 }
0x1547   : > { %v4108_v61 = vadd.f32 %v4104_v63, %v4080_v16 }
0x1548   : > { %v4107_v0 = vadd.f32 %v4103_v17, %v4079_v31  ;;  %v4098_v48 = vpop.permute.xlu1 %4097 }
0x1549   : > { %4112 = vst.msk [vmem:[#allocation2 + $0x28] sm:$0xff] %vm936_vm0, %v4108_v61  ;;  %v4106_v44 = vmul.f32 %v4098_v48, %v4086_v4  ;;  %v4096_v30 = vpop.permute.xlu0 %4095  ;;  %v5180_v48 = vld [vmem:[%s12637_s23 + $0x8] sm:$0xff] }
0x154a   : > { %4111 = vst.msk [vmem:[#allocation2 + $0x20] sm:$0xff] %vm936_vm0, %v4107_v0  ;;  %v4105_v27 = vmul.f32 %v4096_v30, %v4085_v34  ;;  %v5179_v0 = vld [vmem:[%s12637_s23] sm:$0xff] }
0x154b   : > { %v4110_v24 = vadd.f32 %v4106_v44, %v4082_v21  ;;  %v12641_v21 = vpack.c.bf16 %v5180_v48, %v5179_v0 }
0x154c   : > { %v4109_v14 = vadd.f32 %v4105_v27, %v4081_v38 }
0x154d   : > { %4114 = vst.msk [vmem:[#allocation2 + $0x38] sm:$0xff] %vm936_vm0, %v4110_v24 }
0x154e   : > { %4113 = vst.msk [vmem:[#allocation2 + $0x30] sm:$0xff] %vm936_vm0, %v4109_v14 }
0x1550   : > { %v12544_v39 = vld [vmem:[#allocation2 + $0x28] sm:$0xff] }
0x1551   : > { %4992 = vrot.lane.b32.xlu1 %v12544_v39, %s13637_s21  ;;  %v12548_v55 = vld [vmem:[#allocation2 + $0x20] sm:$0xff] }
0x1552   : > { %4990 = vrot.lane.b32.xlu0 %v12548_v55, %s13637_s21  ;;  %10108 = vmatprep.mubr.msk.f32.mxu1 %vm936_vm0, %v12548_v55 }
0x1553   : > { %10109 = vmatmul.mubr.msk.f32.vlgmr.msra.gmra.mrb[60].mxu1 %vm936_vm0, %v12544_v39 }
0x1554   : > { %10691 = vmatpush3.bf16.msra.mxu1 %v12519_v37  ;;  %v12559_v2 = vld [vmem:[#allocation2 + $0x38] sm:$0xff] }
0x1555   : > { %4996 = vrot.lane.b32.xlu1 %v12559_v2, %s13637_s21  ;;  %v12563_v58 = vld [vmem:[#allocation2 + $0x30] sm:$0xff]  ;;  %10693 = vmatprep.subr.bf16.mxu1 %v12550_v3 }
0x1556   : > { %4994 = vrot.lane.b32.xlu0 %v12563_v58, %s13637_s21  ;;  %10111 = vmatprep.mubr.msk.f32.mxu1 %vm936_vm0, %v12563_v58 }
0x1557   : > { %10112 = vmatmul.mubr.msk.f32.gmra.mrb[62].mxu1 %vm936_vm0, %v12559_v2 }
0x1558   : > { %10695 = vmatpush3.bf16.msra.mxu1 %v12550_v3  ;;  %10136 = vmatprep.mubr.msk.f32.mxu1 %vm936_vm0, %v12572_v51 }
0x1559   : > { %5317 = vrot.lane.b32.xlu1 %v12577_v18, %s13637_s21 }
0x155a   : > { %5315 = vrot.lane.b32.xlu0 %v12572_v51, %s13637_s21 }
0x155b   : > { %10137 = vmatmul.mubr.msk.f32.vlgmr.msra.gmra.mrb[64].mxu1 %vm936_vm0, %v12577_v18 }
0x155c   : > { %10139 = vmatprep.mubr.msk.f32.mxu1 %vm936_vm0, %v12585_v35 }
0x155d   : > { %5321 = vrot.lane.b32.xlu1 %v12589_v45, %s13637_s21 }
0x155e   : > { %5319 = vrot.lane.b32.xlu0 %v12585_v35, %s13637_s21 }
0x155f   : > { %10140 = vmatmul.mubr.msk.f32.gmra.mrb[66].mxu1 %vm936_vm0, %v12589_v45 }
0x159f   : > { %v10082_v52 = vpop.f32.mrb[56].mxu1 }
0x15a0   : > { %v4743_v26 = vpop.f32.mrb[57].mxu1 }
0x15a1   : > { %10094 = vmatprep.mubr.msk.f32.mxu0 %vm936_vm0, %v4743_v26 }
0x15a2   : > { %10095 = vmatmul.mubr.msk.f32.vlgmr.msra.gmra.mrb[56].mxu0 %vm936_vm0, %v10082_v52 }
0x15a3   : > { %v10085_v49 = vpop.f32.mrb[58].mxu1  ;;  %10683 = vmatpush3.bf16.msra.mxu0 %v12322_v33  ;;  %v12611_v33 = vld [vmem:[%s12608_s24] ss:$0 sm:$0xff] }
0x15a4   : > { %v4753_v54 = vpop.f32.mrb[59].mxu1  ;;  %10685 = vmatprep.subr.bf16.mxu0 %v12325_v32 }
0x15a5   : > { %10097 = vmatprep.mubr.msk.f32.mxu0 %vm936_vm0, %v4753_v54 }
0x15a6   : > { %10098 = vmatmul.mubr.msk.f32.gmra.mrb[58].mxu0 %vm936_vm0, %v10085_v49 }
0x15a7   : > { %10687 = vmatpush3.bf16.msra.mxu0 %v12325_v32 }
0x15a8   : > { %10697 = vmatprep.subr.bf16.mxu0 %v12641_v21 }
0x15c3   : > { %v4993_v52 = vpop.permute.xlu1 %4992 }
0x15c4   : > { %v4991_v26 = vpop.permute.xlu0 %4990 }
0x1626   : > { %v10110_v60 = vpop.f32.mrb[60].mxu1 }
0x1627   : > { %v4943_v20 = vpop.f32.mrb[61].mxu1 }
0x162a   : > { %v10113_v50 = vpop.f32.mrb[62].mxu1 }
0x162b   : > { %v4953_v40 = vpop.f32.mrb[63].mxu1 }
0x162e   : > { %v10138_v57 = vpop.f32.mrb[64].mxu1 }
0x162f   : > { %v5262_v41 = vpop.f32.mrb[65].mxu1  ;;  %v5288_v6 = vadd.f32 %v10138_v57, %v12611_v33 }
0x1630   : > { %v5287_v22 = vadd.f32 %v12611_v33, %v5262_v41 }
0x1631   : > { %v9094_v9 = vmul.f32 -1.442695, %v5288_v6 }
0x1632   : > { %v10141_v56 = vpop.f32.mrb[66].mxu1  ;;  %v9093_v29 = vmul.f32 -1.442695, %v5287_v22 }
0x1633   : > { %v5272_v62 = vpop.f32.mrb[67].mxu1  ;;  %v5290_v11 = vadd.f32 %v10141_v56, %v12611_v33 }
0x1634   : > { %v5289_v28 = vadd.f32 %v12611_v33, %v5272_v62 }
0x1635   : > { %v9096_v42 = vmul.f32 -1.442695, %v5290_v11 }
0x1636   : > { %v9095_v63 = vmul.f32 -1.442695, %v5289_v28 }
0x1675   : > { %v10096_v15 = vpop.f32.mrb[56].mxu0 }
0x1676   : > { %v12615_v32 = vadd.f32 %v10096_v15, %v12349_v25  ;;  %v4846_v53 = vpop.f32.mrb[57].mxu0 }
0x1677   : > { %v12619_v23 = vadd.f32 %v12349_v25, %v4846_v53 }
0x1678   : > { %v4963_v19 = vadd.f32 %v10110_v60, %v12615_v32 }
0x1679   : > { %v4962_v36 = vadd.f32 %v4943_v20, %v12619_v23  ;;  %v10099_v10 = vpop.f32.mrb[58].mxu0  ;;  %v4997_v20 = vpop.permute.xlu1 %4996 }
0x167a   : > { %v9081_v43 = vmul.f32 -1.442695, %v4963_v19  ;;  %v12625_v7 = vadd.f32 %v10099_v10, %v12349_v25  ;;  %v4856_v1 = vpop.f32.mrb[59].mxu0 }
0x167b   : > { %v9080_v12 = vmul.f32 -1.442695, %v4962_v36  ;;  %v12629_v13 = vadd.f32 %v12349_v25, %v4856_v1 }
0x167c   : > { %11064 = vpow2.f32 %v9081_v43  ;;  %v4965_v47 = vadd.f32 %v10113_v50, %v12625_v7 }
0x167d   : > { %11066 = vpow2.f32 %v9080_v12  ;;  %v4964_v8 = vadd.f32 %v4953_v40, %v12629_v13  ;;  %v4995_v40 = vpop.permute.xlu0 %4994  ;;  %v5318_v53 = vpop.permute.xlu1 %5317 }
0x167e   : > { %11068 = vpow2.f32 %v9094_v9  ;;  %v9083_v16 = vmul.f32 -1.442695, %v4965_v47  ;;  %v5181_v47 = vld [vmem:[%s12637_s23 + $0x10] sm:$0xff] }
0x167f   : > { %11070 = vpow2.f32 %v9093_v29  ;;  %v9082_v5 = vmul.f32 -1.442695, %v4964_v8  ;;  %v5182_v8 = vld [vmem:[%s12637_s23 + $0x18] sm:$0xff] }
0x1680   : > { %11072 = vpow2.f32 %v9083_v16 }
0x1681   : > { %11074 = vpow2.f32 %v9082_v5  ;;  %v5316_v36 = vpop.permute.xlu0 %5315  ;;  %v5322_v1 = vpop.permute.xlu1 %5321 }
0x1682   : > { %11076 = vpow2.f32 %v9096_v42 }
0x1683   : > { %11078 = vpow2.f32 %v9095_v63  ;;  %v12678_v63 = vpack.c.bf16 %v5182_v8, %v5181_v47 }
0x1685   : > { %v5320_v29 = vpop.permute.xlu0 %5319 }
0x1686   : > { %v11065_v31 = vpop.eup %11064 }
0x1687   : > { %v11067_v25 = vpop.eup %11066  ;;  %v4979_v17 = vadd.f32 1.0, %v11065_v31 }
0x1688   : > { %v11069_v61 = vpop.eup %11068  ;;  %v4978_v4 = vadd.f32 1.0, %v11067_v25 }
0x1689   : > { %v11071_v34 = vpop.eup %11070  ;;  %11080 = vrcp.f32 %v4979_v17  ;;  %v5304_v38 = vadd.f32 1.0, %v11069_v61 }
0x168a   : > { %v11073_v44 = vpop.eup %11072  ;;  %11082 = vrcp.f32 %v4978_v4  ;;  %v5303_v14 = vadd.f32 1.0, %v11071_v34 }
0x168b   : > { %v11075_v30 = vpop.eup %11074  ;;  %v4981_v27 = vadd.f32 1.0, %v11073_v44 }
0x168c   : > { %v11077_v24 = vpop.eup %11076  ;;  %v4980_v46 = vadd.f32 1.0, %v11075_v30 }
0x168d   : > { %v11079_v59 = vpop.eup %11078  ;;  %11084 = vrcp.f32 %v4981_v27  ;;  %v5306_v49 = vadd.f32 1.0, %v11077_v24 }
0x168e   : > { %11086 = vrcp.f32 %v4980_v46  ;;  %v5305_v54 = vadd.f32 1.0, %v11079_v59 }
0x168f   : > { %11088 = vrcp.f32 %v5304_v38 }
0x1690   : > { %11090 = vrcp.f32 %v5303_v14 }
0x1691   : > { %11092 = vrcp.f32 %v5306_v49 }
0x1692   : > { %11094 = vrcp.f32 %v5305_v54 }
0x1693   : > { %v12644_v60 = vpop.eup %11080 }
0x1694   : > { %v12646_v50 = vpop.eup %11082  ;;  %v5003_v57 = vmul.f32 %v12644_v60, %v4993_v52 }
0x1695   : > { %v5002_v41 = vmul.f32 %v12646_v50, %v4991_v26 }
0x1696   : > { %5012 = vrot.lane.b32.xlu1 %v5003_v57, %s13628_s26 }
0x1697   : > { %v12651_v56 = vpop.eup %11084  ;;  %5010 = vrot.lane.b32.xlu0 %v5002_v41, %s13628_s26  ;;  %v12708_v41 = vld [vmem:[%s12704_s1 + $0x20] sm:$0xff] }
0x1698   : > { %v12654_v62 = vpop.eup %11086  ;;  %v5005_v15 = vmul.f32 %v12651_v56, %v4997_v20  ;;  %10164 = vmatprep.mubr.msk.f32.mxu1 %vm936_vm0, %v12708_v41 }
0x1699   : > { %v12657_v6 = vpop.eup %11088  ;;  %v5004_v22 = vmul.f32 %v12654_v62, %v4995_v40 }
0x169a   : > { %v12660_v19 = vpop.eup %11090  ;;  %5016 = vrot.lane.b32.xlu1 %v5005_v15, %s13628_s26  ;;  %v5328_v10 = vmul.f32 %v12657_v6, %v5318_v53 }
0x169b   : > { %5014 = vrot.lane.b32.xlu0 %v5004_v22, %s13628_s26  ;;  %v12665_v9 = vpop.eup %11092  ;;  %v5327_v11 = vmul.f32 %v12660_v19, %v5316_v36  ;;  %v5465_v22 = vsub.f32 1.0, %v12657_v6 }
0x169c   : > { %v12668_v43 = vpop.eup %11094  ;;  %v5330_v28 = vmul.f32 %v12665_v9, %v5322_v1  ;;  %v5467_v8 = vsub.f32 1.0, %v12665_v9 }
0x169d   : > { %v5329_v12 = vmul.f32 %v12668_v43, %v5320_v29 }
0x169e   : > { %5337 = vrot.lane.b32.xlu1 %v5328_v10, %s13628_s26  ;;  %v5464_v10 = vsub.f32 1.0, %v12660_v19 }
0x169f   : > { %5335 = vrot.lane.b32.xlu0 %v5327_v11, %s13628_s26  ;;  %v5461_v11 = vmul.f32 %v12657_v6, %v12577_v18 }
0x16a2   : > { %5341 = vrot.lane.b32.xlu1 %v5330_v28, %s13628_s26  ;;  %v5460_v28 = vmul.f32 %v12660_v19, %v12572_v51  ;;  %v5462_v51 = vmul.f32 %v12668_v43, %v12585_v35 }
0x16a3   : > { %5339 = vrot.lane.b32.xlu0 %v5329_v12, %s13628_s26 }
0x1708   : > { %v5013_v42 = vpop.permute.xlu1 %5012 }
0x1709   : > { %v5011_v16 = vpop.permute.xlu0 %5010 }
0x170a   : > { %10122 = vmatprep.mubr.msk.f32.mxu0 %vm936_vm0, %v5011_v16 }
0x170b   : > { %10123 = vmatmul.mubr.msk.f32.vlgmr.msra.gmra.mrb[60].mxu0 %vm936_vm0, %v5013_v42 }
0x170c   : > { %v5017_v5 = vpop.permute.xlu1 %5016  ;;  %10699 = vmatpush3.bf16.msra.mxu0 %v12641_v21 }
0x170d   : > { %v5015_v31 = vpop.permute.xlu0 %5014  ;;  %10701 = vmatprep.subr.bf16.mxu0 %v12678_v63 }
0x170e   : > { %10125 = vmatprep.mubr.msk.f32.mxu0 %vm936_vm0, %v5015_v31  ;;  %v5463_v31 = vmul.f32 %v12665_v9, %v12589_v45 }
0x170f   : > { %10126 = vmatmul.mubr.msk.f32.gmra.mrb[62].mxu0 %vm936_vm0, %v5017_v5  ;;  %v5466_v5 = vsub.f32 1.0, %v12668_v43  ;;  %v5510_v43 = vld [vmem:[%s12741_s27 + $0x8] sm:$0xff] }
0x1710   : > { %v5338_v25 = vpop.permute.xlu1 %5337  ;;  %10703 = vmatpush3.bf16.msra.mxu0 %v12678_v63 }
0x1711   : > { %v5336_v17 = vpop.permute.xlu0 %5335 }
0x1712   : > { %10150 = vmatprep.mubr.msk.f32.mxu0 %vm936_vm0, %v5336_v17 }
0x1713   : > { %10151 = vmatmul.mubr.msk.f32.vlgmr.msra.gmra.mrb[64].mxu0 %vm936_vm0, %v5338_v25 }
0x1714   : > { %v5342_v4 = vpop.permute.xlu1 %5341 }
0x1715   : > { %v5340_v61 = vpop.permute.xlu0 %5339 }
0x1716   : > { %10153 = vmatprep.mubr.msk.f32.mxu0 %vm936_vm0, %v5340_v61 }
0x1717   : > { %10154 = vmatmul.mubr.msk.f32.gmra.mrb[66].mxu0 %vm936_vm0, %v5342_v4 }
0x17de   : > { %v10124_v0 = vpop.f32.mrb[60].mxu0 }
0x17df   : > { %v5092_v48 = vpop.f32.mrb[61].mxu0 }
0x17e2   : > { %v10127_v34 = vpop.f32.mrb[62].mxu0 }
0x17e3   : > { %v5102_v44 = vpop.f32.mrb[63].mxu0 }
0x17e6   : > { %v10152_v30 = vpop.f32.mrb[64].mxu0 }
0x17e7   : > { %5442 = vrot.lane.b32.xlu1 %v10152_v30, %s13638_s22  ;;  %v5417_v38 = vpop.f32.mrb[65].mxu0 }
0x17e8   : > { %5440 = vrot.lane.b32.xlu0 %v5417_v38, %s13638_s22 }
0x17ea   : > { %v10155_v27 = vpop.f32.mrb[66].mxu0 }
0x17eb   : > { %5446 = vrot.lane.b32.xlu1 %v10155_v27, %s13638_s22  ;;  %v5427_v24 = vpop.f32.mrb[67].mxu0  ;;  %v12753_v27 = vld [vmem:[%s12704_s1 + $0x30] sm:$0xff] }
0x17ec   : > { %5444 = vrot.lane.b32.xlu0 %v5427_v24, %s13638_s22  ;;  %v5511_v24 = vld [vmem:[%s12741_s27 + $0x10] sm:$0xff] }
0x1859   : > { %v5443_v14 = vpop.permute.xlu1 %5442 }
0x185a   : > { %v5453_v46 = vadd.f32 %v12611_v33, %v5443_v14  ;;  %v5441_v59 = vpop.permute.xlu0 %5440  ;;  %v5512_v14 = vld [vmem:[%s12741_s27 + $0x18] sm:$0xff] }
0x185b   : > { %v5452_v52 = vadd.f32 %v12611_v33, %v5441_v59 }
0x185c   : > { %11096 = vtanh.f32 %v5453_v46 }
0x185d   : > { %11098 = vtanh.f32 %v5452_v52  ;;  %v5447_v26 = vpop.permute.xlu1 %5446 }
0x185e   : > { %v5455_v49 = vadd.f32 %v12611_v33, %v5447_v26  ;;  %v5445_v54 = vpop.permute.xlu0 %5444 }
0x185f   : > { %v5454_v20 = vadd.f32 %v12611_v33, %v5445_v54  ;;  %v5506_v54 = vld [vmem:[%s12781_s3 + $0x8] sm:$0xff] }
0x1860   : > { %11100 = vtanh.f32 %v5455_v49  ;;  %v5505_v49 = vld [vmem:[%s12781_s3] sm:$0xff] }
0x1861   : > { %11102 = vtanh.f32 %v5454_v20  ;;  %v5507_v20 = vld [vmem:[%s12781_s3 + $0x10] sm:$0xff] }
0x1866   : > { %v11097_v40 = vpop.eup %11096 }
0x1867   : > { %v11099_v57 = vpop.eup %11098  ;;  %5474 = vrot.lane.b32.xlu1 %v11097_v40, %s13638_s22  ;;  %v12786_v40 = vpack.c.bf16 %v5506_v54, %v5505_v49 }
0x1868   : > { %5472 = vrot.lane.b32.xlu0 %v11099_v57, %s13638_s22  ;;  %v5508_v57 = vld [vmem:[%s12781_s3 + $0x18] sm:$0xff] }
0x1869   : > { %10713 = vmatprep.subr.bf16.mxu0 %v12786_v40 }
0x186a   : > { %v11101_v15 = vpop.eup %11100  ;;  %10715 = vmatpush3.bf16.msra.mxu0 %v12786_v40 }
0x186b   : > { %v11103_v53 = vpop.eup %11102  ;;  %5478 = vrot.lane.b32.xlu1 %v11101_v15, %s13638_s22  ;;  %v12789_v15 = vpack.c.bf16 %v5508_v57, %v5507_v20 }
0x186c   : > { %5476 = vrot.lane.b32.xlu0 %v11103_v53, %s13638_s22  ;;  %v5140_v53 = vsub.f32 1.0, %v12644_v60 }
0x186d   : > { %10717 = vmatprep.subr.bf16.mxu0 %v12789_v15 }
0x186e   : > { %10719 = vmatpush3.bf16.msra.mxu0 %v12789_v15 }
0x186f   : > { %5117 = vrot.lane.b32.xlu1 %v10124_v0, %s13638_s22 }
0x1870   : > { %5115 = vrot.lane.b32.xlu0 %v5092_v48, %s13638_s22 }
0x1873   : > { %5121 = vrot.lane.b32.xlu1 %v10127_v34, %s13638_s22 }
0x1874   : > { %5119 = vrot.lane.b32.xlu0 %v5102_v44, %s13638_s22  ;;  %v12747_v44 = vld [vmem:[%s12704_s1 + $0x28] sm:$0xff] }
0x18d9   : > { %v5475_v36 = vpop.permute.xlu1 %5474 }
0x18da   : > { %v5485_v1 = vmul.f32 %v5475_v36, %v5465_v22  ;;  %v5473_v29 = vpop.permute.xlu0 %5472  ;;  %v5139_v36 = vsub.f32 1.0, %v12646_v50 }
0x18db   : > { %v5484_v12 = vmul.f32 %v5473_v29, %v5464_v10  ;;  %v5136_v10 = vmul.f32 %v12644_v60, %v12544_v39  ;;  %v5135_v29 = vmul.f32 %v12646_v50, %v12548_v55  ;;  %v5137_v55 = vmul.f32 %v12654_v62, %v12563_v58 }
0x18dc   : > { %v5489_v47 = vadd.f32 %v5485_v1, %v5461_v11 }
0x18dd   : > { %v5488_v42 = vadd.f32 %v5484_v12, %v5460_v28  ;;  %v5479_v16 = vpop.permute.xlu1 %5478 }
0x18de   : > { %5493 = vst.msk [vmem:[#allocation2 + $0x8] sm:$0xff] %vm936_vm0, %v5489_v47  ;;  %v5487_v25 = vmul.f32 %v5479_v16, %v5467_v8  ;;  %v5477_v18 = vpop.permute.xlu0 %5476  ;;  %v5141_v16 = vsub.f32 1.0, %v12654_v62 }
0x18df   : > { %5492 = vst.msk [vmem:[#allocation2] sm:$0xff] %vm936_vm0, %v5488_v42  ;;  %v5486_v6 = vmul.f32 %v5477_v18, %v5466_v5  ;;  %v10704_v19 = vpack.c.bf16 %v5489_v47, %v5488_v42  ;;  %v5142_v47 = vsub.f32 1.0, %v12651_v56  ;;  %v5138_v5 = vmul.f32 %v12651_v56, %v12559_v2 }
0x18e0   : > { %v5491_v17 = vadd.f32 %v5487_v25, %v5463_v31 }
0x18e1   : > { %v5490_v61 = vadd.f32 %v5486_v6, %v5462_v51  ;;  %v5118_v4 = vpop.permute.xlu1 %5117  ;;  %10705 = vmatprep.subr.bf16.mxu1 %v10704_v19 }
0x18e2   : > { %5495 = vst.msk [vmem:[#allocation2 + $0x18] sm:$0xff] %vm936_vm0, %v5491_v17  ;;  %v5128_v0 = vadd.f32 %v5118_v4, %v12615_v32  ;;  %10707 = vmatpush3.bf16.msra.mxu1 %v10704_v19  ;;  %v5116_v45 = vpop.permute.xlu0 %5115  ;;  %v5509_v32 = vld [vmem:[%s12741_s27] sm:$0xff]  ;;  %v5514_v4 = vld [vmem:[%s12872_s30 + $0x8] sm:$0xff] }
0x18e3   : > { %5494 = vst.msk [vmem:[#allocation2 + $0x10] sm:$0xff] %vm936_vm0, %v5490_v61  ;;  %v5127_v9 = vadd.f32 %v5116_v45, %v12619_v23  ;;  %v10708_v48 = vpack.c.bf16 %v5491_v17, %v5490_v61  ;;  %v12749_v30 = vpack.c.bf16 %v5510_v43, %v5509_v32 }
0x18e4   : > { %11104 = vtanh.f32 %v5128_v0  ;;  %v5515_v0 = vld [vmem:[%s12872_s30 + $0x10] sm:$0xff] }
0x18e5   : > { %11106 = vtanh.f32 %v5127_v9  ;;  %v5122_v35 = vpop.permute.xlu1 %5121  ;;  %10709 = vmatprep.subr.bf16.mxu1 %v10708_v48  ;;  %v5516_v9 = vld [vmem:[%s12872_s30 + $0x18] sm:$0xff] }
0x18e6   : > { %v5130_v34 = vadd.f32 %v5122_v35, %v12625_v7  ;;  %10711 = vmatpush3.bf16.msra.mxu1 %v10708_v48  ;;  %v5120_v23 = vpop.permute.xlu0 %5119  ;;  %v12763_v7 = vld [vmem:[%s12704_s1 + $0x38] sm:$0xff]  ;;  %v12837_v62 = vld [vmem:[#allocation2] sm:$0xff]  ;;  %v12880_v35 = vpack.c.bf16 %v5516_v9, %v5515_v0 }
0x18e7   : > { %v5129_v38 = vadd.f32 %v5120_v23, %v12629_v13  ;;  %10721 = vmatprep.subr.bf16.mxu1 %v12749_v30  ;;  %v12766_v13 = vpack.c.bf16 %v5512_v14, %v5511_v24 }
0x18e8   : > { %11108 = vtanh.f32 %v5130_v34 }
0x18e9   : > { %11110 = vtanh.f32 %v5129_v38  ;;  %10165 = vmatmul.mubr.msk.f32.vlgmr.msra.gmra.mrb[68].mxu1 %vm936_vm0, %v12747_v44 }
0x18ea   : > { %10167 = vmatprep.mubr.msk.f32.mxu1 %vm936_vm0, %v12753_v27  ;;  %10723 = vmatpush3.bf16.msra.mxu1 %v12749_v30  ;;  %v12850_v51 = vld [vmem:[#allocation2 + $0x10] sm:$0xff] }
0x18eb   : > { %10725 = vmatprep.subr.bf16.mxu1 %v12766_v13 }
0x18ed   : > { %10168 = vmatmul.mubr.msk.f32.gmra.mrb[70].mxu1 %vm936_vm0, %v12763_v7 }
0x18ee   : > { %v11105_v46 = vpop.eup %11104  ;;  %10727 = vmatpush3.bf16.msra.mxu1 %v12766_v13 }
0x18ef   : > { %v11107_v59 = vpop.eup %11106  ;;  %5149 = vrot.lane.b32.xlu1 %v11105_v46, %s13638_s22  ;;  %10737 = vmatprep.subr.bf16.mxu1 %v12519_v37  ;;  %v12894_v46 = vld [vmem:[%s12891_s25] ss:$0 sm:$0xff] }
0x18f0   : > { %5147 = vrot.lane.b32.xlu0 %v11107_v59, %s13638_s22 }
0x18f2   : > { %v11109_v52 = vpop.eup %11108 }
0x18f3   : > { %v11111_v26 = vpop.eup %11110  ;;  %5153 = vrot.lane.b32.xlu1 %v11109_v52, %s13638_s22 }
0x18f4   : > { %5151 = vrot.lane.b32.xlu0 %v11111_v26, %s13638_s22 }
0x1961   : > { %v5150_v22 = vpop.permute.xlu1 %5149 }
0x1962   : > { %v5160_v11 = vmul.f32 %v5150_v22, %v5140_v53  ;;  %v5148_v1 = vpop.permute.xlu0 %5147 }
0x1963   : > { %v5159_v28 = vmul.f32 %v5148_v1, %v5139_v36 }
0x1964   : > { %v5164_v12 = vadd.f32 %v5160_v11, %v5136_v10 }
0x1965   : > { %v5163_v8 = vadd.f32 %v5159_v28, %v5135_v29  ;;  %v5154_v42 = vpop.permute.xlu1 %5153 }
0x1966   : > { %5168 = vst.msk [vmem:[#allocation2 + $0x28] sm:$0xff] %vm936_vm0, %v5164_v12  ;;  %v5162_v31 = vmul.f32 %v5154_v42, %v5142_v47  ;;  %v5152_v39 = vpop.permute.xlu0 %5151 }
0x1967   : > { %5167 = vst.msk [vmem:[#allocation2 + $0x20] sm:$0xff] %vm936_vm0, %v5163_v8  ;;  %v5161_v60 = vmul.f32 %v5152_v39, %v5141_v16 }
0x1968   : > { %v5166_v50 = vadd.f32 %v5162_v31, %v5138_v5 }
0x1969   : > { %v5165_v25 = vadd.f32 %v5161_v60, %v5137_v55 }
0x196a   : > { %5170 = vst.msk [vmem:[#allocation2 + $0x38] sm:$0xff] %vm936_vm0, %v5166_v50 }
0x196b   : > { %5169 = vst.msk [vmem:[#allocation2 + $0x30] sm:$0xff] %vm936_vm0, %v5165_v25 }
0x196d   : > { %v12811_v18 = vld [vmem:[#allocation2 + $0x28] sm:$0xff] }
0x196e   : > { %5845 = vrot.lane.b32.xlu1 %v12811_v18, %s13637_s21  ;;  %v12815_v2 = vld [vmem:[#allocation2 + $0x20] sm:$0xff] }
0x196f   : > { %5843 = vrot.lane.b32.xlu0 %v12815_v2, %s13637_s21  ;;  %10192 = vmatprep.mubr.msk.f32.mxu1 %vm936_vm0, %v12815_v2 }
0x1970   : > { %10193 = vmatmul.mubr.msk.f32.vlgmr.msra.gmra.mrb[72].mxu1 %vm936_vm0, %v12811_v18 }
0x1971   : > { %10739 = vmatpush3.bf16.msra.mxu1 %v12519_v37  ;;  %v12824_v58 = vld [vmem:[#allocation2 + $0x38] sm:$0xff]  ;;  %v12842_v37 = vld [vmem:[#allocation2 + $0x8] sm:$0xff] }
0x1972   : > { %5849 = vrot.lane.b32.xlu1 %v12824_v58, %s13637_s21  ;;  %v12828_v56 = vld [vmem:[#allocation2 + $0x30] sm:$0xff]  ;;  %10741 = vmatprep.subr.bf16.mxu1 %v12550_v3 }
0x1973   : > { %5847 = vrot.lane.b32.xlu0 %v12828_v56, %s13637_s21  ;;  %10195 = vmatprep.mubr.msk.f32.mxu1 %vm936_vm0, %v12828_v56 }
0x1974   : > { %10196 = vmatmul.mubr.msk.f32.gmra.mrb[74].mxu1 %vm936_vm0, %v12824_v58 }
0x1975   : > { %10743 = vmatpush3.bf16.msra.mxu1 %v12550_v3  ;;  %10220 = vmatprep.mubr.msk.f32.mxu1 %vm936_vm0, %v12837_v62  ;;  %v12854_v3 = vld [vmem:[#allocation2 + $0x18] sm:$0xff] }
0x1976   : > { %6174 = vrot.lane.b32.xlu1 %v12842_v37, %s13637_s21 }
0x1977   : > { %6172 = vrot.lane.b32.xlu0 %v12837_v62, %s13637_s21 }
0x1978   : > { %10221 = vmatmul.mubr.msk.f32.vlgmr.msra.gmra.mrb[76].mxu1 %vm936_vm0, %v12842_v37 }
0x1979   : > { %10223 = vmatprep.mubr.msk.f32.mxu1 %vm936_vm0, %v12850_v51 }
0x197a   : > { %6178 = vrot.lane.b32.xlu1 %v12854_v3, %s13637_s21 }
0x197b   : > { %6176 = vrot.lane.b32.xlu0 %v12850_v51, %s13637_s21 }
0x197c   : > { %10224 = vmatmul.mubr.msk.f32.gmra.mrb[78].mxu1 %vm936_vm0, %v12854_v3 }
0x197d   : > { %10248 = vmatprep.mubr.msk.f32.mxu1 %vm936_vm0, %v12708_v41  ;;  %v5513_v41 = vld [vmem:[%s12872_s30] sm:$0xff] }
0x197e   : > { %v12877_v45 = vpack.c.bf16 %v5514_v4, %v5513_v41 }
0x1980   : > { %10729 = vmatprep.subr.bf16.mxu0 %v12877_v45 }
0x19bc   : > { %v10166_v6 = vpop.f32.mrb[68].mxu1 }
0x19bd   : > { %v5596_v19 = vpop.f32.mrb[69].mxu1 }
0x19be   : > { %10178 = vmatprep.mubr.msk.f32.mxu0 %vm936_vm0, %v5596_v19 }
0x19bf   : > { %10179 = vmatmul.mubr.msk.f32.vlgmr.msra.gmra.mrb[68].mxu0 %vm936_vm0, %v10166_v6 }
0x19c0   : > { %v10169_v17 = vpop.f32.mrb[70].mxu1  ;;  %10731 = vmatpush3.bf16.msra.mxu0 %v12877_v45 }
0x19c1   : > { %v5606_v61 = vpop.f32.mrb[71].mxu1  ;;  %10733 = vmatprep.subr.bf16.mxu0 %v12880_v35 }
0x19c2   : > { %10181 = vmatprep.mubr.msk.f32.mxu0 %vm936_vm0, %v5606_v61 }
0x19c3   : > { %10182 = vmatmul.mubr.msk.f32.gmra.mrb[70].mxu0 %vm936_vm0, %v10169_v17 }
0x19c4   : > { %10735 = vmatpush3.bf16.msra.mxu0 %v12880_v35 }
0x19c5   : > { %10745 = vmatprep.subr.bf16.mxu0 %v12641_v21 }
0x1a43   : > { %v10194_v48 = vpop.f32.mrb[72].mxu1 }
0x1a44   : > { %v5796_v32 = vpop.f32.mrb[73].mxu1 }
0x1a47   : > { %v10197_v43 = vpop.f32.mrb[74].mxu1 }
0x1a48   : > { %v5806_v34 = vpop.f32.mrb[75].mxu1 }
0x1a4b   : > { %v10222_v23 = vpop.f32.mrb[76].mxu1 }
0x1a4c   : > { %v6119_v38 = vpop.f32.mrb[77].mxu1  ;;  %v6145_v52 = vadd.f32 %v10222_v23, %v12611_v33  ;;  %v5844_v23 = vpop.permute.xlu0 %5843 }
0x1a4d   : > { %v6144_v54 = vadd.f32 %v12611_v33, %v6119_v38 }
0x1a4e   : > { %v9132_v36 = vmul.f32 -1.442695, %v6145_v52 }
0x1a4f   : > { %v10225_v24 = vpop.f32.mrb[78].mxu1  ;;  %v9131_v28 = vmul.f32 -1.442695, %v6144_v54 }
0x1a50   : > { %v6129_v14 = vpop.f32.mrb[79].mxu1  ;;  %v6147_v10 = vadd.f32 %v10225_v24, %v12611_v33 }
0x1a51   : > { %v6146_v12 = vadd.f32 %v12611_v33, %v6129_v14 }
0x1a52   : > { %v9134_v5 = vmul.f32 -1.442695, %v6147_v10 }
0x1a53   : > { %v9133_v39 = vmul.f32 -1.442695, %v6146_v12 }
0x1a92   : > { %v10180_v59 = vpop.f32.mrb[68].mxu0 }
0x1a93   : > { %v12898_v26 = vadd.f32 %v10180_v59, %v12894_v46  ;;  %v5699_v49 = vpop.f32.mrb[69].mxu0 }
0x1a94   : > { %v12902_v20 = vadd.f32 %v12894_v46, %v5699_v49  ;;  %v5848_v49 = vpop.permute.xlu0 %5847 }
0x1a95   : > { %v5816_v57 = vadd.f32 %v10194_v48, %v12898_v26 }
0x1a96   : > { %v5815_v53 = vadd.f32 %v5796_v32, %v12902_v20  ;;  %v10183_v22 = vpop.f32.mrb[70].mxu0 }
0x1a97   : > { %v9119_v11 = vmul.f32 -1.442695, %v5816_v57  ;;  %v12908_v1 = vadd.f32 %v10183_v22, %v12894_v46  ;;  %v5709_v29 = vpop.f32.mrb[71].mxu0 }
0x1a98   : > { %v9118_v47 = vmul.f32 -1.442695, %v5815_v53  ;;  %v12912_v8 = vadd.f32 %v12894_v46, %v5709_v29  ;;  %v6173_v12 = vpop.permute.xlu0 %6172 }
0x1a99   : > { %11112 = vpow2.f32 %v9119_v11  ;;  %v5818_v42 = vadd.f32 %v10197_v43, %v12908_v1 }
0x1a9a   : > { %11114 = vpow2.f32 %v9118_v47  ;;  %v5817_v16 = vadd.f32 %v5806_v34, %v12912_v8  ;;  %v5846_v34 = vpop.permute.xlu1 %5845 }
0x1a9b   : > { %11116 = vpow2.f32 %v9132_v36  ;;  %v9121_v31 = vmul.f32 -1.442695, %v5818_v42 }
0x1a9c   : > { %11118 = vpow2.f32 %v9131_v28  ;;  %v9120_v55 = vmul.f32 -1.442695, %v5817_v16 }
0x1a9d   : > { %11120 = vpow2.f32 %v9121_v31 }
0x1a9e   : > { %11122 = vpow2.f32 %v9120_v55  ;;  %v5850_v59 = vpop.permute.xlu1 %5849 }
0x1a9f   : > { %11124 = vpow2.f32 %v9134_v5 }
0x1aa0   : > { %11126 = vpow2.f32 %v9133_v39  ;;  %v6177_v39 = vpop.permute.xlu0 %6176 }
0x1aa2   : > { %v6175_v11 = vpop.permute.xlu1 %6174 }
0x1aa3   : > { %v11113_v60 = vpop.eup %11112 }
0x1aa4   : > { %v11115_v50 = vpop.eup %11114  ;;  %v5832_v25 = vadd.f32 1.0, %v11113_v60 }
0x1aa5   : > { %v11117_v6 = vpop.eup %11116  ;;  %v5831_v19 = vadd.f32 1.0, %v11115_v50 }
0x1aa6   : > { %v11119_v17 = vpop.eup %11118  ;;  %11128 = vrcp.f32 %v5832_v25  ;;  %v6161_v4 = vadd.f32 1.0, %v11117_v6  ;;  %v6179_v31 = vpop.permute.xlu1 %6178 }
0x1aa7   : > { %v11121_v61 = vpop.eup %11120  ;;  %11130 = vrcp.f32 %v5831_v19  ;;  %v6160_v48 = vadd.f32 1.0, %v11119_v17 }
0x1aa8   : > { %v11123_v41 = vpop.eup %11122  ;;  %v5834_v0 = vadd.f32 1.0, %v11121_v61 }
0x1aa9   : > { %v11125_v9 = vpop.eup %11124  ;;  %v5833_v32 = vadd.f32 1.0, %v11123_v41 }
0x1aaa   : > { %v11127_v43 = vpop.eup %11126  ;;  %11132 = vrcp.f32 %v5834_v0  ;;  %v6163_v38 = vadd.f32 1.0, %v11125_v9 }
0x1aab   : > { %11134 = vrcp.f32 %v5833_v32  ;;  %v6162_v24 = vadd.f32 1.0, %v11127_v43 }
0x1aac   : > { %11136 = vrcp.f32 %v6161_v4 }
0x1aad   : > { %11138 = vrcp.f32 %v6160_v48 }
0x1aae   : > { %11140 = vrcp.f32 %v6163_v38 }
0x1aaf   : > { %11142 = vrcp.f32 %v6162_v24 }
0x1ab0   : > { %v12916_v14 = vpop.eup %11128 }
0x1ab1   : > { %v12918_v52 = vpop.eup %11130  ;;  %v5856_v54 = vmul.f32 %v12916_v14, %v5846_v34 }
0x1ab2   : > { %v5855_v57 = vmul.f32 %v12918_v52, %v5844_v23 }
0x1ab3   : > { %5865 = vrot.lane.b32.xlu1 %v5856_v54, %s13628_s26 }
0x1ab4   : > { %v12923_v53 = vpop.eup %11132  ;;  %5863 = vrot.lane.b32.xlu0 %v5855_v57, %s13628_s26 }
0x1ab5   : > { %v12926_v22 = vpop.eup %11134  ;;  %v5858_v36 = vmul.f32 %v12923_v53, %v5850_v59 }
0x1ab6   : > { %v12929_v10 = vpop.eup %11136  ;;  %v5857_v29 = vmul.f32 %v12926_v22, %v5848_v49 }
0x1ab7   : > { %v12932_v28 = vpop.eup %11138  ;;  %5869 = vrot.lane.b32.xlu1 %v5858_v36, %s13628_s26  ;;  %v6185_v47 = vmul.f32 %v12929_v10, %v6175_v11 }
0x1ab8   : > { %5867 = vrot.lane.b32.xlu0 %v5857_v29, %s13628_s26  ;;  %v12937_v42 = vpop.eup %11140  ;;  %v6184_v16 = vmul.f32 %v12932_v28, %v6173_v12 }
0x1ab9   : > { %v12940_v5 = vpop.eup %11142  ;;  %v6187_v55 = vmul.f32 %v12937_v42, %v6179_v31 }
0x1aba   : > { %v6186_v60 = vmul.f32 %v12940_v5, %v6177_v39 }
0x1abb   : > { %6194 = vrot.lane.b32.xlu1 %v6185_v47, %s13628_s26  ;;  %v6321_v47 = vsub.f32 1.0, %v12932_v28 }
0x1abc   : > { %6192 = vrot.lane.b32.xlu0 %v6184_v16, %s13628_s26  ;;  %v6318_v16 = vmul.f32 %v12929_v10, %v12842_v37 }
0x1abf   : > { %6198 = vrot.lane.b32.xlu1 %v6187_v55, %s13628_s26  ;;  %v6317_v55 = vmul.f32 %v12932_v28, %v12837_v62  ;;  %v6319_v62 = vmul.f32 %v12940_v5, %v12850_v51 }
0x1ac0   : > { %6196 = vrot.lane.b32.xlu0 %v6186_v60, %s13628_s26  ;;  %s13028_s26 = scalar_lea.vmem %s13621_s19, %s13641_s28 }
0x1b25   : > { %v5866_v50 = vpop.permute.xlu1 %5865 }
0x1b26   : > { %v5864_v25 = vpop.permute.xlu0 %5863 }
0x1b27   : > { %10206 = vmatprep.mubr.msk.f32.mxu0 %vm936_vm0, %v5864_v25  ;;  %v6324_v25 = vsub.f32 1.0, %v12937_v42 }
0x1b28   : > { %10207 = vmatmul.mubr.msk.f32.vlgmr.msra.gmra.mrb[72].mxu0 %vm936_vm0, %v5866_v50 }
0x1b29   : > { %v5870_v6 = vpop.permute.xlu1 %5869  ;;  %10747 = vmatpush3.bf16.msra.mxu0 %v12641_v21 }
0x1b2a   : > { %v5868_v19 = vpop.permute.xlu0 %5867  ;;  %10749 = vmatprep.subr.bf16.mxu0 %v12678_v63 }
0x1b2b   : > { %10209 = vmatprep.mubr.msk.f32.mxu0 %vm936_vm0, %v5868_v19 }
0x1b2c   : > { %10210 = vmatmul.mubr.msk.f32.gmra.mrb[74].mxu0 %vm936_vm0, %v5870_v6 }
0x1b2d   : > { %v6195_v17 = vpop.permute.xlu1 %6194  ;;  %10751 = vmatpush3.bf16.msra.mxu0 %v12678_v63 }
0x1b2e   : > { %v6193_v61 = vpop.permute.xlu0 %6192  ;;  %10761 = vmatprep.subr.bf16.mxu0 %v12786_v40 }
0x1b2f   : > { %10234 = vmatprep.mubr.msk.f32.mxu0 %vm936_vm0, %v6193_v61  ;;  %v6320_v61 = vmul.f32 %v12937_v42, %v12854_v3 }
0x1b30   : > { %10235 = vmatmul.mubr.msk.f32.vlgmr.msra.gmra.mrb[76].mxu0 %vm936_vm0, %v6195_v17  ;;  %v6323_v17 = vsub.f32 1.0, %v12940_v5 }
0x1b31   : > { %10763 = vmatpush3.bf16.msra.mxu0 %v12786_v40  ;;  %v6199_v41 = vpop.permute.xlu1 %6198 }
0x1b32   : > { %v6197_v21 = vpop.permute.xlu0 %6196  ;;  %10765 = vmatprep.subr.bf16.mxu0 %v12789_v15 }
0x1b33   : > { %10237 = vmatprep.mubr.msk.f32.mxu0 %vm936_vm0, %v6197_v21 }
0x1b34   : > { %10238 = vmatmul.mubr.msk.f32.gmra.mrb[78].mxu0 %vm936_vm0, %v6199_v41 }
0x1b35   : > { %10767 = vmatpush3.bf16.msra.mxu0 %v12789_v15 }
0x1b36   : > { %10777 = vmatprep.subr.bf16.mxu0 %v12877_v45 }
0x1bfb   : > { %v10208_v63 = vpop.f32.mrb[72].mxu0 }
0x1bfc   : > { %v5945_v4 = vpop.f32.mrb[73].mxu0 }
0x1bff   : > { %v10211_v0 = vpop.f32.mrb[74].mxu0 }
0x1c00   : > { %v5955_v9 = vpop.f32.mrb[75].mxu0 }
0x1c03   : > { %v10236_v48 = vpop.f32.mrb[76].mxu0 }
0x1c04   : > { %6299 = vrot.lane.b32.xlu1 %v10236_v48, %s13638_s22  ;;  %v6274_v40 = vpop.f32.mrb[77].mxu0 }
0x1c05   : > { %6297 = vrot.lane.b32.xlu0 %v6274_v40, %s13638_s22 }
0x1c07   : > { %v10239_v32 = vpop.f32.mrb[78].mxu0 }
0x1c08   : > { %6303 = vrot.lane.b32.xlu1 %v10239_v32, %s13638_s22  ;;  %v6284_v43 = vpop.f32.mrb[79].mxu0 }
0x1c09   : > { %6301 = vrot.lane.b32.xlu0 %v6284_v43, %s13638_s22  ;;  %v5989_v43 = vmul.f32 %v12916_v14, %v12811_v18 }
0x1c76   : > { %v6300_v34 = vpop.permute.xlu1 %6299 }
0x1c77   : > { %v6310_v15 = vadd.f32 %v12611_v33, %v6300_v34  ;;  %v6298_v23 = vpop.permute.xlu0 %6297 }
0x1c78   : > { %v6309_v38 = vadd.f32 %v12611_v33, %v6298_v23  ;;  %v5988_v23 = vmul.f32 %v12918_v52, %v12815_v2 }
0x1c79   : > { %11144 = vtanh.f32 %v6310_v15 }
0x1c7a   : > { %11146 = vtanh.f32 %v6309_v38  ;;  %v6304_v24 = vpop.permute.xlu1 %6303 }
0x1c7b   : > { %v6312_v59 = vadd.f32 %v12611_v33, %v6304_v24  ;;  %v6302_v49 = vpop.permute.xlu0 %6301 }
0x1c7c   : > { %v6311_v54 = vadd.f32 %v12611_v33, %v6302_v49  ;;  %v6322_v33 = vsub.f32 1.0, %v12929_v10 }
0x1c7d   : > { %11148 = vtanh.f32 %v6312_v59  ;;  %v5995_v59 = vsub.f32 1.0, %v12923_v53 }
0x1c7e   : > { %11150 = vtanh.f32 %v6311_v54  ;;  %v5991_v54 = vmul.f32 %v12923_v53, %v12824_v58  ;;  %v6891_v58 = vld [vmem:[%s12512_s2 + $0x10] sm:$0xff]  ;;  %v6892_v53 = vld [vmem:[%s12512_s2 + $0x18] sm:$0xff] }
0x1c83   : > { %v11145_v57 = vpop.eup %11144 }
0x1c84   : > { %v11147_v36 = vpop.eup %11146  ;;  %6331 = vrot.lane.b32.xlu1 %v11145_v57, %s13638_s22  ;;  %v5990_v57 = vmul.f32 %v12926_v22, %v12828_v56  ;;  %v13058_v56 = vpack.c.bf16 %v6892_v53, %v6891_v58 }
0x1c85   : > { %6329 = vrot.lane.b32.xlu0 %v11147_v36, %s13638_s22 }
0x1c87   : > { %v11149_v11 = vpop.eup %11148 }
0x1c88   : > { %v11151_v29 = vpop.eup %11150  ;;  %6335 = vrot.lane.b32.xlu1 %v11149_v11, %s13638_s22 }
0x1c89   : > { %6333 = vrot.lane.b32.xlu0 %v11151_v29, %s13638_s22 }
0x1c8c   : > { %5970 = vrot.lane.b32.xlu1 %v10208_v63, %s13638_s22 }
0x1c8d   : > { %5968 = vrot.lane.b32.xlu0 %v5945_v4, %s13638_s22 }
0x1c90   : > { %5974 = vrot.lane.b32.xlu1 %v10211_v0, %s13638_s22 }
0x1c91   : > { %5972 = vrot.lane.b32.xlu0 %v5955_v9, %s13638_s22 }
0x1cf6   : > { %v6332_v12 = vpop.permute.xlu1 %6331 }
0x1cf7   : > { %v6342_v31 = vmul.f32 %v6332_v12, %v6322_v33  ;;  %v6330_v39 = vpop.permute.xlu0 %6329 }
0x1cf8   : > { %v6341_v60 = vmul.f32 %v6330_v39, %v6321_v47 }
0x1cf9   : > { %v6346_v50 = vadd.f32 %v6342_v31, %v6318_v16 }
0x1cfa   : > { %v6345_v6 = vadd.f32 %v6341_v60, %v6317_v55  ;;  %v6336_v19 = vpop.permute.xlu1 %6335 }
0x1cfb   : > { %6350 = vst.msk [vmem:[#allocation2 + $0x8] sm:$0xff] %vm936_vm0, %v6346_v50  ;;  %v6344_v21 = vmul.f32 %v6336_v19, %v6324_v25  ;;  %v6334_v37 = vpop.permute.xlu0 %6333 }
0x1cfc   : > { %6349 = vst.msk [vmem:[#allocation2] sm:$0xff] %vm936_vm0, %v6345_v6  ;;  %v6343_v10 = vmul.f32 %v6334_v37, %v6323_v17  ;;  %v10752_v28 = vpack.c.bf16 %v6346_v50, %v6345_v6 }
0x1cfd   : > { %v6348_v41 = vadd.f32 %v6344_v21, %v6320_v61 }
0x1cfe   : > { %v6347_v63 = vadd.f32 %v6343_v10, %v6319_v62  ;;  %v5971_v4 = vpop.permute.xlu1 %5970  ;;  %10753 = vmatprep.subr.bf16.mxu1 %v10752_v28 }
0x1cff   : > { %6352 = vst.msk [vmem:[#allocation2 + $0x18] sm:$0xff] %vm936_vm0, %v6348_v41  ;;  %v5981_v0 = vadd.f32 %v5971_v4, %v12898_v26  ;;  %10755 = vmatpush3.bf16.msra.mxu1 %v10752_v28  ;;  %v5969_v9 = vpop.permute.xlu0 %5968  ;;  %v6889_v26 = vld [vmem:[%s12512_s2] sm:$0xff] }
0x1d00   : > { %6351 = vst.msk [vmem:[#allocation2 + $0x10] sm:$0xff] %vm936_vm0, %v6347_v63  ;;  %v5980_v3 = vadd.f32 %v5969_v9, %v12902_v20  ;;  %v10756_v42 = vpack.c.bf16 %v6348_v41, %v6347_v63  ;;  %v6890_v20 = vld [vmem:[%s12512_s2 + $0x8] sm:$0xff]  ;;  %v13113_v41 = vld [vmem:[%s12608_s24] ss:$0 sm:$0xff] }
0x1d01   : > { %11152 = vtanh.f32 %v5981_v0 }
0x1d02   : > { %11154 = vtanh.f32 %v5980_v3  ;;  %v5975_v51 = vpop.permute.xlu1 %5974  ;;  %10757 = vmatprep.subr.bf16.mxu1 %v10756_v42  ;;  %v13085_v31 = vld [vmem:[#allocation2 + $0x8] sm:$0xff] }
0x1d03   : > { %v5983_v5 = vadd.f32 %v5975_v51, %v12908_v1  ;;  %10759 = vmatpush3.bf16.msra.mxu1 %v10756_v42  ;;  %v5973_v48 = vpop.permute.xlu0 %5972  ;;  %v13080_v16 = vld [vmem:[#allocation2] sm:$0xff] }
0x1d04   : > { %v5982_v40 = vadd.f32 %v5973_v48, %v12912_v8  ;;  %10769 = vmatprep.subr.bf16.mxu1 %v12749_v30  ;;  %v13012_v8 = vpack.c.bf16 %v6890_v20, %v6889_v26 }
0x1d05   : > { %11156 = vtanh.f32 %v5983_v5 }
0x1d06   : > { %11158 = vtanh.f32 %v5982_v40  ;;  %10249 = vmatmul.mubr.msk.f32.vlgmr.msra.gmra.mrb[80].mxu1 %vm936_vm0, %v12747_v44  ;;  %v13097_v55 = vld [vmem:[#allocation2 + $0x18] sm:$0xff] }
0x1d07   : > { %10251 = vmatprep.mubr.msk.f32.mxu1 %vm936_vm0, %v12753_v27  ;;  %10771 = vmatpush3.bf16.msra.mxu1 %v12749_v30  ;;  %v5993_v27 = vsub.f32 1.0, %v12916_v14  ;;  %v5994_v14 = vsub.f32 1.0, %v12926_v22  ;;  %v13093_v39 = vld [vmem:[#allocation2 + $0x10] sm:$0xff] }
0x1d08   : > { %10773 = vmatprep.subr.bf16.mxu1 %v12766_v13 }
0x1d0a   : > { %10252 = vmatmul.mubr.msk.f32.gmra.mrb[82].mxu1 %vm936_vm0, %v12763_v7 }
0x1d0b   : > { %v11153_v1 = vpop.eup %11152  ;;  %10775 = vmatpush3.bf16.msra.mxu1 %v12766_v13  ;;  %v5992_v13 = vsub.f32 1.0, %v12918_v52 }
0x1d0c   : > { %v11155_v32 = vpop.eup %11154  ;;  %6002 = vrot.lane.b32.xlu1 %v11153_v1, %s13638_s22  ;;  %10785 = vmatprep.subr.bf16.mxu1 %v13012_v8 }
0x1d0d   : > { %6000 = vrot.lane.b32.xlu0 %v11155_v32, %s13638_s22 }
0x1d0f   : > { %v11157_v44 = vpop.eup %11156 }
0x1d10   : > { %v11159_v30 = vpop.eup %11158  ;;  %6006 = vrot.lane.b32.xlu1 %v11157_v44, %s13638_s22 }
0x1d11   : > { %6004 = vrot.lane.b32.xlu0 %v11159_v30, %s13638_s22 }
0x1d7e   : > { %v6003_v7 = vpop.permute.xlu1 %6002 }
0x1d7f   : > { %v6013_v34 = vmul.f32 %v6003_v7, %v5993_v27  ;;  %v6001_v15 = vpop.permute.xlu0 %6000 }
0x1d80   : > { %v6012_v38 = vmul.f32 %v6001_v15, %v5992_v13 }
0x1d81   : > { %v6017_v24 = vadd.f32 %v6013_v34, %v5989_v43 }
0x1d82   : > { %v6016_v49 = vadd.f32 %v6012_v38, %v5988_v23  ;;  %v6007_v18 = vpop.permute.xlu1 %6006 }
0x1d83   : > { %6021 = vst.msk [vmem:[#allocation2 + $0x28] sm:$0xff] %vm936_vm0, %v6017_v24  ;;  %6025 = vst.msk [vmem:[%s13028_s26 + $0x8] sm:$0xff] %vm936_vm0, %v6017_v24  ;;  %v6015_v2 = vmul.f32 %v6007_v18, %v5995_v59  ;;  %v6005_v52 = vpop.permute.xlu0 %6004  ;;  %v6894_v18 = vld [vmem:[%s12637_s23 + $0x8] sm:$0xff] }
0x1d84   : > { %6020 = vst.msk [vmem:[#allocation2 + $0x20] sm:$0xff] %vm936_vm0, %v6016_v49  ;;  %6024 = vst.msk [vmem:[%s13028_s26] sm:$0xff] %vm936_vm0, %v6016_v49  ;;  %v6014_v36 = vmul.f32 %v6005_v52, %v5994_v14  ;;  %v6893_v49 = vld [vmem:[%s12637_s23] sm:$0xff] }
0x1d85   : > { %v6019_v11 = vadd.f32 %v6015_v2, %v5991_v54  ;;  %v13137_v54 = vpack.c.bf16 %v6894_v18, %v6893_v49 }
0x1d86   : > { %v6018_v29 = vadd.f32 %v6014_v36, %v5990_v57 }
0x1d87   : > { %6023 = vst.msk [vmem:[#allocation2 + $0x38] sm:$0xff] %vm936_vm0, %v6019_v11  ;;  %6027 = vst.msk [vmem:[%s13028_s26 + $0x18] sm:$0xff] %vm936_vm0, %v6019_v11 }
0x1d88   : > { %6022 = vst.msk [vmem:[#allocation2 + $0x30] sm:$0xff] %vm936_vm0, %v6018_v29  ;;  %6026 = vst.msk [vmem:[%s13028_s26 + $0x10] sm:$0xff] %vm936_vm0, %v6018_v29 }
0x1d8a   : > { %v13052_v33 = vld [vmem:[#allocation2 + $0x28] sm:$0xff] }
0x1d8b   : > { %6701 = vrot.lane.b32.xlu1 %v13052_v33, %s13637_s21  ;;  %v13056_v12 = vld [vmem:[#allocation2 + $0x20] sm:$0xff] }
0x1d8c   : > { %6699 = vrot.lane.b32.xlu0 %v13056_v12, %s13637_s21  ;;  %10276 = vmatprep.mubr.msk.f32.mxu1 %vm936_vm0, %v13056_v12 }
0x1d8d   : > { %10277 = vmatmul.mubr.msk.f32.vlgmr.msra.gmra.mrb[84].mxu1 %vm936_vm0, %v13052_v33 }
0x1d8e   : > { %10787 = vmatpush3.bf16.msra.mxu1 %v13012_v8  ;;  %v13067_v22 = vld [vmem:[#allocation2 + $0x38] sm:$0xff] }
0x1d8f   : > { %6705 = vrot.lane.b32.xlu1 %v13067_v22, %s13637_s21  ;;  %v13071_v47 = vld [vmem:[#allocation2 + $0x30] sm:$0xff]  ;;  %10789 = vmatprep.subr.bf16.mxu1 %v13058_v56 }
0x1d90   : > { %6703 = vrot.lane.b32.xlu0 %v13071_v47, %s13637_s21  ;;  %10279 = vmatprep.mubr.msk.f32.mxu1 %vm936_vm0, %v13071_v47 }
0x1d91   : > { %10280 = vmatmul.mubr.msk.f32.gmra.mrb[86].mxu1 %vm936_vm0, %v13067_v22 }
0x1d92   : > { %10791 = vmatpush3.bf16.msra.mxu1 %v13058_v56  ;;  %10304 = vmatprep.mubr.msk.f32.mxu1 %vm936_vm0, %v13080_v16 }
0x1d93   : > { %7031 = vrot.lane.b32.xlu1 %v13085_v31, %s13637_s21 }
0x1d94   : > { %7029 = vrot.lane.b32.xlu0 %v13080_v16, %s13637_s21 }
0x1d95   : > { %10305 = vmatmul.mubr.msk.f32.vlgmr.msra.gmra.mrb[88].mxu1 %vm936_vm0, %v13085_v31 }
0x1d96   : > { %10307 = vmatprep.mubr.msk.f32.mxu1 %vm936_vm0, %v13093_v39 }
0x1d97   : > { %7035 = vrot.lane.b32.xlu1 %v13097_v55, %s13637_s21 }
0x1d98   : > { %7033 = vrot.lane.b32.xlu0 %v13093_v39, %s13637_s21 }
0x1d99   : > { %10308 = vmatmul.mubr.msk.f32.gmra.mrb[90].mxu1 %vm936_vm0, %v13097_v55 }
0x1dd9   : > { %v10250_v60 = vpop.f32.mrb[80].mxu1 }
0x1dda   : > { %v6452_v50 = vpop.f32.mrb[81].mxu1 }
0x1ddb   : > { %10262 = vmatprep.mubr.msk.f32.mxu0 %vm936_vm0, %v6452_v50 }
0x1ddc   : > { %10263 = vmatmul.mubr.msk.f32.vlgmr.msra.gmra.mrb[80].mxu0 %vm936_vm0, %v10250_v60 }
0x1ddd   : > { %v10253_v25 = vpop.f32.mrb[82].mxu1  ;;  %10779 = vmatpush3.bf16.msra.mxu0 %v12877_v45 }
0x1dde   : > { %v6462_v6 = vpop.f32.mrb[83].mxu1  ;;  %10781 = vmatprep.subr.bf16.mxu0 %v12880_v35 }
0x1ddf   : > { %10265 = vmatprep.mubr.msk.f32.mxu0 %vm936_vm0, %v6462_v6 }
0x1de0   : > { %10266 = vmatmul.mubr.msk.f32.gmra.mrb[82].mxu0 %vm936_vm0, %v10253_v25 }
0x1de1   : > { %10783 = vmatpush3.bf16.msra.mxu0 %v12880_v35 }
0x1de2   : > { %10793 = vmatprep.subr.bf16.mxu0 %v13137_v54 }
0x1dfd   : > { %v6702_v60 = vpop.permute.xlu1 %6701 }
0x1dfe   : > { %v6700_v50 = vpop.permute.xlu0 %6699 }
0x1e60   : > { %v10278_v19 = vpop.f32.mrb[84].mxu1 }
0x1e61   : > { %v6652_v17 = vpop.f32.mrb[85].mxu1 }
0x1e64   : > { %v10281_v61 = vpop.f32.mrb[86].mxu1 }
0x1e65   : > { %v6662_v21 = vpop.f32.mrb[87].mxu1 }
0x1e68   : > { %v10306_v37 = vpop.f32.mrb[88].mxu1 }
0x1e69   : > { %v6976_v62 = vpop.f32.mrb[89].mxu1  ;;  %v7002_v63 = vadd.f32 %v10306_v37, %v13113_v41 }
0x1e6a   : > { %v7001_v9 = vadd.f32 %v13113_v41, %v6976_v62 }
0x1e6b   : > { %v9174_v5 = vmul.f32 -1.442695, %v7002_v63 }
0x1e6c   : > { %v10309_v10 = vpop.f32.mrb[90].mxu1  ;;  %v9173_v1 = vmul.f32 -1.442695, %v7001_v9 }
0x1e6d   : > { %v6986_v28 = vpop.f32.mrb[91].mxu1  ;;  %v7004_v48 = vadd.f32 %v10309_v10, %v13113_v41 }
0x1e6e   : > { %v7003_v32 = vadd.f32 %v13113_v41, %v6986_v28 }
0x1e6f   : > { %v9176_v13 = vmul.f32 -1.442695, %v7004_v48 }
0x1e70   : > { %v9175_v34 = vmul.f32 -1.442695, %v7003_v32 }
0x1eaf   : > { %v10264_v45 = vpop.f32.mrb[80].mxu0 }
0x1eb0   : > { %v13117_v4 = vadd.f32 %v10264_v45, %v12894_v46  ;;  %v6555_v0 = vpop.f32.mrb[81].mxu0 }
0x1eb1   : > { %v13121_v35 = vadd.f32 %v12894_v46, %v6555_v0 }
0x1eb2   : > { %v6672_v3 = vadd.f32 %v10278_v19, %v13117_v4 }
0x1eb3   : > { %v6671_v42 = vadd.f32 %v6652_v17, %v13121_v35  ;;  %v10267_v51 = vpop.f32.mrb[82].mxu0  ;;  %v6706_v17 = vpop.permute.xlu1 %6705 }
0x1eb4   : > { %v9157_v40 = vmul.f32 -1.442695, %v6672_v3  ;;  %v13127_v26 = vadd.f32 %v10267_v51, %v12894_v46  ;;  %v6565_v20 = vpop.f32.mrb[83].mxu0 }
0x1eb5   : > { %v9156_v44 = vmul.f32 -1.442695, %v6671_v42  ;;  %v13131_v30 = vadd.f32 %v12894_v46, %v6565_v20 }
0x1eb6   : > { %11160 = vpow2.f32 %v9157_v40  ;;  %v6674_v27 = vadd.f32 %v10281_v61, %v13127_v26 }
0x1eb7   : > { %11162 = vpow2.f32 %v9156_v44  ;;  %v6673_v7 = vadd.f32 %v6662_v21, %v13131_v30  ;;  %v6704_v21 = vpop.permute.xlu0 %6703  ;;  %v7032_v0 = vpop.permute.xlu1 %7031 }
0x1eb8   : > { %11164 = vpow2.f32 %v9174_v5  ;;  %v9159_v43 = vmul.f32 -1.442695, %v6674_v27  ;;  %v6895_v27 = vld [vmem:[%s12637_s23 + $0x10] sm:$0xff] }
0x1eb9   : > { %11166 = vpow2.f32 %v9173_v1  ;;  %v9158_v15 = vmul.f32 -1.442695, %v6673_v7  ;;  %v6896_v7 = vld [vmem:[%s12637_s23 + $0x18] sm:$0xff] }
0x1eba   : > { %11168 = vpow2.f32 %v9159_v43 }
0x1ebb   : > { %11170 = vpow2.f32 %v9158_v15  ;;  %v7030_v42 = vpop.permute.xlu0 %7029  ;;  %v7036_v20 = vpop.permute.xlu1 %7035 }
0x1ebc   : > { %11172 = vpow2.f32 %v9176_v13 }
0x1ebd   : > { %11174 = vpow2.f32 %v9175_v34  ;;  %v13174_v34 = vpack.c.bf16 %v6896_v7, %v6895_v27 }
0x1ebf   : > { %v7034_v1 = vpop.permute.xlu0 %7033 }
0x1ec0   : > { %v11161_v46 = vpop.eup %11160 }
0x1ec1   : > { %v11163_v23 = vpop.eup %11162  ;;  %v6688_v38 = vadd.f32 1.0, %v11161_v46 }
0x1ec2   : > { %v11165_v24 = vpop.eup %11164  ;;  %v6687_v59 = vadd.f32 1.0, %v11163_v23 }
0x1ec3   : > { %v11167_v14 = vpop.eup %11166  ;;  %11176 = vrcp.f32 %v6688_v38  ;;  %v7018_v57 = vadd.f32 1.0, %v11165_v24 }
0x1ec4   : > { %v11169_v2 = vpop.eup %11168  ;;  %11178 = vrcp.f32 %v6687_v59  ;;  %v7017_v29 = vadd.f32 1.0, %v11167_v14 }
0x1ec5   : > { %v11171_v52 = vpop.eup %11170  ;;  %v6690_v36 = vadd.f32 1.0, %v11169_v2 }
0x1ec6   : > { %v11173_v11 = vpop.eup %11172  ;;  %v6689_v58 = vadd.f32 1.0, %v11171_v52 }
0x1ec7   : > { %v11175_v53 = vpop.eup %11174  ;;  %11180 = vrcp.f32 %v6690_v36  ;;  %v7020_v25 = vadd.f32 1.0, %v11173_v11 }
0x1ec8   : > { %11182 = vrcp.f32 %v6689_v58  ;;  %v7019_v6 = vadd.f32 1.0, %v11175_v53 }
0x1ec9   : > { %11184 = vrcp.f32 %v7018_v57 }
0x1eca   : > { %11186 = vrcp.f32 %v7017_v29 }
0x1ecb   : > { %11188 = vrcp.f32 %v7020_v25 }
0x1ecc   : > { %11190 = vrcp.f32 %v7019_v6 }
0x1ecd   : > { %v13140_v19 = vpop.eup %11176 }
0x1ece   : > { %v13142_v61 = vpop.eup %11178  ;;  %v6712_v37 = vmul.f32 %v13140_v19, %v6702_v60 }
0x1ecf   : > { %v6711_v62 = vmul.f32 %v13142_v61, %v6700_v50 }
0x1ed0   : > { %6721 = vrot.lane.b32.xlu1 %v6712_v37, %s13642_s0 }
0x1ed1   : > { %v13147_v10 = vpop.eup %11180  ;;  %6719 = vrot.lane.b32.xlu0 %v6711_v62, %s13642_s0  ;;  %v13197_v62 = vld [vmem:[%s12704_s1 + $0x20] sm:$0xff] }
0x1ed2   : > { %v13150_v28 = vpop.eup %11182  ;;  %v6714_v45 = vmul.f32 %v13147_v10, %v6706_v17  ;;  %10332 = vmatprep.mubr.msk.f32.mxu1 %vm936_vm0, %v13197_v62 }
0x1ed3   : > { %v13153_v63 = vpop.eup %11184  ;;  %v6713_v9 = vmul.f32 %v13150_v28, %v6704_v21 }
0x1ed4   : > { %v13156_v3 = vpop.eup %11186  ;;  %6725 = vrot.lane.b32.xlu1 %v6714_v45, %s13642_s0  ;;  %v7042_v51 = vmul.f32 %v13153_v63, %v7032_v0 }
0x1ed5   : > { %6723 = vrot.lane.b32.xlu0 %v6713_v9, %s13642_s0  ;;  %v13161_v5 = vpop.eup %11188  ;;  %v7041_v48 = vmul.f32 %v13156_v3, %v7030_v42  ;;  %v7179_v9 = vsub.f32 1.0, %v13153_v63 }
0x1ed6   : > { %v13164_v40 = vpop.eup %11190  ;;  %v7044_v32 = vmul.f32 %v13161_v5, %v7036_v20  ;;  %v7181_v7 = vsub.f32 1.0, %v13161_v5 }
0x1ed7   : > { %v7043_v44 = vmul.f32 %v13164_v40, %v7034_v1 }
0x1ed8   : > { %7051 = vrot.lane.b32.xlu1 %v7042_v51, %s13642_s0  ;;  %v7178_v51 = vsub.f32 1.0, %v13156_v3 }
0x1ed9   : > { %7049 = vrot.lane.b32.xlu0 %v7041_v48, %s13642_s0  ;;  %v7175_v48 = vmul.f32 %v13153_v63, %v13085_v31 }
0x1edc   : > { %7055 = vrot.lane.b32.xlu1 %v7044_v32, %s13642_s0  ;;  %v7174_v32 = vmul.f32 %v13156_v3, %v13080_v16  ;;  %v7176_v16 = vmul.f32 %v13164_v40, %v13093_v39 }
0x1edd   : > { %7053 = vrot.lane.b32.xlu0 %v7043_v44, %s13642_s0 }
0x1f42   : > { %v6722_v13 = vpop.permute.xlu1 %6721 }
0x1f43   : > { %v6720_v43 = vpop.permute.xlu0 %6719 }
0x1f44   : > { %10290 = vmatprep.mubr.msk.f32.mxu0 %vm936_vm0, %v6720_v43 }
0x1f45   : > { %10291 = vmatmul.mubr.msk.f32.vlgmr.msra.gmra.mrb[84].mxu0 %vm936_vm0, %v6722_v13 }
0x1f46   : > { %v6726_v15 = vpop.permute.xlu1 %6725  ;;  %10795 = vmatpush3.bf16.msra.mxu0 %v13137_v54 }
0x1f47   : > { %v6724_v46 = vpop.permute.xlu0 %6723  ;;  %10797 = vmatprep.subr.bf16.mxu0 %v13174_v34 }
0x1f48   : > { %10293 = vmatprep.mubr.msk.f32.mxu0 %vm936_vm0, %v6724_v46  ;;  %v7177_v46 = vmul.f32 %v13161_v5, %v13097_v55 }
0x1f49   : > { %10294 = vmatmul.mubr.msk.f32.gmra.mrb[86].mxu0 %vm936_vm0, %v6726_v15  ;;  %v7180_v15 = vsub.f32 1.0, %v13164_v40 }
0x1f4a   : > { %v7052_v23 = vpop.permute.xlu1 %7051  ;;  %10799 = vmatpush3.bf16.msra.mxu0 %v13174_v34 }
0x1f4b   : > { %v7050_v38 = vpop.permute.xlu0 %7049 }
0x1f4c   : > { %10318 = vmatprep.mubr.msk.f32.mxu0 %vm936_vm0, %v7050_v38 }
0x1f4d   : > { %10319 = vmatmul.mubr.msk.f32.vlgmr.msra.gmra.mrb[88].mxu0 %vm936_vm0, %v7052_v23 }
0x1f4e   : > { %v7056_v59 = vpop.permute.xlu1 %7055 }
0x1f4f   : > { %v7054_v24 = vpop.permute.xlu0 %7053 }
0x1f50   : > { %10321 = vmatprep.mubr.msk.f32.mxu0 %vm936_vm0, %v7054_v24 }
0x1f51   : > { %10322 = vmatmul.mubr.msk.f32.gmra.mrb[90].mxu0 %vm936_vm0, %v7056_v59 }
0x2018   : > { %v10292_v49 = vpop.f32.mrb[84].mxu0 }
0x2019   : > { %v6801_v18 = vpop.f32.mrb[85].mxu0 }
0x201c   : > { %v10295_v14 = vpop.f32.mrb[86].mxu0 }
0x201d   : > { %v6811_v2 = vpop.f32.mrb[87].mxu0 }
0x2020   : > { %v10320_v52 = vpop.f32.mrb[88].mxu0 }
0x2021   : > { %7156 = vrot.lane.b32.xlu1 %v10320_v52, %s13638_s22  ;;  %v7131_v57 = vpop.f32.mrb[89].mxu0  ;;  %v13230_v52 = vld [vmem:[%s12704_s1 + $0x28] sm:$0xff] }
0x2022   : > { %7154 = vrot.lane.b32.xlu0 %v7131_v57, %s13638_s22 }
0x2024   : > { %v10323_v36 = vpop.f32.mrb[90].mxu0 }
0x2025   : > { %7160 = vrot.lane.b32.xlu1 %v10323_v36, %s13638_s22  ;;  %v7141_v11 = vpop.f32.mrb[91].mxu0  ;;  %v13236_v36 = vld [vmem:[%s12704_s1 + $0x30] sm:$0xff] }
0x2026   : > { %7158 = vrot.lane.b32.xlu0 %v7141_v11, %s13638_s22  ;;  %v7224_v11 = vld [vmem:[%s12741_s27 + $0x10] sm:$0xff] }
0x2093   : > { %v7157_v29 = vpop.permute.xlu1 %7156 }
0x2094   : > { %v7167_v58 = vadd.f32 %v13113_v41, %v7157_v29  ;;  %v7155_v53 = vpop.permute.xlu0 %7154  ;;  %v7225_v29 = vld [vmem:[%s12741_s27 + $0x18] sm:$0xff] }
0x2095   : > { %v7166_v60 = vadd.f32 %v13113_v41, %v7155_v53 }
0x2096   : > { %11192 = vtanh.f32 %v7167_v58 }
0x2097   : > { %11194 = vtanh.f32 %v7166_v60  ;;  %v7161_v50 = vpop.permute.xlu1 %7160 }
0x2098   : > { %v7169_v25 = vadd.f32 %v13113_v41, %v7161_v50  ;;  %v7159_v6 = vpop.permute.xlu0 %7158 }
0x2099   : > { %v7168_v17 = vadd.f32 %v13113_v41, %v7159_v6  ;;  %v7219_v6 = vld [vmem:[%s12781_s3 + $0x8] sm:$0xff] }
0x209a   : > { %11196 = vtanh.f32 %v7169_v25  ;;  %v7218_v25 = vld [vmem:[%s12781_s3] sm:$0xff] }
0x209b   : > { %11198 = vtanh.f32 %v7168_v17  ;;  %v7220_v17 = vld [vmem:[%s12781_s3 + $0x10] sm:$0xff] }
0x20a0   : > { %v11193_v21 = vpop.eup %11192 }
0x20a1   : > { %v11195_v37 = vpop.eup %11194  ;;  %7188 = vrot.lane.b32.xlu1 %v11193_v21, %s13638_s22  ;;  %v13263_v21 = vpack.c.bf16 %v7219_v6, %v7218_v25 }
0x20a2   : > { %7186 = vrot.lane.b32.xlu0 %v11195_v37, %s13638_s22  ;;  %v7221_v37 = vld [vmem:[%s12781_s3 + $0x18] sm:$0xff] }
0x20a3   : > { %10809 = vmatprep.subr.bf16.mxu0 %v13263_v21 }
0x20a4   : > { %v11197_v45 = vpop.eup %11196  ;;  %10811 = vmatpush3.bf16.msra.mxu0 %v13263_v21 }
0x20a5   : > { %v11199_v0 = vpop.eup %11198  ;;  %7192 = vrot.lane.b32.xlu1 %v11197_v45, %s13638_s22  ;;  %v13266_v45 = vpack.c.bf16 %v7221_v37, %v7220_v17 }
0x20a6   : > { %7190 = vrot.lane.b32.xlu0 %v11199_v0, %s13638_s22  ;;  %v6849_v0 = vsub.f32 1.0, %v13140_v19 }
0x20a7   : > { %10813 = vmatprep.subr.bf16.mxu0 %v13266_v45 }
0x20a8   : > { %10815 = vmatpush3.bf16.msra.mxu0 %v13266_v45 }
0x20a9   : > { %6826 = vrot.lane.b32.xlu1 %v10292_v49, %s13638_s22 }
0x20aa   : > { %6824 = vrot.lane.b32.xlu0 %v6801_v18, %s13638_s22  ;;  %v7222_v18 = vld [vmem:[%s12741_s27] sm:$0xff] }
0x20ad   : > { %6830 = vrot.lane.b32.xlu1 %v10295_v14, %s13638_s22  ;;  %v7223_v14 = vld [vmem:[%s12741_s27 + $0x8] sm:$0xff] }
0x20ae   : > { %6828 = vrot.lane.b32.xlu0 %v6811_v2, %s13638_s22  ;;  %v13232_v57 = vpack.c.bf16 %v7223_v14, %v7222_v18 }
0x2113   : > { %v7189_v42 = vpop.permute.xlu1 %7188 }
0x2114   : > { %v7199_v20 = vmul.f32 %v7189_v42, %v7179_v9  ;;  %v7187_v1 = vpop.permute.xlu0 %7186  ;;  %v6848_v42 = vsub.f32 1.0, %v13142_v61 }
0x2115   : > { %v7198_v44 = vmul.f32 %v7187_v1, %v7178_v51  ;;  %v6845_v51 = vmul.f32 %v13140_v19, %v13052_v33  ;;  %v6844_v1 = vmul.f32 %v13142_v61, %v13056_v12  ;;  %v6847_v33 = vmul.f32 %v13147_v10, %v13067_v22 }
0x2116   : > { %v7203_v27 = vadd.f32 %v7199_v20, %v7175_v48  ;;  %v6846_v12 = vmul.f32 %v13150_v28, %v13071_v47 }
0x2117   : > { %v7202_v13 = vadd.f32 %v7198_v44, %v7174_v32  ;;  %v7193_v43 = vpop.permute.xlu1 %7192 }
0x2118   : > { %7207 = vst.msk [vmem:[#allocation2 + $0x8] sm:$0xff] %vm936_vm0, %v7203_v27  ;;  %v7201_v23 = vmul.f32 %v7193_v43, %v7181_v7  ;;  %v7191_v31 = vpop.permute.xlu0 %7190  ;;  %v6850_v43 = vsub.f32 1.0, %v13150_v28 }
0x2119   : > { %7206 = vst.msk [vmem:[#allocation2] sm:$0xff] %vm936_vm0, %v7202_v13  ;;  %v7200_v63 = vmul.f32 %v7191_v31, %v7180_v15  ;;  %v10800_v3 = vpack.c.bf16 %v7203_v27, %v7202_v13  ;;  %v6851_v27 = vsub.f32 1.0, %v13147_v10 }
0x211a   : > { %v7205_v38 = vadd.f32 %v7201_v23, %v7177_v46 }
0x211b   : > { %v7204_v24 = vadd.f32 %v7200_v63, %v7176_v16  ;;  %v6827_v59 = vpop.permute.xlu1 %6826  ;;  %10801 = vmatprep.subr.bf16.mxu1 %v10800_v3 }
0x211c   : > { %7209 = vst.msk [vmem:[#allocation2 + $0x18] sm:$0xff] %vm936_vm0, %v7205_v38  ;;  %v6837_v55 = vadd.f32 %v6827_v59, %v13117_v4  ;;  %10803 = vmatpush3.bf16.msra.mxu1 %v10800_v3  ;;  %v6825_v5 = vpop.permute.xlu0 %6824  ;;  %v7226_v59 = vld [vmem:[%s12872_s30] sm:$0xff] }
0x211d   : > { %7208 = vst.msk [vmem:[#allocation2 + $0x10] sm:$0xff] %vm936_vm0, %v7204_v24  ;;  %v6836_v39 = vadd.f32 %v6825_v5, %v13121_v35  ;;  %v10804_v40 = vpack.c.bf16 %v7205_v38, %v7204_v24  ;;  %v7228_v5 = vld [vmem:[%s12872_s30 + $0x10] sm:$0xff] }
0x211e   : > { %11200 = vtanh.f32 %v6837_v55  ;;  %v7227_v55 = vld [vmem:[%s12872_s30 + $0x8] sm:$0xff] }
0x211f   : > { %11202 = vtanh.f32 %v6836_v39  ;;  %v6831_v49 = vpop.permute.xlu1 %6830  ;;  %10805 = vmatprep.subr.bf16.mxu1 %v10804_v40  ;;  %v13356_v39 = vpack.c.bf16 %v7227_v55, %v7226_v59 }
0x2120   : > { %v6839_v2 = vadd.f32 %v6831_v49, %v13127_v26  ;;  %10807 = vmatpush3.bf16.msra.mxu1 %v10804_v40  ;;  %v6829_v4 = vpop.permute.xlu0 %6828  ;;  %v13246_v26 = vld [vmem:[%s12704_s1 + $0x38] sm:$0xff]  ;;  %v13322_v31 = vld [vmem:[#allocation2] sm:$0xff] }
0x2121   : > { %v6838_v35 = vadd.f32 %v6829_v4, %v13131_v30  ;;  %10817 = vmatprep.subr.bf16.mxu1 %v13232_v57  ;;  %v13249_v30 = vpack.c.bf16 %v7225_v29, %v7224_v11  ;;  %v7229_v40 = vld [vmem:[%s12872_s30 + $0x18] sm:$0xff]  ;;  %10825 = vmatprep.subr.bf16.mxu0 %v13356_v39 }
0x2122   : > { %11204 = vtanh.f32 %v6839_v2 }
0x2123   : > { %11206 = vtanh.f32 %v6838_v35  ;;  %10333 = vmatmul.mubr.msk.f32.vlgmr.msra.gmra.mrb[92].mxu1 %vm936_vm0, %v13230_v52 }
0x2124   : > { %10335 = vmatprep.mubr.msk.f32.mxu1 %vm936_vm0, %v13236_v36  ;;  %10819 = vmatpush3.bf16.msra.mxu1 %v13232_v57  ;;  %v13335_v16 = vld [vmem:[#allocation2 + $0x10] sm:$0xff] }
0x2125   : > { %10821 = vmatprep.subr.bf16.mxu1 %v13249_v30 }
0x2127   : > { %10336 = vmatmul.mubr.msk.f32.gmra.mrb[94].mxu1 %vm936_vm0, %v13246_v26 }
0x2128   : > { %v11201_v58 = vpop.eup %11200  ;;  %10823 = vmatpush3.bf16.msra.mxu1 %v13249_v30 }
0x2129   : > { %v11203_v53 = vpop.eup %11202  ;;  %6858 = vrot.lane.b32.xlu1 %v11201_v58, %s13638_s22  ;;  %10833 = vmatprep.subr.bf16.mxu1 %v13012_v8  ;;  %v13367_v58 = vld [vmem:[%s12891_s25] ss:$0 sm:$0xff] }
0x212a   : > { %6856 = vrot.lane.b32.xlu0 %v11203_v53, %s13638_s22 }
0x212c   : > { %v11205_v60 = vpop.eup %11204 }
0x212d   : > { %v11207_v50 = vpop.eup %11206  ;;  %6862 = vrot.lane.b32.xlu1 %v11205_v60, %s13638_s22 }
0x212e   : > { %6860 = vrot.lane.b32.xlu0 %v11207_v50, %s13638_s22 }
0x219b   : > { %v6859_v9 = vpop.permute.xlu1 %6858 }
0x219c   : > { %v6869_v48 = vmul.f32 %v6859_v9, %v6849_v0  ;;  %v6857_v20 = vpop.permute.xlu0 %6856 }
0x219d   : > { %v6868_v32 = vmul.f32 %v6857_v20, %v6848_v42 }
0x219e   : > { %v6873_v44 = vadd.f32 %v6869_v48, %v6845_v51 }
0x219f   : > { %v6872_v7 = vadd.f32 %v6868_v32, %v6844_v1  ;;  %v6863_v13 = vpop.permute.xlu1 %6862 }
0x21a0   : > { %6877 = vst.msk [vmem:[#allocation2 + $0x28] sm:$0xff] %vm936_vm0, %v6873_v44  ;;  %9165 = vst.msk [vmem:[%s13028_s26 + $0x28] sm:$0xff] %vm936_vm0, %v6873_v44  ;;  %v6871_v19 = vmul.f32 %v6863_v13, %v6851_v27  ;;  %v6861_v15 = vpop.permute.xlu0 %6860 }
0x21a1   : > { %6876 = vst.msk [vmem:[#allocation2 + $0x20] sm:$0xff] %vm936_vm0, %v6872_v7  ;;  %9164 = vst.msk [vmem:[%s13028_s26 + $0x20] sm:$0xff] %vm936_vm0, %v6872_v7  ;;  %v6870_v61 = vmul.f32 %v6861_v15, %v6850_v43 }
0x21a2   : > { %v6875_v46 = vadd.f32 %v6871_v19, %v6847_v33 }
0x21a3   : > { %v6874_v23 = vadd.f32 %v6870_v61, %v6846_v12 }
0x21a4   : > { %6879 = vst.msk [vmem:[#allocation2 + $0x38] sm:$0xff] %vm936_vm0, %v6875_v46  ;;  %9167 = vst.msk [vmem:[%s13028_s26 + $0x38] sm:$0xff] %vm936_vm0, %v6875_v46 }
0x21a5   : > { %6878 = vst.msk [vmem:[#allocation2 + $0x30] sm:$0xff] %vm936_vm0, %v6874_v23  ;;  %9166 = vst.msk [vmem:[%s13028_s26 + $0x30] sm:$0xff] %vm936_vm0, %v6874_v23 }
0x21a7   : > { %v13296_v22 = vld [vmem:[#allocation2 + $0x28] sm:$0xff] }
0x21a8   : > { %7558 = vrot.lane.b32.xlu1 %v13296_v22, %s13637_s21  ;;  %v13300_v10 = vld [vmem:[#allocation2 + $0x20] sm:$0xff] }
0x21a9   : > { %7556 = vrot.lane.b32.xlu0 %v13300_v10, %s13637_s21  ;;  %10360 = vmatprep.mubr.msk.f32.mxu1 %vm936_vm0, %v13300_v10 }
0x21aa   : > { %10361 = vmatmul.mubr.msk.f32.vlgmr.msra.gmra.mrb[96].mxu1 %vm936_vm0, %v13296_v22 }
0x21ab   : > { %10835 = vmatpush3.bf16.msra.mxu1 %v13012_v8  ;;  %v13309_v47 = vld [vmem:[#allocation2 + $0x38] sm:$0xff]  ;;  %v13327_v8 = vld [vmem:[#allocation2 + $0x8] sm:$0xff] }
0x21ac   : > { %7562 = vrot.lane.b32.xlu1 %v13309_v47, %s13637_s21  ;;  %v13313_v28 = vld [vmem:[#allocation2 + $0x30] sm:$0xff]  ;;  %10837 = vmatprep.subr.bf16.mxu1 %v13058_v56 }
0x21ad   : > { %7560 = vrot.lane.b32.xlu0 %v13313_v28, %s13637_s21  ;;  %10363 = vmatprep.mubr.msk.f32.mxu1 %vm936_vm0, %v13313_v28 }
0x21ae   : > { %10364 = vmatmul.mubr.msk.f32.gmra.mrb[98].mxu1 %vm936_vm0, %v13309_v47 }
0x21af   : > { %10839 = vmatpush3.bf16.msra.mxu1 %v13058_v56  ;;  %10388 = vmatprep.mubr.msk.f32.mxu1 %vm936_vm0, %v13322_v31  ;;  %v13339_v56 = vld [vmem:[#allocation2 + $0x18] sm:$0xff] }
0x21b0   : > { %7888 = vrot.lane.b32.xlu1 %v13327_v8, %s13637_s21 }
0x21b1   : > { %7886 = vrot.lane.b32.xlu0 %v13322_v31, %s13637_s21 }
0x21b2   : > { %10389 = vmatmul.mubr.msk.f32.vlgmr.msra.gmra.mrb[100].mxu1 %vm936_vm0, %v13327_v8 }
0x21b3   : > { %10391 = vmatprep.mubr.msk.f32.mxu1 %vm936_vm0, %v13335_v16 }
0x21b4   : > { %7892 = vrot.lane.b32.xlu1 %v13339_v56, %s13637_s21 }
0x21b5   : > { %7890 = vrot.lane.b32.xlu0 %v13335_v16, %s13637_s21 }
0x21b6   : > { %10392 = vmatmul.mubr.msk.f32.gmra.mrb[102].mxu1 %vm936_vm0, %v13339_v56 }
0x21b7   : > { %10416 = vmatprep.mubr.msk.f32.mxu1 %vm936_vm0, %v13197_v62  ;;  %v13359_v62 = vpack.c.bf16 %v7229_v40, %v7228_v5 }
0x21f6   : > { %v10334_v63 = vpop.f32.mrb[92].mxu1 }
0x21f7   : > { %v7309_v3 = vpop.f32.mrb[93].mxu1 }
0x21f8   : > { %10346 = vmatprep.mubr.msk.f32.mxu0 %vm936_vm0, %v7309_v3 }
0x21f9   : > { %10347 = vmatmul.mubr.msk.f32.vlgmr.msra.gmra.mrb[92].mxu0 %vm936_vm0, %v10334_v63 }
0x21fa   : > { %v10337_v38 = vpop.f32.mrb[94].mxu1  ;;  %10827 = vmatpush3.bf16.msra.mxu0 %v13356_v39 }
0x21fb   : > { %v7319_v24 = vpop.f32.mrb[95].mxu1  ;;  %10829 = vmatprep.subr.bf16.mxu0 %v13359_v62 }
0x21fc   : > { %10349 = vmatprep.mubr.msk.f32.mxu0 %vm936_vm0, %v7319_v24 }
0x21fd   : > { %10350 = vmatmul.mubr.msk.f32.gmra.mrb[94].mxu0 %vm936_vm0, %v10337_v38 }
0x21fe   : > { %10831 = vmatpush3.bf16.msra.mxu0 %v13359_v62 }
0x21ff   : > { %10841 = vmatprep.subr.bf16.mxu0 %v13137_v54 }
0x227d   : > { %v10362_v49 = vpop.f32.mrb[96].mxu1 }
0x227e   : > { %v7509_v18 = vpop.f32.mrb[97].mxu1 }
0x2281   : > { %v10365_v14 = vpop.f32.mrb[98].mxu1 }
0x2282   : > { %v7519_v2 = vpop.f32.mrb[99].mxu1 }
0x2285   : > { %v10390_v4 = vpop.f32.mrb[100].mxu1 }
0x2286   : > { %v7833_v35 = vpop.f32.mrb[101].mxu1  ;;  %v7859_v60 = vadd.f32 %v10390_v4, %v13113_v41  ;;  %v7557_v4 = vpop.permute.xlu0 %7556 }
0x2287   : > { %v7858_v6 = vadd.f32 %v13113_v41, %v7833_v35 }
0x2288   : > { %v9216_v42 = vmul.f32 -1.442695, %v7859_v60 }
0x2289   : > { %v10393_v11 = vpop.f32.mrb[102].mxu1  ;;  %v9215_v32 = vmul.f32 -1.442695, %v7858_v6 }
0x228a   : > { %v7843_v29 = vpop.f32.mrb[103].mxu1  ;;  %v7861_v51 = vadd.f32 %v10393_v11, %v13113_v41 }
0x228b   : > { %v7860_v44 = vadd.f32 %v13113_v41, %v7843_v29 }
0x228c   : > { %v9218_v33 = vmul.f32 -1.442695, %v7861_v51 }
0x228d   : > { %v9217_v15 = vmul.f32 -1.442695, %v7860_v44 }
0x22cc   : > { %v10348_v53 = vpop.f32.mrb[92].mxu0 }
0x22cd   : > { %v13371_v50 = vadd.f32 %v10348_v53, %v13367_v58  ;;  %v7412_v25 = vpop.f32.mrb[93].mxu0 }
0x22ce   : > { %v13375_v17 = vadd.f32 %v13367_v58, %v7412_v25  ;;  %v7561_v25 = vpop.permute.xlu0 %7560 }
0x22cf   : > { %v7529_v37 = vadd.f32 %v10362_v49, %v13371_v50 }
0x22d0   : > { %v7528_v0 = vadd.f32 %v7509_v18, %v13375_v17  ;;  %v10351_v9 = vpop.f32.mrb[94].mxu0 }
0x22d1   : > { %v9199_v48 = vmul.f32 -1.442695, %v7529_v37  ;;  %v13381_v20 = vadd.f32 %v10351_v9, %v13367_v58  ;;  %v7422_v1 = vpop.f32.mrb[95].mxu0 }
0x22d2   : > { %v9198_v27 = vmul.f32 -1.442695, %v7528_v0  ;;  %v13385_v7 = vadd.f32 %v13367_v58, %v7422_v1  ;;  %v7887_v44 = vpop.permute.xlu0 %7886 }
0x22d3   : > { %11208 = vpow2.f32 %v9199_v48  ;;  %v7531_v13 = vadd.f32 %v10365_v14, %v13381_v20 }
0x22d4   : > { %11210 = vpow2.f32 %v9198_v27  ;;  %v7530_v43 = vadd.f32 %v7519_v2, %v13385_v7  ;;  %v7559_v2 = vpop.permute.xlu1 %7558 }
0x22d5   : > { %11212 = vpow2.f32 %v9216_v42  ;;  %v9201_v19 = vmul.f32 -1.442695, %v7531_v13 }
0x22d6   : > { %11214 = vpow2.f32 %v9215_v32  ;;  %v9200_v12 = vmul.f32 -1.442695, %v7530_v43 }
0x22d7   : > { %11216 = vpow2.f32 %v9201_v19 }
0x22d8   : > { %11218 = vpow2.f32 %v9200_v12  ;;  %v7563_v53 = vpop.permute.xlu1 %7562 }
0x22d9   : > { %11220 = vpow2.f32 %v9218_v33 }
0x22da   : > { %11222 = vpow2.f32 %v9217_v15  ;;  %v7891_v15 = vpop.permute.xlu0 %7890 }
0x22dc   : > { %v7889_v48 = vpop.permute.xlu1 %7888 }
0x22dd   : > { %v11209_v61 = vpop.eup %11208 }
0x22de   : > { %v11211_v46 = vpop.eup %11210  ;;  %v7545_v23 = vadd.f32 1.0, %v11209_v61 }
0x22df   : > { %v11213_v63 = vpop.eup %11212  ;;  %v7544_v3 = vadd.f32 1.0, %v11211_v46 }
0x22e0   : > { %v11215_v38 = vpop.eup %11214  ;;  %11224 = vrcp.f32 %v7545_v23  ;;  %v7875_v55 = vadd.f32 1.0, %v11213_v63  ;;  %v7893_v19 = vpop.permute.xlu1 %7892 }
0x22e1   : > { %v11217_v24 = vpop.eup %11216  ;;  %11226 = vrcp.f32 %v7544_v3  ;;  %v7874_v49 = vadd.f32 1.0, %v11215_v38 }
0x22e2   : > { %v11219_v59 = vpop.eup %11218  ;;  %v7547_v5 = vadd.f32 1.0, %v11217_v24 }
0x22e3   : > { %v11221_v40 = vpop.eup %11220  ;;  %v7546_v18 = vadd.f32 1.0, %v11219_v59 }
0x22e4   : > { %v11223_v14 = vpop.eup %11222  ;;  %11228 = vrcp.f32 %v7547_v5  ;;  %v7877_v35 = vadd.f32 1.0, %v11221_v40 }
0x22e5   : > { %11230 = vrcp.f32 %v7546_v18  ;;  %v7876_v11 = vadd.f32 1.0, %v11223_v14 }
0x22e6   : > { %11232 = vrcp.f32 %v7875_v55 }
0x22e7   : > { %11234 = vrcp.f32 %v7874_v49 }
0x22e8   : > { %11236 = vrcp.f32 %v7877_v35 }
0x22e9   : > { %11238 = vrcp.f32 %v7876_v11 }
0x22ea   : > { %v13389_v29 = vpop.eup %11224 }
0x22eb   : > { %v13391_v60 = vpop.eup %11226  ;;  %v7569_v6 = vmul.f32 %v13389_v29, %v7559_v2 }
0x22ec   : > { %v7568_v37 = vmul.f32 %v13391_v60, %v7557_v4 }
0x22ed   : > { %7578 = vrot.lane.b32.xlu1 %v7569_v6, %s13642_s0 }
0x22ee   : > { %v13396_v0 = vpop.eup %11228  ;;  %7576 = vrot.lane.b32.xlu0 %v7568_v37, %s13642_s0 }
0x22ef   : > { %v13399_v9 = vpop.eup %11230  ;;  %v7571_v42 = vmul.f32 %v13396_v0, %v7563_v53 }
0x22f0   : > { %v13402_v51 = vpop.eup %11232  ;;  %v7570_v1 = vmul.f32 %v13399_v9, %v7561_v25 }
0x22f1   : > { %v13405_v32 = vpop.eup %11234  ;;  %7582 = vrot.lane.b32.xlu1 %v7571_v42, %s13642_s0  ;;  %v7899_v27 = vmul.f32 %v13402_v51, %v7889_v48 }
0x22f2   : > { %7580 = vrot.lane.b32.xlu0 %v7570_v1, %s13642_s0  ;;  %v13410_v13 = vpop.eup %11236  ;;  %v7898_v43 = vmul.f32 %v13405_v32, %v7887_v44 }
0x22f3   : > { %v13413_v33 = vpop.eup %11238  ;;  %v7901_v12 = vmul.f32 %v13410_v13, %v7893_v19 }
0x22f4   : > { %v7900_v61 = vmul.f32 %v13413_v33, %v7891_v15 }
0x22f5   : > { %7908 = vrot.lane.b32.xlu1 %v7899_v27, %s13642_s0  ;;  %v8035_v27 = vsub.f32 1.0, %v13405_v32 }
0x22f6   : > { %7906 = vrot.lane.b32.xlu0 %v7898_v43, %s13642_s0  ;;  %v8032_v43 = vmul.f32 %v13402_v51, %v13327_v8 }
0x22f9   : > { %7912 = vrot.lane.b32.xlu1 %v7901_v12, %s13642_s0  ;;  %v8031_v12 = vmul.f32 %v13405_v32, %v13322_v31  ;;  %v8033_v31 = vmul.f32 %v13413_v33, %v13335_v16 }
0x22fa   : > { %7910 = vrot.lane.b32.xlu0 %v7900_v61, %s13642_s0 }
0x235f   : > { %v7579_v46 = vpop.permute.xlu1 %7578 }
0x2360   : > { %v7577_v23 = vpop.permute.xlu0 %7576 }
0x2361   : > { %10374 = vmatprep.mubr.msk.f32.mxu0 %vm936_vm0, %v7577_v23  ;;  %v8038_v23 = vsub.f32 1.0, %v13410_v13 }
0x2362   : > { %10375 = vmatmul.mubr.msk.f32.vlgmr.msra.gmra.mrb[96].mxu0 %vm936_vm0, %v7579_v46 }
0x2363   : > { %v7583_v63 = vpop.permute.xlu1 %7582  ;;  %10843 = vmatpush3.bf16.msra.mxu0 %v13137_v54 }
0x2364   : > { %v7581_v3 = vpop.permute.xlu0 %7580  ;;  %10845 = vmatprep.subr.bf16.mxu0 %v13174_v34 }
0x2365   : > { %10377 = vmatprep.mubr.msk.f32.mxu0 %vm936_vm0, %v7581_v3 }
0x2366   : > { %10378 = vmatmul.mubr.msk.f32.gmra.mrb[98].mxu0 %vm936_vm0, %v7583_v63 }
0x2367   : > { %v7909_v38 = vpop.permute.xlu1 %7908  ;;  %10847 = vmatpush3.bf16.msra.mxu0 %v13174_v34 }
0x2368   : > { %v7907_v24 = vpop.permute.xlu0 %7906  ;;  %10857 = vmatprep.subr.bf16.mxu0 %v13263_v21 }
0x2369   : > { %10402 = vmatprep.mubr.msk.f32.mxu0 %vm936_vm0, %v7907_v24  ;;  %v8034_v24 = vmul.f32 %v13410_v13, %v13339_v56 }
0x236a   : > { %10403 = vmatmul.mubr.msk.f32.vlgmr.msra.gmra.mrb[100].mxu0 %vm936_vm0, %v7909_v38  ;;  %v8037_v38 = vsub.f32 1.0, %v13413_v33 }
0x236b   : > { %10859 = vmatpush3.bf16.msra.mxu0 %v13263_v21  ;;  %v7913_v59 = vpop.permute.xlu1 %7912 }
0x236c   : > { %v7911_v54 = vpop.permute.xlu0 %7910  ;;  %10861 = vmatprep.subr.bf16.mxu0 %v13266_v45 }
0x236d   : > { %10405 = vmatprep.mubr.msk.f32.mxu0 %vm936_vm0, %v7911_v54 }
0x236e   : > { %10406 = vmatmul.mubr.msk.f32.gmra.mrb[102].mxu0 %vm936_vm0, %v7913_v59 }
0x236f   : > { %10863 = vmatpush3.bf16.msra.mxu0 %v13266_v45 }
0x2370   : > { %10873 = vmatprep.subr.bf16.mxu0 %v13356_v39 }
0x2435   : > { %v10376_v34 = vpop.f32.mrb[96].mxu0 }
0x2436   : > { %v7658_v55 = vpop.f32.mrb[97].mxu0 }
0x2439   : > { %v10379_v5 = vpop.f32.mrb[98].mxu0 }
0x243a   : > { %v7668_v40 = vpop.f32.mrb[99].mxu0 }
0x243d   : > { %v10404_v49 = vpop.f32.mrb[100].mxu0 }
0x243e   : > { %8013 = vrot.lane.b32.xlu1 %v10404_v49, %s13638_s22  ;;  %v7988_v21 = vpop.f32.mrb[101].mxu0 }
0x243f   : > { %8011 = vrot.lane.b32.xlu0 %v7988_v21, %s13638_s22 }
0x2441   : > { %v10407_v18 = vpop.f32.mrb[102].mxu0 }
0x2442   : > { %8017 = vrot.lane.b32.xlu1 %v10407_v18, %s13638_s22  ;;  %v7998_v14 = vpop.f32.mrb[103].mxu0 }
0x2443   : > { %8015 = vrot.lane.b32.xlu0 %v7998_v14, %s13638_s22  ;;  %v7701_v14 = vmul.f32 %v13391_v60, %v13300_v10  ;;  %v7703_v10 = vmul.f32 %v13399_v9, %v13313_v28 }
0x24b0   : > { %v8014_v2 = vpop.permute.xlu1 %8013 }
0x24b1   : > { %v8024_v45 = vadd.f32 %v13113_v41, %v8014_v2  ;;  %v8012_v4 = vpop.permute.xlu0 %8011 }
0x24b2   : > { %v8023_v35 = vadd.f32 %v13113_v41, %v8012_v4  ;;  %v7708_v4 = vsub.f32 1.0, %v13396_v0 }
0x24b3   : > { %11240 = vtanh.f32 %v8024_v45 }
0x24b4   : > { %11242 = vtanh.f32 %v8023_v35  ;;  %v8018_v11 = vpop.permute.xlu1 %8017 }
0x24b5   : > { %v8026_v53 = vadd.f32 %v13113_v41, %v8018_v11  ;;  %v8016_v25 = vpop.permute.xlu0 %8015 }
0x24b6   : > { %v8025_v6 = vadd.f32 %v13113_v41, %v8016_v25  ;;  %v8036_v41 = vsub.f32 1.0, %v13402_v51 }
0x24b7   : > { %11244 = vtanh.f32 %v8026_v53  ;;  %v7707_v53 = vsub.f32 1.0, %v13399_v9 }
0x24b8   : > { %11246 = vtanh.f32 %v8025_v6 }
0x24bd   : > { %v11241_v37 = vpop.eup %11240 }
0x24be   : > { %v11243_v42 = vpop.eup %11242  ;;  %8045 = vrot.lane.b32.xlu1 %v11241_v37, %s13638_s22 }
0x24bf   : > { %8043 = vrot.lane.b32.xlu0 %v11243_v42, %s13638_s22 }
0x24c1   : > { %v11245_v48 = vpop.eup %11244 }
0x24c2   : > { %v11247_v1 = vpop.eup %11246  ;;  %8049 = vrot.lane.b32.xlu1 %v11245_v48, %s13638_s22 }
0x24c3   : > { %8047 = vrot.lane.b32.xlu0 %v11247_v1, %s13638_s22 }
0x24c6   : > { %7683 = vrot.lane.b32.xlu1 %v10376_v34, %s13638_s22 }
0x24c7   : > { %7681 = vrot.lane.b32.xlu0 %v7658_v55, %s13638_s22 }
0x24ca   : > { %7687 = vrot.lane.b32.xlu1 %v10379_v5, %s13638_s22 }
0x24cb   : > { %7685 = vrot.lane.b32.xlu0 %v7668_v40, %s13638_s22 }
0x2530   : > { %v8046_v44 = vpop.permute.xlu1 %8045 }
0x2531   : > { %v8056_v19 = vmul.f32 %v8046_v44, %v8036_v41  ;;  %v8044_v15 = vpop.permute.xlu0 %8043 }
0x2532   : > { %v8055_v61 = vmul.f32 %v8044_v15, %v8035_v27 }
0x2533   : > { %v8060_v46 = vadd.f32 %v8056_v19, %v8032_v43 }
0x2534   : > { %v8059_v63 = vadd.f32 %v8055_v61, %v8031_v12  ;;  %v8050_v3 = vpop.permute.xlu1 %8049 }
0x2535   : > { %8064 = vst.msk [vmem:[#allocation2 + $0x8] sm:$0xff] %vm936_vm0, %v8060_v46  ;;  %v8058_v54 = vmul.f32 %v8050_v3, %v8038_v23  ;;  %v8048_v8 = vpop.permute.xlu0 %8047 }
0x2536   : > { %8063 = vst.msk [vmem:[#allocation2] sm:$0xff] %vm936_vm0, %v8059_v63  ;;  %v8057_v51 = vmul.f32 %v8048_v8, %v8037_v38  ;;  %v10848_v32 = vpack.c.bf16 %v8060_v46, %v8059_v63 }
0x2537   : > { %v8062_v59 = vadd.f32 %v8058_v54, %v8034_v24 }
0x2538   : > { %v8061_v34 = vadd.f32 %v8057_v51, %v8033_v31  ;;  %v7684_v55 = vpop.permute.xlu1 %7683  ;;  %10849 = vmatprep.subr.bf16.mxu1 %v10848_v32 }
0x2539   : > { %8066 = vst.msk [vmem:[#allocation2 + $0x18] sm:$0xff] %vm936_vm0, %v8062_v59  ;;  %v7694_v5 = vadd.f32 %v7684_v55, %v13371_v50  ;;  %10851 = vmatpush3.bf16.msra.mxu1 %v10848_v32  ;;  %v7682_v40 = vpop.permute.xlu0 %7681 }
0x253a   : > { %8065 = vst.msk [vmem:[#allocation2 + $0x10] sm:$0xff] %vm936_vm0, %v8061_v34  ;;  %v7693_v56 = vadd.f32 %v7682_v40, %v13375_v17  ;;  %v10852_v13 = vpack.c.bf16 %v8062_v59, %v8061_v34 }
0x253b   : > { %11248 = vtanh.f32 %v7694_v5 }
0x253c   : > { %11250 = vtanh.f32 %v7693_v56  ;;  %v7688_v16 = vpop.permute.xlu1 %7687  ;;  %10853 = vmatprep.subr.bf16.mxu1 %v10852_v13 }
0x253d   : > { %v7696_v33 = vadd.f32 %v7688_v16, %v13381_v20  ;;  %10855 = vmatpush3.bf16.msra.mxu1 %v10852_v13  ;;  %v7686_v49 = vpop.permute.xlu0 %7685 }
0x253e   : > { %v7695_v21 = vadd.f32 %v7686_v49, %v13385_v7  ;;  %10865 = vmatprep.subr.bf16.mxu1 %v13232_v57 }
0x253f   : > { %11252 = vtanh.f32 %v7696_v33 }
0x2540   : > { %11254 = vtanh.f32 %v7695_v21  ;;  %10417 = vmatmul.mubr.msk.f32.vlgmr.msra.gmra.mrb[104].mxu1 %vm936_vm0, %v13230_v52 }
0x2541   : > { %10419 = vmatprep.mubr.msk.f32.mxu1 %vm936_vm0, %v13236_v36  ;;  %10867 = vmatpush3.bf16.msra.mxu1 %v13232_v57  ;;  %v7706_v57 = vsub.f32 1.0, %v13389_v29 }
0x2542   : > { %10869 = vmatprep.subr.bf16.mxu1 %v13249_v30 }
0x2544   : > { %10420 = vmatmul.mubr.msk.f32.gmra.mrb[106].mxu1 %vm936_vm0, %v13246_v26  ;;  %v7705_v26 = vsub.f32 1.0, %v13391_v60 }
0x2545   : > { %v11249_v50 = vpop.eup %11248  ;;  %10871 = vmatpush3.bf16.msra.mxu1 %v13249_v30  ;;  %v7702_v30 = vmul.f32 %v13389_v29, %v13296_v22  ;;  %v7704_v22 = vmul.f32 %v13396_v0, %v13309_v47 }
0x2546   : > { %v11251_v17 = vpop.eup %11250  ;;  %7715 = vrot.lane.b32.xlu1 %v11249_v50, %s13638_s22  ;;  %10880 = vmatprep.subr.bf16.mxu1 %v13356_v39 }
0x2547   : > { %7713 = vrot.lane.b32.xlu0 %v11251_v17, %s13638_s22 }
0x2549   : > { %v11253_v52 = vpop.eup %11252 }
0x254a   : > { %v11255_v20 = vpop.eup %11254  ;;  %7719 = vrot.lane.b32.xlu1 %v11253_v52, %s13638_s22 }
0x254b   : > { %7717 = vrot.lane.b32.xlu0 %v11255_v20, %s13638_s22 }
0x25b8   : > { %v7716_v36 = vpop.permute.xlu1 %7715 }
0x25b9   : > { %v7726_v7 = vmul.f32 %v7716_v36, %v7706_v57  ;;  %v7714_v18 = vpop.permute.xlu0 %7713 }
0x25ba   : > { %v7725_v2 = vmul.f32 %v7714_v18, %v7705_v26 }
0x25bb   : > { %v7730_v45 = vadd.f32 %v7726_v7, %v7702_v30 }
0x25bc   : > { %v7729_v35 = vadd.f32 %v7725_v2, %v7701_v14  ;;  %v7720_v11 = vpop.permute.xlu1 %7719 }
0x25bd   : > { %7734 = vst.msk [vmem:[#allocation2 + $0x28] sm:$0xff] %vm936_vm0, %v7730_v45  ;;  %9207 = vst.msk [vmem:[%s13028_s26 + $0x48] sm:$0xff] %vm936_vm0, %v7730_v45  ;;  %v7728_v29 = vmul.f32 %v7720_v11, %v7708_v4  ;;  %v7718_v25 = vpop.permute.xlu0 %7717 }
0x25be   : > { %7733 = vst.msk [vmem:[#allocation2 + $0x20] sm:$0xff] %vm936_vm0, %v7729_v35  ;;  %9206 = vst.msk [vmem:[%s13028_s26 + $0x40] sm:$0xff] %vm936_vm0, %v7729_v35  ;;  %v7727_v60 = vmul.f32 %v7718_v25, %v7707_v53 }
0x25bf   : > { %v7732_v6 = vadd.f32 %v7728_v29, %v7704_v22 }
0x25c0   : > { %v7731_v37 = vadd.f32 %v7727_v60, %v7703_v10 }
0x25c1   : > { %7736 = vst.msk [vmem:[#allocation2 + $0x38] sm:$0xff] %vm936_vm0, %v7732_v6  ;;  %9209 = vst.msk [vmem:[%s13028_s26 + $0x58] sm:$0xff] %vm936_vm0, %v7732_v6 }
0x25c2   : > { %7735 = vst.msk [vmem:[#allocation2 + $0x30] sm:$0xff] %vm936_vm0, %v7731_v37  ;;  %9208 = vst.msk [vmem:[%s13028_s26 + $0x50] sm:$0xff] %vm936_vm0, %v7731_v37 }
0x25c4   : > { %v13518_v28 = vld [vmem:[#allocation2 + $0x28] sm:$0xff] }
0x25c5   : > { %v13512_v47 = vld [vmem:[#allocation2 + $0x20] sm:$0xff] }
0x25c6   : > { %8413 = vrot.lane.b32.xlu0 %v13512_v47, %s13637_s21  ;;  %10444 = vmatprep.mubr.msk.f32.mxu1 %vm936_vm0, %v13512_v47 }
0x25c7   : > { %10445 = vmatmul.mubr.msk.f32.vlgmr.msra.gmra.mrb[108].mxu1 %vm936_vm0, %v13518_v28 }
0x25c8   : > { %10882 = vmatpush3.bf16.msra.mxu1 %v13356_v39  ;;  %v13532_v9 = vld [vmem:[#allocation2 + $0x38] sm:$0xff] }
0x25c9   : > { %v13523_v0 = vld [vmem:[#allocation2 + $0x30] sm:$0xff]  ;;  %10881 = vmatprep.subr.bf16.mxu1 %v13359_v62 }
0x25ca   : > { %8415 = vrot.lane.b32.xlu0 %v13518_v28, %s13637_s21  ;;  %8417 = vrot.lane.b32.xlu1 %v13523_v0, %s13637_s21 }
0x25cb   : > { %10447 = vmatprep.mubr.msk.f32.mxu1 %vm936_vm0, %v13523_v0 }
0x25cc   : > { %10448 = vmatmul.mubr.msk.f32.gmra.mrb[110].mxu1 %vm936_vm0, %v13532_v9 }
0x25cd   : > { %10883 = vmatpush3.bf16.msra.mxu1 %v13359_v62 }
0x25ce   : > { %8419 = vrot.lane.b32.xlu1 %v13532_v9, %s13637_s21 }
0x2613   : > { %v10418_v42 = vpop.f32.mrb[104].mxu1 }
0x2614   : > { %v8166_v48 = vpop.f32.mrb[105].mxu1 }
0x2615   : > { %10430 = vmatprep.mubr.msk.f32.mxu0 %vm936_vm0, %v8166_v48 }
0x2616   : > { %10431 = vmatmul.mubr.msk.f32.vlgmr.msra.gmra.mrb[104].mxu0 %vm936_vm0, %v10418_v42 }
0x2617   : > { %v10421_v1 = vpop.f32.mrb[106].mxu1  ;;  %10875 = vmatpush3.bf16.msra.mxu0 %v13356_v39 }
0x2618   : > { %v8176_v41 = vpop.f32.mrb[107].mxu1  ;;  %10877 = vmatprep.subr.bf16.mxu0 %v13359_v62 }
0x2619   : > { %10433 = vmatprep.mubr.msk.f32.mxu0 %vm936_vm0, %v8176_v41 }
0x261a   : > { %10434 = vmatmul.mubr.msk.f32.gmra.mrb[106].mxu0 %vm936_vm0, %v10421_v1 }
0x261b   : > { %10879 = vmatpush3.bf16.msra.mxu0 %v13359_v62 }
0x263c   : > { %v8418_v50 = vpop.permute.xlu1 %8417 }
0x2640   : > { %v8420_v26 = vpop.permute.xlu1 %8419 }
0x269a   : > { %v10446_v44 = vpop.f32.mrb[108].mxu1 }
0x269b   : > { %v8366_v27 = vpop.f32.mrb[109].mxu1 }
0x269f   : > { %v10449_v43 = vpop.f32.mrb[110].mxu1 }
0x26a0   : > { %v8376_v19 = vpop.f32.mrb[111].mxu1 }
0x26e9   : > { %v10432_v15 = vpop.f32.mrb[104].mxu0 }
0x26ea   : > { %v13547_v12 = vadd.f32 %v10432_v15, %v13367_v58  ;;  %v8269_v61 = vpop.f32.mrb[105].mxu0 }
0x26eb   : > { %v13550_v39 = vadd.f32 %v13367_v58, %v8269_v61 }
0x26ec   : > { %v8386_v46 = vadd.f32 %v10446_v44, %v13547_v12 }
0x26ed   : > { %v8385_v23 = vadd.f32 %v8366_v27, %v13550_v39  ;;  %v10435_v63 = vpop.f32.mrb[106].mxu0 }
0x26ee   : > { %v9241_v3 = vmul.f32 -1.442695, %v8386_v46  ;;  %v13555_v62 = vadd.f32 %v10435_v63, %v13367_v58  ;;  %v8279_v38 = vpop.f32.mrb[107].mxu0 }
0x26ef   : > { %v9240_v24 = vmul.f32 -1.442695, %v8385_v23  ;;  %v8280_v54 = vadd.f32 %v13367_v58, %v8279_v38  ;;  %v8414_v58 = vpop.permute.xlu0 %8413 }
0x26f0   : > { %11256 = vpow2.f32 %v9241_v3  ;;  %v8388_v8 = vadd.f32 %v10449_v43, %v13555_v62 }
0x26f1   : > { %11258 = vpow2.f32 %v9240_v24  ;;  %v8387_v31 = vadd.f32 %v8376_v19, %v8280_v54 }
0x26f2   : > { %v9243_v51 = vmul.f32 -1.442695, %v8388_v8 }
0x26f3   : > { %v9242_v32 = vmul.f32 -1.442695, %v8387_v31  ;;  %v8416_v52 = vpop.permute.xlu0 %8415 }
0x26f4   : > { %11260 = vpow2.f32 %v9243_v51 }
0x26f5   : > { %11262 = vpow2.f32 %v9242_v32 }
0x26fa   : > { %v11257_v59 = vpop.eup %11256 }
0x26fb   : > { %v11259_v34 = vpop.eup %11258  ;;  %v8402_v55 = vadd.f32 1.0, %v11257_v59 }
0x26fc   : > { %v8401_v5 = vadd.f32 1.0, %v11259_v34 }
0x26fe   : > { %v11261_v40 = vpop.eup %11260  ;;  %11264 = vrcp.f32 %v8401_v5 }
0x26ff   : > { %v11263_v56 = vpop.eup %11262  ;;  %11266 = vrcp.f32 %v8402_v55  ;;  %v8404_v13 = vadd.f32 1.0, %v11261_v40 }
0x2700   : > { %v8403_v16 = vadd.f32 1.0, %v11263_v56 }
0x2702   : > { %11268 = vrcp.f32 %v8403_v16 }
0x2703   : > { %11270 = vrcp.f32 %v8404_v13 }
0x2708   : > { %v11265_v33 = vpop.eup %11264 }
0x2709   : > { %v8425_v49 = vmul.f32 %v11265_v33, %v8414_v58  ;;  %v11267_v21 = vpop.eup %11266  ;;  %v8562_v43 = vsub.f32 1.0, %v11265_v33  ;;  %v8558_v61 = vmul.f32 %v11265_v33, %v13512_v47 }
0x270a   : > { %v8426_v57 = vmul.f32 %v11267_v21, %v8416_v52  ;;  %v8563_v44 = vsub.f32 1.0, %v11267_v21  ;;  %v8559_v19 = vmul.f32 %v11267_v21, %v13518_v28 }
0x270b   : > { %8433 = vrot.lane.b32.xlu0 %v8425_v49, %s13642_s0 }
0x270c   : > { %v13560_v17 = vpop.eup %11268 }
0x270d   : > { %v8427_v20 = vmul.f32 %v13560_v17, %v8418_v50  ;;  %v11271_v36 = vpop.eup %11270  ;;  %v8560_v47 = vmul.f32 %v13560_v17, %v13523_v0 }
0x270e   : > { %v8428_v30 = vmul.f32 %v11271_v36, %v8420_v26  ;;  %v8565_v23 = vsub.f32 1.0, %v11271_v36  ;;  %v8561_v28 = vmul.f32 %v11271_v36, %v13532_v9 }
0x270f   : > { %8437 = vrot.lane.b32.xlu1 %v8427_v20, %s13642_s0  ;;  %8435 = vrot.lane.b32.xlu0 %v8426_v57, %s13642_s0 }
0x2713   : > { %8439 = vrot.lane.b32.xlu1 %v8428_v30, %s13642_s0 }
0x277d   : > { %v8434_v7 = vpop.permute.xlu0 %8433 }
0x277e   : > { %10458 = vmatprep.mubr.msk.f32.mxu0 %vm936_vm0, %v8434_v7 }
0x2781   : > { %v8438_v18 = vpop.permute.xlu1 %8437  ;;  %v8436_v14 = vpop.permute.xlu0 %8435 }
0x2782   : > { %10459 = vmatmul.mubr.msk.f32.vlgmr.msra.gmra.mrb[108].mxu0 %vm936_vm0, %v8436_v14  ;;  %10461 = vmatprep.mubr.msk.f32.mxu1 %vm936_vm0, %v8438_v18 }
0x2785   : > { %v8440_v2 = vpop.permute.xlu1 %8439 }
0x2786   : > { %10462 = vmatmul.mubr.msk.f32.vlgmr.msra.gmra.mrb[112].mxu1 %vm936_vm0, %v8440_v2 }
0x2855   : > { %v10460_v45 = vpop.f32.mrb[108].mxu0 }
0x2856   : > { %8540 = vrot.lane.b32.xlu1 %v10460_v45, %s13638_s22  ;;  %v8515_v4 = vpop.f32.mrb[109].mxu0 }
0x2857   : > { %8538 = vrot.lane.b32.xlu0 %v8515_v4, %s13638_s22 }
0x2859   : > { %v10463_v35 = vpop.f32.mrb[112].mxu1 }
0x285a   : > { %v8525_v11 = vpop.f32.mrb[113].mxu1  ;;  %8544 = vrot.lane.b32.xlu1 %v10463_v35, %s13638_s22 }
0x285b   : > { %8542 = vrot.lane.b32.xlu0 %v8525_v11, %s13638_s22 }
0x28c8   : > { %v8541_v53 = vpop.permute.xlu1 %8540 }
0x28c9   : > { %v8551_v22 = vadd.f32 %v8541_v53, %v13547_v12  ;;  %v8539_v29 = vpop.permute.xlu0 %8538 }
0x28ca   : > { %v8550_v25 = vadd.f32 %v8539_v29, %v13550_v39 }
0x28cb   : > { %11272 = vtanh.f32 %v8551_v22 }
0x28cc   : > { %11274 = vtanh.f32 %v8550_v25  ;;  %v8545_v10 = vpop.permute.xlu1 %8544 }
0x28cd   : > { %v8553_v60 = vadd.f32 %v8545_v10, %v13555_v62  ;;  %v8543_v6 = vpop.permute.xlu0 %8542  ;;  %v8564_v62 = vsub.f32 1.0, %v13560_v17 }
0x28ce   : > { %v8552_v37 = vadd.f32 %v8543_v6, %v8280_v54 }
0x28cf   : > { %11276 = vtanh.f32 %v8553_v60 }
0x28d0   : > { %11278 = vtanh.f32 %v8552_v37 }
0x28d5   : > { %v11273_v42 = vpop.eup %11272 }
0x28d6   : > { %v11275_v48 = vpop.eup %11274  ;;  %8572 = vrot.lane.b32.xlu1 %v11273_v42, %s13638_s22 }
0x28d7   : > { %8570 = vrot.lane.b32.xlu0 %v11275_v48, %s13638_s22 }
0x28d9   : > { %v11277_v1 = vpop.eup %11276 }
0x28da   : > { %v11279_v41 = vpop.eup %11278  ;;  %8576 = vrot.lane.b32.xlu1 %v11277_v1, %s13638_s22 }
0x28db   : > { %8574 = vrot.lane.b32.xlu0 %v11279_v41, %s13638_s22 }
0x2948   : > { %v8573_v27 = vpop.permute.xlu1 %8572 }
0x2949   : > { %v8583_v15 = vmul.f32 %v8573_v27, %v8563_v44  ;;  %v8571_v12 = vpop.permute.xlu0 %8570 }
0x294a   : > { %v8582_v39 = vmul.f32 %v8571_v12, %v8562_v43 }
0x294b   : > { %v8587_v46 = vadd.f32 %v8583_v15, %v8559_v19 }
0x294c   : > { %v8586_v63 = vadd.f32 %v8582_v39, %v8558_v61  ;;  %v8577_v3 = vpop.permute.xlu1 %8576 }
0x294d   : > { %8591 = vst.msk [vmem:[#allocation2 + $0x28] sm:$0xff] %vm936_vm0, %v8587_v46  ;;  %9249 = vst.msk [vmem:[%s13028_s26 + $0x68] sm:$0xff] %vm936_vm0, %v8587_v46  ;;  %v8585_v38 = vmul.f32 %v8577_v3, %v8565_v23  ;;  %v8575_v24 = vpop.permute.xlu0 %8574 }
0x294e   : > { %8590 = vst.msk [vmem:[#allocation2 + $0x20] sm:$0xff] %vm936_vm0, %v8586_v63  ;;  %9248 = vst.msk [vmem:[%s13028_s26 + $0x60] sm:$0xff] %vm936_vm0, %v8586_v63  ;;  %v8584_v54 = vmul.f32 %v8575_v24, %v8564_v62 }
0x294f   : > { %v8589_v8 = vadd.f32 %v8585_v38, %v8561_v28 }
0x2950   : > { %v8588_v31 = vadd.f32 %v8584_v54, %v8560_v47 }
0x2951   : > { %8593 = vst.msk [vmem:[#allocation2 + $0x38] sm:$0xff] %vm936_vm0, %v8589_v8  ;;  %9251 = vst.msk [vmem:[%s13028_s26 + $0x78] sm:$0xff] %vm936_vm0, %v8589_v8 }
0x2952   : > { %8592 = vst.msk [vmem:[#allocation2 + $0x30] sm:$0xff] %vm936_vm0, %v8588_v31  ;;  %9250 = vst.msk [vmem:[%s13028_s26 + $0x70] sm:$0xff] %vm936_vm0, %v8588_v31 }
0x2953 PF: > { %s29_s29 = sadd.s32 1, %s11286_s29  }
0x2954   : > { %p26_p4 = scmp.ge.s32.totalorder %s29_s29, 5  }
0x2956   :  { %28 = sbr.rel (!%p26_p4) target bundleno = 5 (0x5), region = 189 }

</bundles_post_ra>
